<compile_context>
chip_gen: v7x
topology: tpu7x:2x2x1
jax: 0.10.0
libtpu: 0.0.40
codegen_flags: <defaults>
</compile_context>

<pallas_src>
import functools

import numpy as np
import jax
import jax.numpy as jnp
from jax.experimental import pallas as pl
from jax.experimental.pallas import tpu as pltpu


def _round_up(v, m):
    return -(-v // m) * m


# ------------------------------ fused kernel -------------------------------

def _block_kernel(x_ref, w_ref, b_ref, m_ref, o_ref, pre_ref, *, D, H, W, C):
    """4 x (conv3x3x3 + bias + ReLU) + residual add for one batch element.

    x_ref  : [1, C, M]   input activation, M = D*H*W flattened (z,y,x), f32
    w_ref  : [4, KR, C]  per-conv packed weights, row r = tap*C + co, f32
    b_ref  : [4, C, 1]   per-conv bias, f32
    m_ref  : [32, M]     per-tap validity masks (rows 0..26 used), f32
    o_ref  : [1, C, M]   output, f32
    pre_ref: [KR, M]     VMEM scratch for the per-tap weighted activations
    """
    M = D * H * W
    HW = H * W

    def conv3x3x3_relu(cur, ci):
        # One dot per conv: pre[t*C + co, m] = sum_ci W[co, ci, tap] * cur[ci, m]
        pre_ref[...] = jnp.dot(w_ref[ci], cur, preferred_element_type=jnp.float32)
        acc = jnp.zeros((C, M), jnp.float32)
        t = 0
        for kz in range(3):
            for ky in range(3):
                for kx in range(3):
                    off = (kz - 1) * HW + (ky - 1) * W + (kx - 1)
                    slab = pre_ref[C * t:C * (t + 1), :]          # [C, M]
                    if off != 0:
                        # shifted[:, m] = slab[:, m + off] (stencil neighbour gather);
                        # wrap-around positions are exactly the ones zeroed by the
                        # padding mask, so roll + mask == conv padding=1.
                        slab = pltpu.roll(slab, shift=(-off) % M, axis=1)
                        slab = slab * m_ref[t:t + 1, :]
                    acc = acc + slab
                    t += 1
        return jnp.maximum(acc + b_ref[ci], 0.0)

    x0 = x_ref[0, :, :]
    a = conv3x3x3_relu(x0, 0)
    a = conv3x3x3_relu(a, 1)
    a = conv3x3x3_relu(a, 2)
    a = conv3x3x3_relu(a, 3)
    o_ref[0, :, :] = a + x0                                      # residual; no final ReLU


# ------------------------------ host wrappers -------------------------------

def pack_params(ws, bs):
    """PyTorch Conv3d weights [Cout,Cin,3,3,3] -> ([4, KR, Cin] f32, [4, Cout, 1] f32).

    Row r = tap*Cout + co with tap = kz*9 + ky*3 + kx; rows zero-padded to a
    multiple of 8 (KR) so kernel slices stay sublane-tile friendly.
    """
    cout, cin = ws[0].shape[0], ws[0].shape[1]
    kr = 27 * cout
    kr_pad = _round_up(kr, 8)
    w_rows = []
    for w in ws:
        wt = jnp.transpose(w, (2, 3, 4, 0, 1)).reshape(kr, cin)   # (kz,ky,kx,co) rows
        w_rows.append(jnp.pad(wt, ((0, kr_pad - kr), (0, 0))))
    w_all = jnp.stack(w_rows).astype(jnp.float32)                 # [4, KR, Cin]
    b_all = jnp.stack(bs).astype(jnp.float32)[..., None]          # [4, Cout, 1]
    return w_all, b_all


def _tap_masks(D, H, W):
    """[32, M] f32: mask[t, m] = 1 iff the tap-t neighbour of voxel m is in bounds."""
    M = D * H * W
    idx = np.arange(M)
    z, y, x = idx // (H * W), (idx // W) % H, idx % W
    m = np.zeros((32, M), np.float32)          # 27 taps, padded to 32 rows
    t = 0
    for kz in range(3):
        for ky in range(3):
            for kx in range(3):
                ok = ((z + kz - 1 >= 0) & (z + kz - 1 < D) &
                      (y + ky - 1 >= 0) & (y + ky - 1 < H) &
                      (x + kx - 1 >= 0) & (x + kx - 1 < W))
                m[t] = ok
                t += 1
    return jnp.asarray(m)


def basic_block_forward(w_all, b_all, x_ncdhw, *, downsample):
    n, c, d0, h0, w0 = x_ncdhw.shape
    x = x_ncdhw.astype(jnp.float32)
    if downsample:
        # TODO(synk): MaxPool3d(2,2) kept as a single reshape+max in JAX (boundary glue).
        x = x.reshape(n, c, d0 // 2, 2, h0 // 2, 2, w0 // 2, 2).max(axis=(3, 5, 7))
    N, C, D, H, W = x.shape
    M = D * H * W
    KR = w_all.shape[1]
    assert M % 128 == 0, "kernel expects D*H*W to be a multiple of 128"
    assert w_all.shape == (4, _round_up(27 * C, 8), C)

    x_flat = x.reshape(N, C, M)        # NCDHW with flat spatial: pure reshape, no transpose
    masks = _tap_masks(D, H, W)

    out = pl.pallas_call(
        functools.partial(_block_kernel, D=D, H=H, W=W, C=C),
        out_shape=jax.ShapeDtypeStruct((N, C, M), jnp.float32),
        grid_spec=pltpu.PrefetchScalarGridSpec(
            num_scalar_prefetch=0,
            grid=(N,),
            in_specs=[
                pl.BlockSpec((1, C, M), lambda nb: (nb, 0, 0)),   # x (per batch element)
                pl.BlockSpec((4, KR, C), lambda nb: (0, 0, 0)),   # packed weights
                pl.BlockSpec((4, C, 1), lambda nb: (0, 0, 0)),    # bias
                pl.BlockSpec((32, M), lambda nb: (0, 0)),         # tap masks
            ],
            out_specs=pl.BlockSpec((1, C, M), lambda nb: (nb, 0, 0)),
            scratch_shapes=[pltpu.VMEM((KR, M), jnp.float32)],
        ),
        compiler_params=pltpu.CompilerParams(
            dimension_semantics=("parallel",),
            vmem_limit_bytes=32 * 1024 * 1024),
    )(x_flat, w_all, b_all, masks)
    return out.reshape(N, C, D, H, W)


# ------------------------------ pure-JAX reference ---------------------------

def _conv3d_ref(x, w, b):
    out = jax.lax.conv_general_dilated(
        x, w, window_strides=(1, 1, 1), padding=((1, 1), (1, 1), (1, 1)),
        dimension_numbers=("NCDHW", "OIDHW", "NCDHW"),
        precision=jax.lax.Precision.HIGHEST)
    return out + b[None, :, None, None, None]


def block_ref(x, ws, bs, downsample):
    if downsample:
        n, c, d, h, w = x.shape
        x = x.reshape(n, c, d // 2, 2, h // 2, 2, w // 2, 2).max(axis=(3, 5, 7))
    out = x
    for w_, b_ in zip(ws, bs):
        out = jax.nn.relu(_conv3d_ref(out, w_, b_))
    return out + x


# ----------------------------------- main ------------------------------------

if __name__ == "__main__":
    key = jax.random.PRNGKey(0)
    k_w, k_b, k_x1, k_x2 = jax.random.split(key, 4)

    inplanes = 4
    fan_in = inplanes * 27
    bound = fan_in ** -0.5                 # ~ PyTorch Conv3d default uniform init
    wkeys = jax.random.split(k_w, 4)
    bkeys = jax.random.split(k_b, 4)
    ws = [jax.random.uniform(wkeys[i], (inplanes, inplanes, 3, 3, 3),
                             jnp.float32, -bound, bound) for i in range(4)]
    bs = [jax.random.uniform(bkeys[i], (inplanes,), jnp.float32, -bound, bound)
          for i in range(4)]
    w_all, b_all = pack_params(ws, bs)

    # downsample=True path: PyTorch NCDHW input [batch=2, C=4, 16, 16, 16]
    x1 = jax.random.normal(k_x1, (2, inplanes, 16, 16, 16), jnp.float32)
    fwd_ds = jax.jit(functools.partial(basic_block_forward, downsample=True))
    out1 = jax.block_until_ready(fwd_ds(w_all, b_all, x1))
    ref1 = block_ref(x1, ws, bs, True)
    assert out1.shape == (2, inplanes, 8, 8, 8)
    err1 = float(jnp.max(jnp.abs(out1 - ref1)))
    assert err1 < 1e-2, f"downsample path mismatch: max abs err {err1}"

    # downsample=False path (identity residual).
    x2 = jax.random.normal(k_x2, (2, inplanes, 8, 8, 8), jnp.float32)
    fwd = jax.jit(functools.partial(basic_block_forward, downsample=False))
    out2 = jax.block_until_ready(fwd(w_all, b_all, x2))
    ref2 = block_ref(x2, ws, bs, False)
    assert out2.shape == (2, inplanes, 8, 8, 8)
    err2 = float(jnp.max(jnp.abs(out2 - ref2)))
    assert err2 < 1e-2, f"identity path mismatch: max abs err {err2}"

    print("KERNEL_OK")
</pallas_src>

<mosaic_0001>
module attributes {stable_mosaic.version = 11 : i64} {
  func.func @_block_kernel(%arg0: i32, %arg1: memref<1x4x512xf32, #tpu.memory_space<vmem>>, %arg2: memref<4x112x4xf32, #tpu.memory_space<vmem>>, %arg3: memref<4x4x1xf32, #tpu.memory_space<vmem>>, %arg4: memref<32x512xf32, #tpu.memory_space<vmem>>, %arg5: memref<1x4x512xf32, #tpu.memory_space<vmem>>, %arg6: memref<112x512xf32, #tpu.memory_space<vmem>>) attributes {dimension_semantics = [#tpu.dimension_semantics<parallel>], iteration_bounds = array<i64: 2>, scalar_prefetch = 0 : i64, scratch_operands = 1 : i64, tpu.core_type = #tpu.core_type<tc>, window_params = [{transform_indices = @transform_0, window_bounds = array<i64: 1, 4, 512>}, {pipeline_mode = #tpu.pipeline_mode<synchronous>, transform_indices = @transform_1, window_bounds = array<i64: 4, 112, 4>}, {pipeline_mode = #tpu.pipeline_mode<synchronous>, transform_indices = @transform_2, window_bounds = array<i64: 4, 4, 1>}, {pipeline_mode = #tpu.pipeline_mode<synchronous>, transform_indices = @transform_3, window_bounds = array<i64: 32, 512>}, {transform_indices = @transform_4, window_bounds = array<i64: 1, 4, 512>}]} {
    %c0 = arith.constant 0 : index
    %c0_0 = arith.constant 0 : index
    %c0_1 = arith.constant 0 : index
    %0 = vector.load %arg1[%c0, %c0_0, %c0_1] : memref<1x4x512xf32, #tpu.memory_space<vmem>>, vector<1x4x512xf32>
    %1 = vector.shape_cast %0 : vector<1x4x512xf32> to vector<4x512xf32>
    %c0_2 = arith.constant 0 : index
    %c0_3 = arith.constant 0 : index
    %c0_4 = arith.constant 0 : index
    %2 = vector.load %arg2[%c0_2, %c0_3, %c0_4] : memref<4x112x4xf32, #tpu.memory_space<vmem>>, vector<1x112x4xf32>
    %3 = vector.shape_cast %2 : vector<1x112x4xf32> to vector<112x4xf32>
    %cst = arith.constant dense<0.000000e+00> : vector<112x512xf32>
    %4 = tpu.matmul %3, %1, %cst {dimension_numbers = #tpu.dot_dimension_numbers<[1], [0], [0], [1], [0, 0, 1, 1], [], []>} : vector<112x4xf32>, vector<4x512xf32>, vector<112x512xf32> -> vector<112x512xf32>
    %c0_5 = arith.constant 0 : index
    %c0_6 = arith.constant 0 : index
    %5 = vector.load %arg6[%c0_5, %c0_6] : memref<112x512xf32, #tpu.memory_space<vmem>>, vector<112x512xf32>
    tpu.vector_store %arg6[%c0_5, %c0_6], %4 {strides = array<i32>} : memref<112x512xf32, #tpu.memory_space<vmem>>, vector<112x512xf32>,
    %cst_7 = arith.constant 0.000000e+00 : f32
    %6 = vector.broadcast %cst_7 : f32 to vector<4x512xf32>
    %c0_8 = arith.constant 0 : index
    %c0_9 = arith.constant 0 : index
    %7 = vector.load %arg6[%c0_8, %c0_9] : memref<112x512xf32, #tpu.memory_space<vmem>>, vector<4x512xf32>
    %c73_i32 = arith.constant 73 : i32
    %8 = tpu.dynamic_rotate %7 by %c73_i32 dim 1 : vector<4x512xf32>, i32 -> vector<4x512xf32>
    %c0_10 = arith.constant 0 : index
    %c0_11 = arith.constant 0 : index
    %9 = vector.load %arg4[%c0_10, %c0_11] : memref<32x512xf32, #tpu.memory_space<vmem>>, vector<1x512xf32>
    %10 = vector.broadcast %9 : vector<1x512xf32> to vector<4x512xf32>
    %11 = arith.mulf %8, %10 : vector<4x512xf32>
    %12 = arith.addf %6, %11 : vector<4x512xf32>
    %c4 = arith.constant 4 : index
    %c0_12 = arith.constant 0 : index
    %13 = vector.load %arg6[%c4, %c0_12] : memref<112x512xf32, #tpu.memory_space<vmem>>, vector<4x512xf32>
    %c72_i32 = arith.constant 72 : i32
    %14 = tpu.dynamic_rotate %13 by %c72_i32 dim 1 : vector<4x512xf32>, i32 -> vector<4x512xf32>
    %c1 = arith.constant 1 : index
    %c0_13 = arith.constant 0 : index
    %15 = vector.load %arg4[%c1, %c0_13] : memref<32x512xf32, #tpu.memory_space<vmem>>, vector<1x512xf32>
    %16 = vector.broadcast %15 : vector<1x512xf32> to vector<4x512xf32>
    %17 = arith.mulf %14, %16 : vector<4x512xf32>
    %18 = arith.addf %12, %17 : vector<4x512xf32>
    %c8 = arith.constant 8 : index
    %c0_14 = arith.constant 0 : index
    %19 = vector.load %arg6[%c8, %c0_14] : memref<112x512xf32, #tpu.memory_space<vmem>>, vector<4x512xf32>
    %c71_i32 = arith.constant 71 : i32
    %20 = tpu.dynamic_rotate %19 by %c71_i32 dim 1 : vector<4x512xf32>, i32 -> vector<4x512xf32>
    %c2 = arith.constant 2 : index
    %c0_15 = arith.constant 0 : index
    %21 = vector.load %arg4[%c2, %c0_15] : memref<32x512xf32, #tpu.memory_space<vmem>>, vector<1x512xf32>
    %22 = vector.broadcast %21 : vector<1x512xf32> to vector<4x512xf32>
    %23 = arith.mulf %20, %22 : vector<4x512xf32>
    %24 = arith.addf %18, %23 : vector<4x512xf32>
    %c12 = arith.constant 12 : index
    %c0_16 = arith.constant 0 : index
    %25 = vector.load %arg6[%c12, %c0_16] : memref<112x512xf32, #tpu.memory_space<vmem>>, vector<4x512xf32>
    %c65_i32 = arith.constant 65 : i32
    %26 = tpu.dynamic_rotate %25 by %c65_i32 dim 1 : vector<4x512xf32>, i32 -> vector<4x512xf32>
    %c3 = arith.constant 3 : index
    %c0_17 = arith.constant 0 : index
    %27 = vector.load %arg4[%c3, %c0_17] : memref<32x512xf32, #tpu.memory_space<vmem>>, vector<1x512xf32>
    %28 = vector.broadcast %27 : vector<1x512xf32> to vector<4x512xf32>
    %29 = arith.mulf %26, %28 : vector<4x512xf32>
    %30 = arith.addf %24, %29 : vector<4x512xf32>
    %c16 = arith.constant 16 : index
    %c0_18 = arith.constant 0 : index
    %31 = vector.load %arg6[%c16, %c0_18] : memref<112x512xf32, #tpu.memory_space<vmem>>, vector<4x512xf32>
    %c64_i32 = arith.constant 64 : i32
    %32 = tpu.dynamic_rotate %31 by %c64_i32 dim 1 : vector<4x512xf32>, i32 -> vector<4x512xf32>
    %c4_19 = arith.constant 4 : index
    %c0_20 = arith.constant 0 : index
    %33 = vector.load %arg4[%c4_19, %c0_20] : memref<32x512xf32, #tpu.memory_space<vmem>>, vector<1x512xf32>
    %34 = vector.broadcast %33 : vector<1x512xf32> to vector<4x512xf32>
    %35 = arith.mulf %32, %34 : vector<4x512xf32>
    %36 = arith.addf %30, %35 : vector<4x512xf32>
    %c20 = arith.constant 20 : index
    %c0_21 = arith.constant 0 : index
    %37 = vector.load %arg6[%c20, %c0_21] : memref<112x512xf32, #tpu.memory_space<vmem>>, vector<4x512xf32>
    %c63_i32 = arith.constant 63 : i32
    %38 = tpu.dynamic_rotate %37 by %c63_i32 dim 1 : vector<4x512xf32>, i32 -> vector<4x512xf32>
    %c5 = arith.constant 5 : index
    %c0_22 = arith.constant 0 : index
    %39 = vector.load %arg4[%c5, %c0_22] : memref<32x512xf32, #tpu.memory_space<vmem>>, vector<1x512xf32>
    %40 = vector.broadcast %39 : vector<1x512xf32> to vector<4x512xf32>
    %41 = arith.mulf %38, %40 : vector<4x512xf32>
    %42 = arith.addf %36, %41 : vector<4x512xf32>
    %c24 = arith.constant 24 : index
    %c0_23 = arith.constant 0 : index
    %43 = vector.load %arg6[%c24, %c0_23] : memref<112x512xf32, #tpu.memory_space<vmem>>, vector<4x512xf32>
    %c57_i32 = arith.constant 57 : i32
    %44 = tpu.dynamic_rotate %43 by %c57_i32 dim 1 : vector<4x512xf32>, i32 -> vector<4x512xf32>
    %c6 = arith.constant 6 : index
    %c0_24 = arith.constant 0 : index
    %45 = vector.load %arg4[%c6, %c0_24] : memref<32x512xf32, #tpu.memory_space<vmem>>, vector<1x512xf32>
    %46 = vector.broadcast %45 : vector<1x512xf32> to vector<4x512xf32>
    %47 = arith.mulf %44, %46 : vector<4x512xf32>
    %48 = arith.addf %42, %47 : vector<4x512xf32>
    %c28 = arith.constant 28 : index
    %c0_25 = arith.constant 0 : index
    %49 = vector.load %arg6[%c28, %c0_25] : memref<112x512xf32, #tpu.memory_space<vmem>>, vector<4x512xf32>
    %c56_i32 = arith.constant 56 : i32
    %50 = tpu.dynamic_rotate %49 by %c56_i32 dim 1 : vector<4x512xf32>, i32 -> vector<4x512xf32>
    %c7 = arith.constant 7 : index
    %c0_26 = arith.constant 0 : index
    %51 = vector.load %arg4[%c7, %c0_26] : memref<32x512xf32, #tpu.memory_space<vmem>>, vector<1x512xf32>
    %52 = vector.broadcast %51 : vector<1x512xf32> to vector<4x512xf32>
    %53 = arith.mulf %50, %52 : vector<4x512xf32>
    %54 = arith.addf %48, %53 : vector<4x512xf32>
    %c32 = arith.constant 32 : index
    %c0_27 = arith.constant 0 : index
    %55 = vector.load %arg6[%c32, %c0_27] : memref<112x512xf32, #tpu.memory_space<vmem>>, vector<4x512xf32>
    %c55_i32 = arith.constant 55 : i32
    %56 = tpu.dynamic_rotate %55 by %c55_i32 dim 1 : vector<4x512xf32>, i32 -> vector<4x512xf32>
    %c8_28 = arith.constant 8 : index
    %c0_29 = arith.constant 0 : index
    %57 = vector.load %arg4[%c8_28, %c0_29] : memref<32x512xf32, #tpu.memory_space<vmem>>, vector<1x512xf32>
    %58 = vector.broadcast %57 : vector<1x512xf32> to vector<4x512xf32>
    %59 = arith.mulf %56, %58 : vector<4x512xf32>
    %60 = arith.addf %54, %59 : vector<4x512xf32>
    %c36 = arith.constant 36 : index
    %c0_30 = arith.constant 0 : index
    %61 = vector.load %arg6[%c36, %c0_30] : memref<112x512xf32, #tpu.memory_space<vmem>>, vector<4x512xf32>
    %c9_i32 = arith.constant 9 : i32
    %62 = tpu.dynamic_rotate %61 by %c9_i32 dim 1 : vector<4x512xf32>, i32 -> vector<4x512xf32>
    %c9 = arith.constant 9 : index
    %c0_31 = arith.constant 0 : index
    %63 = vector.load %arg4[%c9, %c0_31] : memref<32x512xf32, #tpu.memory_space<vmem>>, vector<1x512xf32>
    %64 = vector.broadcast %63 : vector<1x512xf32> to vector<4x512xf32>
    %65 = arith.mulf %62, %64 : vector<4x512xf32>
    %66 = arith.addf %60, %65 : vector<4x512xf32>
    %c40 = arith.constant 40 : index
    %c0_32 = arith.constant 0 : index
    %67 = vector.load %arg6[%c40, %c0_32] : memref<112x512xf32, #tpu.memory_space<vmem>>, vector<4x512xf32>
    %c8_i32 = arith.constant 8 : i32
    %68 = tpu.dynamic_rotate %67 by %c8_i32 dim 1 : vector<4x512xf32>, i32 -> vector<4x512xf32>
    %c10 = arith.constant 10 : index
    %c0_33 = arith.constant 0 : index
    %69 = vector.load %arg4[%c10, %c0_33] : memref<32x512xf32, #tpu.memory_space<vmem>>, vector<1x512xf32>
    %70 = vector.broadcast %69 : vector<1x512xf32> to vector<4x512xf32>
    %71 = arith.mulf %68, %70 : vector<4x512xf32>
    %72 = arith.addf %66, %71 : vector<4x512xf32>
    %c44 = arith.constant 44 : index
    %c0_34 = arith.constant 0 : index
    %73 = vector.load %arg6[%c44, %c0_34] : memref<112x512xf32, #tpu.memory_space<vmem>>, vector<4x512xf32>
    %c7_i32 = arith.constant 7 : i32
    %74 = tpu.dynamic_rotate %73 by %c7_i32 dim 1 : vector<4x512xf32>, i32 -> vector<4x512xf32>
    %c11 = arith.constant 11 : index
    %c0_35 = arith.constant 0 : index
    %75 = vector.load %arg4[%c11, %c0_35] : memref<32x512xf32, #tpu.memory_space<vmem>>, vector<1x512xf32>
    %76 = vector.broadcast %75 : vector<1x512xf32> to vector<4x512xf32>
    %77 = arith.mulf %74, %76 : vector<4x512xf32>
    %78 = arith.addf %72, %77 : vector<4x512xf32>
    %c48 = arith.constant 48 : index
    %c0_36 = arith.constant 0 : index
    %79 = vector.load %arg6[%c48, %c0_36] : memref<112x512xf32, #tpu.memory_space<vmem>>, vector<4x512xf32>
    %c1_i32 = arith.constant 1 : i32
    %80 = tpu.dynamic_rotate %79 by %c1_i32 dim 1 : vector<4x512xf32>, i32 -> vector<4x512xf32>
    %c12_37 = arith.constant 12 : index
    %c0_38 = arith.constant 0 : index
    %81 = vector.load %arg4[%c12_37, %c0_38] : memref<32x512xf32, #tpu.memory_space<vmem>>, vector<1x512xf32>
    %82 = vector.broadcast %81 : vector<1x512xf32> to vector<4x512xf32>
    %83 = arith.mulf %80, %82 : vector<4x512xf32>
    %84 = arith.addf %78, %83 : vector<4x512xf32>
    %c52 = arith.constant 52 : index
    %c0_39 = arith.constant 0 : index
    %85 = vector.load %arg6[%c52, %c0_39] : memref<112x512xf32, #tpu.memory_space<vmem>>, vector<4x512xf32>
    %86 = arith.addf %84, %85 : vector<4x512xf32>
    %c56 = arith.constant 56 : index
    %c0_40 = arith.constant 0 : index
    %87 = vector.load %arg6[%c56, %c0_40] : memref<112x512xf32, #tpu.memory_space<vmem>>, vector<4x512xf32>
    %c511_i32 = arith.constant 511 : i32
    %88 = tpu.dynamic_rotate %87 by %c511_i32 dim 1 : vector<4x512xf32>, i32 -> vector<4x512xf32>
    %c14 = arith.constant 14 : index
    %c0_41 = arith.constant 0 : index
    %89 = vector.load %arg4[%c14, %c0_41] : memref<32x512xf32, #tpu.memory_space<vmem>>, vector<1x512xf32>
    %90 = vector.broadcast %89 : vector<1x512xf32> to vector<4x512xf32>
    %91 = arith.mulf %88, %90 : vector<4x512xf32>
    %92 = arith.addf %86, %91 : vector<4x512xf32>
    %c60 = arith.constant 60 : index
    %c0_42 = arith.constant 0 : index
    %93 = vector.load %arg6[%c60, %c0_42] : memref<112x512xf32, #tpu.memory_space<vmem>>, vector<4x512xf32>
    %c505_i32 = arith.constant 505 : i32
    %94 = tpu.dynamic_rotate %93 by %c505_i32 dim 1 : vector<4x512xf32>, i32 -> vector<4x512xf32>
    %c15 = arith.constant 15 : index
    %c0_43 = arith.constant 0 : index
    %95 = vector.load %arg4[%c15, %c0_43] : memref<32x512xf32, #tpu.memory_space<vmem>>, vector<1x512xf32>
    %96 = vector.broadcast %95 : vector<1x512xf32> to vector<4x512xf32>
    %97 = arith.mulf %94, %96 : vector<4x512xf32>
    %98 = arith.addf %92, %97 : vector<4x512xf32>
    %c64 = arith.constant 64 : index
    %c0_44 = arith.constant 0 : index
    %99 = vector.load %arg6[%c64, %c0_44] : memref<112x512xf32, #tpu.memory_space<vmem>>, vector<4x512xf32>
    %c504_i32 = arith.constant 504 : i32
    %100 = tpu.dynamic_rotate %99 by %c504_i32 dim 1 : vector<4x512xf32>, i32 -> vector<4x512xf32>
    %c16_45 = arith.constant 16 : index
    %c0_46 = arith.constant 0 : index
    %101 = vector.load %arg4[%c16_45, %c0_46] : memref<32x512xf32, #tpu.memory_space<vmem>>, vector<1x512xf32>
    %102 = vector.broadcast %101 : vector<1x512xf32> to vector<4x512xf32>
    %103 = arith.mulf %100, %102 : vector<4x512xf32>
    %104 = arith.addf %98, %103 : vector<4x512xf32>
    %c68 = arith.constant 68 : index
    %c0_47 = arith.constant 0 : index
    %105 = vector.load %arg6[%c68, %c0_47] : memref<112x512xf32, #tpu.memory_space<vmem>>, vector<4x512xf32>
    %c503_i32 = arith.constant 503 : i32
    %106 = tpu.dynamic_rotate %105 by %c503_i32 dim 1 : vector<4x512xf32>, i32 -> vector<4x512xf32>
    %c17 = arith.constant 17 : index
    %c0_48 = arith.constant 0 : index
    %107 = vector.load %arg4[%c17, %c0_48] : memref<32x512xf32, #tpu.memory_space<vmem>>, vector<1x512xf32>
    %108 = vector.broadcast %107 : vector<1x512xf32> to vector<4x512xf32>
    %109 = arith.mulf %106, %108 : vector<4x512xf32>
    %110 = arith.addf %104, %109 : vector<4x512xf32>
    %c72 = arith.constant 72 : index
    %c0_49 = arith.constant 0 : index
    %111 = vector.load %arg6[%c72, %c0_49] : memref<112x512xf32, #tpu.memory_space<vmem>>, vector<4x512xf32>
    %c457_i32 = arith.constant 457 : i32
    %112 = tpu.dynamic_rotate %111 by %c457_i32 dim 1 : vector<4x512xf32>, i32 -> vector<4x512xf32>
    %c18 = arith.constant 18 : index
    %c0_50 = arith.constant 0 : index
    %113 = vector.load %arg4[%c18, %c0_50] : memref<32x512xf32, #tpu.memory_space<vmem>>, vector<1x512xf32>
    %114 = vector.broadcast %113 : vector<1x512xf32> to vector<4x512xf32>
    %115 = arith.mulf %112, %114 : vector<4x512xf32>
    %116 = arith.addf %110, %115 : vector<4x512xf32>
    %c76 = arith.constant 76 : index
    %c0_51 = arith.constant 0 : index
    %117 = vector.load %arg6[%c76, %c0_51] : memref<112x512xf32, #tpu.memory_space<vmem>>, vector<4x512xf32>
    %c456_i32 = arith.constant 456 : i32
    %118 = tpu.dynamic_rotate %117 by %c456_i32 dim 1 : vector<4x512xf32>, i32 -> vector<4x512xf32>
    %c19 = arith.constant 19 : index
    %c0_52 = arith.constant 0 : index
    %119 = vector.load %arg4[%c19, %c0_52] : memref<32x512xf32, #tpu.memory_space<vmem>>, vector<1x512xf32>
    %120 = vector.broadcast %119 : vector<1x512xf32> to vector<4x512xf32>
    %121 = arith.mulf %118, %120 : vector<4x512xf32>
    %122 = arith.addf %116, %121 : vector<4x512xf32>
    %c80 = arith.constant 80 : index
    %c0_53 = arith.constant 0 : index
    %123 = vector.load %arg6[%c80, %c0_53] : memref<112x512xf32, #tpu.memory_space<vmem>>, vector<4x512xf32>
    %c455_i32 = arith.constant 455 : i32
    %124 = tpu.dynamic_rotate %123 by %c455_i32 dim 1 : vector<4x512xf32>, i32 -> vector<4x512xf32>
    %c20_54 = arith.constant 20 : index
    %c0_55 = arith.constant 0 : index
    %125 = vector.load %arg4[%c20_54, %c0_55] : memref<32x512xf32, #tpu.memory_space<vmem>>, vector<1x512xf32>
    %126 = vector.broadcast %125 : vector<1x512xf32> to vector<4x512xf32>
    %127 = arith.mulf %124, %126 : vector<4x512xf32>
    %128 = arith.addf %122, %127 : vector<4x512xf32>
    %c84 = arith.constant 84 : index
    %c0_56 = arith.constant 0 : index
    %129 = vector.load %arg6[%c84, %c0_56] : memref<112x512xf32, #tpu.memory_space<vmem>>, vector<4x512xf32>
    %c449_i32 = arith.constant 449 : i32
    %130 = tpu.dynamic_rotate %129 by %c449_i32 dim 1 : vector<4x512xf32>, i32 -> vector<4x512xf32>
    %c21 = arith.constant 21 : index
    %c0_57 = arith.constant 0 : index
    %131 = vector.load %arg4[%c21, %c0_57] : memref<32x512xf32, #tpu.memory_space<vmem>>, vector<1x512xf32>
    %132 = vector.broadcast %131 : vector<1x512xf32> to vector<4x512xf32>
    %133 = arith.mulf %130, %132 : vector<4x512xf32>
    %134 = arith.addf %128, %133 : vector<4x512xf32>
    %c88 = arith.constant 88 : index
    %c0_58 = arith.constant 0 : index
    %135 = vector.load %arg6[%c88, %c0_58] : memref<112x512xf32, #tpu.memory_space<vmem>>, vector<4x512xf32>
    %c448_i32 = arith.constant 448 : i32
    %136 = tpu.dynamic_rotate %135 by %c448_i32 dim 1 : vector<4x512xf32>, i32 -> vector<4x512xf32>
    %c22 = arith.constant 22 : index
    %c0_59 = arith.constant 0 : index
    %137 = vector.load %arg4[%c22, %c0_59] : memref<32x512xf32, #tpu.memory_space<vmem>>, vector<1x512xf32>
    %138 = vector.broadcast %137 : vector<1x512xf32> to vector<4x512xf32>
    %139 = arith.mulf %136, %138 : vector<4x512xf32>
    %140 = arith.addf %134, %139 : vector<4x512xf32>
    %c92 = arith.constant 92 : index
    %c0_60 = arith.constant 0 : index
    %141 = vector.load %arg6[%c92, %c0_60] : memref<112x512xf32, #tpu.memory_space<vmem>>, vector<4x512xf32>
    %c447_i32 = arith.constant 447 : i32
    %142 = tpu.dynamic_rotate %141 by %c447_i32 dim 1 : vector<4x512xf32>, i32 -> vector<4x512xf32>
    %c23 = arith.constant 23 : index
    %c0_61 = arith.constant 0 : index
    %143 = vector.load %arg4[%c23, %c0_61] : memref<32x512xf32, #tpu.memory_space<vmem>>, vector<1x512xf32>
    %144 = vector.broadcast %143 : vector<1x512xf32> to vector<4x512xf32>
    %145 = arith.mulf %142, %144 : vector<4x512xf32>
    %146 = arith.addf %140, %145 : vector<4x512xf32>
    %c96 = arith.constant 96 : index
    %c0_62 = arith.constant 0 : index
    %147 = vector.load %arg6[%c96, %c0_62] : memref<112x512xf32, #tpu.memory_space<vmem>>, vector<4x512xf32>
    %c441_i32 = arith.constant 441 : i32
    %148 = tpu.dynamic_rotate %147 by %c441_i32 dim 1 : vector<4x512xf32>, i32 -> vector<4x512xf32>
    %c24_63 = arith.constant 24 : index
    %c0_64 = arith.constant 0 : index
    %149 = vector.load %arg4[%c24_63, %c0_64] : memref<32x512xf32, #tpu.memory_space<vmem>>, vector<1x512xf32>
    %150 = vector.broadcast %149 : vector<1x512xf32> to vector<4x512xf32>
    %151 = arith.mulf %148, %150 : vector<4x512xf32>
    %152 = arith.addf %146, %151 : vector<4x512xf32>
    %c100 = arith.constant 100 : index
    %c0_65 = arith.constant 0 : index
    %153 = vector.load %arg6[%c100, %c0_65] : memref<112x512xf32, #tpu.memory_space<vmem>>, vector<4x512xf32>
    %c440_i32 = arith.constant 440 : i32
    %154 = tpu.dynamic_rotate %153 by %c440_i32 dim 1 : vector<4x512xf32>, i32 -> vector<4x512xf32>
    %c25 = arith.constant 25 : index
    %c0_66 = arith.constant 0 : index
    %155 = vector.load %arg4[%c25, %c0_66] : memref<32x512xf32, #tpu.memory_space<vmem>>, vector<1x512xf32>
    %156 = vector.broadcast %155 : vector<1x512xf32> to vector<4x512xf32>
    %157 = arith.mulf %154, %156 : vector<4x512xf32>
    %158 = arith.addf %152, %157 : vector<4x512xf32>
    %c104 = arith.constant 104 : index
    %c0_67 = arith.constant 0 : index
    %159 = vector.load %arg6[%c104, %c0_67] : memref<112x512xf32, #tpu.memory_space<vmem>>, vector<4x512xf32>
    %c439_i32 = arith.constant 439 : i32
    %160 = tpu.dynamic_rotate %159 by %c439_i32 dim 1 : vector<4x512xf32>, i32 -> vector<4x512xf32>
    %c26 = arith.constant 26 : index
    %c0_68 = arith.constant 0 : index
    %161 = vector.load %arg4[%c26, %c0_68] : memref<32x512xf32, #tpu.memory_space<vmem>>, vector<1x512xf32>
    %162 = vector.broadcast %161 : vector<1x512xf32> to vector<4x512xf32>
    %163 = arith.mulf %160, %162 : vector<4x512xf32>
    %164 = arith.addf %158, %163 : vector<4x512xf32>
    %c0_69 = arith.constant 0 : index
    %c0_70 = arith.constant 0 : index
    %c0_71 = arith.constant 0 : index
    %165 = vector.load %arg3[%c0_69, %c0_70, %c0_71] : memref<4x4x1xf32, #tpu.memory_space<vmem>>, vector<1x4x1xf32>
    %166 = vector.shape_cast %165 : vector<1x4x1xf32> to vector<4x1xf32>
    %167 = vector.broadcast %166 : vector<4x1xf32> to vector<4x512xf32>
    %168 = arith.addf %164, %167 : vector<4x512xf32>
    %cst_72 = arith.constant 0.000000e+00 : f32
    %169 = vector.broadcast %cst_72 : f32 to vector<4x512xf32>
    %170 = arith.maximumf %168, %169 : vector<4x512xf32>
    %c1_73 = arith.constant 1 : index
    %c0_74 = arith.constant 0 : index
    %c0_75 = arith.constant 0 : index
    %171 = vector.load %arg2[%c1_73, %c0_74, %c0_75] : memref<4x112x4xf32, #tpu.memory_space<vmem>>, vector<1x112x4xf32>
    %172 = vector.shape_cast %171 : vector<1x112x4xf32> to vector<112x4xf32>
    %cst_76 = arith.constant dense<0.000000e+00> : vector<112x512xf32>
    %173 = tpu.matmul %172, %170, %cst_76 {dimension_numbers = #tpu.dot_dimension_numbers<[1], [0], [0], [1], [0, 0, 1, 1], [], []>} : vector<112x4xf32>, vector<4x512xf32>, vector<112x512xf32> -> vector<112x512xf32>
    %c0_77 = arith.constant 0 : index
    %c0_78 = arith.constant 0 : index
    %174 = vector.load %arg6[%c0_77, %c0_78] : memref<112x512xf32, #tpu.memory_space<vmem>>, vector<112x512xf32>
    tpu.vector_store %arg6[%c0_77, %c0_78], %173 {strides = array<i32>} : memref<112x512xf32, #tpu.memory_space<vmem>>, vector<112x512xf32>,
    %cst_79 = arith.constant 0.000000e+00 : f32
    %175 = vector.broadcast %cst_79 : f32 to vector<4x512xf32>
    %c0_80 = arith.constant 0 : index
    %c0_81 = arith.constant 0 : index
    %176 = vector.load %arg6[%c0_80, %c0_81] : memref<112x512xf32, #tpu.memory_space<vmem>>, vector<4x512xf32>
    %c73_i32_82 = arith.constant 73 : i32
    %177 = tpu.dynamic_rotate %176 by %c73_i32_82 dim 1 : vector<4x512xf32>, i32 -> vector<4x512xf32>
    %c0_83 = arith.constant 0 : index
    %c0_84 = arith.constant 0 : index
    %178 = vector.load %arg4[%c0_83, %c0_84] : memref<32x512xf32, #tpu.memory_space<vmem>>, vector<1x512xf32>
    %179 = vector.broadcast %178 : vector<1x512xf32> to vector<4x512xf32>
    %180 = arith.mulf %177, %179 : vector<4x512xf32>
    %181 = arith.addf %175, %180 : vector<4x512xf32>
    %c4_85 = arith.constant 4 : index
    %c0_86 = arith.constant 0 : index
    %182 = vector.load %arg6[%c4_85, %c0_86] : memref<112x512xf32, #tpu.memory_space<vmem>>, vector<4x512xf32>
    %c72_i32_87 = arith.constant 72 : i32
    %183 = tpu.dynamic_rotate %182 by %c72_i32_87 dim 1 : vector<4x512xf32>, i32 -> vector<4x512xf32>
    %c1_88 = arith.constant 1 : index
    %c0_89 = arith.constant 0 : index
    %184 = vector.load %arg4[%c1_88, %c0_89] : memref<32x512xf32, #tpu.memory_space<vmem>>, vector<1x512xf32>
    %185 = vector.broadcast %184 : vector<1x512xf32> to vector<4x512xf32>
    %186 = arith.mulf %183, %185 : vector<4x512xf32>
    %187 = arith.addf %181, %186 : vector<4x512xf32>
    %c8_90 = arith.constant 8 : index
    %c0_91 = arith.constant 0 : index
    %188 = vector.load %arg6[%c8_90, %c0_91] : memref<112x512xf32, #tpu.memory_space<vmem>>, vector<4x512xf32>
    %c71_i32_92 = arith.constant 71 : i32
    %189 = tpu.dynamic_rotate %188 by %c71_i32_92 dim 1 : vector<4x512xf32>, i32 -> vector<4x512xf32>
    %c2_93 = arith.constant 2 : index
    %c0_94 = arith.constant 0 : index
    %190 = vector.load %arg4[%c2_93, %c0_94] : memref<32x512xf32, #tpu.memory_space<vmem>>, vector<1x512xf32>
    %191 = vector.broadcast %190 : vector<1x512xf32> to vector<4x512xf32>
    %192 = arith.mulf %189, %191 : vector<4x512xf32>
    %193 = arith.addf %187, %192 : vector<4x512xf32>
    %c12_95 = arith.constant 12 : index
    %c0_96 = arith.constant 0 : index
    %194 = vector.load %arg6[%c12_95, %c0_96] : memref<112x512xf32, #tpu.memory_space<vmem>>, vector<4x512xf32>
    %c65_i32_97 = arith.constant 65 : i32
    %195 = tpu.dynamic_rotate %194 by %c65_i32_97 dim 1 : vector<4x512xf32>, i32 -> vector<4x512xf32>
    %c3_98 = arith.constant 3 : index
    %c0_99 = arith.constant 0 : index
    %196 = vector.load %arg4[%c3_98, %c0_99] : memref<32x512xf32, #tpu.memory_space<vmem>>, vector<1x512xf32>
    %197 = vector.broadcast %196 : vector<1x512xf32> to vector<4x512xf32>
    %198 = arith.mulf %195, %197 : vector<4x512xf32>
    %199 = arith.addf %193, %198 : vector<4x512xf32>
    %c16_100 = arith.constant 16 : index
    %c0_101 = arith.constant 0 : index
    %200 = vector.load %arg6[%c16_100, %c0_101] : memref<112x512xf32, #tpu.memory_space<vmem>>, vector<4x512xf32>
    %c64_i32_102 = arith.constant 64 : i32
    %201 = tpu.dynamic_rotate %200 by %c64_i32_102 dim 1 : vector<4x512xf32>, i32 -> vector<4x512xf32>
    %c4_103 = arith.constant 4 : index
    %c0_104 = arith.constant 0 : index
    %202 = vector.load %arg4[%c4_103, %c0_104] : memref<32x512xf32, #tpu.memory_space<vmem>>, vector<1x512xf32>
    %203 = vector.broadcast %202 : vector<1x512xf32> to vector<4x512xf32>
    %204 = arith.mulf %201, %203 : vector<4x512xf32>
    %205 = arith.addf %199, %204 : vector<4x512xf32>
    %c20_105 = arith.constant 20 : index
    %c0_106 = arith.constant 0 : index
    %206 = vector.load %arg6[%c20_105, %c0_106] : memref<112x512xf32, #tpu.memory_space<vmem>>, vector<4x512xf32>
    %c63_i32_107 = arith.constant 63 : i32
    %207 = tpu.dynamic_rotate %206 by %c63_i32_107 dim 1 : vector<4x512xf32>, i32 -> vector<4x512xf32>
    %c5_108 = arith.constant 5 : index
    %c0_109 = arith.constant 0 : index
    %208 = vector.load %arg4[%c5_108, %c0_109] : memref<32x512xf32, #tpu.memory_space<vmem>>, vector<1x512xf32>
    %209 = vector.broadcast %208 : vector<1x512xf32> to vector<4x512xf32>
    %210 = arith.mulf %207, %209 : vector<4x512xf32>
    %211 = arith.addf %205, %210 : vector<4x512xf32>
    %c24_110 = arith.constant 24 : index
    %c0_111 = arith.constant 0 : index
    %212 = vector.load %arg6[%c24_110, %c0_111] : memref<112x512xf32, #tpu.memory_space<vmem>>, vector<4x512xf32>
    %c57_i32_112 = arith.constant 57 : i32
    %213 = tpu.dynamic_rotate %212 by %c57_i32_112 dim 1 : vector<4x512xf32>, i32 -> vector<4x512xf32>
    %c6_113 = arith.constant 6 : index
    %c0_114 = arith.constant 0 : index
    %214 = vector.load %arg4[%c6_113, %c0_114] : memref<32x512xf32, #tpu.memory_space<vmem>>, vector<1x512xf32>
    %215 = vector.broadcast %214 : vector<1x512xf32> to vector<4x512xf32>
    %216 = arith.mulf %213, %215 : vector<4x512xf32>
    %217 = arith.addf %211, %216 : vector<4x512xf32>
    %c28_115 = arith.constant 28 : index
    %c0_116 = arith.constant 0 : index
    %218 = vector.load %arg6[%c28_115, %c0_116] : memref<112x512xf32, #tpu.memory_space<vmem>>, vector<4x512xf32>
    %c56_i32_117 = arith.constant 56 : i32
    %219 = tpu.dynamic_rotate %218 by %c56_i32_117 dim 1 : vector<4x512xf32>, i32 -> vector<4x512xf32>
    %c7_118 = arith.constant 7 : index
    %c0_119 = arith.constant 0 : index
    %220 = vector.load %arg4[%c7_118, %c0_119] : memref<32x512xf32, #tpu.memory_space<vmem>>, vector<1x512xf32>
    %221 = vector.broadcast %220 : vector<1x512xf32> to vector<4x512xf32>
    %222 = arith.mulf %219, %221 : vector<4x512xf32>
    %223 = arith.addf %217, %222 : vector<4x512xf32>
    %c32_120 = arith.constant 32 : index
    %c0_121 = arith.constant 0 : index
    %224 = vector.load %arg6[%c32_120, %c0_121] : memref<112x512xf32, #tpu.memory_space<vmem>>, vector<4x512xf32>
    %c55_i32_122 = arith.constant 55 : i32
    %225 = tpu.dynamic_rotate %224 by %c55_i32_122 dim 1 : vector<4x512xf32>, i32 -> vector<4x512xf32>
    %c8_123 = arith.constant 8 : index
    %c0_124 = arith.constant 0 : index
    %226 = vector.load %arg4[%c8_123, %c0_124] : memref<32x512xf32, #tpu.memory_space<vmem>>, vector<1x512xf32>
    %227 = vector.broadcast %226 : vector<1x512xf32> to vector<4x512xf32>
    %228 = arith.mulf %225, %227 : vector<4x512xf32>
    %229 = arith.addf %223, %228 : vector<4x512xf32>
    %c36_125 = arith.constant 36 : index
    %c0_126 = arith.constant 0 : index
    %230 = vector.load %arg6[%c36_125, %c0_126] : memref<112x512xf32, #tpu.memory_space<vmem>>, vector<4x512xf32>
    %c9_i32_127 = arith.constant 9 : i32
    %231 = tpu.dynamic_rotate %230 by %c9_i32_127 dim 1 : vector<4x512xf32>, i32 -> vector<4x512xf32>
    %c9_128 = arith.constant 9 : index
    %c0_129 = arith.constant 0 : index
    %232 = vector.load %arg4[%c9_128, %c0_129] : memref<32x512xf32, #tpu.memory_space<vmem>>, vector<1x512xf32>
    %233 = vector.broadcast %232 : vector<1x512xf32> to vector<4x512xf32>
    %234 = arith.mulf %231, %233 : vector<4x512xf32>
    %235 = arith.addf %229, %234 : vector<4x512xf32>
    %c40_130 = arith.constant 40 : index
    %c0_131 = arith.constant 0 : index
    %236 = vector.load %arg6[%c40_130, %c0_131] : memref<112x512xf32, #tpu.memory_space<vmem>>, vector<4x512xf32>
    %c8_i32_132 = arith.constant 8 : i32
    %237 = tpu.dynamic_rotate %236 by %c8_i32_132 dim 1 : vector<4x512xf32>, i32 -> vector<4x512xf32>
    %c10_133 = arith.constant 10 : index
    %c0_134 = arith.constant 0 : index
    %238 = vector.load %arg4[%c10_133, %c0_134] : memref<32x512xf32, #tpu.memory_space<vmem>>, vector<1x512xf32>
    %239 = vector.broadcast %238 : vector<1x512xf32> to vector<4x512xf32>
    %240 = arith.mulf %237, %239 : vector<4x512xf32>
    %241 = arith.addf %235, %240 : vector<4x512xf32>
    %c44_135 = arith.constant 44 : index
    %c0_136 = arith.constant 0 : index
    %242 = vector.load %arg6[%c44_135, %c0_136] : memref<112x512xf32, #tpu.memory_space<vmem>>, vector<4x512xf32>
    %c7_i32_137 = arith.constant 7 : i32
    %243 = tpu.dynamic_rotate %242 by %c7_i32_137 dim 1 : vector<4x512xf32>, i32 -> vector<4x512xf32>
    %c11_138 = arith.constant 11 : index
    %c0_139 = arith.constant 0 : index
    %244 = vector.load %arg4[%c11_138, %c0_139] : memref<32x512xf32, #tpu.memory_space<vmem>>, vector<1x512xf32>
    %245 = vector.broadcast %244 : vector<1x512xf32> to vector<4x512xf32>
    %246 = arith.mulf %243, %245 : vector<4x512xf32>
    %247 = arith.addf %241, %246 : vector<4x512xf32>
    %c48_140 = arith.constant 48 : index
    %c0_141 = arith.constant 0 : index
    %248 = vector.load %arg6[%c48_140, %c0_141] : memref<112x512xf32, #tpu.memory_space<vmem>>, vector<4x512xf32>
    %c1_i32_142 = arith.constant 1 : i32
    %249 = tpu.dynamic_rotate %248 by %c1_i32_142 dim 1 : vector<4x512xf32>, i32 -> vector<4x512xf32>
    %c12_143 = arith.constant 12 : index
    %c0_144 = arith.constant 0 : index
    %250 = vector.load %arg4[%c12_143, %c0_144] : memref<32x512xf32, #tpu.memory_space<vmem>>, vector<1x512xf32>
    %251 = vector.broadcast %250 : vector<1x512xf32> to vector<4x512xf32>
    %252 = arith.mulf %249, %251 : vector<4x512xf32>
    %253 = arith.addf %247, %252 : vector<4x512xf32>
    %c52_145 = arith.constant 52 : index
    %c0_146 = arith.constant 0 : index
    %254 = vector.load %arg6[%c52_145, %c0_146] : memref<112x512xf32, #tpu.memory_space<vmem>>, vector<4x512xf32>
    %255 = arith.addf %253, %254 : vector<4x512xf32>
    %c56_147 = arith.constant 56 : index
    %c0_148 = arith.constant 0 : index
    %256 = vector.load %arg6[%c56_147, %c0_148] : memref<112x512xf32, #tpu.memory_space<vmem>>, vector<4x512xf32>
    %c511_i32_149 = arith.constant 511 : i32
    %257 = tpu.dynamic_rotate %256 by %c511_i32_149 dim 1 : vector<4x512xf32>, i32 -> vector<4x512xf32>
    %c14_150 = arith.constant 14 : index
    %c0_151 = arith.constant 0 : index
    %258 = vector.load %arg4[%c14_150, %c0_151] : memref<32x512xf32, #tpu.memory_space<vmem>>, vector<1x512xf32>
    %259 = vector.broadcast %258 : vector<1x512xf32> to vector<4x512xf32>
    %260 = arith.mulf %257, %259 : vector<4x512xf32>
    %261 = arith.addf %255, %260 : vector<4x512xf32>
    %c60_152 = arith.constant 60 : index
    %c0_153 = arith.constant 0 : index
    %262 = vector.load %arg6[%c60_152, %c0_153] : memref<112x512xf32, #tpu.memory_space<vmem>>, vector<4x512xf32>
    %c505_i32_154 = arith.constant 505 : i32
    %263 = tpu.dynamic_rotate %262 by %c505_i32_154 dim 1 : vector<4x512xf32>, i32 -> vector<4x512xf32>
    %c15_155 = arith.constant 15 : index
    %c0_156 = arith.constant 0 : index
    %264 = vector.load %arg4[%c15_155, %c0_156] : memref<32x512xf32, #tpu.memory_space<vmem>>, vector<1x512xf32>
    %265 = vector.broadcast %264 : vector<1x512xf32> to vector<4x512xf32>
    %266 = arith.mulf %263, %265 : vector<4x512xf32>
    %267 = arith.addf %261, %266 : vector<4x512xf32>
    %c64_157 = arith.constant 64 : index
    %c0_158 = arith.constant 0 : index
    %268 = vector.load %arg6[%c64_157, %c0_158] : memref<112x512xf32, #tpu.memory_space<vmem>>, vector<4x512xf32>
    %c504_i32_159 = arith.constant 504 : i32
    %269 = tpu.dynamic_rotate %268 by %c504_i32_159 dim 1 : vector<4x512xf32>, i32 -> vector<4x512xf32>
    %c16_160 = arith.constant 16 : index
    %c0_161 = arith.constant 0 : index
    %270 = vector.load %arg4[%c16_160, %c0_161] : memref<32x512xf32, #tpu.memory_space<vmem>>, vector<1x512xf32>
    %271 = vector.broadcast %270 : vector<1x512xf32> to vector<4x512xf32>
    %272 = arith.mulf %269, %271 : vector<4x512xf32>
    %273 = arith.addf %267, %272 : vector<4x512xf32>
    %c68_162 = arith.constant 68 : index
    %c0_163 = arith.constant 0 : index
    %274 = vector.load %arg6[%c68_162, %c0_163] : memref<112x512xf32, #tpu.memory_space<vmem>>, vector<4x512xf32>
    %c503_i32_164 = arith.constant 503 : i32
    %275 = tpu.dynamic_rotate %274 by %c503_i32_164 dim 1 : vector<4x512xf32>, i32 -> vector<4x512xf32>
    %c17_165 = arith.constant 17 : index
    %c0_166 = arith.constant 0 : index
    %276 = vector.load %arg4[%c17_165, %c0_166] : memref<32x512xf32, #tpu.memory_space<vmem>>, vector<1x512xf32>
    %277 = vector.broadcast %276 : vector<1x512xf32> to vector<4x512xf32>
    %278 = arith.mulf %275, %277 : vector<4x512xf32>
    %279 = arith.addf %273, %278 : vector<4x512xf32>
    %c72_167 = arith.constant 72 : index
    %c0_168 = arith.constant 0 : index
    %280 = vector.load %arg6[%c72_167, %c0_168] : memref<112x512xf32, #tpu.memory_space<vmem>>, vector<4x512xf32>
    %c457_i32_169 = arith.constant 457 : i32
    %281 = tpu.dynamic_rotate %280 by %c457_i32_169 dim 1 : vector<4x512xf32>, i32 -> vector<4x512xf32>
    %c18_170 = arith.constant 18 : index
    %c0_171 = arith.constant 0 : index
    %282 = vector.load %arg4[%c18_170, %c0_171] : memref<32x512xf32, #tpu.memory_space<vmem>>, vector<1x512xf32>
    %283 = vector.broadcast %282 : vector<1x512xf32> to vector<4x512xf32>
    %284 = arith.mulf %281, %283 : vector<4x512xf32>
    %285 = arith.addf %279, %284 : vector<4x512xf32>
    %c76_172 = arith.constant 76 : index
    %c0_173 = arith.constant 0 : index
    %286 = vector.load %arg6[%c76_172, %c0_173] : memref<112x512xf32, #tpu.memory_space<vmem>>, vector<4x512xf32>
    %c456_i32_174 = arith.constant 456 : i32
    %287 = tpu.dynamic_rotate %286 by %c456_i32_174 dim 1 : vector<4x512xf32>, i32 -> vector<4x512xf32>
    %c19_175 = arith.constant 19 : index
    %c0_176 = arith.constant 0 : index
    %288 = vector.load %arg4[%c19_175, %c0_176] : memref<32x512xf32, #tpu.memory_space<vmem>>, vector<1x512xf32>
    %289 = vector.broadcast %288 : vector<1x512xf32> to vector<4x512xf32>
    %290 = arith.mulf %287, %289 : vector<4x512xf32>
    %291 = arith.addf %285, %290 : vector<4x512xf32>
    %c80_177 = arith.constant 80 : index
    %c0_178 = arith.constant 0 : index
    %292 = vector.load %arg6[%c80_177, %c0_178] : memref<112x512xf32, #tpu.memory_space<vmem>>, vector<4x512xf32>
    %c455_i32_179 = arith.constant 455 : i32
    %293 = tpu.dynamic_rotate %292 by %c455_i32_179 dim 1 : vector<4x512xf32>, i32 -> vector<4x512xf32>
    %c20_180 = arith.constant 20 : index
    %c0_181 = arith.constant 0 : index
    %294 = vector.load %arg4[%c20_180, %c0_181] : memref<32x512xf32, #tpu.memory_space<vmem>>, vector<1x512xf32>
    %295 = vector.broadcast %294 : vector<1x512xf32> to vector<4x512xf32>
    %296 = arith.mulf %293, %295 : vector<4x512xf32>
    %297 = arith.addf %291, %296 : vector<4x512xf32>
    %c84_182 = arith.constant 84 : index
    %c0_183 = arith.constant 0 : index
    %298 = vector.load %arg6[%c84_182, %c0_183] : memref<112x512xf32, #tpu.memory_space<vmem>>, vector<4x512xf32>
    %c449_i32_184 = arith.constant 449 : i32
    %299 = tpu.dynamic_rotate %298 by %c449_i32_184 dim 1 : vector<4x512xf32>, i32 -> vector<4x512xf32>
    %c21_185 = arith.constant 21 : index
    %c0_186 = arith.constant 0 : index
    %300 = vector.load %arg4[%c21_185, %c0_186] : memref<32x512xf32, #tpu.memory_space<vmem>>, vector<1x512xf32>
    %301 = vector.broadcast %300 : vector<1x512xf32> to vector<4x512xf32>
    %302 = arith.mulf %299, %301 : vector<4x512xf32>
    %303 = arith.addf %297, %302 : vector<4x512xf32>
    %c88_187 = arith.constant 88 : index
    %c0_188 = arith.constant 0 : index
    %304 = vector.load %arg6[%c88_187, %c0_188] : memref<112x512xf32, #tpu.memory_space<vmem>>, vector<4x512xf32>
    %c448_i32_189 = arith.constant 448 : i32
    %305 = tpu.dynamic_rotate %304 by %c448_i32_189 dim 1 : vector<4x512xf32>, i32 -> vector<4x512xf32>
    %c22_190 = arith.constant 22 : index
    %c0_191 = arith.constant 0 : index
    %306 = vector.load %arg4[%c22_190, %c0_191] : memref<32x512xf32, #tpu.memory_space<vmem>>, vector<1x512xf32>
    %307 = vector.broadcast %306 : vector<1x512xf32> to vector<4x512xf32>
    %308 = arith.mulf %305, %307 : vector<4x512xf32>
    %309 = arith.addf %303, %308 : vector<4x512xf32>
    %c92_192 = arith.constant 92 : index
    %c0_193 = arith.constant 0 : index
    %310 = vector.load %arg6[%c92_192, %c0_193] : memref<112x512xf32, #tpu.memory_space<vmem>>, vector<4x512xf32>
    %c447_i32_194 = arith.constant 447 : i32
    %311 = tpu.dynamic_rotate %310 by %c447_i32_194 dim 1 : vector<4x512xf32>, i32 -> vector<4x512xf32>
    %c23_195 = arith.constant 23 : index
    %c0_196 = arith.constant 0 : index
    %312 = vector.load %arg4[%c23_195, %c0_196] : memref<32x512xf32, #tpu.memory_space<vmem>>, vector<1x512xf32>
    %313 = vector.broadcast %312 : vector<1x512xf32> to vector<4x512xf32>
    %314 = arith.mulf %311, %313 : vector<4x512xf32>
    %315 = arith.addf %309, %314 : vector<4x512xf32>
    %c96_197 = arith.constant 96 : index
    %c0_198 = arith.constant 0 : index
    %316 = vector.load %arg6[%c96_197, %c0_198] : memref<112x512xf32, #tpu.memory_space<vmem>>, vector<4x512xf32>
    %c441_i32_199 = arith.constant 441 : i32
    %317 = tpu.dynamic_rotate %316 by %c441_i32_199 dim 1 : vector<4x512xf32>, i32 -> vector<4x512xf32>
    %c24_200 = arith.constant 24 : index
    %c0_201 = arith.constant 0 : index
    %318 = vector.load %arg4[%c24_200, %c0_201] : memref<32x512xf32, #tpu.memory_space<vmem>>, vector<1x512xf32>
    %319 = vector.broadcast %318 : vector<1x512xf32> to vector<4x512xf32>
    %320 = arith.mulf %317, %319 : vector<4x512xf32>
    %321 = arith.addf %315, %320 : vector<4x512xf32>
    %c100_202 = arith.constant 100 : index
    %c0_203 = arith.constant 0 : index
    %322 = vector.load %arg6[%c100_202, %c0_203] : memref<112x512xf32, #tpu.memory_space<vmem>>, vector<4x512xf32>
    %c440_i32_204 = arith.constant 440 : i32
    %323 = tpu.dynamic_rotate %322 by %c440_i32_204 dim 1 : vector<4x512xf32>, i32 -> vector<4x512xf32>
    %c25_205 = arith.constant 25 : index
    %c0_206 = arith.constant 0 : index
    %324 = vector.load %arg4[%c25_205, %c0_206] : memref<32x512xf32, #tpu.memory_space<vmem>>, vector<1x512xf32>
    %325 = vector.broadcast %324 : vector<1x512xf32> to vector<4x512xf32>
    %326 = arith.mulf %323, %325 : vector<4x512xf32>
    %327 = arith.addf %321, %326 : vector<4x512xf32>
    %c104_207 = arith.constant 104 : index
    %c0_208 = arith.constant 0 : index
    %328 = vector.load %arg6[%c104_207, %c0_208] : memref<112x512xf32, #tpu.memory_space<vmem>>, vector<4x512xf32>
    %c439_i32_209 = arith.constant 439 : i32
    %329 = tpu.dynamic_rotate %328 by %c439_i32_209 dim 1 : vector<4x512xf32>, i32 -> vector<4x512xf32>
    %c26_210 = arith.constant 26 : index
    %c0_211 = arith.constant 0 : index
    %330 = vector.load %arg4[%c26_210, %c0_211] : memref<32x512xf32, #tpu.memory_space<vmem>>, vector<1x512xf32>
    %331 = vector.broadcast %330 : vector<1x512xf32> to vector<4x512xf32>
    %332 = arith.mulf %329, %331 : vector<4x512xf32>
    %333 = arith.addf %327, %332 : vector<4x512xf32>
    %c1_212 = arith.constant 1 : index
    %c0_213 = arith.constant 0 : index
    %c0_214 = arith.constant 0 : index
    %334 = vector.load %arg3[%c1_212, %c0_213, %c0_214] : memref<4x4x1xf32, #tpu.memory_space<vmem>>, vector<1x4x1xf32>
    %335 = vector.shape_cast %334 : vector<1x4x1xf32> to vector<4x1xf32>
    %336 = vector.broadcast %335 : vector<4x1xf32> to vector<4x512xf32>
    %337 = arith.addf %333, %336 : vector<4x512xf32>
    %cst_215 = arith.constant 0.000000e+00 : f32
    %338 = vector.broadcast %cst_215 : f32 to vector<4x512xf32>
    %339 = arith.maximumf %337, %338 : vector<4x512xf32>
    %c2_216 = arith.constant 2 : index
    %c0_217 = arith.constant 0 : index
    %c0_218 = arith.constant 0 : index
    %340 = vector.load %arg2[%c2_216, %c0_217, %c0_218] : memref<4x112x4xf32, #tpu.memory_space<vmem>>, vector<1x112x4xf32>
    %341 = vector.shape_cast %340 : vector<1x112x4xf32> to vector<112x4xf32>
    %cst_219 = arith.constant dense<0.000000e+00> : vector<112x512xf32>
    %342 = tpu.matmul %341, %339, %cst_219 {dimension_numbers = #tpu.dot_dimension_numbers<[1], [0], [0], [1], [0, 0, 1, 1], [], []>} : vector<112x4xf32>, vector<4x512xf32>, vector<112x512xf32> -> vector<112x512xf32>
    %c0_220 = arith.constant 0 : index
    %c0_221 = arith.constant 0 : index
    %343 = vector.load %arg6[%c0_220, %c0_221] : memref<112x512xf32, #tpu.memory_space<vmem>>, vector<112x512xf32>
    tpu.vector_store %arg6[%c0_220, %c0_221], %342 {strides = array<i32>} : memref<112x512xf32, #tpu.memory_space<vmem>>, vector<112x512xf32>,
    %cst_222 = arith.constant 0.000000e+00 : f32
    %344 = vector.broadcast %cst_222 : f32 to vector<4x512xf32>
    %c0_223 = arith.constant 0 : index
    %c0_224 = arith.constant 0 : index
    %345 = vector.load %arg6[%c0_223, %c0_224] : memref<112x512xf32, #tpu.memory_space<vmem>>, vector<4x512xf32>
    %c73_i32_225 = arith.constant 73 : i32
    %346 = tpu.dynamic_rotate %345 by %c73_i32_225 dim 1 : vector<4x512xf32>, i32 -> vector<4x512xf32>
    %c0_226 = arith.constant 0 : index
    %c0_227 = arith.constant 0 : index
    %347 = vector.load %arg4[%c0_226, %c0_227] : memref<32x512xf32, #tpu.memory_space<vmem>>, vector<1x512xf32>
    %348 = vector.broadcast %347 : vector<1x512xf32> to vector<4x512xf32>
    %349 = arith.mulf %346, %348 : vector<4x512xf32>
    %350 = arith.addf %344, %349 : vector<4x512xf32>
    %c4_228 = arith.constant 4 : index
    %c0_229 = arith.constant 0 : index
    %351 = vector.load %arg6[%c4_228, %c0_229] : memref<112x512xf32, #tpu.memory_space<vmem>>, vector<4x512xf32>
    %c72_i32_230 = arith.constant 72 : i32
    %352 = tpu.dynamic_rotate %351 by %c72_i32_230 dim 1 : vector<4x512xf32>, i32 -> vector<4x512xf32>
    %c1_231 = arith.constant 1 : index
    %c0_232 = arith.constant 0 : index
    %353 = vector.load %arg4[%c1_231, %c0_232] : memref<32x512xf32, #tpu.memory_space<vmem>>, vector<1x512xf32>
    %354 = vector.broadcast %353 : vector<1x512xf32> to vector<4x512xf32>
    %355 = arith.mulf %352, %354 : vector<4x512xf32>
    %356 = arith.addf %350, %355 : vector<4x512xf32>
    %c8_233 = arith.constant 8 : index
    %c0_234 = arith.constant 0 : index
    %357 = vector.load %arg6[%c8_233, %c0_234] : memref<112x512xf32, #tpu.memory_space<vmem>>, vector<4x512xf32>
    %c71_i32_235 = arith.constant 71 : i32
    %358 = tpu.dynamic_rotate %357 by %c71_i32_235 dim 1 : vector<4x512xf32>, i32 -> vector<4x512xf32>
    %c2_236 = arith.constant 2 : index
    %c0_237 = arith.constant 0 : index
    %359 = vector.load %arg4[%c2_236, %c0_237] : memref<32x512xf32, #tpu.memory_space<vmem>>, vector<1x512xf32>
    %360 = vector.broadcast %359 : vector<1x512xf32> to vector<4x512xf32>
    %361 = arith.mulf %358, %360 : vector<4x512xf32>
    %362 = arith.addf %356, %361 : vector<4x512xf32>
    %c12_238 = arith.constant 12 : index
    %c0_239 = arith.constant 0 : index
    %363 = vector.load %arg6[%c12_238, %c0_239] : memref<112x512xf32, #tpu.memory_space<vmem>>, vector<4x512xf32>
    %c65_i32_240 = arith.constant 65 : i32
    %364 = tpu.dynamic_rotate %363 by %c65_i32_240 dim 1 : vector<4x512xf32>, i32 -> vector<4x512xf32>
    %c3_241 = arith.constant 3 : index
    %c0_242 = arith.constant 0 : index
    %365 = vector.load %arg4[%c3_241, %c0_242] : memref<32x512xf32, #tpu.memory_space<vmem>>, vector<1x512xf32>
    %366 = vector.broadcast %365 : vector<1x512xf32> to vector<4x512xf32>
    %367 = arith.mulf %364, %366 : vector<4x512xf32>
    %368 = arith.addf %362, %367 : vector<4x512xf32>
    %c16_243 = arith.constant 16 : index
    %c0_244 = arith.constant 0 : index
    %369 = vector.load %arg6[%c16_243, %c0_244] : memref<112x512xf32, #tpu.memory_space<vmem>>, vector<4x512xf32>
    %c64_i32_245 = arith.constant 64 : i32
    %370 = tpu.dynamic_rotate %369 by %c64_i32_245 dim 1 : vector<4x512xf32>, i32 -> vector<4x512xf32>
    %c4_246 = arith.constant 4 : index
    %c0_247 = arith.constant 0 : index
    %371 = vector.load %arg4[%c4_246, %c0_247] : memref<32x512xf32, #tpu.memory_space<vmem>>, vector<1x512xf32>
    %372 = vector.broadcast %371 : vector<1x512xf32> to vector<4x512xf32>
    %373 = arith.mulf %370, %372 : vector<4x512xf32>
    %374 = arith.addf %368, %373 : vector<4x512xf32>
    %c20_248 = arith.constant 20 : index
    %c0_249 = arith.constant 0 : index
    %375 = vector.load %arg6[%c20_248, %c0_249] : memref<112x512xf32, #tpu.memory_space<vmem>>, vector<4x512xf32>
    %c63_i32_250 = arith.constant 63 : i32
    %376 = tpu.dynamic_rotate %375 by %c63_i32_250 dim 1 : vector<4x512xf32>, i32 -> vector<4x512xf32>
    %c5_251 = arith.constant 5 : index
    %c0_252 = arith.constant 0 : index
    %377 = vector.load %arg4[%c5_251, %c0_252] : memref<32x512xf32, #tpu.memory_space<vmem>>, vector<1x512xf32>
    %378 = vector.broadcast %377 : vector<1x512xf32> to vector<4x512xf32>
    %379 = arith.mulf %376, %378 : vector<4x512xf32>
    %380 = arith.addf %374, %379 : vector<4x512xf32>
    %c24_253 = arith.constant 24 : index
    %c0_254 = arith.constant 0 : index
    %381 = vector.load %arg6[%c24_253, %c0_254] : memref<112x512xf32, #tpu.memory_space<vmem>>, vector<4x512xf32>
    %c57_i32_255 = arith.constant 57 : i32
    %382 = tpu.dynamic_rotate %381 by %c57_i32_255 dim 1 : vector<4x512xf32>, i32 -> vector<4x512xf32>
    %c6_256 = arith.constant 6 : index
    %c0_257 = arith.constant 0 : index
    %383 = vector.load %arg4[%c6_256, %c0_257] : memref<32x512xf32, #tpu.memory_space<vmem>>, vector<1x512xf32>
    %384 = vector.broadcast %383 : vector<1x512xf32> to vector<4x512xf32>
    %385 = arith.mulf %382, %384 : vector<4x512xf32>
    %386 = arith.addf %380, %385 : vector<4x512xf32>
    %c28_258 = arith.constant 28 : index
    %c0_259 = arith.constant 0 : index
    %387 = vector.load %arg6[%c28_258, %c0_259] : memref<112x512xf32, #tpu.memory_space<vmem>>, vector<4x512xf32>
    %c56_i32_260 = arith.constant 56 : i32
    %388 = tpu.dynamic_rotate %387 by %c56_i32_260 dim 1 : vector<4x512xf32>, i32 -> vector<4x512xf32>
    %c7_261 = arith.constant 7 : index
    %c0_262 = arith.constant 0 : index
    %389 = vector.load %arg4[%c7_261, %c0_262] : memref<32x512xf32, #tpu.memory_space<vmem>>, vector<1x512xf32>
    %390 = vector.broadcast %389 : vector<1x512xf32> to vector<4x512xf32>
    %391 = arith.mulf %388, %390 : vector<4x512xf32>
    %392 = arith.addf %386, %391 : vector<4x512xf32>
    %c32_263 = arith.constant 32 : index
    %c0_264 = arith.constant 0 : index
    %393 = vector.load %arg6[%c32_263, %c0_264] : memref<112x512xf32, #tpu.memory_space<vmem>>, vector<4x512xf32>
    %c55_i32_265 = arith.constant 55 : i32
    %394 = tpu.dynamic_rotate %393 by %c55_i32_265 dim 1 : vector<4x512xf32>, i32 -> vector<4x512xf32>
    %c8_266 = arith.constant 8 : index
    %c0_267 = arith.constant 0 : index
    %395 = vector.load %arg4[%c8_266, %c0_267] : memref<32x512xf32, #tpu.memory_space<vmem>>, vector<1x512xf32>
    %396 = vector.broadcast %395 : vector<1x512xf32> to vector<4x512xf32>
    %397 = arith.mulf %394, %396 : vector<4x512xf32>
    %398 = arith.addf %392, %397 : vector<4x512xf32>
    %c36_268 = arith.constant 36 : index
    %c0_269 = arith.constant 0 : index
    %399 = vector.load %arg6[%c36_268, %c0_269] : memref<112x512xf32, #tpu.memory_space<vmem>>, vector<4x512xf32>
    %c9_i32_270 = arith.constant 9 : i32
    %400 = tpu.dynamic_rotate %399 by %c9_i32_270 dim 1 : vector<4x512xf32>, i32 -> vector<4x512xf32>
    %c9_271 = arith.constant 9 : index
    %c0_272 = arith.constant 0 : index
    %401 = vector.load %arg4[%c9_271, %c0_272] : memref<32x512xf32, #tpu.memory_space<vmem>>, vector<1x512xf32>
    %402 = vector.broadcast %401 : vector<1x512xf32> to vector<4x512xf32>
    %403 = arith.mulf %400, %402 : vector<4x512xf32>
    %404 = arith.addf %398, %403 : vector<4x512xf32>
    %c40_273 = arith.constant 40 : index
    %c0_274 = arith.constant 0 : index
    %405 = vector.load %arg6[%c40_273, %c0_274] : memref<112x512xf32, #tpu.memory_space<vmem>>, vector<4x512xf32>
    %c8_i32_275 = arith.constant 8 : i32
    %406 = tpu.dynamic_rotate %405 by %c8_i32_275 dim 1 : vector<4x512xf32>, i32 -> vector<4x512xf32>
    %c10_276 = arith.constant 10 : index
    %c0_277 = arith.constant 0 : index
    %407 = vector.load %arg4[%c10_276, %c0_277] : memref<32x512xf32, #tpu.memory_space<vmem>>, vector<1x512xf32>
    %408 = vector.broadcast %407 : vector<1x512xf32> to vector<4x512xf32>
    %409 = arith.mulf %406, %408 : vector<4x512xf32>
    %410 = arith.addf %404, %409 : vector<4x512xf32>
    %c44_278 = arith.constant 44 : index
    %c0_279 = arith.constant 0 : index
    %411 = vector.load %arg6[%c44_278, %c0_279] : memref<112x512xf32, #tpu.memory_space<vmem>>, vector<4x512xf32>
    %c7_i32_280 = arith.constant 7 : i32
    %412 = tpu.dynamic_rotate %411 by %c7_i32_280 dim 1 : vector<4x512xf32>, i32 -> vector<4x512xf32>
    %c11_281 = arith.constant 11 : index
    %c0_282 = arith.constant 0 : index
    %413 = vector.load %arg4[%c11_281, %c0_282] : memref<32x512xf32, #tpu.memory_space<vmem>>, vector<1x512xf32>
    %414 = vector.broadcast %413 : vector<1x512xf32> to vector<4x512xf32>
    %415 = arith.mulf %412, %414 : vector<4x512xf32>
    %416 = arith.addf %410, %415 : vector<4x512xf32>
    %c48_283 = arith.constant 48 : index
    %c0_284 = arith.constant 0 : index
    %417 = vector.load %arg6[%c48_283, %c0_284] : memref<112x512xf32, #tpu.memory_space<vmem>>, vector<4x512xf32>
    %c1_i32_285 = arith.constant 1 : i32
    %418 = tpu.dynamic_rotate %417 by %c1_i32_285 dim 1 : vector<4x512xf32>, i32 -> vector<4x512xf32>
    %c12_286 = arith.constant 12 : index
    %c0_287 = arith.constant 0 : index
    %419 = vector.load %arg4[%c12_286, %c0_287] : memref<32x512xf32, #tpu.memory_space<vmem>>, vector<1x512xf32>
    %420 = vector.broadcast %419 : vector<1x512xf32> to vector<4x512xf32>
    %421 = arith.mulf %418, %420 : vector<4x512xf32>
    %422 = arith.addf %416, %421 : vector<4x512xf32>
    %c52_288 = arith.constant 52 : index
    %c0_289 = arith.constant 0 : index
    %423 = vector.load %arg6[%c52_288, %c0_289] : memref<112x512xf32, #tpu.memory_space<vmem>>, vector<4x512xf32>
    %424 = arith.addf %422, %423 : vector<4x512xf32>
    %c56_290 = arith.constant 56 : index
    %c0_291 = arith.constant 0 : index
    %425 = vector.load %arg6[%c56_290, %c0_291] : memref<112x512xf32, #tpu.memory_space<vmem>>, vector<4x512xf32>
    %c511_i32_292 = arith.constant 511 : i32
    %426 = tpu.dynamic_rotate %425 by %c511_i32_292 dim 1 : vector<4x512xf32>, i32 -> vector<4x512xf32>
    %c14_293 = arith.constant 14 : index
    %c0_294 = arith.constant 0 : index
    %427 = vector.load %arg4[%c14_293, %c0_294] : memref<32x512xf32, #tpu.memory_space<vmem>>, vector<1x512xf32>
    %428 = vector.broadcast %427 : vector<1x512xf32> to vector<4x512xf32>
    %429 = arith.mulf %426, %428 : vector<4x512xf32>
    %430 = arith.addf %424, %429 : vector<4x512xf32>
    %c60_295 = arith.constant 60 : index
    %c0_296 = arith.constant 0 : index
    %431 = vector.load %arg6[%c60_295, %c0_296] : memref<112x512xf32, #tpu.memory_space<vmem>>, vector<4x512xf32>
    %c505_i32_297 = arith.constant 505 : i32
    %432 = tpu.dynamic_rotate %431 by %c505_i32_297 dim 1 : vector<4x512xf32>, i32 -> vector<4x512xf32>
    %c15_298 = arith.constant 15 : index
    %c0_299 = arith.constant 0 : index
    %433 = vector.load %arg4[%c15_298, %c0_299] : memref<32x512xf32, #tpu.memory_space<vmem>>, vector<1x512xf32>
    %434 = vector.broadcast %433 : vector<1x512xf32> to vector<4x512xf32>
    %435 = arith.mulf %432, %434 : vector<4x512xf32>
    %436 = arith.addf %430, %435 : vector<4x512xf32>
    %c64_300 = arith.constant 64 : index
    %c0_301 = arith.constant 0 : index
    %437 = vector.load %arg6[%c64_300, %c0_301] : memref<112x512xf32, #tpu.memory_space<vmem>>, vector<4x512xf32>
    %c504_i32_302 = arith.constant 504 : i32
    %438 = tpu.dynamic_rotate %437 by %c504_i32_302 dim 1 : vector<4x512xf32>, i32 -> vector<4x512xf32>
    %c16_303 = arith.constant 16 : index
    %c0_304 = arith.constant 0 : index
    %439 = vector.load %arg4[%c16_303, %c0_304] : memref<32x512xf32, #tpu.memory_space<vmem>>, vector<1x512xf32>
    %440 = vector.broadcast %439 : vector<1x512xf32> to vector<4x512xf32>
    %441 = arith.mulf %438, %440 : vector<4x512xf32>
    %442 = arith.addf %436, %441 : vector<4x512xf32>
    %c68_305 = arith.constant 68 : index
    %c0_306 = arith.constant 0 : index
    %443 = vector.load %arg6[%c68_305, %c0_306] : memref<112x512xf32, #tpu.memory_space<vmem>>, vector<4x512xf32>
    %c503_i32_307 = arith.constant 503 : i32
    %444 = tpu.dynamic_rotate %443 by %c503_i32_307 dim 1 : vector<4x512xf32>, i32 -> vector<4x512xf32>
    %c17_308 = arith.constant 17 : index
    %c0_309 = arith.constant 0 : index
    %445 = vector.load %arg4[%c17_308, %c0_309] : memref<32x512xf32, #tpu.memory_space<vmem>>, vector<1x512xf32>
    %446 = vector.broadcast %445 : vector<1x512xf32> to vector<4x512xf32>
    %447 = arith.mulf %444, %446 : vector<4x512xf32>
    %448 = arith.addf %442, %447 : vector<4x512xf32>
    %c72_310 = arith.constant 72 : index
    %c0_311 = arith.constant 0 : index
    %449 = vector.load %arg6[%c72_310, %c0_311] : memref<112x512xf32, #tpu.memory_space<vmem>>, vector<4x512xf32>
    %c457_i32_312 = arith.constant 457 : i32
    %450 = tpu.dynamic_rotate %449 by %c457_i32_312 dim 1 : vector<4x512xf32>, i32 -> vector<4x512xf32>
    %c18_313 = arith.constant 18 : index
    %c0_314 = arith.constant 0 : index
    %451 = vector.load %arg4[%c18_313, %c0_314] : memref<32x512xf32, #tpu.memory_space<vmem>>, vector<1x512xf32>
    %452 = vector.broadcast %451 : vector<1x512xf32> to vector<4x512xf32>
    %453 = arith.mulf %450, %452 : vector<4x512xf32>
    %454 = arith.addf %448, %453 : vector<4x512xf32>
    %c76_315 = arith.constant 76 : index
    %c0_316 = arith.constant 0 : index
    %455 = vector.load %arg6[%c76_315, %c0_316] : memref<112x512xf32, #tpu.memory_space<vmem>>, vector<4x512xf32>
    %c456_i32_317 = arith.constant 456 : i32
    %456 = tpu.dynamic_rotate %455 by %c456_i32_317 dim 1 : vector<4x512xf32>, i32 -> vector<4x512xf32>
    %c19_318 = arith.constant 19 : index
    %c0_319 = arith.constant 0 : index
    %457 = vector.load %arg4[%c19_318, %c0_319] : memref<32x512xf32, #tpu.memory_space<vmem>>, vector<1x512xf32>
    %458 = vector.broadcast %457 : vector<1x512xf32> to vector<4x512xf32>
    %459 = arith.mulf %456, %458 : vector<4x512xf32>
    %460 = arith.addf %454, %459 : vector<4x512xf32>
    %c80_320 = arith.constant 80 : index
    %c0_321 = arith.constant 0 : index
    %461 = vector.load %arg6[%c80_320, %c0_321] : memref<112x512xf32, #tpu.memory_space<vmem>>, vector<4x512xf32>
    %c455_i32_322 = arith.constant 455 : i32
    %462 = tpu.dynamic_rotate %461 by %c455_i32_322 dim 1 : vector<4x512xf32>, i32 -> vector<4x512xf32>
    %c20_323 = arith.constant 20 : index
    %c0_324 = arith.constant 0 : index
    %463 = vector.load %arg4[%c20_323, %c0_324] : memref<32x512xf32, #tpu.memory_space<vmem>>, vector<1x512xf32>
    %464 = vector.broadcast %463 : vector<1x512xf32> to vector<4x512xf32>
    %465 = arith.mulf %462, %464 : vector<4x512xf32>
    %466 = arith.addf %460, %465 : vector<4x512xf32>
    %c84_325 = arith.constant 84 : index
    %c0_326 = arith.constant 0 : index
    %467 = vector.load %arg6[%c84_325, %c0_326] : memref<112x512xf32, #tpu.memory_space<vmem>>, vector<4x512xf32>
    %c449_i32_327 = arith.constant 449 : i32
    %468 = tpu.dynamic_rotate %467 by %c449_i32_327 dim 1 : vector<4x512xf32>, i32 -> vector<4x512xf32>
    %c21_328 = arith.constant 21 : index
    %c0_329 = arith.constant 0 : index
    %469 = vector.load %arg4[%c21_328, %c0_329] : memref<32x512xf32, #tpu.memory_space<vmem>>, vector<1x512xf32>
    %470 = vector.broadcast %469 : vector<1x512xf32> to vector<4x512xf32>
    %471 = arith.mulf %468, %470 : vector<4x512xf32>
    %472 = arith.addf %466, %471 : vector<4x512xf32>
    %c88_330 = arith.constant 88 : index
    %c0_331 = arith.constant 0 : index
    %473 = vector.load %arg6[%c88_330, %c0_331] : memref<112x512xf32, #tpu.memory_space<vmem>>, vector<4x512xf32>
    %c448_i32_332 = arith.constant 448 : i32
    %474 = tpu.dynamic_rotate %473 by %c448_i32_332 dim 1 : vector<4x512xf32>, i32 -> vector<4x512xf32>
    %c22_333 = arith.constant 22 : index
    %c0_334 = arith.constant 0 : index
    %475 = vector.load %arg4[%c22_333, %c0_334] : memref<32x512xf32, #tpu.memory_space<vmem>>, vector<1x512xf32>
    %476 = vector.broadcast %475 : vector<1x512xf32> to vector<4x512xf32>
    %477 = arith.mulf %474, %476 : vector<4x512xf32>
    %478 = arith.addf %472, %477 : vector<4x512xf32>
    %c92_335 = arith.constant 92 : index
    %c0_336 = arith.constant 0 : index
    %479 = vector.load %arg6[%c92_335, %c0_336] : memref<112x512xf32, #tpu.memory_space<vmem>>, vector<4x512xf32>
    %c447_i32_337 = arith.constant 447 : i32
    %480 = tpu.dynamic_rotate %479 by %c447_i32_337 dim 1 : vector<4x512xf32>, i32 -> vector<4x512xf32>
    %c23_338 = arith.constant 23 : index
    %c0_339 = arith.constant 0 : index
    %481 = vector.load %arg4[%c23_338, %c0_339] : memref<32x512xf32, #tpu.memory_space<vmem>>, vector<1x512xf32>
    %482 = vector.broadcast %481 : vector<1x512xf32> to vector<4x512xf32>
    %483 = arith.mulf %480, %482 : vector<4x512xf32>
    %484 = arith.addf %478, %483 : vector<4x512xf32>
    %c96_340 = arith.constant 96 : index
    %c0_341 = arith.constant 0 : index
    %485 = vector.load %arg6[%c96_340, %c0_341] : memref<112x512xf32, #tpu.memory_space<vmem>>, vector<4x512xf32>
    %c441_i32_342 = arith.constant 441 : i32
    %486 = tpu.dynamic_rotate %485 by %c441_i32_342 dim 1 : vector<4x512xf32>, i32 -> vector<4x512xf32>
    %c24_343 = arith.constant 24 : index
    %c0_344 = arith.constant 0 : index
    %487 = vector.load %arg4[%c24_343, %c0_344] : memref<32x512xf32, #tpu.memory_space<vmem>>, vector<1x512xf32>
    %488 = vector.broadcast %487 : vector<1x512xf32> to vector<4x512xf32>
    %489 = arith.mulf %486, %488 : vector<4x512xf32>
    %490 = arith.addf %484, %489 : vector<4x512xf32>
    %c100_345 = arith.constant 100 : index
    %c0_346 = arith.constant 0 : index
    %491 = vector.load %arg6[%c100_345, %c0_346] : memref<112x512xf32, #tpu.memory_space<vmem>>, vector<4x512xf32>
    %c440_i32_347 = arith.constant 440 : i32
    %492 = tpu.dynamic_rotate %491 by %c440_i32_347 dim 1 : vector<4x512xf32>, i32 -> vector<4x512xf32>
    %c25_348 = arith.constant 25 : index
    %c0_349 = arith.constant 0 : index
    %493 = vector.load %arg4[%c25_348, %c0_349] : memref<32x512xf32, #tpu.memory_space<vmem>>, vector<1x512xf32>
    %494 = vector.broadcast %493 : vector<1x512xf32> to vector<4x512xf32>
    %495 = arith.mulf %492, %494 : vector<4x512xf32>
    %496 = arith.addf %490, %495 : vector<4x512xf32>
    %c104_350 = arith.constant 104 : index
    %c0_351 = arith.constant 0 : index
    %497 = vector.load %arg6[%c104_350, %c0_351] : memref<112x512xf32, #tpu.memory_space<vmem>>, vector<4x512xf32>
    %c439_i32_352 = arith.constant 439 : i32
    %498 = tpu.dynamic_rotate %497 by %c439_i32_352 dim 1 : vector<4x512xf32>, i32 -> vector<4x512xf32>
    %c26_353 = arith.constant 26 : index
    %c0_354 = arith.constant 0 : index
    %499 = vector.load %arg4[%c26_353, %c0_354] : memref<32x512xf32, #tpu.memory_space<vmem>>, vector<1x512xf32>
    %500 = vector.broadcast %499 : vector<1x512xf32> to vector<4x512xf32>
    %501 = arith.mulf %498, %500 : vector<4x512xf32>
    %502 = arith.addf %496, %501 : vector<4x512xf32>
    %c2_355 = arith.constant 2 : index
    %c0_356 = arith.constant 0 : index
    %c0_357 = arith.constant 0 : index
    %503 = vector.load %arg3[%c2_355, %c0_356, %c0_357] : memref<4x4x1xf32, #tpu.memory_space<vmem>>, vector<1x4x1xf32>
    %504 = vector.shape_cast %503 : vector<1x4x1xf32> to vector<4x1xf32>
    %505 = vector.broadcast %504 : vector<4x1xf32> to vector<4x512xf32>
    %506 = arith.addf %502, %505 : vector<4x512xf32>
    %cst_358 = arith.constant 0.000000e+00 : f32
    %507 = vector.broadcast %cst_358 : f32 to vector<4x512xf32>
    %508 = arith.maximumf %506, %507 : vector<4x512xf32>
    %c3_359 = arith.constant 3 : index
    %c0_360 = arith.constant 0 : index
    %c0_361 = arith.constant 0 : index
    %509 = vector.load %arg2[%c3_359, %c0_360, %c0_361] : memref<4x112x4xf32, #tpu.memory_space<vmem>>, vector<1x112x4xf32>
    %510 = vector.shape_cast %509 : vector<1x112x4xf32> to vector<112x4xf32>
    %cst_362 = arith.constant dense<0.000000e+00> : vector<112x512xf32>
    %511 = tpu.matmul %510, %508, %cst_362 {dimension_numbers = #tpu.dot_dimension_numbers<[1], [0], [0], [1], [0, 0, 1, 1], [], []>} : vector<112x4xf32>, vector<4x512xf32>, vector<112x512xf32> -> vector<112x512xf32>
    %c0_363 = arith.constant 0 : index
    %c0_364 = arith.constant 0 : index
    %512 = vector.load %arg6[%c0_363, %c0_364] : memref<112x512xf32, #tpu.memory_space<vmem>>, vector<112x512xf32>
    tpu.vector_store %arg6[%c0_363, %c0_364], %511 {strides = array<i32>} : memref<112x512xf32, #tpu.memory_space<vmem>>, vector<112x512xf32>,
    %cst_365 = arith.constant 0.000000e+00 : f32
    %513 = vector.broadcast %cst_365 : f32 to vector<4x512xf32>
    %c0_366 = arith.constant 0 : index
    %c0_367 = arith.constant 0 : index
    %514 = vector.load %arg6[%c0_366, %c0_367] : memref<112x512xf32, #tpu.memory_space<vmem>>, vector<4x512xf32>
    %c73_i32_368 = arith.constant 73 : i32
    %515 = tpu.dynamic_rotate %514 by %c73_i32_368 dim 1 : vector<4x512xf32>, i32 -> vector<4x512xf32>
    %c0_369 = arith.constant 0 : index
    %c0_370 = arith.constant 0 : index
    %516 = vector.load %arg4[%c0_369, %c0_370] : memref<32x512xf32, #tpu.memory_space<vmem>>, vector<1x512xf32>
    %517 = vector.broadcast %516 : vector<1x512xf32> to vector<4x512xf32>
    %518 = arith.mulf %515, %517 : vector<4x512xf32>
    %519 = arith.addf %513, %518 : vector<4x512xf32>
    %c4_371 = arith.constant 4 : index
    %c0_372 = arith.constant 0 : index
    %520 = vector.load %arg6[%c4_371, %c0_372] : memref<112x512xf32, #tpu.memory_space<vmem>>, vector<4x512xf32>
    %c72_i32_373 = arith.constant 72 : i32
    %521 = tpu.dynamic_rotate %520 by %c72_i32_373 dim 1 : vector<4x512xf32>, i32 -> vector<4x512xf32>
    %c1_374 = arith.constant 1 : index
    %c0_375 = arith.constant 0 : index
    %522 = vector.load %arg4[%c1_374, %c0_375] : memref<32x512xf32, #tpu.memory_space<vmem>>, vector<1x512xf32>
    %523 = vector.broadcast %522 : vector<1x512xf32> to vector<4x512xf32>
    %524 = arith.mulf %521, %523 : vector<4x512xf32>
    %525 = arith.addf %519, %524 : vector<4x512xf32>
    %c8_376 = arith.constant 8 : index
    %c0_377 = arith.constant 0 : index
    %526 = vector.load %arg6[%c8_376, %c0_377] : memref<112x512xf32, #tpu.memory_space<vmem>>, vector<4x512xf32>
    %c71_i32_378 = arith.constant 71 : i32
    %527 = tpu.dynamic_rotate %526 by %c71_i32_378 dim 1 : vector<4x512xf32>, i32 -> vector<4x512xf32>
    %c2_379 = arith.constant 2 : index
    %c0_380 = arith.constant 0 : index
    %528 = vector.load %arg4[%c2_379, %c0_380] : memref<32x512xf32, #tpu.memory_space<vmem>>, vector<1x512xf32>
    %529 = vector.broadcast %528 : vector<1x512xf32> to vector<4x512xf32>
    %530 = arith.mulf %527, %529 : vector<4x512xf32>
    %531 = arith.addf %525, %530 : vector<4x512xf32>
    %c12_381 = arith.constant 12 : index
    %c0_382 = arith.constant 0 : index
    %532 = vector.load %arg6[%c12_381, %c0_382] : memref<112x512xf32, #tpu.memory_space<vmem>>, vector<4x512xf32>
    %c65_i32_383 = arith.constant 65 : i32
    %533 = tpu.dynamic_rotate %532 by %c65_i32_383 dim 1 : vector<4x512xf32>, i32 -> vector<4x512xf32>
    %c3_384 = arith.constant 3 : index
    %c0_385 = arith.constant 0 : index
    %534 = vector.load %arg4[%c3_384, %c0_385] : memref<32x512xf32, #tpu.memory_space<vmem>>, vector<1x512xf32>
    %535 = vector.broadcast %534 : vector<1x512xf32> to vector<4x512xf32>
    %536 = arith.mulf %533, %535 : vector<4x512xf32>
    %537 = arith.addf %531, %536 : vector<4x512xf32>
    %c16_386 = arith.constant 16 : index
    %c0_387 = arith.constant 0 : index
    %538 = vector.load %arg6[%c16_386, %c0_387] : memref<112x512xf32, #tpu.memory_space<vmem>>, vector<4x512xf32>
    %c64_i32_388 = arith.constant 64 : i32
    %539 = tpu.dynamic_rotate %538 by %c64_i32_388 dim 1 : vector<4x512xf32>, i32 -> vector<4x512xf32>
    %c4_389 = arith.constant 4 : index
    %c0_390 = arith.constant 0 : index
    %540 = vector.load %arg4[%c4_389, %c0_390] : memref<32x512xf32, #tpu.memory_space<vmem>>, vector<1x512xf32>
    %541 = vector.broadcast %540 : vector<1x512xf32> to vector<4x512xf32>
    %542 = arith.mulf %539, %541 : vector<4x512xf32>
    %543 = arith.addf %537, %542 : vector<4x512xf32>
    %c20_391 = arith.constant 20 : index
    %c0_392 = arith.constant 0 : index
    %544 = vector.load %arg6[%c20_391, %c0_392] : memref<112x512xf32, #tpu.memory_space<vmem>>, vector<4x512xf32>
    %c63_i32_393 = arith.constant 63 : i32
    %545 = tpu.dynamic_rotate %544 by %c63_i32_393 dim 1 : vector<4x512xf32>, i32 -> vector<4x512xf32>
    %c5_394 = arith.constant 5 : index
    %c0_395 = arith.constant 0 : index
    %546 = vector.load %arg4[%c5_394, %c0_395] : memref<32x512xf32, #tpu.memory_space<vmem>>, vector<1x512xf32>
    %547 = vector.broadcast %546 : vector<1x512xf32> to vector<4x512xf32>
    %548 = arith.mulf %545, %547 : vector<4x512xf32>
    %549 = arith.addf %543, %548 : vector<4x512xf32>
    %c24_396 = arith.constant 24 : index
    %c0_397 = arith.constant 0 : index
    %550 = vector.load %arg6[%c24_396, %c0_397] : memref<112x512xf32, #tpu.memory_space<vmem>>, vector<4x512xf32>
    %c57_i32_398 = arith.constant 57 : i32
    %551 = tpu.dynamic_rotate %550 by %c57_i32_398 dim 1 : vector<4x512xf32>, i32 -> vector<4x512xf32>
    %c6_399 = arith.constant 6 : index
    %c0_400 = arith.constant 0 : index
    %552 = vector.load %arg4[%c6_399, %c0_400] : memref<32x512xf32, #tpu.memory_space<vmem>>, vector<1x512xf32>
    %553 = vector.broadcast %552 : vector<1x512xf32> to vector<4x512xf32>
    %554 = arith.mulf %551, %553 : vector<4x512xf32>
    %555 = arith.addf %549, %554 : vector<4x512xf32>
    %c28_401 = arith.constant 28 : index
    %c0_402 = arith.constant 0 : index
    %556 = vector.load %arg6[%c28_401, %c0_402] : memref<112x512xf32, #tpu.memory_space<vmem>>, vector<4x512xf32>
    %c56_i32_403 = arith.constant 56 : i32
    %557 = tpu.dynamic_rotate %556 by %c56_i32_403 dim 1 : vector<4x512xf32>, i32 -> vector<4x512xf32>
    %c7_404 = arith.constant 7 : index
    %c0_405 = arith.constant 0 : index
    %558 = vector.load %arg4[%c7_404, %c0_405] : memref<32x512xf32, #tpu.memory_space<vmem>>, vector<1x512xf32>
    %559 = vector.broadcast %558 : vector<1x512xf32> to vector<4x512xf32>
    %560 = arith.mulf %557, %559 : vector<4x512xf32>
    %561 = arith.addf %555, %560 : vector<4x512xf32>
    %c32_406 = arith.constant 32 : index
    %c0_407 = arith.constant 0 : index
    %562 = vector.load %arg6[%c32_406, %c0_407] : memref<112x512xf32, #tpu.memory_space<vmem>>, vector<4x512xf32>
    %c55_i32_408 = arith.constant 55 : i32
    %563 = tpu.dynamic_rotate %562 by %c55_i32_408 dim 1 : vector<4x512xf32>, i32 -> vector<4x512xf32>
    %c8_409 = arith.constant 8 : index
    %c0_410 = arith.constant 0 : index
    %564 = vector.load %arg4[%c8_409, %c0_410] : memref<32x512xf32, #tpu.memory_space<vmem>>, vector<1x512xf32>
    %565 = vector.broadcast %564 : vector<1x512xf32> to vector<4x512xf32>
    %566 = arith.mulf %563, %565 : vector<4x512xf32>
    %567 = arith.addf %561, %566 : vector<4x512xf32>
    %c36_411 = arith.constant 36 : index
    %c0_412 = arith.constant 0 : index
    %568 = vector.load %arg6[%c36_411, %c0_412] : memref<112x512xf32, #tpu.memory_space<vmem>>, vector<4x512xf32>
    %c9_i32_413 = arith.constant 9 : i32
    %569 = tpu.dynamic_rotate %568 by %c9_i32_413 dim 1 : vector<4x512xf32>, i32 -> vector<4x512xf32>
    %c9_414 = arith.constant 9 : index
    %c0_415 = arith.constant 0 : index
    %570 = vector.load %arg4[%c9_414, %c0_415] : memref<32x512xf32, #tpu.memory_space<vmem>>, vector<1x512xf32>
    %571 = vector.broadcast %570 : vector<1x512xf32> to vector<4x512xf32>
    %572 = arith.mulf %569, %571 : vector<4x512xf32>
    %573 = arith.addf %567, %572 : vector<4x512xf32>
    %c40_416 = arith.constant 40 : index
    %c0_417 = arith.constant 0 : index
    %574 = vector.load %arg6[%c40_416, %c0_417] : memref<112x512xf32, #tpu.memory_space<vmem>>, vector<4x512xf32>
    %c8_i32_418 = arith.constant 8 : i32
    %575 = tpu.dynamic_rotate %574 by %c8_i32_418 dim 1 : vector<4x512xf32>, i32 -> vector<4x512xf32>
    %c10_419 = arith.constant 10 : index
    %c0_420 = arith.constant 0 : index
    %576 = vector.load %arg4[%c10_419, %c0_420] : memref<32x512xf32, #tpu.memory_space<vmem>>, vector<1x512xf32>
    %577 = vector.broadcast %576 : vector<1x512xf32> to vector<4x512xf32>
    %578 = arith.mulf %575, %577 : vector<4x512xf32>
    %579 = arith.addf %573, %578 : vector<4x512xf32>
    %c44_421 = arith.constant 44 : index
    %c0_422 = arith.constant 0 : index
    %580 = vector.load %arg6[%c44_421, %c0_422] : memref<112x512xf32, #tpu.memory_space<vmem>>, vector<4x512xf32>
    %c7_i32_423 = arith.constant 7 : i32
    %581 = tpu.dynamic_rotate %580 by %c7_i32_423 dim 1 : vector<4x512xf32>, i32 -> vector<4x512xf32>
    %c11_424 = arith.constant 11 : index
    %c0_425 = arith.constant 0 : index
    %582 = vector.load %arg4[%c11_424, %c0_425] : memref<32x512xf32, #tpu.memory_space<vmem>>, vector<1x512xf32>
    %583 = vector.broadcast %582 : vector<1x512xf32> to vector<4x512xf32>
    %584 = arith.mulf %581, %583 : vector<4x512xf32>
    %585 = arith.addf %579, %584 : vector<4x512xf32>
    %c48_426 = arith.constant 48 : index
    %c0_427 = arith.constant 0 : index
    %586 = vector.load %arg6[%c48_426, %c0_427] : memref<112x512xf32, #tpu.memory_space<vmem>>, vector<4x512xf32>
    %c1_i32_428 = arith.constant 1 : i32
    %587 = tpu.dynamic_rotate %586 by %c1_i32_428 dim 1 : vector<4x512xf32>, i32 -> vector<4x512xf32>
    %c12_429 = arith.constant 12 : index
    %c0_430 = arith.constant 0 : index
    %588 = vector.load %arg4[%c12_429, %c0_430] : memref<32x512xf32, #tpu.memory_space<vmem>>, vector<1x512xf32>
    %589 = vector.broadcast %588 : vector<1x512xf32> to vector<4x512xf32>
    %590 = arith.mulf %587, %589 : vector<4x512xf32>
    %591 = arith.addf %585, %590 : vector<4x512xf32>
    %c52_431 = arith.constant 52 : index
    %c0_432 = arith.constant 0 : index
    %592 = vector.load %arg6[%c52_431, %c0_432] : memref<112x512xf32, #tpu.memory_space<vmem>>, vector<4x512xf32>
    %593 = arith.addf %591, %592 : vector<4x512xf32>
    %c56_433 = arith.constant 56 : index
    %c0_434 = arith.constant 0 : index
    %594 = vector.load %arg6[%c56_433, %c0_434] : memref<112x512xf32, #tpu.memory_space<vmem>>, vector<4x512xf32>
    %c511_i32_435 = arith.constant 511 : i32
    %595 = tpu.dynamic_rotate %594 by %c511_i32_435 dim 1 : vector<4x512xf32>, i32 -> vector<4x512xf32>
    %c14_436 = arith.constant 14 : index
    %c0_437 = arith.constant 0 : index
    %596 = vector.load %arg4[%c14_436, %c0_437] : memref<32x512xf32, #tpu.memory_space<vmem>>, vector<1x512xf32>
    %597 = vector.broadcast %596 : vector<1x512xf32> to vector<4x512xf32>
    %598 = arith.mulf %595, %597 : vector<4x512xf32>
    %599 = arith.addf %593, %598 : vector<4x512xf32>
    %c60_438 = arith.constant 60 : index
    %c0_439 = arith.constant 0 : index
    %600 = vector.load %arg6[%c60_438, %c0_439] : memref<112x512xf32, #tpu.memory_space<vmem>>, vector<4x512xf32>
    %c505_i32_440 = arith.constant 505 : i32
    %601 = tpu.dynamic_rotate %600 by %c505_i32_440 dim 1 : vector<4x512xf32>, i32 -> vector<4x512xf32>
    %c15_441 = arith.constant 15 : index
    %c0_442 = arith.constant 0 : index
    %602 = vector.load %arg4[%c15_441, %c0_442] : memref<32x512xf32, #tpu.memory_space<vmem>>, vector<1x512xf32>
    %603 = vector.broadcast %602 : vector<1x512xf32> to vector<4x512xf32>
    %604 = arith.mulf %601, %603 : vector<4x512xf32>
    %605 = arith.addf %599, %604 : vector<4x512xf32>
    %c64_443 = arith.constant 64 : index
    %c0_444 = arith.constant 0 : index
    %606 = vector.load %arg6[%c64_443, %c0_444] : memref<112x512xf32, #tpu.memory_space<vmem>>, vector<4x512xf32>
    %c504_i32_445 = arith.constant 504 : i32
    %607 = tpu.dynamic_rotate %606 by %c504_i32_445 dim 1 : vector<4x512xf32>, i32 -> vector<4x512xf32>
    %c16_446 = arith.constant 16 : index
    %c0_447 = arith.constant 0 : index
    %608 = vector.load %arg4[%c16_446, %c0_447] : memref<32x512xf32, #tpu.memory_space<vmem>>, vector<1x512xf32>
    %609 = vector.broadcast %608 : vector<1x512xf32> to vector<4x512xf32>
    %610 = arith.mulf %607, %609 : vector<4x512xf32>
    %611 = arith.addf %605, %610 : vector<4x512xf32>
    %c68_448 = arith.constant 68 : index
    %c0_449 = arith.constant 0 : index
    %612 = vector.load %arg6[%c68_448, %c0_449] : memref<112x512xf32, #tpu.memory_space<vmem>>, vector<4x512xf32>
    %c503_i32_450 = arith.constant 503 : i32
    %613 = tpu.dynamic_rotate %612 by %c503_i32_450 dim 1 : vector<4x512xf32>, i32 -> vector<4x512xf32>
    %c17_451 = arith.constant 17 : index
    %c0_452 = arith.constant 0 : index
    %614 = vector.load %arg4[%c17_451, %c0_452] : memref<32x512xf32, #tpu.memory_space<vmem>>, vector<1x512xf32>
    %615 = vector.broadcast %614 : vector<1x512xf32> to vector<4x512xf32>
    %616 = arith.mulf %613, %615 : vector<4x512xf32>
    %617 = arith.addf %611, %616 : vector<4x512xf32>
    %c72_453 = arith.constant 72 : index
    %c0_454 = arith.constant 0 : index
    %618 = vector.load %arg6[%c72_453, %c0_454] : memref<112x512xf32, #tpu.memory_space<vmem>>, vector<4x512xf32>
    %c457_i32_455 = arith.constant 457 : i32
    %619 = tpu.dynamic_rotate %618 by %c457_i32_455 dim 1 : vector<4x512xf32>, i32 -> vector<4x512xf32>
    %c18_456 = arith.constant 18 : index
    %c0_457 = arith.constant 0 : index
    %620 = vector.load %arg4[%c18_456, %c0_457] : memref<32x512xf32, #tpu.memory_space<vmem>>, vector<1x512xf32>
    %621 = vector.broadcast %620 : vector<1x512xf32> to vector<4x512xf32>
    %622 = arith.mulf %619, %621 : vector<4x512xf32>
    %623 = arith.addf %617, %622 : vector<4x512xf32>
    %c76_458 = arith.constant 76 : index
    %c0_459 = arith.constant 0 : index
    %624 = vector.load %arg6[%c76_458, %c0_459] : memref<112x512xf32, #tpu.memory_space<vmem>>, vector<4x512xf32>
    %c456_i32_460 = arith.constant 456 : i32
    %625 = tpu.dynamic_rotate %624 by %c456_i32_460 dim 1 : vector<4x512xf32>, i32 -> vector<4x512xf32>
    %c19_461 = arith.constant 19 : index
    %c0_462 = arith.constant 0 : index
    %626 = vector.load %arg4[%c19_461, %c0_462] : memref<32x512xf32, #tpu.memory_space<vmem>>, vector<1x512xf32>
    %627 = vector.broadcast %626 : vector<1x512xf32> to vector<4x512xf32>
    %628 = arith.mulf %625, %627 : vector<4x512xf32>
    %629 = arith.addf %623, %628 : vector<4x512xf32>
    %c80_463 = arith.constant 80 : index
    %c0_464 = arith.constant 0 : index
    %630 = vector.load %arg6[%c80_463, %c0_464] : memref<112x512xf32, #tpu.memory_space<vmem>>, vector<4x512xf32>
    %c455_i32_465 = arith.constant 455 : i32
    %631 = tpu.dynamic_rotate %630 by %c455_i32_465 dim 1 : vector<4x512xf32>, i32 -> vector<4x512xf32>
    %c20_466 = arith.constant 20 : index
    %c0_467 = arith.constant 0 : index
    %632 = vector.load %arg4[%c20_466, %c0_467] : memref<32x512xf32, #tpu.memory_space<vmem>>, vector<1x512xf32>
    %633 = vector.broadcast %632 : vector<1x512xf32> to vector<4x512xf32>
    %634 = arith.mulf %631, %633 : vector<4x512xf32>
    %635 = arith.addf %629, %634 : vector<4x512xf32>
    %c84_468 = arith.constant 84 : index
    %c0_469 = arith.constant 0 : index
    %636 = vector.load %arg6[%c84_468, %c0_469] : memref<112x512xf32, #tpu.memory_space<vmem>>, vector<4x512xf32>
    %c449_i32_470 = arith.constant 449 : i32
    %637 = tpu.dynamic_rotate %636 by %c449_i32_470 dim 1 : vector<4x512xf32>, i32 -> vector<4x512xf32>
    %c21_471 = arith.constant 21 : index
    %c0_472 = arith.constant 0 : index
    %638 = vector.load %arg4[%c21_471, %c0_472] : memref<32x512xf32, #tpu.memory_space<vmem>>, vector<1x512xf32>
    %639 = vector.broadcast %638 : vector<1x512xf32> to vector<4x512xf32>
    %640 = arith.mulf %637, %639 : vector<4x512xf32>
    %641 = arith.addf %635, %640 : vector<4x512xf32>
    %c88_473 = arith.constant 88 : index
    %c0_474 = arith.constant 0 : index
    %642 = vector.load %arg6[%c88_473, %c0_474] : memref<112x512xf32, #tpu.memory_space<vmem>>, vector<4x512xf32>
    %c448_i32_475 = arith.constant 448 : i32
    %643 = tpu.dynamic_rotate %642 by %c448_i32_475 dim 1 : vector<4x512xf32>, i32 -> vector<4x512xf32>
    %c22_476 = arith.constant 22 : index
    %c0_477 = arith.constant 0 : index
    %644 = vector.load %arg4[%c22_476, %c0_477] : memref<32x512xf32, #tpu.memory_space<vmem>>, vector<1x512xf32>
    %645 = vector.broadcast %644 : vector<1x512xf32> to vector<4x512xf32>
    %646 = arith.mulf %643, %645 : vector<4x512xf32>
    %647 = arith.addf %641, %646 : vector<4x512xf32>
    %c92_478 = arith.constant 92 : index
    %c0_479 = arith.constant 0 : index
    %648 = vector.load %arg6[%c92_478, %c0_479] : memref<112x512xf32, #tpu.memory_space<vmem>>, vector<4x512xf32>
    %c447_i32_480 = arith.constant 447 : i32
    %649 = tpu.dynamic_rotate %648 by %c447_i32_480 dim 1 : vector<4x512xf32>, i32 -> vector<4x512xf32>
    %c23_481 = arith.constant 23 : index
    %c0_482 = arith.constant 0 : index
    %650 = vector.load %arg4[%c23_481, %c0_482] : memref<32x512xf32, #tpu.memory_space<vmem>>, vector<1x512xf32>
    %651 = vector.broadcast %650 : vector<1x512xf32> to vector<4x512xf32>
    %652 = arith.mulf %649, %651 : vector<4x512xf32>
    %653 = arith.addf %647, %652 : vector<4x512xf32>
    %c96_483 = arith.constant 96 : index
    %c0_484 = arith.constant 0 : index
    %654 = vector.load %arg6[%c96_483, %c0_484] : memref<112x512xf32, #tpu.memory_space<vmem>>, vector<4x512xf32>
    %c441_i32_485 = arith.constant 441 : i32
    %655 = tpu.dynamic_rotate %654 by %c441_i32_485 dim 1 : vector<4x512xf32>, i32 -> vector<4x512xf32>
    %c24_486 = arith.constant 24 : index
    %c0_487 = arith.constant 0 : index
    %656 = vector.load %arg4[%c24_486, %c0_487] : memref<32x512xf32, #tpu.memory_space<vmem>>, vector<1x512xf32>
    %657 = vector.broadcast %656 : vector<1x512xf32> to vector<4x512xf32>
    %658 = arith.mulf %655, %657 : vector<4x512xf32>
    %659 = arith.addf %653, %658 : vector<4x512xf32>
    %c100_488 = arith.constant 100 : index
    %c0_489 = arith.constant 0 : index
    %660 = vector.load %arg6[%c100_488, %c0_489] : memref<112x512xf32, #tpu.memory_space<vmem>>, vector<4x512xf32>
    %c440_i32_490 = arith.constant 440 : i32
    %661 = tpu.dynamic_rotate %660 by %c440_i32_490 dim 1 : vector<4x512xf32>, i32 -> vector<4x512xf32>
    %c25_491 = arith.constant 25 : index
    %c0_492 = arith.constant 0 : index
    %662 = vector.load %arg4[%c25_491, %c0_492] : memref<32x512xf32, #tpu.memory_space<vmem>>, vector<1x512xf32>
    %663 = vector.broadcast %662 : vector<1x512xf32> to vector<4x512xf32>
    %664 = arith.mulf %661, %663 : vector<4x512xf32>
    %665 = arith.addf %659, %664 : vector<4x512xf32>
    %c104_493 = arith.constant 104 : index
    %c0_494 = arith.constant 0 : index
    %666 = vector.load %arg6[%c104_493, %c0_494] : memref<112x512xf32, #tpu.memory_space<vmem>>, vector<4x512xf32>
    %c439_i32_495 = arith.constant 439 : i32
    %667 = tpu.dynamic_rotate %666 by %c439_i32_495 dim 1 : vector<4x512xf32>, i32 -> vector<4x512xf32>
    %c26_496 = arith.constant 26 : index
    %c0_497 = arith.constant 0 : index
    %668 = vector.load %arg4[%c26_496, %c0_497] : memref<32x512xf32, #tpu.memory_space<vmem>>, vector<1x512xf32>
    %669 = vector.broadcast %668 : vector<1x512xf32> to vector<4x512xf32>
    %670 = arith.mulf %667, %669 : vector<4x512xf32>
    %671 = arith.addf %665, %670 : vector<4x512xf32>
    %c3_498 = arith.constant 3 : index
    %c0_499 = arith.constant 0 : index
    %c0_500 = arith.constant 0 : index
    %672 = vector.load %arg3[%c3_498, %c0_499, %c0_500] : memref<4x4x1xf32, #tpu.memory_space<vmem>>, vector<1x4x1xf32>
    %673 = vector.shape_cast %672 : vector<1x4x1xf32> to vector<4x1xf32>
    %674 = vector.broadcast %673 : vector<4x1xf32> to vector<4x512xf32>
    %675 = arith.addf %671, %674 : vector<4x512xf32>
    %cst_501 = arith.constant 0.000000e+00 : f32
    %676 = vector.broadcast %cst_501 : f32 to vector<4x512xf32>
    %677 = arith.maximumf %675, %676 : vector<4x512xf32>
    %678 = arith.addf %677, %1 : vector<4x512xf32>
    %c0_502 = arith.constant 0 : index
    %c0_503 = arith.constant 0 : index
    %c0_504 = arith.constant 0 : index
    %679 = vector.load %arg5[%c0_502, %c0_503, %c0_504] : memref<1x4x512xf32, #tpu.memory_space<vmem>>, vector<1x4x512xf32>
    %680 = vector.shape_cast %679 : vector<1x4x512xf32> to vector<4x512xf32>
    %681 = vector.shape_cast %678 : vector<4x512xf32> to vector<1x4x512xf32>
    tpu.vector_store %arg5[%c0_502, %c0_503, %c0_504], %681 {strides = array<i32>} : memref<1x4x512xf32, #tpu.memory_space<vmem>>, vector<1x4x512xf32>,
    return
  }
  func.func @transform_0(%arg0: i32) -> (i32, i32, i32) {
    %c0_i32 = arith.constant 0 : i32
    %c0_i32_0 = arith.constant 0 : i32
    %c0_i32_1 = arith.constant 0 : i32
    return %arg0, %c0_i32, %c0_i32_0 : i32, i32, i32
  }
  func.func @transform_1(%arg0: i32) -> (i32, i32, i32) {
    %c0_i32 = arith.constant 0 : i32
    %c0_i32_0 = arith.constant 0 : i32
    %c0_i32_1 = arith.constant 0 : i32
    %c0_i32_2 = arith.constant 0 : i32
    return %c0_i32, %c0_i32_0, %c0_i32_1 : i32, i32, i32
  }
  func.func @transform_2(%arg0: i32) -> (i32, i32, i32) {
    %c0_i32 = arith.constant 0 : i32
    %c0_i32_0 = arith.constant 0 : i32
    %c0_i32_1 = arith.constant 0 : i32
    %c0_i32_2 = arith.constant 0 : i32
    return %c0_i32, %c0_i32_0, %c0_i32_1 : i32, i32, i32
  }
  func.func @transform_3(%arg0: i32) -> (i32, i32) {
    %c0_i32 = arith.constant 0 : i32
    %c0_i32_0 = arith.constant 0 : i32
    %c0_i32_1 = arith.constant 0 : i32
    return %c0_i32, %c0_i32_0 : i32, i32
  }
  func.func @transform_4(%arg0: i32) -> (i32, i32, i32) {
    %c0_i32 = arith.constant 0 : i32
    %c0_i32_0 = arith.constant 0 : i32
    %c0_i32_1 = arith.constant 0 : i32
    return %arg0, %c0_i32, %c0_i32_0 : i32, i32, i32
  }
}

</mosaic_0001>

<bundles_post_ra>
// kernel: basic_block_forward.1
= control target key start
LH: loop header
LB: loop body
LE: loop exit
PB: predicated region body
PF: predicated region fallthrough
CT: control target
= control target key end

     0   :  { %s7878_s15 = smov 0   ;;  %s13227_s0 = inlined_call_operand.vmem [shape: f32[2,4,512], index: 0, kind: input, shape index: {}]   ;;  %s13228_s1 = inlined_call_operand.vmem [shape: f32[4,112,4], index: 1, kind: input, shape index: {}]   ;;  %s13229_s2 = inlined_call_operand.vmem [shape: f32[4,4,1], index: 2, kind: input, shape index: {}]   ;;  %s13230_s3 = inlined_call_operand.vmem [shape: f32[32,512], index: 3, kind: input, shape index: {}]   ;;  %s13231_s4 = inlined_call_operand.vmem [shape: f32[2,4,512], index: 4, kind: output, shape index: {}]  }
   0x1 LB: > { %s7507_s16 = sadd.s32 4294967295, %s7832_s15   ;;  %p7511_p0 = scmp.ge.s32.totalorder %s7832_s15, 1  ;;  %s7832_s15 = sphi %s7878_s15, %s14_s15  }
   0x2   : > { %p162_p1 = scmp.lt.s32.totalorder %s7832_s15, 3 }
   0x4   : > { %p163_p2 = pnand %p7511_p0, %p162_p1 }
   0x6   : > { %166 = sbr.rel (%p163_p2) target bundleno = 2270 (0x8de), region = 36 }
   0xd   : > { %p188_p3 = scmp.lt.s32.totalorder %s7507_s16, 1  ;;  %v13232_v0 = vmov 0.0   ;;  %v7835_v1 = vmov 0   ;;  %v2028_v2 = vld [vmem:[%s13229_s2] sm:$0xf]  ;;  %vm13341_vm0 = vcmask 1043456  }
   0xe   : > { %334 = vmatprep.mubr.f32.mxu0 %v13232_v0  ;;  %483 = vmatprep.mubr.f32.mxu1 %v13232_v0  ;;  %v200_v7 = vld [vmem:[%s13228_s1] sm:$0xff]  ;;  %vm13340_vm1 = vcmask 31744   ;;  %v201_v8 = vld [vmem:[%s13228_s1 + $0x8] sm:$0xff]  ;;  %v202_v9 = vld [vmem:[%s13228_s1 + $0x10] sm:$0xff]  ;;  %s7836_s29 = smov 73   ;;  %s7837_s30 = smov 72  }
   0xf   : > { %s14143_s16 = smov (!%p188_p3, %s7507_s16), 1  ;;  %7820 = vset.pattern.permute.xlu0 %v7835_v1  ;;  %7821 = vset.pattern.permute.xlu1 %v7835_v1  ;;  %v203_v10 = vld [vmem:[%s13228_s1 + $0x18] sm:$0xff]  ;;  %v204_v11 = vld [vmem:[%s13228_s1 + $0x20] sm:$0xff]  ;;  %v205_v12 = vld [vmem:[%s13228_s1 + $0x28] sm:$0xff]  ;;  %s7838_s5 = smov 71  }
  0x10   : > { %s13236_s17 = sshll.u32 %s14143_s16, 4  ;;  %2031 = vperm.xlu0 %7820, %v2028_v2   ;;  %v206_v13 = vld [vmem:[%s13228_s1 + $0x30] sm:$0xff]  ;;  %v207_v14 = vld [vmem:[%s13228_s1 + $0x38] sm:$0xff]  ;;  %v208_v15 = vld [vmem:[%s13228_s1 + $0x40] sm:$0xff]  ;;  %s7839_s6 = smov 65  }
  0x11   : > { %s7896_s20 = scalar_lea.vmem %s13227_s0, %s13236_s17  ;;  %v209_v16 = vld [vmem:[%s13228_s1 + $0x48] sm:$0xff]  ;;  %v210_v17 = vld [vmem:[%s13228_s1 + $0x50] sm:$0xff]  ;;  %v211_v18 = vld [vmem:[%s13228_s1 + $0x58] sm:$0xff]  ;;  %s7840_s7 = smov 64  }
  0x12   : > { %v198_v3 = vld [vmem:[%s7896_s20] sm:$0xff]  ;;  %v199_v4 = vld [vmem:[%s7896_s20 + $0x8] sm:$0xff]  ;;  %s7841_s8 = smov 63   ;;  %s7842_s9 = smov 57  }
  0x13   : > { %v7903_v5 = vcombine.high %v198_v3, %v198_v3  ;;  %v7905_v6 = vcombine.high %v199_v4, %v199_v4  ;;  %v212_v19 = vld [vmem:[%s13228_s1 + $0x60] sm:$0xff]  ;;  %v213_v20 = vld [vmem:[%s13228_s1 + $0x68] sm:$0xff]  ;;  %s7843_s10 = smov 56   ;;  %s7844_s11 = smov 55  }
  0x14   : > { %s7845_s12 = smov 9   ;;  %s7846_s13 = smov 8  }
  0x15   : > { %13405 = vst [vmem:[#allocation3_spill] sm:$0xff] %v7903_v5  ;;  %13406 = vst [vmem:[#allocation4_spill] sm:$0xff] %v7905_v6  ;;  %7516 = vmatprep.subr.msk.mxu0 %vm13341_vm0, %v7903_v5  ;;  %7532 = vmatprep.subr.msk.mxu1 %vm13341_vm0, %v7905_v6  ;;  %s7847_s14 = smov 7   ;;  %s7848_s18 = smov 1  }
  0x16   : > { %7517 = vmatpush1.msk.msra.mxu0 %vm13341_vm0, %v198_v3  ;;  %7533 = vmatpush1.msk.msra.mxu1 %vm13341_vm0, %v199_v4  ;;  %s7849_s19 = smov 127   ;;  %s7850_s21 = smov 121  }
  0x17   : > { %7518 = vmatmul.mubr.msk.f32.vlgmr.msra.gmra.mrb[0].mxu0 %vm13340_vm1, %v200_v7  ;;  %7534 = vmatmul.mubr.msk.f32.vlgmr.msra.gmra.mrb[0].mxu1 %vm13340_vm1, %v200_v7  ;;  %s7851_s22 = smov 120   ;;  %s7852_s23 = smov 119  }
  0x18   : > { %340 = vmatprep.mubr.f32.mxu0 %v13232_v0  ;;  %489 = vmatprep.mubr.f32.mxu1 %v13232_v0 }
  0x1b   : > { %7519 = vmatmul.mubr.msk.f32.gmra.mrb[2].mxu0 %vm13340_vm1, %v201_v8  ;;  %7535 = vmatmul.mubr.msk.f32.gmra.mrb[2].mxu1 %vm13340_vm1, %v201_v8 }
  0x1c   : > { %346 = vmatprep.mubr.f32.mxu0 %v13232_v0  ;;  %495 = vmatprep.mubr.f32.mxu1 %v13232_v0 }
  0x1f   : > { %7520 = vmatmul.mubr.msk.f32.gmra.mrb[4].mxu0 %vm13340_vm1, %v202_v9  ;;  %7536 = vmatmul.mubr.msk.f32.gmra.mrb[4].mxu1 %vm13340_vm1, %v202_v9 }
  0x20   : > { %352 = vmatprep.mubr.f32.mxu0 %v13232_v0  ;;  %501 = vmatprep.mubr.f32.mxu1 %v13232_v0 }
  0x23   : > { %7521 = vmatmul.mubr.msk.f32.gmra.mrb[6].mxu0 %vm13340_vm1, %v203_v10  ;;  %7537 = vmatmul.mubr.msk.f32.gmra.mrb[6].mxu1 %vm13340_vm1, %v203_v10 }
  0x24   : > { %358 = vmatprep.mubr.f32.mxu0 %v13232_v0  ;;  %507 = vmatprep.mubr.f32.mxu1 %v13232_v0 }
  0x27   : > { %7522 = vmatmul.mubr.msk.f32.gmra.mrb[8].mxu0 %vm13340_vm1, %v204_v11  ;;  %7538 = vmatmul.mubr.msk.f32.gmra.mrb[8].mxu1 %vm13340_vm1, %v204_v11 }
  0x28   : > { %364 = vmatprep.mubr.f32.mxu0 %v13232_v0  ;;  %513 = vmatprep.mubr.f32.mxu1 %v13232_v0 }
  0x2b   : > { %7523 = vmatmul.mubr.msk.f32.gmra.mrb[10].mxu0 %vm13340_vm1, %v205_v12  ;;  %7539 = vmatmul.mubr.msk.f32.gmra.mrb[10].mxu1 %vm13340_vm1, %v205_v12 }
  0x2c   : > { %370 = vmatprep.mubr.f32.mxu0 %v13232_v0  ;;  %519 = vmatprep.mubr.f32.mxu1 %v13232_v0 }
  0x2f   : > { %7524 = vmatmul.mubr.msk.f32.gmra.mrb[12].mxu0 %vm13340_vm1, %v206_v13  ;;  %7540 = vmatmul.mubr.msk.f32.gmra.mrb[12].mxu1 %vm13340_vm1, %v206_v13 }
  0x30   : > { %376 = vmatprep.mubr.f32.mxu0 %v13232_v0  ;;  %525 = vmatprep.mubr.f32.mxu1 %v13232_v0 }
  0x33   : > { %7525 = vmatmul.mubr.msk.f32.gmra.mrb[14].mxu0 %vm13340_vm1, %v207_v14  ;;  %7541 = vmatmul.mubr.msk.f32.gmra.mrb[14].mxu1 %vm13340_vm1, %v207_v14 }
  0x34   : > { %382 = vmatprep.mubr.f32.mxu0 %v13232_v0  ;;  %531 = vmatprep.mubr.f32.mxu1 %v13232_v0 }
  0x37   : > { %7526 = vmatmul.mubr.msk.f32.gmra.mrb[16].mxu0 %vm13340_vm1, %v208_v15  ;;  %7542 = vmatmul.mubr.msk.f32.gmra.mrb[16].mxu1 %vm13340_vm1, %v208_v15 }
  0x38   : > { %388 = vmatprep.mubr.f32.mxu0 %v13232_v0  ;;  %537 = vmatprep.mubr.f32.mxu1 %v13232_v0 }
  0x3b   : > { %7527 = vmatmul.mubr.msk.f32.gmra.mrb[18].mxu0 %vm13340_vm1, %v209_v16  ;;  %7543 = vmatmul.mubr.msk.f32.gmra.mrb[18].mxu1 %vm13340_vm1, %v209_v16 }
  0x3c   : > { %394 = vmatprep.mubr.f32.mxu0 %v13232_v0  ;;  %543 = vmatprep.mubr.f32.mxu1 %v13232_v0 }
  0x3f   : > { %7528 = vmatmul.mubr.msk.f32.gmra.mrb[20].mxu0 %vm13340_vm1, %v210_v17  ;;  %7544 = vmatmul.mubr.msk.f32.gmra.mrb[20].mxu1 %vm13340_vm1, %v210_v17 }
  0x40   : > { %400 = vmatprep.mubr.f32.mxu0 %v13232_v0  ;;  %549 = vmatprep.mubr.f32.mxu1 %v13232_v0 }
  0x43   : > { %7529 = vmatmul.mubr.msk.f32.gmra.mrb[22].mxu0 %vm13340_vm1, %v211_v18  ;;  %7545 = vmatmul.mubr.msk.f32.gmra.mrb[22].mxu1 %vm13340_vm1, %v211_v18 }
  0x44   : > { %406 = vmatprep.mubr.f32.mxu0 %v13232_v0  ;;  %555 = vmatprep.mubr.f32.mxu1 %v13232_v0 }
  0x47   : > { %7530 = vmatmul.mubr.msk.f32.gmra.mrb[24].mxu0 %vm13340_vm1, %v212_v19  ;;  %7546 = vmatmul.mubr.msk.f32.gmra.mrb[24].mxu1 %vm13340_vm1, %v212_v19 }
  0x48   : > { %412 = vmatprep.mubr.f32.mxu0 %v13232_v0  ;;  %561 = vmatprep.mubr.f32.mxu1 %v13232_v0 }
  0x4b   : > { %7531 = vmatmul.mubr.msk.f32.gmra.mrb[26].mxu0 %vm13340_vm1, %v213_v20  ;;  %7547 = vmatmul.mubr.msk.f32.gmra.mrb[26].mxu1 %vm13340_vm1, %v213_v20 }
  0x4c   : > { %2175 = vmatprep.mubr.f32.mxu0 %v13232_v0  ;;  %2324 = vmatprep.mubr.f32.mxu1 %v13232_v0 }
  0xea   : > { %v336_v21 = vpop.f32.mrb[0].mxu0  ;;  %v485_v22 = vpop.f32.mrb[0].mxu1 }
  0xeb   : > { %568 = vst [vmem:[#allocation2] sm:$0xff] %v336_v21  ;;  %570 = vst [vmem:[#allocation2 + $0x10] sm:$0xff] %v485_v22  ;;  %v487_v23 = vpop.f32.mrb[1].mxu1  ;;  %v338_v24 = vpop.f32.mrb[1].mxu0 }
  0xec   : > { %571 = vst [vmem:[#allocation2 + $0x18] sm:$0xff] %v487_v23  ;;  %569 = vst [vmem:[#allocation2 + $0x8] sm:$0xff] %v338_v24 }
  0xee   : > { %v342_v25 = vpop.f32.mrb[2].mxu0  ;;  %v491_v26 = vpop.f32.mrb[2].mxu1 }
  0xef   : > { %572 = vst [vmem:[#allocation2 + $0x20] sm:$0xff] %v342_v25  ;;  %v344_v27 = vpop.f32.mrb[3].mxu0  ;;  %574 = vst [vmem:[#allocation2 + $0x30] sm:$0xff] %v491_v26  ;;  %v493_v28 = vpop.f32.mrb[3].mxu1 }
  0xf0   : > { %573 = vst [vmem:[#allocation2 + $0x28] sm:$0xff] %v344_v27  ;;  %575 = vst [vmem:[#allocation2 + $0x38] sm:$0xff] %v493_v28 }
  0xf2   : > { %v626_v29 = vld [vmem:[#allocation2 + $0x10] sm:$0xf]  ;;  %v624_v30 = vld [vmem:[#allocation2] sm:$0xf]  ;;  %v673_v32 = vld [vmem:[#allocation2] sm:$0xf0] }
  0xf3   : > { %632 = vrot.lane.b32.xlu1 %v626_v29, %s7836_s29  ;;  %628 = vrot.lane.b32.xlu0 %v624_v30, %s7836_s29  ;;  %v625_v31 = vld [vmem:[#allocation2 + $0x8] sm:$0xf]  ;;  %v348_v33 = vpop.f32.mrb[4].mxu0  ;;  %v497_v34 = vpop.f32.mrb[4].mxu1  ;;  %v627_v35 = vld [vmem:[#allocation2 + $0x18] sm:$0xf] }
  0xf4   : > { %v674_v36 = vld [vmem:[#allocation2 + $0x8] sm:$0xf0]  ;;  %576 = vst [vmem:[#allocation2 + $0x40] sm:$0xff] %v348_v33  ;;  %v350_v37 = vpop.f32.mrb[5].mxu0  ;;  %578 = vst [vmem:[#allocation2 + $0x50] sm:$0xff] %v497_v34  ;;  %v499_v38 = vpop.f32.mrb[5].mxu1 }
  0xf5   : > { %577 = vst [vmem:[#allocation2 + $0x48] sm:$0xff] %v350_v37  ;;  %579 = vst [vmem:[#allocation2 + $0x58] sm:$0xff] %v499_v38  ;;  %v682_v40 = vrot.slane %v674_v36, 4  ;;  %v681_v41 = vrot.slane %v673_v32, 4  ;;  %v676_v44 = vld [vmem:[#allocation2 + $0x18] sm:$0xf0] }
  0xf6   : > { %v354_v39 = vpop.f32.mrb[6].mxu0  ;;  %v503_v43 = vpop.f32.mrb[6].mxu1  ;;  %v675_v45 = vld [vmem:[#allocation2 + $0x10] sm:$0xf0]  ;;  %v684_v51 = vrot.slane %v676_v44, 4 }
  0xf7   : > { %634 = vrot.lane.b32.xlu1 %v627_v35, %s7836_s29  ;;  %630 = vrot.lane.b32.xlu0 %v625_v31, %s7836_s29  ;;  %580 = vst [vmem:[#allocation2 + $0x60] sm:$0xff] %v354_v39  ;;  %v356_v42 = vpop.f32.mrb[7].mxu0  ;;  %582 = vst [vmem:[#allocation2 + $0x70] sm:$0xff] %v503_v43  ;;  %v505_v46 = vpop.f32.mrb[7].mxu1  ;;  %v683_v52 = vrot.slane %v675_v45, 4 }
  0xf8   : > { %581 = vst [vmem:[#allocation2 + $0x68] sm:$0xff] %v356_v42  ;;  %583 = vst [vmem:[#allocation2 + $0x78] sm:$0xff] %v505_v46  ;;  %v733_v54 = vld [vmem:[#allocation2 + $0x20] sm:$0xf]  ;;  %v734_v55 = vld [vmem:[#allocation2 + $0x28] sm:$0xf] }
  0xf9   : > { %v735_v59 = vld [vmem:[#allocation2 + $0x30] sm:$0xf]  ;;  %v736_v60 = vld [vmem:[#allocation2 + $0x38] sm:$0xf]  ;;  %v781_v61 = vld [vmem:[#allocation2 + $0x20] sm:$0xf0] }
  0xfa   : > { %v360_v47 = vpop.f32.mrb[8].mxu0  ;;  %v509_v49 = vpop.f32.mrb[8].mxu1  ;;  %v782_v62 = vld [vmem:[#allocation2 + $0x28] sm:$0xf0]  ;;  %v789_v2 = vrot.slane %v781_v61, 4 }
  0xfb   : > { %691 = vrot.lane.b32.xlu1 %v682_v40, %s7837_s30  ;;  %689 = vrot.lane.b32.xlu0 %v681_v41, %s7837_s30  ;;  %584 = vst [vmem:[#allocation2 + $0x80] sm:$0xff] %v360_v47  ;;  %v362_v48 = vpop.f32.mrb[9].mxu0  ;;  %586 = vst [vmem:[#allocation2 + $0x90] sm:$0xff] %v509_v49  ;;  %v511_v50 = vpop.f32.mrb[9].mxu1  ;;  %v790_v3 = vrot.slane %v782_v62, 4 }
  0xfc   : > { %585 = vst [vmem:[#allocation2 + $0x88] sm:$0xff] %v362_v48  ;;  %587 = vst [vmem:[#allocation2 + $0x98] sm:$0xff] %v511_v50  ;;  %v783_v8 = vld [vmem:[#allocation2 + $0x30] sm:$0xf0]  ;;  %v784_v9 = vld [vmem:[#allocation2 + $0x38] sm:$0xf0] }
  0xfd   : > { %v791_v14 = vrot.slane %v783_v8, 4  ;;  %v792_v15 = vrot.slane %v784_v9, 4  ;;  %v841_v22 = vld [vmem:[#allocation2 + $0x40] sm:$0xf]  ;;  %v842_v23 = vld [vmem:[#allocation2 + $0x48] sm:$0xf] }
  0xfe   : > { %v366_v53 = vpop.f32.mrb[10].mxu0  ;;  %v515_v57 = vpop.f32.mrb[10].mxu1  ;;  %v843_v29 = vld [vmem:[#allocation2 + $0x50] sm:$0xf]  ;;  %v844_v30 = vld [vmem:[#allocation2 + $0x58] sm:$0xf] }
  0xff   : > { %695 = vrot.lane.b32.xlu1 %v684_v51, %s7837_s30  ;;  %693 = vrot.lane.b32.xlu0 %v683_v52, %s7837_s30  ;;  %588 = vst [vmem:[#allocation2 + $0xa0] sm:$0xff] %v366_v53  ;;  %v368_v56 = vpop.f32.mrb[11].mxu0  ;;  %590 = vst [vmem:[#allocation2 + $0xb0] sm:$0xff] %v515_v57  ;;  %v517_v58 = vpop.f32.mrb[11].mxu1  ;;  %v889_v32 = vld [vmem:[#allocation2 + $0x40] sm:$0xf0] }
 0x100   : > { %589 = vst [vmem:[#allocation2 + $0xa8] sm:$0xff] %v368_v56  ;;  %591 = vst [vmem:[#allocation2 + $0xb8] sm:$0xff] %v517_v58  ;;  %v890_v33 = vld [vmem:[#allocation2 + $0x48] sm:$0xf0]  ;;  %v897_v36 = vrot.slane %v889_v32, 4 }
 0x101   : > { %v898_v37 = vrot.slane %v890_v33, 4  ;;  %v891_v38 = vld [vmem:[#allocation2 + $0x50] sm:$0xf0]  ;;  %v892_v39 = vld [vmem:[#allocation2 + $0x58] sm:$0xf0] }
 0x102   : > { %v372_v63 = vpop.f32.mrb[12].mxu0  ;;  %v521_v4 = vpop.f32.mrb[12].mxu1  ;;  %v899_v41 = vrot.slane %v891_v38, 4  ;;  %v900_v42 = vrot.slane %v892_v39, 4  ;;  %v949_v44 = vld [vmem:[#allocation2 + $0x60] sm:$0xf] }
 0x103   : > { %737 = vrot.lane.b32.xlu0 %v733_v54, %s7838_s5  ;;  %739 = vrot.lane.b32.xlu1 %v734_v55, %s7838_s5  ;;  %592 = vst [vmem:[#allocation2 + $0xc0] sm:$0xff] %v372_v63  ;;  %v374_v1 = vpop.f32.mrb[13].mxu0  ;;  %594 = vst [vmem:[#allocation2 + $0xd0] sm:$0xff] %v521_v4  ;;  %v523_v10 = vpop.f32.mrb[13].mxu1  ;;  %v950_v45 = vld [vmem:[#allocation2 + $0x68] sm:$0xf] }
 0x104   : > { %593 = vst [vmem:[#allocation2 + $0xc8] sm:$0xff] %v374_v1  ;;  %595 = vst [vmem:[#allocation2 + $0xd8] sm:$0xff] %v523_v10  ;;  %v951_v47 = vld [vmem:[#allocation2 + $0x70] sm:$0xf]  ;;  %v952_v48 = vld [vmem:[#allocation2 + $0x78] sm:$0xf] }
 0x105   : > { %v997_v51 = vld [vmem:[#allocation2 + $0x60] sm:$0xf0]  ;;  %v998_v52 = vld [vmem:[#allocation2 + $0x68] sm:$0xf0]  ;;  %v999_v56 = vld [vmem:[#allocation2 + $0x70] sm:$0xf0] }
 0x106   : > { %v378_v7 = vpop.f32.mrb[14].mxu0  ;;  %v527_v12 = vpop.f32.mrb[14].mxu1  ;;  %v1005_v54 = vrot.slane %v997_v51, 4  ;;  %v1006_v55 = vrot.slane %v998_v52, 4  ;;  %v1000_v57 = vld [vmem:[#allocation2 + $0x78] sm:$0xf0] }
 0x107   : > { %741 = vrot.lane.b32.xlu0 %v735_v59, %s7838_s5  ;;  %743 = vrot.lane.b32.xlu1 %v736_v60, %s7838_s5  ;;  %596 = vst [vmem:[#allocation2 + $0xe0] sm:$0xff] %v378_v7  ;;  %v380_v11 = vpop.f32.mrb[15].mxu0  ;;  %598 = vst [vmem:[#allocation2 + $0xf0] sm:$0xff] %v527_v12  ;;  %v529_v16 = vpop.f32.mrb[15].mxu1  ;;  %v1007_v58 = vrot.slane %v999_v56, 4  ;;  %v1008_v59 = vrot.slane %v1000_v57, 4 }
 0x108   : > { %597 = vst [vmem:[#allocation2 + $0xe8] sm:$0xff] %v380_v11  ;;  %599 = vst [vmem:[#allocation2 + $0xf8] sm:$0xff] %v529_v16  ;;  %v1057_v60 = vld [vmem:[#allocation2 + $0x80] sm:$0xf]  ;;  %v1058_v61 = vld [vmem:[#allocation2 + $0x88] sm:$0xf] }
 0x109   : > { %v1059_v63 = vld [vmem:[#allocation2 + $0x90] sm:$0xf]  ;;  %v1060_v1 = vld [vmem:[#allocation2 + $0x98] sm:$0xf]  ;;  %v1105_v4 = vld [vmem:[#allocation2 + $0x80] sm:$0xf0] }
 0x10a   : > { %v384_v13 = vpop.f32.mrb[16].mxu0  ;;  %v533_v18 = vpop.f32.mrb[16].mxu1  ;;  %v1106_v7 = vld [vmem:[#allocation2 + $0x88] sm:$0xf0]  ;;  %v1113_v9 = vrot.slane %v1105_v4, 4 }
 0x10b   : > { %797 = vrot.lane.b32.xlu0 %v789_v2, %s7839_s6  ;;  %799 = vrot.lane.b32.xlu1 %v790_v3, %s7839_s6  ;;  %600 = vst [vmem:[#allocation2 + $0x100] sm:$0xff] %v384_v13  ;;  %v386_v17 = vpop.f32.mrb[17].mxu0  ;;  %602 = vst [vmem:[#allocation2 + $0x110] sm:$0xff] %v533_v18  ;;  %v535_v20 = vpop.f32.mrb[17].mxu1  ;;  %v1114_v10 = vrot.slane %v1106_v7, 4 }
 0x10c   : > { %601 = vst [vmem:[#allocation2 + $0x108] sm:$0xff] %v386_v17  ;;  %603 = vst [vmem:[#allocation2 + $0x118] sm:$0xff] %v535_v20  ;;  %v1107_v11 = vld [vmem:[#allocation2 + $0x90] sm:$0xf0]  ;;  %v1108_v12 = vld [vmem:[#allocation2 + $0x98] sm:$0xf0] }
 0x10d   : > { %v1115_v13 = vrot.slane %v1107_v11, 4  ;;  %v1166_v16 = vld [vmem:[#allocation2 + $0xa8] sm:$0xf]  ;;  %v1167_v17 = vld [vmem:[#allocation2 + $0xb0] sm:$0xf] }
 0x10e   : > { %v390_v19 = vpop.f32.mrb[18].mxu0  ;;  %v539_v24 = vpop.f32.mrb[18].mxu1  ;;  %v1168_v18 = vld [vmem:[#allocation2 + $0xb8] sm:$0xf]  ;;  %v1214_v20 = vld [vmem:[#allocation2 + $0xa8] sm:$0xf0] }
 0x10f   : > { %801 = vrot.lane.b32.xlu0 %v791_v14, %s7839_s6  ;;  %803 = vrot.lane.b32.xlu1 %v792_v15, %s7839_s6  ;;  %604 = vst [vmem:[#allocation2 + $0x120] sm:$0xff] %v390_v19  ;;  %v392_v21 = vpop.f32.mrb[19].mxu0  ;;  %606 = vst [vmem:[#allocation2 + $0x130] sm:$0xff] %v539_v24  ;;  %v541_v25 = vpop.f32.mrb[19].mxu1  ;;  %v1116_v14 = vrot.slane %v1108_v12, 4 }
 0x110   : > { %605 = vst [vmem:[#allocation2 + $0x128] sm:$0xff] %v392_v21  ;;  %607 = vst [vmem:[#allocation2 + $0x138] sm:$0xff] %v541_v25  ;;  %v1165_v15 = vld [vmem:[#allocation2 + $0xa0] sm:$0xf]  ;;  %v1213_v19 = vld [vmem:[#allocation2 + $0xa0] sm:$0xf0] }
 0x111   : > { %v1221_v21 = vrot.slane %v1213_v19, 4  ;;  %v1216_v24 = vld [vmem:[#allocation2 + $0xb8] sm:$0xf0]  ;;  %v1342_v32 = vld [vmem:[#allocation2 + $0xe8] sm:$0xf] }
 0x112   : > { %v396_v26 = vpop.f32.mrb[20].mxu0  ;;  %v545_v28 = vpop.f32.mrb[20].mxu1  ;;  %v1343_v33 = vld [vmem:[#allocation2 + $0xf0] sm:$0xf] }
 0x113   : > { %845 = vrot.lane.b32.xlu0 %v841_v22, %s7840_s7  ;;  %847 = vrot.lane.b32.xlu1 %v842_v23, %s7840_s7  ;;  %608 = vst [vmem:[#allocation2 + $0x140] sm:$0xff] %v396_v26  ;;  %v398_v27 = vpop.f32.mrb[21].mxu0  ;;  %610 = vst [vmem:[#allocation2 + $0x150] sm:$0xff] %v545_v28  ;;  %v547_v31 = vpop.f32.mrb[21].mxu1  ;;  %v1222_v22 = vrot.slane %v1214_v20, 4  ;;  %v1224_v26 = vrot.slane %v1216_v24, 4 }
 0x114   : > { %609 = vst [vmem:[#allocation2 + $0x148] sm:$0xff] %v398_v27  ;;  %611 = vst [vmem:[#allocation2 + $0x158] sm:$0xff] %v547_v31  ;;  %v1215_v23 = vld [vmem:[#allocation2 + $0xb0] sm:$0xf0]  ;;  %v1273_v27 = vld [vmem:[#allocation2 + $0xc0] sm:$0xf] }
 0x115   : > { %v1223_v25 = vrot.slane %v1215_v23, 4  ;;  %v1274_v28 = vld [vmem:[#allocation2 + $0xc8] sm:$0xf]  ;;  %v1341_v31 = vld [vmem:[#allocation2 + $0xe0] sm:$0xf] }
 0x116   : > { %v402_v34 = vpop.f32.mrb[22].mxu0  ;;  %v551_v40 = vpop.f32.mrb[22].mxu1  ;;  %v1606_v19 = vld [vmem:[#allocation2 + $0x130] sm:$0xf0] }
 0x117   : > { %849 = vrot.lane.b32.xlu0 %v843_v29, %s7840_s7  ;;  %851 = vrot.lane.b32.xlu1 %v844_v30, %s7840_s7  ;;  %612 = vst [vmem:[#allocation2 + $0x160] sm:$0xff] %v402_v34  ;;  %v404_v35 = vpop.f32.mrb[23].mxu0  ;;  %614 = vst [vmem:[#allocation2 + $0x170] sm:$0xff] %v551_v40  ;;  %v553_v43 = vpop.f32.mrb[23].mxu1  ;;  %v1275_v29 = vld [vmem:[#allocation2 + $0xd0] sm:$0xf] }
 0x118   : > { %613 = vst [vmem:[#allocation2 + $0x168] sm:$0xff] %v404_v35  ;;  %615 = vst [vmem:[#allocation2 + $0x178] sm:$0xff] %v553_v43  ;;  %v1276_v30 = vld [vmem:[#allocation2 + $0xd8] sm:$0xf]  ;;  %v1389_v35 = vld [vmem:[#allocation2 + $0xe0] sm:$0xf0] }
 0x119   : > { %v1344_v34 = vld [vmem:[#allocation2 + $0xf8] sm:$0xf]  ;;  %v1397_v38 = vrot.slane %v1389_v35, 4  ;;  %v1391_v40 = vld [vmem:[#allocation2 + $0xf0] sm:$0xf0]  ;;  %v1614_v23 = vrot.slane %v1606_v19, 4 }
 0x11a   : > { %v408_v46 = vpop.f32.mrb[24].mxu0  ;;  %v557_v50 = vpop.f32.mrb[24].mxu1  ;;  %v1560_v12 = vld [vmem:[#allocation2 + $0x138] sm:$0xf]  ;;  %v1607_v20 = vld [vmem:[#allocation2 + $0x138] sm:$0xf0] }
 0x11b   : > { %905 = vrot.lane.b32.xlu0 %v897_v36, %s7841_s8  ;;  %907 = vrot.lane.b32.xlu1 %v898_v37, %s7841_s8  ;;  %616 = vst [vmem:[#allocation2 + $0x180] sm:$0xff] %v408_v46  ;;  %v410_v49 = vpop.f32.mrb[25].mxu0  ;;  %618 = vst [vmem:[#allocation2 + $0x190] sm:$0xff] %v557_v50  ;;  %v559_v53 = vpop.f32.mrb[25].mxu1  ;;  %v1390_v36 = vld [vmem:[#allocation2 + $0xe8] sm:$0xf0] }
 0x11c   : > { %617 = vst [vmem:[#allocation2 + $0x188] sm:$0xff] %v410_v49  ;;  %619 = vst [vmem:[#allocation2 + $0x198] sm:$0xff] %v559_v53  ;;  %v8067_v37 = vpop.permute.xlu0 %2031  ;;  %v1398_v39 = vrot.slane %v1390_v36, 4  ;;  %v1449_v46 = vld [vmem:[#allocation2 + $0x100] sm:$0xf]  ;;  %v1615_v24 = vrot.slane %v1607_v20, 4 }
 0x11d   : > { %13407 = vst [vmem:[#allocation5_spill] sm:$0xff] %v8067_v37  ;;  %v1450_v49 = vld [vmem:[#allocation2 + $0x108] sm:$0xf]  ;;  %v1451_v50 = vld [vmem:[#allocation2 + $0x110] sm:$0xf] }
 0x11e   : > { %v414_v62 = vpop.f32.mrb[26].mxu0  ;;  %v563_v3 = vpop.f32.mrb[26].mxu1  ;;  %v1452_v53 = vld [vmem:[#allocation2 + $0x118] sm:$0xf] }
 0x11f   : > { %909 = vrot.lane.b32.xlu0 %v899_v41, %s7841_s8  ;;  %911 = vrot.lane.b32.xlu1 %v900_v42, %s7841_s8  ;;  %620 = vst [vmem:[#allocation2 + $0x1a0] sm:$0xff] %v414_v62  ;;  %v416_v2 = vpop.f32.mrb[27].mxu0  ;;  %622 = vst [vmem:[#allocation2 + $0x1b0] sm:$0xff] %v563_v3  ;;  %v565_v8 = vpop.f32.mrb[27].mxu1  ;;  %v1392_v41 = vld [vmem:[#allocation2 + $0xf8] sm:$0xf0] }
 0x120   : > { %621 = vst [vmem:[#allocation2 + $0x1a8] sm:$0xff] %v416_v2  ;;  %623 = vst [vmem:[#allocation2 + $0x1b8] sm:$0xff] %v565_v8  ;;  %v1557_v3 = vld [vmem:[#allocation2 + $0x120] sm:$0xf]  ;;  %v1558_v8 = vld [vmem:[#allocation2 + $0x128] sm:$0xf] }
 0x121   : > { %v8473_v37 = vld [vmem:[%s13230_s3 + $0x41] ss:$8 sm:$0xf] }
 0x122   : > { %13442 = vst [vmem:[#allocation40_spill] sm:$0xff] %v8473_v37 }
 0x123   : > { %953 = vrot.lane.b32.xlu0 %v949_v44, %s7842_s9  ;;  %955 = vrot.lane.b32.xlu1 %v950_v45, %s7842_s9  ;;  %v1399_v44 = vrot.slane %v1391_v40, 4  ;;  %v1400_v45 = vrot.slane %v1392_v41, 4  ;;  %v1712_v40 = vld [vmem:[#allocation2 + $0x150] sm:$0xf0]  ;;  %v1713_v41 = vld [vmem:[#allocation2 + $0x158] sm:$0xf0] }
 0x127   : > { %957 = vrot.lane.b32.xlu0 %v951_v47, %s7842_s9  ;;  %959 = vrot.lane.b32.xlu1 %v952_v48, %s7842_s9 }
 0x12b   : > { %1013 = vrot.lane.b32.xlu0 %v1005_v54, %s7843_s10  ;;  %1015 = vrot.lane.b32.xlu1 %v1006_v55, %s7843_s10  ;;  %v1497_v54 = vld [vmem:[#allocation2 + $0x100] sm:$0xf0]  ;;  %v1498_v55 = vld [vmem:[#allocation2 + $0x108] sm:$0xf0] }
 0x12f   : > { %1017 = vrot.lane.b32.xlu0 %v1007_v58, %s7843_s10  ;;  %1019 = vrot.lane.b32.xlu1 %v1008_v59, %s7843_s10  ;;  %v1505_v58 = vrot.slane %v1497_v54, 4  ;;  %v1506_v59 = vrot.slane %v1498_v55, 4  ;;  %v1770_v55 = vld [vmem:[#allocation2 + $0x168] sm:$0xf] }
 0x133   : > { %1061 = vrot.lane.b32.xlu0 %v1057_v60, %s7844_s11  ;;  %1063 = vrot.lane.b32.xlu1 %v1058_v61, %s7844_s11  ;;  %v1499_v60 = vld [vmem:[#allocation2 + $0x110] sm:$0xf0]  ;;  %v1500_v61 = vld [vmem:[#allocation2 + $0x118] sm:$0xf0] }
 0x134   : > { %v1508_v2 = vrot.slane %v1500_v61, 4  ;;  %v1772_v61 = vld [vmem:[#allocation2 + $0x178] sm:$0xf] }
 0x137   : > { %1065 = vrot.lane.b32.xlu0 %v1059_v63, %s7844_s11  ;;  %1067 = vrot.lane.b32.xlu1 %v1060_v1, %s7844_s11  ;;  %v1507_v1 = vrot.slane %v1499_v60, 4 }
 0x13b   : > { %1121 = vrot.lane.b32.xlu0 %v1113_v9, %s7845_s12  ;;  %1123 = vrot.lane.b32.xlu1 %v1114_v10, %s7845_s12  ;;  %v1559_v9 = vld [vmem:[#allocation2 + $0x130] sm:$0xf] }
 0x13f   : > { %1125 = vrot.lane.b32.xlu0 %v1115_v13, %s7845_s12  ;;  %1127 = vrot.lane.b32.xlu1 %v1116_v14, %s7845_s12  ;;  %v1604_v13 = vld [vmem:[#allocation2 + $0x120] sm:$0xf0]  ;;  %v1605_v14 = vld [vmem:[#allocation2 + $0x128] sm:$0xf0] }
 0x143   : > { %1169 = vrot.lane.b32.xlu0 %v1165_v15, %s7846_s13  ;;  %1171 = vrot.lane.b32.xlu1 %v1166_v16, %s7846_s13 }
 0x147   : > { %1173 = vrot.lane.b32.xlu0 %v1167_v17, %s7846_s13  ;;  %1175 = vrot.lane.b32.xlu1 %v1168_v18, %s7846_s13  ;;  %v1612_v17 = vrot.slane %v1604_v13, 4  ;;  %v1613_v18 = vrot.slane %v1605_v14, 4  ;;  %v1818_v13 = vld [vmem:[#allocation2 + $0x170] sm:$0xf0]  ;;  %v1819_v14 = vld [vmem:[#allocation2 + $0x178] sm:$0xf0] }
 0x148   : > { %v1826_v19 = vrot.slane %v1818_v13, 4  ;;  %v1827_v20 = vrot.slane %v1819_v14, 4  ;;  %v1981_v14 = vld [vmem:[#allocation2 + $0x1a0] sm:$0xf] }
 0x14b   : > { %1229 = vrot.lane.b32.xlu0 %v1221_v21, %s7847_s14  ;;  %1231 = vrot.lane.b32.xlu1 %v1222_v22, %s7847_s14 }
 0x14f   : > { %1233 = vrot.lane.b32.xlu0 %v1223_v25, %s7847_s14  ;;  %1235 = vrot.lane.b32.xlu1 %v1224_v26, %s7847_s14  ;;  %v1663_v25 = vld [vmem:[#allocation2 + $0x140] sm:$0xf] }
 0x153   : > { %1277 = vrot.lane.b32.xlu0 %v1273_v27, %s7848_s18  ;;  %1279 = vrot.lane.b32.xlu1 %v1274_v28, %s7848_s18  ;;  %v1664_v28 = vld [vmem:[#allocation2 + $0x148] sm:$0xf] }
 0x157   : > { %1281 = vrot.lane.b32.xlu0 %v1275_v29, %s7848_s18  ;;  %1283 = vrot.lane.b32.xlu1 %v1276_v30, %s7848_s18  ;;  %v1665_v29 = vld [vmem:[#allocation2 + $0x150] sm:$0xf] }
 0x15b   : > { %1345 = vrot.lane.b32.xlu0 %v1341_v31, %s7849_s19  ;;  %1347 = vrot.lane.b32.xlu1 %v1342_v32, %s7849_s19  ;;  %v1666_v32 = vld [vmem:[#allocation2 + $0x158] sm:$0xf] }
 0x15f   : > { %1349 = vrot.lane.b32.xlu0 %v1343_v33, %s7849_s19  ;;  %1351 = vrot.lane.b32.xlu1 %v1344_v34, %s7849_s19  ;;  %v1710_v33 = vld [vmem:[#allocation2 + $0x140] sm:$0xf0]  ;;  %v1711_v34 = vld [vmem:[#allocation2 + $0x148] sm:$0xf0] }
 0x163   : > { %1405 = vrot.lane.b32.xlu0 %v1397_v38, %s7850_s21  ;;  %1407 = vrot.lane.b32.xlu1 %v1398_v39, %s7850_s21  ;;  %v1718_v38 = vrot.slane %v1710_v33, 4  ;;  %v1719_v39 = vrot.slane %v1711_v34, 4  ;;  %v1878_v34 = vld [vmem:[#allocation2 + $0x198] sm:$0xf] }
 0x165   : > { %v8071_v42 = vpop.permute.xlu1 %632  ;;  %v8073_v43 = vpop.permute.xlu0 %628 }
 0x167   : > { %1409 = vrot.lane.b32.xlu0 %v1399_v44, %s7850_s21  ;;  %1411 = vrot.lane.b32.xlu1 %v1400_v45, %s7850_s21 }
 0x169   : > { %v8077_v47 = vpop.permute.xlu1 %634  ;;  %v8079_v48 = vpop.permute.xlu0 %630 }
 0x16b   : > { %1453 = vrot.lane.b32.xlu0 %v1449_v46, %s7851_s22  ;;  %1455 = vrot.lane.b32.xlu1 %v1450_v49, %s7851_s22  ;;  %v1720_v46 = vrot.slane %v1712_v40, 4  ;;  %v1721_v49 = vrot.slane %v1713_v41, 4 }
 0x16d   : > { %v8083_v51 = vpop.permute.xlu1 %691  ;;  %v8085_v52 = vpop.permute.xlu0 %689 }
 0x16f   : > { %1457 = vrot.lane.b32.xlu0 %v1451_v50, %s7851_s22  ;;  %1459 = vrot.lane.b32.xlu1 %v1452_v53, %s7851_s22  ;;  %v1769_v50 = vld [vmem:[#allocation2 + $0x160] sm:$0xf] }
 0x171   : > { %v8089_v56 = vpop.permute.xlu1 %695  ;;  %v8091_v57 = vpop.permute.xlu0 %693 }
 0x173   : > { %1513 = vrot.lane.b32.xlu0 %v1505_v58, %s7852_s23  ;;  %1515 = vrot.lane.b32.xlu1 %v1506_v59, %s7852_s23  ;;  %v1771_v58 = vld [vmem:[#allocation2 + $0x170] sm:$0xf] }
 0x175   : > { %v8095_v62 = vpop.permute.xlu0 %737  ;;  %v8097_v63 = vpop.permute.xlu1 %739 }
 0x177   : > { %1517 = vrot.lane.b32.xlu0 %v1507_v1, %s7852_s23  ;;  %1519 = vrot.lane.b32.xlu1 %v1508_v2, %s7852_s23  ;;  %v1816_v1 = vld [vmem:[#allocation2 + $0x160] sm:$0xf0]  ;;  %v1817_v2 = vld [vmem:[#allocation2 + $0x168] sm:$0xf0] }
 0x179   : > { %v8101_v4 = vpop.permute.xlu0 %741  ;;  %v8103_v7 = vpop.permute.xlu1 %743 }
 0x17b   : > { %1561 = vrot.lane.b32.xlu0 %v1557_v3, %s7836_s29  ;;  %1563 = vrot.lane.b32.xlu1 %v1558_v8, %s7836_s29 }
 0x17d   : > { %v8107_v10 = vpop.permute.xlu0 %797  ;;  %v8109_v11 = vpop.permute.xlu1 %799 }
 0x17f   : > { %1565 = vrot.lane.b32.xlu0 %v1559_v9, %s7836_s29  ;;  %1567 = vrot.lane.b32.xlu1 %v1560_v12, %s7836_s29  ;;  %v1824_v9 = vrot.slane %v1816_v1, 4  ;;  %v1825_v12 = vrot.slane %v1817_v2, 4 }
 0x181   : > { %v8113_v15 = vpop.permute.xlu0 %801  ;;  %v8115_v16 = vpop.permute.xlu1 %803 }
 0x183   : > { %1620 = vrot.lane.b32.xlu0 %v1612_v17, %s7837_s30  ;;  %1622 = vrot.lane.b32.xlu1 %v1613_v18, %s7837_s30 }
 0x185   : > { %v8119_v21 = vpop.permute.xlu0 %845  ;;  %v8121_v22 = vpop.permute.xlu1 %847 }
 0x187   : > { %1624 = vrot.lane.b32.xlu0 %v1614_v23, %s7837_s30  ;;  %1626 = vrot.lane.b32.xlu1 %v1615_v24, %s7837_s30  ;;  %v1875_v23 = vld [vmem:[#allocation2 + $0x180] sm:$0xf] }
 0x189   : > { %v8125_v26 = vpop.permute.xlu0 %849  ;;  %v8127_v27 = vpop.permute.xlu1 %851 }
 0x18b   : > { %1667 = vrot.lane.b32.xlu0 %v1663_v25, %s7838_s5  ;;  %1669 = vrot.lane.b32.xlu1 %v1664_v28, %s7838_s5  ;;  %v1876_v28 = vld [vmem:[#allocation2 + $0x188] sm:$0xf] }
 0x18d   : > { %v8131_v30 = vpop.permute.xlu0 %905  ;;  %v8133_v31 = vpop.permute.xlu1 %907 }
 0x18f   : > { %1671 = vrot.lane.b32.xlu0 %v1665_v29, %s7838_s5  ;;  %1673 = vrot.lane.b32.xlu1 %v1666_v32, %s7838_s5  ;;  %v1877_v29 = vld [vmem:[#allocation2 + $0x190] sm:$0xf] }
 0x191   : > { %v8137_v35 = vpop.permute.xlu0 %909  ;;  %v8139_v36 = vpop.permute.xlu1 %911 }
 0x193   : > { %1726 = vrot.lane.b32.xlu0 %v1718_v38, %s7839_s6  ;;  %1728 = vrot.lane.b32.xlu1 %v1719_v39, %s7839_s6  ;;  %v1922_v38 = vld [vmem:[#allocation2 + $0x180] sm:$0xf0]  ;;  %v1923_v39 = vld [vmem:[#allocation2 + $0x188] sm:$0xf0] }
 0x195   : > { %v8143_v44 = vpop.permute.xlu0 %953  ;;  %v8145_v45 = vpop.permute.xlu1 %955 }
 0x197   : > { %1730 = vrot.lane.b32.xlu0 %v1720_v46, %s7839_s6  ;;  %1732 = vrot.lane.b32.xlu1 %v1721_v49, %s7839_s6  ;;  %v1930_v46 = vrot.slane %v1922_v38, 4  ;;  %v1931_v49 = vrot.slane %v1923_v39, 4  ;;  %v636_v38 = vlaneseq  ;;  %v1984_v39 = vld [vmem:[#allocation2 + $0x1b8] sm:$0xf] }
 0x199   : > { %v8149_v53 = vpop.permute.xlu0 %957  ;;  %v8151_v54 = vpop.permute.xlu1 %959  ;;  %v8246_v6 = vand.u32 127, %v636_v38 }
 0x19b   : > { %1773 = vrot.lane.b32.xlu0 %v1769_v50, %s7840_s7  ;;  %1775 = vrot.lane.b32.xlu1 %v1770_v55, %s7840_s7  ;;  %v1924_v50 = vld [vmem:[#allocation2 + $0x190] sm:$0xf0]  ;;  %v1925_v55 = vld [vmem:[#allocation2 + $0x198] sm:$0xf0]  ;;  %vm638_vm2 = vcmp.lt.s32.totalorder %v8246_v6, 73  ;;  %vm697_vm3 = vcmp.lt.s32.totalorder %v8246_v6, 72 }
 0x19c   : > { %v1932_v1 = vrot.slane %v1924_v50, 4  ;;  %v1933_v2 = vrot.slane %v1925_v55, 4  ;;  %v646_v50 = vshrl.u32 %v636_v38, 7  ;;  %v8264_v38 = vld [vmem:[%s13230_s3 + $0x3] ss:$8 sm:$0xf] }
 0x19d   : > { %v8155_v59 = vpop.permute.xlu0 %1013  ;;  %v8157_v60 = vpop.permute.xlu1 %1015  ;;  %vm745_vm4 = vcmp.lt.s32.totalorder %v8246_v6, 71  ;;  %vm805_vm5 = vcmp.lt.s32.totalorder %v8246_v6, 65  ;;  %vm853_vm6 = vcmp.lt.s32.totalorder %v8246_v6, 64  ;;  %vm913_vm7 = vcmp.lt.s32.totalorder %v8246_v6, 63 }
 0x19e   : > { %vm961_vm8 = vcmp.lt.s32.totalorder %v8246_v6, 57  ;;  %vm1021_vm9 = vcmp.lt.s32.totalorder %v8246_v6, 56  ;;  %vm13343_vm10 = vcmp.lt.s32.totalorder %v8246_v6, 55  ;;  %vm13342_vm11 = vcmp.lt.s32.totalorder %v8246_v6, 9 }
 0x19f   : > { %1777 = vrot.lane.b32.xlu0 %v1771_v58, %s7840_s7  ;;  %1779 = vrot.lane.b32.xlu1 %v1772_v61, %s7840_s7  ;;  %vm13283_vm12 = vcmp.lt.s32.totalorder %v8246_v6, 8  ;;  %vm13284_vm13 = vcmp.lt.s32.totalorder %v8246_v6, 7  ;;  %vm13285_vm14 = vcmp.lt.s32.totalorder %v8246_v6, 1  ;;  %vm1353_vm15 = vcmp.lt.s32.totalorder %v8246_v6, 127 }
 0x1a1   : > { %v8161_v3 = vpop.permute.xlu0 %1017  ;;  %v8163_v8 = vpop.permute.xlu1 %1019 }
 0x1a3   : > { %1832 = vrot.lane.b32.xlu0 %v1824_v9, %s7841_s8  ;;  %1834 = vrot.lane.b32.xlu1 %v1825_v12, %s7841_s8  ;;  %v1983_v9 = vld [vmem:[#allocation2 + $0x1b0] sm:$0xf] }
 0x1a5   : > { %v8167_v17 = vpop.permute.xlu0 %1061  ;;  %v8169_v18 = vpop.permute.xlu1 %1063 }
 0x1a7   : > { %1836 = vrot.lane.b32.xlu0 %v1826_v19, %s7841_s8  ;;  %1838 = vrot.lane.b32.xlu1 %v1827_v20, %s7841_s8  ;;  %v7644_v19 = vld [vmem:[%s13229_s2 + $0x4] sm:$0xf] }
 0x1a9   : > { %v8173_v24 = vpop.permute.xlu0 %1065  ;;  %v8175_v25 = vpop.permute.xlu1 %1067 }
 0x1ab   : > { %1879 = vrot.lane.b32.xlu0 %v1875_v23, %s7842_s9  ;;  %1881 = vrot.lane.b32.xlu1 %v1876_v28, %s7842_s9  ;;  %v1982_v28 = vld [vmem:[#allocation2 + $0x1a8] sm:$0xf] }
 0x1ad   : > { %v8179_v32 = vpop.permute.xlu0 %1121  ;;  %v8181_v33 = vpop.permute.xlu1 %1123 }
 0x1af   : > { %1883 = vrot.lane.b32.xlu0 %v1877_v29, %s7842_s9  ;;  %1885 = vrot.lane.b32.xlu1 %v1878_v34, %s7842_s9 }
 0x1b1   : > { %v8185_v40 = vpop.permute.xlu0 %1125  ;;  %v8187_v41 = vpop.permute.xlu1 %1127 }
 0x1b2   : > { %13408 = vst [vmem:[#allocation6_spill] sm:$0xff] %v8185_v40  ;;  %13409 = vst [vmem:[#allocation7_spill] sm:$0xff] %v8187_v41  ;;  %v8377_v40 = vld [vmem:[%s13230_s3 + $0x22] ss:$8 sm:$0xf] }
 0x1b3   : > { %1938 = vrot.lane.b32.xlu0 %v1930_v46, %s7843_s10  ;;  %1940 = vrot.lane.b32.xlu1 %v1931_v49, %s7843_s10  ;;  %13432 = vst [vmem:[#allocation30_spill] sm:$0xff] %v8377_v40 }
 0x1b5   : > { %v8191_v58 = vpop.permute.xlu0 %1169  ;;  %v8193_v61 = vpop.permute.xlu1 %1171 }
 0x1b6   : > { %13410 = vst [vmem:[#allocation8_spill] sm:$0xff] %v8191_v58  ;;  %13411 = vst [vmem:[#allocation9_spill] sm:$0xff] %v8193_v61  ;;  %v8434_v58 = vld [vmem:[%s13230_s3 + $0x27] ss:$8 sm:$0xf]  ;;  %v642_v61 = vsel %vm638_vm2, %v8077_v47, %v8073_v43 }
 0x1b7   : > { %1942 = vrot.lane.b32.xlu0 %v1932_v1, %s7843_s10  ;;  %1944 = vrot.lane.b32.xlu1 %v1933_v2, %s7843_s10  ;;  %v8224_v2 = vsub.s32 0, %v646_v50  ;;  %13438 = vst [vmem:[#allocation36_spill] sm:$0xff] %v8434_v58 }
 0x1b9   : > { %v8197_v12 = vpop.permute.xlu0 %1173  ;;  %v8199_v13 = vpop.permute.xlu1 %1175 }
 0x1ba   : > { %13412 = vst [vmem:[#allocation10_spill] sm:$0xff] %v8197_v12  ;;  %13413 = vst [vmem:[#allocation11_spill] sm:$0xff] %v8199_v13  ;;  %v8309_v12 = vld [vmem:[%s13230_s3 + $0x6] ss:$8 sm:$0xf] }
 0x1bb   : > { %1989 = vrot.lane.b32.xlu0 %v1983_v9, %s7844_s11  ;;  %1985 = vrot.lane.b32.xlu1 %v1981_v14, %s7844_s11  ;;  %v8226_v9 = vsub.s32 3, %v646_v50  ;;  %v8228_v14 = vsub.s32 1, %v646_v50  ;;  %v8350_v13 = vld [vmem:[#allocation2 + $0xd8] sm:$0xf0] }
 0x1bc   : > { %13429 = vst [vmem:[#allocation27_spill] sm:$0xff] %v8350_v13  ;;  %v8421_v13 = vld [vmem:[%s13230_s3 + $0x26] ss:$8 sm:$0xf] }
 0x1bd   : > { %v8206_v20 = vpop.permute.xlu0 %1229  ;;  %v8208_v23 = vpop.permute.xlu1 %1231  ;;  %13437 = vst [vmem:[#allocation35_spill] sm:$0xff] %v8421_v13 }
 0x1be   : > { %13414 = vst [vmem:[#allocation12_spill] sm:$0xff] %v8206_v20  ;;  %13415 = vst [vmem:[#allocation13_spill] sm:$0xff] %v8208_v23  ;;  %v8340_v20 = vld [vmem:[#allocation2 + $0xd0] sm:$0xf0] }
 0x1bf   : > { %3829 = vperm.xlu0 %7820, %v7644_v19   ;;  %1987 = vrot.lane.b32.xlu1 %v1982_v28, %s7844_s11  ;;  %v8230_v19 = vsub.s32 2, %v646_v50  ;;  %v8235_v28 = vld [vmem:[%s13230_s3] ss:$8 sm:$0xf]  ;;  %13428 = vst [vmem:[#allocation26_spill] sm:$0xff] %v8340_v20 }
 0x1c0   : > { %v8251_v50 = vld [vmem:[%s13230_s3 + $0x2] ss:$8 sm:$0xf] }
 0x1c1   : > { %v8211_v29 = vpop.permute.xlu0 %1233  ;;  %v8213_v34 = vpop.permute.xlu1 %1235 }
 0x1c2   : > { %13416 = vst [vmem:[#allocation14_spill] sm:$0xff] %v8211_v29  ;;  %13417 = vst [vmem:[#allocation15_spill] sm:$0xff] %v8213_v34  ;;  %v8322_v29 = vld [vmem:[%s13230_s3 + $0x7] ss:$8 sm:$0xf] }
 0x1c3   : > { %1991 = vrot.lane.b32.xlu1 %v1984_v39, %s7844_s11  ;;  %v8240_v39 = vld [vmem:[%s13230_s3 + $0x1] ss:$8 sm:$0xf]  ;;  %v8338_v34 = vld [vmem:[#allocation2 + $0xc8] sm:$0xf0] }
 0x1c4   : > { %13427 = vst [vmem:[#allocation25_spill] sm:$0xff] %v8338_v34 }
 0x1c5   : > { %v8216_v46 = vpop.permute.xlu0 %1277  ;;  %v8218_v49 = vpop.permute.xlu1 %1279 }
 0x1c6   : > { %13418 = vst [vmem:[#allocation16_spill] sm:$0xff] %v8216_v46  ;;  %13419 = vst [vmem:[#allocation17_spill] sm:$0xff] %v8218_v49  ;;  %v8290_v49 = vld [vmem:[%s13230_s3 + $0x5] ss:$8 sm:$0xf] }
 0x1c9   : > { %v8220_v55 = vpop.permute.xlu0 %1281  ;;  %v8222_v1 = vpop.permute.xlu1 %1283 }
 0x1ca   : > { %13420 = vst [vmem:[#allocation18_spill] sm:$0xff] %v8220_v55  ;;  %13421 = vst [vmem:[#allocation19_spill] sm:$0xff] %v8222_v1  ;;  %v8292_v1 = vld [vmem:[#allocation2 + $0xc0] sm:$0xf0] }
 0x1cb   : > { %13424 = vst [vmem:[#allocation22_spill] sm:$0xff] %v8292_v1  ;;  %v8367_v55 = vld [vmem:[%s13230_s3 + $0x21] ss:$8 sm:$0xf] }
 0x1cc   : > { %v8390_v1 = vld [vmem:[%s13230_s3 + $0x23] ss:$8 sm:$0xf] }
 0x1cd   : > { %v8242_v0 = vpop.permute.xlu0 %1345  ;;  %v8244_v5 = vpop.permute.xlu1 %1347  ;;  %13433 = vst [vmem:[#allocation31_spill] sm:$0xff] %v8390_v1 }
 0x1ce   : > { %13422 = vst [vmem:[#allocation20_spill] sm:$0xff] %v8242_v0  ;;  %13423 = vst [vmem:[#allocation21_spill] sm:$0xff] %v8244_v5  ;;  %v8277_v0 = vld [vmem:[%s13230_s3 + $0x4] ss:$8 sm:$0xf] }
 0x1d1   : > { %v8294_v46 = vpop.permute.xlu0 %1349  ;;  %v8296_v23 = vpop.permute.xlu1 %1351 }
 0x1d2   : > { %13425 = vst [vmem:[#allocation23_spill] sm:$0xff] %v8294_v46  ;;  %13426 = vst [vmem:[#allocation24_spill] sm:$0xff] %v8296_v23  ;;  %v8327_v46 = vld [vmem:[%s13230_s3 + $0x20] ss:$8 sm:$0xf] }
 0x1d5   : > { %v8352_v5 = vpop.permute.xlu0 %1405  ;;  %v8354_v23 = vpop.permute.xlu1 %1407 }
 0x1d6   : > { %13430 = vst [vmem:[#allocation28_spill] sm:$0xff] %v8352_v5  ;;  %13431 = vst [vmem:[#allocation29_spill] sm:$0xff] %v8354_v23  ;;  %v8404_v5 = vld [vmem:[%s13230_s3 + $0x24] ss:$8 sm:$0xf] }
 0x1d7   : > { %13434 = vst [vmem:[#allocation32_spill] sm:$0xff] %v8404_v5  ;;  %v8448_v23 = vld [vmem:[%s13230_s3 + $0x40] ss:$8 sm:$0xf]  ;;  %v13444_v5 = vrot.slane %v8235_v28, %v8224_v2 }
 0x1d8   : > { %13439 = vst [vmem:[#allocation37_spill] sm:$0xff] %v8448_v23 }
 0x1d9   : > { %v8406_v20 = vpop.permute.xlu0 %1409  ;;  %v8408_v41 = vpop.permute.xlu1 %1411  ;;  %v665_v58 = vmul.f32 %v13444_v5, %v642_v61  ;;  %v13448_v61 = vrot.slane %v8235_v28, %v8228_v14 }
 0x1da   : > { %13435 = vst [vmem:[#allocation33_spill] sm:$0xff] %v8406_v20  ;;  %13436 = vst [vmem:[#allocation34_spill] sm:$0xff] %v8408_v41  ;;  %v700_v20 = vsel %vm697_vm3, %v8085_v52, %v8083_v51  ;;  %v639_v41 = vsel %vm638_vm2, %v8071_v42, %v8077_v47  ;;  %v701_v47 = vsel %vm697_vm3, %v8089_v56, %v8085_v52 }
 0x1db   : > { %v13445_v52 = vrot.slane %v8240_v39, %v8228_v14 }
 0x1dd   : > { %v8458_v1 = vpop.permute.xlu0 %1453  ;;  %v8468_v40 = vpop.permute.xlu1 %1455  ;;  %v726_v13 = vmul.f32 %v13445_v52, %v700_v20  ;;  %v13449_v52 = vrot.slane %v8235_v28, %v8230_v19 }
 0x1de   : > { %13440 = vst [vmem:[#allocation38_spill] sm:$0xff] %v8458_v1  ;;  %13441 = vst [vmem:[#allocation39_spill] sm:$0xff] %v8468_v40  ;;  %v640_v1 = vsel %vm638_vm2, %v8079_v48, %v8071_v42  ;;  %v641_v40 = vsel %vm638_vm2, %v8073_v43, %v8079_v48  ;;  %v699_v42 = vsel %vm697_vm3, %v8083_v51, %v8091_v57 }
 0x1df   : > { %v698_v51 = vsel %vm697_vm3, %v8091_v57, %v8089_v56  ;;  %v748_v43 = vsel %vm745_vm4, %v8095_v62, %v8097_v63  ;;  %v13447_v48 = vrot.slane %v8235_v28, %v8226_v9  ;;  %v666_v20 = vmul.f32 %v13448_v61, %v641_v40  ;;  %v8547_v57 = vld [vmem:[%s13230_s3 + $0x42] ss:$8 sm:$0xf] }
 0x1e0   : > { %v13451_v40 = vrot.slane %v8240_v39, %v8230_v19 }
 0x1e1   : > { %v8510_v34 = vpop.permute.xlu0 %1457  ;;  %v8530_v23 = vpop.permute.xlu1 %1459  ;;  %v668_v5 = vmul.f32 %v13447_v48, %v639_v41  ;;  %v13450_v41 = vrot.slane %v8240_v39, %v8224_v2 }
 0x1e2   : > { %13443 = vst [vmem:[#allocation41_spill] sm:$0xff] %v8510_v34  ;;  %13446 = vst [vmem:[#allocation42_spill] sm:$0xff] %v8530_v23  ;;  %v667_v34 = vmul.f32 %v13449_v52, %v640_v1  ;;  %v727_v61 = vmul.f32 %v13451_v40, %v699_v42  ;;  %v747_v1 = vsel %vm745_vm4, %v8097_v63, %v8101_v4 }
 0x1e3   : > { %v725_v48 = vmul.f32 %v13450_v41, %v701_v47  ;;  %v13452_v52 = vrot.slane %v8240_v39, %v8226_v9  ;;  %v13453_v23 = vrot.slane %v8251_v50, %v8228_v14  ;;  %v746_v42 = vsel %vm745_vm4, %v8101_v4, %v8103_v7  ;;  %v8588_v4 = vld [vmem:[%s13230_s3 + $0x43] ss:$8 sm:$0xf] }
 0x1e4   : > { %v749_v63 = vsel %vm745_vm4, %v8103_v7, %v8095_v62  ;;  %v730_v40 = vadd.f32 %v726_v13, %v666_v20  ;;  %v13455_v62 = vrot.slane %v8251_v50, %v8230_v19  ;;  %v808_v13 = vsel %vm805_vm5, %v8107_v10, %v8109_v11 }
 0x1e5   : > { %v728_v56 = vmul.f32 %v13452_v52, %v698_v51  ;;  %v774_v47 = vmul.f32 %v13453_v23, %v748_v43  ;;  %v8575_v41 = vpop.permute.xlu0 %1513  ;;  %v8577_v28 = vpop.permute.xlu1 %1515  ;;  %v729_v52 = vadd.f32 %v725_v48, %v665_v58  ;;  %v731_v43 = vadd.f32 %v727_v61, %v667_v34 }
 0x1e6   : > { %13454 = vst [vmem:[#allocation43_spill] sm:$0xff] %v8575_v41  ;;  %v775_v7 = vmul.f32 %v13455_v62, %v747_v1  ;;  %v13456_v23 = vrot.slane %v8251_v50, %v8224_v2  ;;  %v13457_v1 = vrot.slane %v8251_v50, %v8226_v9  ;;  %v807_v51 = vsel %vm805_vm5, %v8109_v11, %v8113_v15 }
 0x1e7   : > { %v732_v37 = vadd.f32 %v728_v56, %v668_v5  ;;  %v778_v41 = vadd.f32 %v774_v47, %v730_v40  ;;  %v13458_v34 = vrot.slane %v8264_v38, %v8228_v14  ;;  %v806_v50 = vsel %vm805_vm5, %v8113_v15, %v8115_v16 }
 0x1e8   : > { %v773_v39 = vmul.f32 %v13456_v23, %v749_v63  ;;  %v776_v62 = vmul.f32 %v13457_v1, %v746_v42  ;;  %v809_v11 = vsel %vm805_vm5, %v8115_v16, %v8107_v10  ;;  %v779_v61 = vadd.f32 %v775_v7, %v731_v43  ;;  %v8642_v10 = vld [vmem:[%s13230_s3 + $0x44] ss:$8 sm:$0xf] }
 0x1e9   : > { %v8612_v20 = vpop.permute.xlu0 %1517  ;;  %v834_v48 = vmul.f32 %v13458_v34, %v808_v13  ;;  %v8627_v5 = vpop.permute.xlu1 %1519  ;;  %v856_v47 = vsel %vm853_vm6, %v8119_v21, %v8121_v22  ;;  %v13459_v40 = vrot.slane %v8264_v38, %v8230_v19  ;;  %v855_v43 = vsel %vm853_vm6, %v8121_v22, %v8125_v26  ;;  %v13542_v42 = vld [vmem:[#allocation26_spill] sm:$0xff] }
 0x1ea   : > { %v777_v16 = vadd.f32 %v773_v39, %v729_v52  ;;  %v780_v63 = vadd.f32 %v776_v62, %v732_v37  ;;  %v13460_v7 = vrot.slane %v8264_v38, %v8224_v2  ;;  %v13461_v1 = vrot.slane %v8264_v38, %v8226_v9 }
 0x1eb   : > { %v835_v23 = vmul.f32 %v13459_v40, %v807_v51  ;;  %v854_v37 = vsel %vm853_vm6, %v8125_v26, %v8127_v27  ;;  %v857_v22 = vsel %vm853_vm6, %v8127_v27, %v8119_v21  ;;  %v838_v52 = vadd.f32 %v834_v48, %v778_v41 }
 0x1ec   : > { %v833_v13 = vmul.f32 %v13460_v7, %v809_v11  ;;  %v836_v39 = vmul.f32 %v13461_v1, %v806_v50  ;;  %v13462_v62 = vrot.slane %v8277_v0, %v8228_v14  ;;  %v916_v38 = vsel %vm913_vm7, %v8131_v30, %v8133_v31 }
 0x1ed   : > { %v8666_v51 = vpop.permute.xlu0 %1561  ;;  %v8676_v26 = vpop.permute.xlu1 %1563  ;;  %v13463_v21 = vrot.slane %v8277_v0, %v8230_v19  ;;  %v839_v40 = vadd.f32 %v835_v23, %v779_v61  ;;  %v13464_v7 = vrot.slane %v8277_v0, %v8224_v2  ;;  %v13466_v41 = vrot.slane %v8290_v49, %v8228_v14 }
 0x1ee   : > { %v882_v34 = vmul.f32 %v13462_v62, %v856_v47  ;;  %v8692_v47 = vld [vmem:[%s13230_s3 + $0x45] ss:$8 sm:$0xf]  ;;  %v837_v11 = vadd.f32 %v833_v13, %v777_v16  ;;  %v840_v48 = vadd.f32 %v836_v39, %v780_v63  ;;  %v917_v61 = vsel %vm913_vm7, %v8139_v36, %v8131_v30  ;;  %v8725_v30 = vld [vmem:[%s13230_s3 + $0x46] ss:$8 sm:$0xf] }
 0x1ef   : > { %v883_v27 = vmul.f32 %v13463_v21, %v855_v43  ;;  %v881_v1 = vmul.f32 %v13464_v7, %v857_v22  ;;  %v13465_v43 = vrot.slane %v8277_v0, %v8226_v9  ;;  %v915_v21 = vsel %vm913_vm7, %v8133_v31, %v8137_v35  ;;  %v13541_v31 = vld [vmem:[#allocation41_spill] sm:$0xff] }
 0x1f0   : > { %v942_v50 = vmul.f32 %v13466_v41, %v916_v38  ;;  %v886_v23 = vadd.f32 %v882_v34, %v838_v52  ;;  %v13467_v39 = vrot.slane %v8290_v49, %v8230_v19  ;;  %v914_v52 = vsel %vm913_vm7, %v8137_v35, %v8139_v36  ;;  %v13508_v34 = vld [vmem:[#allocation18_spill] sm:$0xff] }
 0x1f1   : > { %v884_v62 = vmul.f32 %v13465_v43, %v854_v37  ;;  %v8712_v0 = vpop.permute.xlu0 %1565  ;;  %v8714_v37 = vpop.permute.xlu1 %1567  ;;  %v887_v13 = vadd.f32 %v883_v27, %v839_v40  ;;  %v885_v38 = vadd.f32 %v881_v1, %v837_v11  ;;  %v13468_v7 = vrot.slane %v8290_v49, %v8224_v2 }
 0x1f2   : > { %v943_v22 = vmul.f32 %v13467_v39, %v915_v21  ;;  %v964_v27 = vsel %vm961_vm8, %v8143_v44, %v8145_v45  ;;  %v946_v40 = vadd.f32 %v942_v50, %v886_v23  ;;  %v963_v35 = vsel %vm961_vm8, %v8145_v45, %v8149_v53  ;;  %v13506_v21 = vld [vmem:[#allocation17_spill] sm:$0xff] }
 0x1f3   : > { %v888_v41 = vadd.f32 %v884_v62, %v840_v48  ;;  %v941_v43 = vmul.f32 %v13468_v7, %v917_v61  ;;  %v965_v36 = vsel %vm961_vm8, %v8151_v54, %v8143_v44  ;;  %v13469_v1 = vrot.slane %v8290_v49, %v8226_v9  ;;  %v13483_v44 = vld [vmem:[#allocation7_spill] sm:$0xff] }
 0x1f4   : > { %v962_v50 = vsel %vm961_vm8, %v8149_v53, %v8151_v54  ;;  %v947_v61 = vadd.f32 %v943_v22, %v887_v13  ;;  %v13470_v23 = vrot.slane %v8309_v12, %v8228_v14  ;;  %v1024_v49 = vsel %vm1021_vm9, %v8155_v59, %v8157_v60  ;;  %v8781_v54 = vld [vmem:[%s13230_s3 + $0x47] ss:$8 sm:$0xf] }
 0x1f5   : > { %v8751_v48 = vpop.permute.xlu0 %1620  ;;  %v944_v62 = vmul.f32 %v13469_v1, %v914_v52  ;;  %v8762_v45 = vpop.permute.xlu1 %1622  ;;  %13471 = vst [vmem:[#allocation44_spill] sm:$0xff] %v8781_v54  ;;  %v945_v13 = vadd.f32 %v941_v43, %v885_v38  ;;  %v13472_v22 = vrot.slane %v8309_v12, %v8230_v19  ;;  %v13473_v7 = vrot.slane %v8309_v12, %v8224_v2  ;;  %v13548_v54 = vld [vmem:[#allocation42_spill] sm:$0xff] }
 0x1f6   : > { %v990_v39 = vmul.f32 %v13470_v23, %v964_v27  ;;  %v1023_v1 = vsel %vm1021_vm9, %v8157_v60, %v8161_v3  ;;  %v13474_v23 = vrot.slane %v8309_v12, %v8226_v9  ;;  %v1022_v38 = vsel %vm1021_vm9, %v8161_v3, %v8163_v8 }
 0x1f7   : > { %v991_v52 = vmul.f32 %v13472_v22, %v963_v35  ;;  %v989_v27 = vmul.f32 %v13473_v7, %v965_v36  ;;  %v1025_v43 = vsel %vm1021_vm9, %v8163_v8, %v8155_v59  ;;  %v1072_v35 = vsel %vm13343_vm10, %v8167_v17, %v8169_v18 }
 0x1f8   : > { %v992_v53 = vmul.f32 %v13474_v23, %v962_v50  ;;  %v948_v12 = vadd.f32 %v944_v62, %v888_v41  ;;  %v13475_v36 = vrot.slane %v8322_v29, %v8228_v14  ;;  %v1071_v3 = vsel %vm13343_vm10, %v8169_v18, %v8173_v24 }
 0x1f9   : > { %v8809_v60 = vpop.permute.xlu0 %1624  ;;  %v8818_v59 = vpop.permute.xlu1 %1626  ;;  %v994_v22 = vadd.f32 %v990_v39, %v946_v40  ;;  %v13476_v7 = vrot.slane %v8322_v29, %v8230_v19  ;;  %v1070_v41 = vsel %vm13343_vm10, %v8173_v24, %v8175_v25  ;;  %v1073_v18 = vsel %vm13343_vm10, %v8175_v25, %v8167_v17 }
 0x1fa   : > { %v1050_v50 = vmul.f32 %v13475_v36, %v1024_v49  ;;  %v13477_v62 = vrot.slane %v8322_v29, %v8224_v2  ;;  %v13478_v39 = vrot.slane %v8322_v29, %v8226_v9  ;;  %v1132_v24 = vsel %vm13342_vm11, %v8179_v32, %v8181_v33 }
 0x1fb   : > { %v1051_v23 = vmul.f32 %v13476_v7, %v1023_v1  ;;  %v13479_v1 = vrot.slane %v8327_v46, %v8228_v14  ;;  %v995_v17 = vadd.f32 %v991_v52, %v947_v61  ;;  %v993_v25 = vadd.f32 %v989_v27, %v945_v13 }
 0x1fc   : > { %v1049_v40 = vmul.f32 %v13477_v62, %v1025_v43  ;;  %v1052_v49 = vmul.f32 %v13478_v39, %v1022_v38  ;;  %v996_v7 = vadd.f32 %v992_v53, %v948_v12  ;;  %v13480_v8 = vrot.slane %v8327_v46, %v8230_v19  ;;  %v13499_v12 = vld [vmem:[#allocation19_spill] sm:$0xff] }
 0x1fd   : > { %v1098_v36 = vmul.f32 %v13479_v1, %v1072_v35  ;;  %v8850_v62 = vpop.permute.xlu0 %1667  ;;  %v1054_v29 = vadd.f32 %v1050_v50, %v994_v22  ;;  %v13481_v38 = vrot.slane %v8327_v46, %v8224_v2  ;;  %v13482_v35 = vrot.slane %v8327_v46, %v8226_v9  ;;  %v8862_v53 = vpop.permute.xlu1 %1669  ;;  %v13485_v22 = vld [vmem:[#allocation8_spill] sm:$0xff] }
 0x1fe   : > { %v1099_v43 = vmul.f32 %v13480_v8, %v1071_v3  ;;  %v1133_v61 = vsel %vm13342_vm11, %v13483_v44, %v8179_v32  ;;  %v1055_v13 = vadd.f32 %v1051_v23, %v995_v17  ;;  %v13484_v52 = vrot.slane %v8367_v55, %v8228_v14  ;;  %v13487_v23 = vld [vmem:[#allocation6_spill] sm:$0xff]  ;;  %v13498_v50 = vld [vmem:[#allocation16_spill] sm:$0xff] }
 0x1ff   : > { %v1097_v39 = vmul.f32 %v13481_v38, %v1073_v18  ;;  %v1100_v1 = vmul.f32 %v13482_v35, %v1070_v41  ;;  %v1053_v46 = vadd.f32 %v1049_v40, %v993_v25  ;;  %v1056_v3 = vadd.f32 %v1052_v49, %v996_v7  ;;  %v13486_v41 = vld [vmem:[#allocation11_spill] sm:$0xff]  ;;  %v13490_v38 = vld [vmem:[#allocation12_spill] sm:$0xff] }
 0x200   : > { %v1158_v27 = vmul.f32 %v13484_v52, %v1132_v24  ;;  %v1102_v8 = vadd.f32 %v1098_v36, %v1054_v29  ;;  %v1181_v32 = vsel %vm13283_vm12, %v13486_v41, %v13485_v22  ;;  %v1103_v18 = vadd.f32 %v1099_v43, %v1055_v13  ;;  %v13489_v29 = vld [vmem:[#allocation9_spill] sm:$0xff]  ;;  %v13493_v52 = vld [vmem:[#allocation30_spill] sm:$0xff] }
 0x201   : > { %v1131_v24 = vsel %vm13342_vm11, %v8181_v33, %v13487_v23  ;;  %v1130_v17 = vsel %vm13342_vm11, %v13487_v23, %v13483_v44  ;;  %v13488_v40 = vrot.slane %v8367_v55, %v8224_v2  ;;  %v8886_v36 = vpop.permute.xlu0 %1671  ;;  %v1101_v25 = vadd.f32 %v1097_v39, %v1053_v46  ;;  %v13491_v33 = vld [vmem:[#allocation15_spill] sm:$0xff]  ;;  %v8897_v44 = vpop.permute.xlu1 %1673 }
 0x202   : > { %v1104_v7 = vadd.f32 %v1100_v1, %v1056_v3  ;;  %v1180_v43 = vsel %vm13283_vm12, %v13485_v22, %v13489_v29  ;;  %v1241_v35 = vsel %vm13284_vm13, %v13491_v33, %v13490_v38  ;;  %v1162_v13 = vadd.f32 %v1158_v27, %v1102_v8 }
 0x203   : > { %v1157_v49 = vmul.f32 %v13488_v40, %v1133_v61  ;;  %v13492_v61 = vld [vmem:[#allocation10_spill] sm:$0xff]  ;;  %v13494_v46 = vrot.slane %v13493_v52, %v8224_v2  ;;  %v13495_v22 = vrot.slane %v8367_v55, %v8230_v19  ;;  %v13496_v27 = vrot.slane %v8367_v55, %v8226_v9  ;;  %v13497_v40 = vld [vmem:[#allocation13_spill] sm:$0xff] }
 0x204   : > { %v1179_v39 = vsel %vm13283_vm12, %v13489_v29, %v13492_v61  ;;  %v1178_v1 = vsel %vm13283_vm12, %v13492_v61, %v13486_v41  ;;  %v1240_v29 = vsel %vm13284_vm13, %v13490_v38, %v13497_v40  ;;  %v1289_v41 = vsel %vm13285_vm14, %v13499_v12, %v13498_v50 }
 0x205   : > { %v1205_v3 = vmul.f32 %v13494_v46, %v1181_v32  ;;  %v1159_v23 = vmul.f32 %v13495_v22, %v1131_v24  ;;  %v1160_v8 = vmul.f32 %v13496_v27, %v1130_v17  ;;  %v1161_v61 = vadd.f32 %v1157_v49, %v1101_v25  ;;  %v13501_v24 = vld [vmem:[#allocation14_spill] sm:$0xff]  ;;  %v13502_v17 = vld [vmem:[#allocation31_spill] sm:$0xff]  ;;  %v8935_v38 = vpop.permute.xlu0 %1726 }
 0x206   : > { %v13500_v32 = vrot.slane %v13493_v52, %v8228_v14  ;;  %v1239_v55 = vsel %vm13284_vm13, %v13497_v40, %v13501_v24  ;;  %v13503_v22 = vrot.slane %v13502_v17, %v8224_v2  ;;  %vm13352_vm12 = vcmp.lt.s32.totalorder %v8246_v6, 121 }
 0x207   : > { %v13504_v49 = vrot.slane %v13493_v52, %v8230_v19  ;;  %v1238_v40 = vsel %vm13284_vm13, %v13501_v24, %v13491_v33  ;;  %v1209_v11 = vadd.f32 %v1205_v3, %v1161_v61  ;;  %v1164_v3 = vadd.f32 %v1160_v8, %v1104_v7 }
 0x208   : > { %v1206_v46 = vmul.f32 %v13500_v32, %v1180_v43  ;;  %v1265_v27 = vmul.f32 %v13503_v22, %v1241_v35  ;;  %v13505_v43 = vrot.slane %v13493_v52, %v8226_v9  ;;  %v1288_v35 = vsel %vm13285_vm14, %v13498_v50, %v13506_v21  ;;  %v8951_v22 = vpop.permute.xlu1 %1728  ;;  %v13509_v52 = vld [vmem:[#allocation32_spill] sm:$0xff] }
 0x209   : > { %v1207_v25 = vmul.f32 %v13504_v49, %v1179_v39  ;;  %v13507_v39 = vrot.slane %v13502_v17, %v8228_v14  ;;  %v13510_v33 = vrot.slane %v13509_v52, %v8224_v2  ;;  %v8966_v50 = vld [vmem:[%s13230_s3 + $0x60] ss:$8 sm:$0xf]  ;;  %v13512_v61 = vrot.slane %v13502_v17, %v8230_v19 }
 0x20a   : > { %v1208_v32 = vmul.f32 %v13505_v43, %v1178_v1  ;;  %v1287_v1 = vsel %vm13285_vm14, %v13506_v21, %v13508_v34  ;;  %13511 = vst [vmem:[#allocation7_spill] sm:$0xff] %v8966_v50  ;;  %v1163_v43 = vadd.f32 %v1159_v23, %v1103_v18  ;;  %v1286_v21 = vsel %vm13285_vm14, %v13508_v34, %v13499_v12  ;;  %v8982_v23 = vpop.permute.xlu0 %1730 }
 0x20b   : > { %v1266_v49 = vmul.f32 %v13507_v39, %v1240_v29  ;;  %v1313_v24 = vmul.f32 %v13510_v33, %v1289_v41  ;;  %v1267_v29 = vmul.f32 %v13512_v61, %v1239_v55  ;;  %vm13351_vm13 = vcmp.lt.s32.totalorder %v8246_v6, 120 }
 0x20c   : > { %v1210_v39 = vadd.f32 %v1206_v46, %v1162_v13  ;;  %v13513_v41 = vrot.slane %v13502_v17, %v8226_v9  ;;  %v1269_v63 = vadd.f32 %v1265_v27, %v1209_v11  ;;  %v13514_v18 = vrot.slane %v13509_v52, %v8228_v14  ;;  %v8987_v34 = vpop.permute.xlu1 %1732 }
 0x20d   : > { %v1211_v8 = vadd.f32 %v1207_v25, %v1163_v43  ;;  %v13515_v55 = vrot.slane %v13509_v52, %v8230_v19  ;;  %v1212_v11 = vadd.f32 %v1208_v32, %v1164_v3  ;;  %v13516_v17 = vrot.slane %v13509_v52, %v8226_v9  ;;  %v9000_v25 = vld [vmem:[%s13230_s3 + $0x61] ss:$8 sm:$0xf] }
 0x20e   : > { %v1268_v33 = vmul.f32 %v13513_v41, %v1238_v40  ;;  %v1314_v7 = vmul.f32 %v13514_v18, %v1288_v35  ;;  %v1270_v46 = vadd.f32 %v1266_v49, %v1210_v39  ;;  %v1317_v40 = vadd.f32 %v1313_v24, %v1269_v63  ;;  %13517 = vst [vmem:[#allocation8_spill] sm:$0xff] %v9000_v25  ;;  %v13518_v63 = vld [vmem:[#allocation21_spill] sm:$0xff]  ;;  %v13519_v24 = vld [vmem:[#allocation20_spill] sm:$0xff]  ;;  %v9016_v39 = vpop.permute.xlu0 %1773 }
 0x20f   : > { %v1315_v61 = vmul.f32 %v13515_v55, %v1287_v1  ;;  %v1316_v27 = vmul.f32 %v13516_v17, %v1286_v21  ;;  %vm13350_vm14 = vcmp.lt.s32.totalorder %v8246_v6, 119  ;;  %v1271_v35 = vadd.f32 %v1267_v29, %v1211_v8  ;;  %v13520_v21 = vld [vmem:[#allocation23_spill] sm:$0xff]  ;;  %v13530_v8 = vld [vmem:[#allocation33_spill] sm:$0xff] }
 0x210   : > { %v1272_v52 = vadd.f32 %v1268_v33, %v1212_v11  ;;  %v1318_v43 = vadd.f32 %v1314_v7, %v1270_v46  ;;  %v1356_v3 = vsel %vm1353_vm15, %v13519_v24, %v13518_v63  ;;  %v1355_v29 = vsel %vm1353_vm15, %v13518_v63, %v13520_v21  ;;  %v9018_v18 = vpop.permute.xlu1 %1775  ;;  %v9029_v55 = vld [vmem:[%s13230_s3 + $0x62] ss:$8 sm:$0xf] }
 0x211   : > { %v1319_v41 = vadd.f32 %v1315_v61, %v1271_v35  ;;  %13521 = vst [vmem:[#allocation11_spill] sm:$0xff] %v9029_v55  ;;  %v13522_v46 = vld [vmem:[#allocation22_spill] sm:$0xff]  ;;  %v13524_v35 = vld [vmem:[#allocation24_spill] sm:$0xff]  ;;  %v13525_v7 = vld [vmem:[#allocation35_spill] sm:$0xff]  ;;  %v13543_v56 = vrot.slane %v13542_v42, 4 }
 0x212   : > { %v1320_v11 = vadd.f32 %v1316_v27, %v1272_v52  ;;  %v13523_v17 = vrot.slane %v13522_v46, 4  ;;  %v1354_v63 = vsel %vm1353_vm15, %v13520_v21, %v13524_v35  ;;  %v1357_v49 = vsel %vm1353_vm15, %v13524_v35, %v13519_v24  ;;  %v13528_v46 = vld [vmem:[#allocation29_spill] sm:$0xff]  ;;  %v9057_v13 = vpop.permute.xlu0 %1777 }
 0x213   : > { %v13526_v32 = vrot.slane %v13525_v7, %v8224_v2  ;;  %v13527_v27 = vrot.slane %v13525_v7, %v8228_v14  ;;  %v1415_v21 = vsel %vm13352_vm12, %v13528_v46, %v13530_v8  ;;  %v13531_v1 = vld [vmem:[#allocation25_spill] sm:$0xff]  ;;  %v1339_v58 = vadd.f32 %v13543_v56, %v1319_v41 }
 0x214   : > { %v1337_v61 = vadd.f32 %v13523_v17, %v1317_v40  ;;  %v13529_v40 = vld [vmem:[#allocation28_spill] sm:$0xff]  ;;  %v13532_v24 = vrot.slane %v13531_v1, 4  ;;  %v13549_v41 = vld [vmem:[#allocation37_spill] sm:$0xff] }
 0x215   : > { %v1381_v33 = vmul.f32 %v13526_v32, %v1356_v3  ;;  %v1382_v52 = vmul.f32 %v13527_v27, %v1355_v29  ;;  %v1416_v17 = vsel %vm13352_vm12, %v13529_v40, %v13528_v46  ;;  %v13533_v27 = vrot.slane %v13525_v7, %v8230_v19  ;;  %v9079_v32 = vpop.permute.xlu1 %1779  ;;  %v13536_v29 = vld [vmem:[#allocation36_spill] sm:$0xff] }
 0x216   : > { %v1338_v35 = vadd.f32 %v13532_v24, %v1318_v43  ;;  %v13534_v46 = vrot.slane %v13525_v7, %v8226_v9  ;;  %v13535_v43 = vld [vmem:[#allocation34_spill] sm:$0xff]  ;;  %v13537_v16 = vrot.slane %v13536_v29, %v8224_v2  ;;  %v13538_v7 = vrot.slane %v13536_v29, %v8228_v14  ;;  %v9113_v42 = vpop.permute.xlu0 %1832 }
 0x217   : > { %v1383_v12 = vmul.f32 %v13533_v27, %v1354_v63  ;;  %v1414_v24 = vsel %vm13352_vm12, %v13530_v8, %v13535_v43  ;;  %v1417_v3 = vsel %vm13352_vm12, %v13535_v43, %v13529_v40  ;;  %v13539_v27 = vld [vmem:[#allocation39_spill] sm:$0xff]  ;;  %v1385_v43 = vadd.f32 %v1381_v33, %v1337_v61 }
 0x218   : > { %v1384_v1 = vmul.f32 %v13534_v46, %v1357_v49  ;;  %v1441_v63 = vmul.f32 %v13537_v16, %v1416_v17  ;;  %v1442_v49 = vmul.f32 %v13538_v7, %v1415_v21  ;;  %v13540_v46 = vld [vmem:[#allocation38_spill] sm:$0xff]  ;;  %v1463_v40 = vsel %vm13351_vm13, %v13539_v27, %v13541_v31  ;;  %v13544_v16 = vld [vmem:[#allocation27_spill] sm:$0xff] }
 0x219   : > { %v1464_v8 = vsel %vm13351_vm13, %v13540_v46, %v13539_v27  ;;  %v1386_v15 = vadd.f32 %v1382_v52, %v1338_v35  ;;  %v13545_v17 = vrot.slane %v13544_v16, 4  ;;  %v13546_v21 = vrot.slane %v13536_v29, %v8230_v19  ;;  %v13552_v35 = vld [vmem:[#allocation43_spill] sm:$0xff] }
 0x21a   : > { %v13547_v25 = vrot.slane %v13536_v29, %v8226_v9  ;;  %v1462_v33 = vsel %vm13351_vm13, %v13541_v31, %v13548_v54  ;;  %v1465_v56 = vsel %vm13351_vm13, %v13548_v54, %v13540_v46  ;;  %v13551_v52 = vrot.slane %v13549_v41, %v8228_v14 }
 0x21b   : > { %v1340_v55 = vadd.f32 %v13545_v17, %v1320_v11  ;;  %v1443_v7 = vmul.f32 %v13546_v21, %v1414_v24  ;;  %v13550_v11 = vrot.slane %v13549_v41, %v8224_v2  ;;  %v1524_v31 = vsel %vm13350_vm14, %v13552_v35, %v8577_v28 }
 0x21c   : > { %v1444_v50 = vmul.f32 %v13547_v25, %v1417_v3  ;;  %v1490_v25 = vmul.f32 %v13551_v52, %v1463_v40  ;;  %v1523_v54 = vsel %vm13350_vm14, %v8577_v28, %v8612_v20  ;;  %v9129_v3 = vpop.permute.xlu1 %1834  ;;  %v1387_v29 = vadd.f32 %v1383_v12, %v1339_v58  ;;  %v13555_v58 = vld [vmem:[#allocation40_spill] sm:$0xff] }
 0x21d   : > { %v1489_v61 = vmul.f32 %v13550_v11, %v1464_v8  ;;  %v1388_v24 = vadd.f32 %v1384_v1, %v1340_v55  ;;  %v1445_v27 = vadd.f32 %v1441_v63, %v1385_v43  ;;  %v1446_v46 = vadd.f32 %v1442_v49, %v1386_v15  ;;  %v9159_v49 = vpop.permute.xlu0 %1836 }
 0x21e   : > { %v13553_v8 = vrot.slane %v13549_v41, %v8230_v19  ;;  %v13554_v16 = vrot.slane %v13549_v41, %v8226_v9  ;;  %v1522_v21 = vsel %vm13350_vm14, %v8612_v20, %v8627_v5  ;;  %v1525_v28 = vsel %vm13350_vm14, %v8627_v5, %v13552_v35 }
 0x21f   : > { %v13556_v15 = vrot.slane %v13555_v58, %v8224_v2  ;;  %v13557_v55 = vrot.slane %v13555_v58, %v8228_v14  ;;  %v1571_v63 = vsel %vm638_vm2, %v8666_v51, %v8676_v26  ;;  %v1570_v20 = vsel %vm638_vm2, %v8676_v26, %v8712_v0 }
 0x220   : > { %v1491_v40 = vmul.f32 %v13553_v8, %v1462_v33  ;;  %v1492_v17 = vmul.f32 %v13554_v16, %v1465_v56  ;;  %v1447_v5 = vadd.f32 %v1443_v7, %v1387_v29  ;;  %v1448_v43 = vadd.f32 %v1444_v50, %v1388_v24  ;;  %v9161_v41 = vpop.permute.xlu1 %1838 }
 0x221   : > { %v1549_v12 = vmul.f32 %v13556_v15, %v1524_v31  ;;  %v1550_v1 = vmul.f32 %v13557_v55, %v1523_v54  ;;  %v1493_v33 = vadd.f32 %v1489_v61, %v1445_v27  ;;  %v1494_v56 = vadd.f32 %v1490_v25, %v1446_v46  ;;  %v9191_v46 = vpop.permute.xlu0 %1879 }
 0x222   : > { %v13558_v11 = vrot.slane %v13555_v58, %v8230_v19  ;;  %v13559_v35 = vrot.slane %v13555_v58, %v8226_v9  ;;  %v1569_v26 = vsel %vm638_vm2, %v8712_v0, %v8714_v37  ;;  %v1572_v50 = vsel %vm638_vm2, %v8714_v37, %v8666_v51 }
 0x223   : > { %v13560_v7 = vrot.slane %v8547_v57, %v8224_v2  ;;  %v13561_v25 = vrot.slane %v8547_v57, %v8228_v14  ;;  %v1630_v29 = vsel %vm697_vm3, %v8751_v48, %v8762_v45  ;;  %v1629_v0 = vsel %vm697_vm3, %v8762_v45, %v8809_v60 }
 0x224   : > { %v1551_v52 = vmul.f32 %v13558_v11, %v1522_v21  ;;  %v1552_v31 = vmul.f32 %v13559_v35, %v1525_v28  ;;  %v1495_v24 = vadd.f32 %v1491_v40, %v1447_v5  ;;  %v1496_v51 = vadd.f32 %v1492_v17, %v1448_v43  ;;  %v1882_v40 = vpop.permute.xlu1 %1881 }
 0x225   : > { %v1596_v61 = vmul.f32 %v13560_v7, %v1571_v63  ;;  %v1597_v54 = vmul.f32 %v13561_v25, %v1570_v20  ;;  %v1553_v37 = vadd.f32 %v1549_v12, %v1493_v33  ;;  %v1554_v27 = vadd.f32 %v1550_v1, %v1494_v56  ;;  %v1884_v11 = vpop.permute.xlu0 %1883 }
 0x226   : > { %v13562_v8 = vrot.slane %v8547_v57, %v8230_v19  ;;  %v13563_v21 = vrot.slane %v8547_v57, %v8226_v9  ;;  %v1628_v58 = vsel %vm697_vm3, %v8809_v60, %v8818_v59  ;;  %v1631_v45 = vsel %vm697_vm3, %v8818_v59, %v8751_v48 }
 0x227   : > { %v13564_v17 = vrot.slane %v8588_v4, %v8224_v2  ;;  %v13565_v12 = vrot.slane %v8588_v4, %v8228_v14  ;;  %v1677_v55 = vsel %vm745_vm4, %v8850_v62, %v8862_v53  ;;  %v1676_v60 = vsel %vm745_vm4, %v8862_v53, %v8886_v36 }
 0x228   : > { %v1598_v16 = vmul.f32 %v13562_v8, %v1569_v26  ;;  %v1599_v28 = vmul.f32 %v13563_v21, %v1572_v50  ;;  %v1555_v48 = vadd.f32 %v1551_v52, %v1495_v24  ;;  %v1556_v59 = vadd.f32 %v1552_v31, %v1496_v51 }
 0x229   : > { %v1655_v15 = vmul.f32 %v13564_v17, %v1630_v29  ;;  %v1656_v57 = vmul.f32 %v13565_v12, %v1629_v0  ;;  %v1600_v1 = vadd.f32 %v1596_v61, %v1553_v37  ;;  %v1601_v63 = vadd.f32 %v1597_v54, %v1554_v27 }
 0x22a   : > { %v13566_v20 = vrot.slane %v8588_v4, %v8230_v19  ;;  %v13567_v43 = vrot.slane %v8588_v4, %v8226_v9  ;;  %v1675_v56 = vsel %vm745_vm4, %v8886_v36, %v8897_v44  ;;  %v1678_v53 = vsel %vm745_vm4, %v8897_v44, %v8850_v62  ;;  %v1886_v62 = vpop.permute.xlu1 %1885 }
 0x22b   : > { %v13568_v52 = vrot.slane %v8642_v10, %v8224_v2  ;;  %v13569_v31 = vrot.slane %v8642_v10, %v8228_v14  ;;  %v1736_v26 = vsel %vm805_vm5, %v8935_v38, %v8951_v22  ;;  %v1735_v36 = vsel %vm805_vm5, %v8951_v22, %v8982_v23 }
 0x22c   : > { %v1657_v5 = vmul.f32 %v13566_v20, %v1628_v58  ;;  %v1658_v33 = vmul.f32 %v13567_v43, %v1631_v45  ;;  %v1602_v44 = vadd.f32 %v1598_v16, %v1555_v48  ;;  %v1603_v50 = vadd.f32 %v1599_v28, %v1556_v59  ;;  %v1939_v16 = vpop.permute.xlu0 %1938 }
 0x22d   : > { %v1702_v35 = vmul.f32 %v13568_v52, %v1677_v55  ;;  %v1703_v4 = vmul.f32 %v13569_v31, %v1676_v60  ;;  %v1659_v7 = vadd.f32 %v1655_v15, %v1600_v1  ;;  %v1660_v61 = vadd.f32 %v1656_v57, %v1601_v63 }
 0x22e   : > { %v13570_v25 = vrot.slane %v8642_v10, %v8230_v19  ;;  %v13571_v29 = vrot.slane %v8642_v10, %v8226_v9  ;;  %v1734_v24 = vsel %vm805_vm5, %v8982_v23, %v8987_v34  ;;  %v1737_v22 = vsel %vm805_vm5, %v8987_v34, %v8935_v38  ;;  %v1941_v58 = vpop.permute.xlu1 %1940 }
 0x22f   : > { %v13572_v51 = vrot.slane %v8692_v47, %v8224_v2  ;;  %v13573_v27 = vrot.slane %v8692_v47, %v8228_v14  ;;  %v1783_v10 = vsel %vm853_vm6, %v9016_v39, %v9018_v18  ;;  %v1782_v23 = vsel %vm853_vm6, %v9018_v18, %v9057_v13 }
 0x230   : > { %v1704_v54 = vmul.f32 %v13570_v25, %v1675_v56  ;;  %v1705_v0 = vmul.f32 %v13571_v29, %v1678_v53  ;;  %v1661_v38 = vadd.f32 %v1657_v5, %v1602_v44  ;;  %v1662_v34 = vadd.f32 %v1658_v33, %v1603_v50  ;;  %v1943_v53 = vpop.permute.xlu0 %1942 }
 0x231   : > { %v1761_v37 = vmul.f32 %v13572_v51, %v1736_v26  ;;  %v1762_v8 = vmul.f32 %v13573_v27, %v1735_v36  ;;  %v1706_v21 = vadd.f32 %v1702_v35, %v1659_v7  ;;  %v1707_v28 = vadd.f32 %v1703_v4, %v1660_v61  ;;  %v13580_v35 = vld [vmem:[#allocation44_spill] sm:$0xff] }
 0x232   : > { %v13574_v45 = vrot.slane %v8692_v47, %v8230_v19  ;;  %v13575_v15 = vrot.slane %v8692_v47, %v8226_v9  ;;  %v1781_v57 = vsel %vm853_vm6, %v9057_v13, %v9079_v32  ;;  %v1784_v18 = vsel %vm853_vm6, %v9079_v32, %v9016_v39  ;;  %v1945_v52 = vpop.permute.xlu1 %1944 }
 0x233   : > { %v13576_v55 = vrot.slane %v8725_v30, %v8224_v2  ;;  %v13577_v48 = vrot.slane %v8725_v30, %v8228_v14  ;;  %v1842_v47 = vsel %vm913_vm7, %v9113_v42, %v9129_v3  ;;  %v1841_v13 = vsel %vm913_vm7, %v9129_v3, %v9159_v49 }
 0x234   : > { %v1763_v17 = vmul.f32 %v13574_v45, %v1734_v24  ;;  %v1764_v12 = vmul.f32 %v13575_v15, %v1737_v22  ;;  %v1708_v1 = vadd.f32 %v1704_v54, %v1661_v38  ;;  %v1709_v39 = vadd.f32 %v1705_v0, %v1662_v34  ;;  %v13585_v24 = vld [vmem:[#allocation7_spill] sm:$0xff] }
 0x235   : > { %v1808_v60 = vmul.f32 %v13576_v55, %v1783_v10  ;;  %v1809_v59 = vmul.f32 %v13577_v48, %v1782_v23  ;;  %v1765_v32 = vadd.f32 %v1761_v37, %v1706_v21  ;;  %v1766_v63 = vadd.f32 %v1762_v8, %v1707_v28  ;;  %v13588_v28 = vld [vmem:[#allocation8_spill] sm:$0xff] }
 0x236   : > { %v13578_v20 = vrot.slane %v8725_v30, %v8230_v19  ;;  %v13579_v43 = vrot.slane %v8725_v30, %v8226_v9  ;;  %v1840_v56 = vsel %vm913_vm7, %v9159_v49, %v9161_v41  ;;  %v1843_v3 = vsel %vm913_vm7, %v9161_v41, %v9113_v42  ;;  %v1986_v10 = vpop.permute.xlu1 %1985 }
 0x237   : > { %v13581_v31 = vrot.slane %v13580_v35, %v8224_v2  ;;  %v13582_v30 = vrot.slane %v13580_v35, %v8228_v14  ;;  %v1889_v36 = vsel %vm961_vm8, %v9191_v46, %v1882_v40  ;;  %v1888_v49 = vsel %vm961_vm8, %v1882_v40, %v1884_v11 }
 0x238   : > { %v1810_v5 = vmul.f32 %v13578_v20, %v1781_v57  ;;  %v1811_v33 = vmul.f32 %v13579_v43, %v1784_v18  ;;  %v1767_v44 = vadd.f32 %v1763_v17, %v1708_v1  ;;  %v1768_v50 = vadd.f32 %v1764_v12, %v1709_v39 }
 0x239   : > { %v1867_v4 = vmul.f32 %v13581_v31, %v1842_v47  ;;  %v1868_v26 = vmul.f32 %v13582_v30, %v1841_v13  ;;  %v1812_v42 = vadd.f32 %v1808_v60, %v1765_v32  ;;  %v1813_v41 = vadd.f32 %v1809_v59, %v1766_v63  ;;  %v13593_v60 = vld [vmem:[#allocation11_spill] sm:$0xff] }
 0x23a   : > { %v13583_v7 = vrot.slane %v13580_v35, %v8230_v19  ;;  %v13584_v25 = vrot.slane %v13580_v35, %v8226_v9  ;;  %v1948_v29 = vsel %vm1021_vm9, %v1939_v16, %v1941_v58  ;;  %v1947_v0 = vsel %vm1021_vm9, %v1941_v58, %v1943_v53 }
 0x23b   : > { %v13586_v40 = vrot.slane %v13585_v24, %v8224_v2  ;;  %v13587_v51 = vrot.slane %v13585_v24, %v8228_v14  ;;  %v1887_v27 = vsel %vm961_vm8, %v1884_v11, %v1886_v62  ;;  %v1890_v8 = vsel %vm961_vm8, %v1886_v62, %v9191_v46  ;;  %v1990_v46 = vpop.permute.xlu0 %1989 }
 0x23c   : > { %v1869_v61 = vmul.f32 %v13583_v7, %v1840_v56  ;;  %v1870_v54 = vmul.f32 %v13584_v25, %v1843_v3  ;;  %v1814_v23 = vadd.f32 %v1810_v5, %v1767_v44  ;;  %v1815_v38 = vadd.f32 %v1811_v33, %v1768_v50  ;;  %v13598_v7 = vld [vmem:[#allocation5_spill] sm:$0xff] }
 0x23d   : > { %v1914_v22 = vmul.f32 %v13586_v40, %v1889_v36  ;;  %v1915_v37 = vmul.f32 %v13587_v51, %v1888_v49  ;;  %v1871_v34 = vadd.f32 %v1867_v4, %v1812_v42  ;;  %v1872_v21 = vadd.f32 %v1868_v26, %v1813_v41  ;;  %v7573_v51 = vld [vmem:[%s13228_s1 + $0x70] sm:$0xff] }
 0x23e   : > { %v13589_v58 = vrot.slane %v13588_v28, %v8224_v2  ;;  %v13590_v17 = vrot.slane %v13588_v28, %v8228_v14  ;;  %v1946_v11 = vsel %vm1021_vm9, %v1943_v53, %v1945_v52  ;;  %v1949_v12 = vsel %vm1021_vm9, %v1945_v52, %v1939_v16  ;;  %v1988_v16 = vpop.permute.xlu1 %1987 }
 0x23f   : > { %v13591_v62 = vrot.slane %v13585_v24, %v8230_v19  ;;  %v13592_v18 = vrot.slane %v13585_v24, %v8226_v9  ;;  %v2011_v48 = vrot.slane %v13593_v60, %v8230_v19  ;;  %v2015_v59 = vrot.slane %v13593_v60, %v8226_v9 }
 0x240   : > { %v1973_v45 = vmul.f32 %v13589_v58, %v1948_v29  ;;  %v1974_v15 = vmul.f32 %v13590_v17, %v1947_v0  ;;  %v1873_v47 = vadd.f32 %v1869_v61, %v1814_v23  ;;  %v1874_v13 = vadd.f32 %v1870_v54, %v1815_v38  ;;  %v7574_v38 = vld [vmem:[%s13228_s1 + $0x78] sm:$0xff]  ;;  %v7580_v17 = vld [vmem:[%s13228_s1 + $0xa8] sm:$0xff] }
 0x241   : > { %v1916_v57 = vmul.f32 %v13591_v62, %v1887_v27  ;;  %v1917_v55 = vmul.f32 %v13592_v18, %v1890_v8  ;;  %v1918_v1 = vadd.f32 %v1914_v22, %v1871_v34  ;;  %v1919_v39 = vadd.f32 %v1915_v37, %v1872_v21  ;;  %v7575_v34 = vld [vmem:[%s13228_s1 + $0x80] sm:$0xff]  ;;  %v7576_v21 = vld [vmem:[%s13228_s1 + $0x88] sm:$0xff]  ;;  %v7578_v58 = vld [vmem:[%s13228_s1 + $0x98] sm:$0xff] }
 0x242   : > { %v13594_v32 = vrot.slane %v13588_v28, %v8230_v19  ;;  %v13595_v20 = vrot.slane %v13588_v28, %v8226_v9  ;;  %v1994_v43 = vsel %vm13343_vm10, %v1988_v16, %v1990_v46  ;;  %v1995_v33 = vsel %vm13343_vm10, %v1986_v10, %v1988_v16  ;;  %v1992_v49 = vpop.permute.xlu1 %1991  ;;  %v7577_v28 = vld [vmem:[%s13228_s1 + $0x90] sm:$0xff] }
 0x243   : > { %v1977_v56 = vadd.f32 %v1973_v45, %v1918_v1  ;;  %v1978_v3 = vadd.f32 %v1974_v15, %v1919_v39  ;;  %v13596_v53 = vrot.slane %v13593_v60, %v8224_v2  ;;  %v13597_v35 = vrot.slane %v13593_v60, %v8228_v14  ;;  %v7579_v45 = vld [vmem:[%s13228_s1 + $0xa0] sm:$0xff]  ;;  %v7581_v15 = vld [vmem:[%s13228_s1 + $0xb0] sm:$0xff] }
 0x244   : > { %v1975_v63 = vmul.f32 %v13594_v32, %v1946_v11  ;;  %v1976_v5 = vmul.f32 %v13595_v20, %v1949_v12  ;;  %v1920_v4 = vadd.f32 %v1916_v57, %v1873_v47  ;;  %v1921_v30 = vadd.f32 %v1917_v55, %v1874_v13  ;;  %v7582_v11 = vld [vmem:[%s13228_s1 + $0xb8] sm:$0xff]  ;;  %v7583_v12 = vld [vmem:[%s13228_s1 + $0xc0] sm:$0xff]  ;;  %v7585_v62 = vld [vmem:[%s13228_s1 + $0xd0] sm:$0xff] }
 0x245   : > { %v2020_v52 = vmul.f32 %v13596_v53, %v1995_v33  ;;  %v2021_v31 = vmul.f32 %v13597_v35, %v1994_v43  ;;  %v1993_v42 = vsel %vm13343_vm10, %v1990_v46, %v1992_v49  ;;  %v1996_v41 = vsel %vm13343_vm10, %v1992_v49, %v1986_v10  ;;  %v7584_v46 = vld [vmem:[%s13228_s1 + $0xc8] sm:$0xff]  ;;  %v7586_v57 = vld [vmem:[%s13228_s1 + $0xd8] sm:$0xff] }
 0x246   : > { %v1979_v44 = vadd.f32 %v1975_v63, %v1920_v4  ;;  %v1980_v50 = vadd.f32 %v1976_v5, %v1921_v30  ;;  %v2022_v25 = vmul.f32 %v2011_v48, %v1993_v42  ;;  %v2023_v54 = vmul.f32 %v2015_v59, %v1996_v41 }
 0x247   : > { %v2024_v26 = vadd.f32 %v2020_v52, %v1977_v56  ;;  %v2025_v36 = vadd.f32 %v2021_v31, %v1978_v3  ;;  %v13599_v23 = vmov 0.0  }
 0x248   : > { %v2026_v24 = vadd.f32 %v2022_v25, %v1979_v44  ;;  %v2027_v40 = vadd.f32 %v2023_v54, %v1980_v50 }
 0x249   : > { %v2034_v61 = vadd.f32 %v13598_v7, %v2024_v26  ;;  %v2035_v29 = vadd.f32 %v13598_v7, %v2025_v36 }
 0x24a   : > { %v2036_v37 = vadd.f32 %v13598_v7, %v2026_v24  ;;  %v2037_v27 = vadd.f32 %v13598_v7, %v2027_v40 }
 0x24b   : > { %v2038_v0 = vmax.f32 %v2034_v61, 0.0  ;;  %v2039_v22 = vmax.f32 %v2035_v29, 0.0 }
 0x24c   : > { %v2040_v8 = vmax.f32 %v2036_v37, 0.0  ;;  %v2041_v10 = vmax.f32 %v2037_v27, 0.0 }
 0x24d   : > { %7587 = vmatprep.subr.msk.mxu0 %vm13341_vm0, %v2039_v22 }
 0x24e   : > { %7588 = vmatpush1.msk.msra.mxu0 %vm13341_vm0, %v2038_v0  ;;  %7603 = vmatprep.subr.msk.mxu1 %vm13341_vm0, %v2041_v10 }
 0x24f   : > { %7589 = vmatmul.mubr.msk.f32.vlgmr.msra.gmra.mrb[28].mxu0 %vm13340_vm1, %v7573_v51  ;;  %7604 = vmatpush1.msk.msra.mxu1 %vm13341_vm0, %v2040_v8  ;;  %vm13688_vm0 = vcmp.lt.s32.totalorder %v8246_v6, 7 }
 0x250   : > { %2181 = vmatprep.mubr.f32.mxu0 %v13599_v23  ;;  %7605 = vmatmul.mubr.msk.f32.vlgmr.msra.gmra.mrb[28].mxu1 %vm13340_vm1, %v7573_v51 }
 0x251   : > { %2330 = vmatprep.mubr.f32.mxu1 %v13599_v23 }
 0x253   : > { %7590 = vmatmul.mubr.msk.f32.gmra.mrb[30].mxu0 %vm13340_vm1, %v7574_v38 }
 0x254   : > { %2187 = vmatprep.mubr.f32.mxu0 %v13599_v23  ;;  %7606 = vmatmul.mubr.msk.f32.gmra.mrb[30].mxu1 %vm13340_vm1, %v7574_v38 }
 0x255   : > { %2336 = vmatprep.mubr.f32.mxu1 %v13599_v23 }
 0x257   : > { %7591 = vmatmul.mubr.msk.f32.gmra.mrb[32].mxu0 %vm13340_vm1, %v7575_v34 }
 0x258   : > { %2193 = vmatprep.mubr.f32.mxu0 %v13599_v23  ;;  %7607 = vmatmul.mubr.msk.f32.gmra.mrb[32].mxu1 %vm13340_vm1, %v7575_v34 }
 0x259   : > { %2342 = vmatprep.mubr.f32.mxu1 %v13599_v23 }
 0x25b   : > { %7592 = vmatmul.mubr.msk.f32.gmra.mrb[34].mxu0 %vm13340_vm1, %v7576_v21 }
 0x25c   : > { %2199 = vmatprep.mubr.f32.mxu0 %v13599_v23  ;;  %7608 = vmatmul.mubr.msk.f32.gmra.mrb[34].mxu1 %vm13340_vm1, %v7576_v21 }
 0x25d   : > { %2348 = vmatprep.mubr.f32.mxu1 %v13599_v23 }
 0x25f   : > { %7593 = vmatmul.mubr.msk.f32.gmra.mrb[36].mxu0 %vm13340_vm1, %v7577_v28 }
 0x260   : > { %2205 = vmatprep.mubr.f32.mxu0 %v13599_v23  ;;  %7609 = vmatmul.mubr.msk.f32.gmra.mrb[36].mxu1 %vm13340_vm1, %v7577_v28 }
 0x261   : > { %2354 = vmatprep.mubr.f32.mxu1 %v13599_v23 }
 0x263   : > { %7594 = vmatmul.mubr.msk.f32.gmra.mrb[38].mxu0 %vm13340_vm1, %v7578_v58 }
 0x264   : > { %2211 = vmatprep.mubr.f32.mxu0 %v13599_v23  ;;  %7610 = vmatmul.mubr.msk.f32.gmra.mrb[38].mxu1 %vm13340_vm1, %v7578_v58 }
 0x265   : > { %2360 = vmatprep.mubr.f32.mxu1 %v13599_v23 }
 0x267   : > { %7595 = vmatmul.mubr.msk.f32.gmra.mrb[40].mxu0 %vm13340_vm1, %v7579_v45 }
 0x268   : > { %2217 = vmatprep.mubr.f32.mxu0 %v13599_v23  ;;  %7611 = vmatmul.mubr.msk.f32.gmra.mrb[40].mxu1 %vm13340_vm1, %v7579_v45 }
 0x269   : > { %2366 = vmatprep.mubr.f32.mxu1 %v13599_v23 }
 0x26b   : > { %7596 = vmatmul.mubr.msk.f32.gmra.mrb[42].mxu0 %vm13340_vm1, %v7580_v17 }
 0x26c   : > { %2223 = vmatprep.mubr.f32.mxu0 %v13599_v23  ;;  %7612 = vmatmul.mubr.msk.f32.gmra.mrb[42].mxu1 %vm13340_vm1, %v7580_v17 }
 0x26d   : > { %2372 = vmatprep.mubr.f32.mxu1 %v13599_v23 }
 0x26f   : > { %7597 = vmatmul.mubr.msk.f32.gmra.mrb[44].mxu0 %vm13340_vm1, %v7581_v15 }
 0x270   : > { %2229 = vmatprep.mubr.f32.mxu0 %v13599_v23  ;;  %7613 = vmatmul.mubr.msk.f32.gmra.mrb[44].mxu1 %vm13340_vm1, %v7581_v15 }
 0x271   : > { %2378 = vmatprep.mubr.f32.mxu1 %v13599_v23 }
 0x273   : > { %7598 = vmatmul.mubr.msk.f32.gmra.mrb[46].mxu0 %vm13340_vm1, %v7582_v11 }
 0x274   : > { %2235 = vmatprep.mubr.f32.mxu0 %v13599_v23  ;;  %7614 = vmatmul.mubr.msk.f32.gmra.mrb[46].mxu1 %vm13340_vm1, %v7582_v11 }
 0x275   : > { %2384 = vmatprep.mubr.f32.mxu1 %v13599_v23 }
 0x277   : > { %7599 = vmatmul.mubr.msk.f32.gmra.mrb[48].mxu0 %vm13340_vm1, %v7583_v12 }
 0x278   : > { %2241 = vmatprep.mubr.f32.mxu0 %v13599_v23  ;;  %7615 = vmatmul.mubr.msk.f32.gmra.mrb[48].mxu1 %vm13340_vm1, %v7583_v12 }
 0x279   : > { %2390 = vmatprep.mubr.f32.mxu1 %v13599_v23 }
 0x27b   : > { %7600 = vmatmul.mubr.msk.f32.gmra.mrb[50].mxu0 %vm13340_vm1, %v7584_v46 }
 0x27c   : > { %2247 = vmatprep.mubr.f32.mxu0 %v13599_v23  ;;  %7616 = vmatmul.mubr.msk.f32.gmra.mrb[50].mxu1 %vm13340_vm1, %v7584_v46 }
 0x27d   : > { %2396 = vmatprep.mubr.f32.mxu1 %v13599_v23 }
 0x27f   : > { %7601 = vmatmul.mubr.msk.f32.gmra.mrb[52].mxu0 %vm13340_vm1, %v7585_v62 }
 0x280   : > { %2253 = vmatprep.mubr.f32.mxu0 %v13599_v23  ;;  %7617 = vmatmul.mubr.msk.f32.gmra.mrb[52].mxu1 %vm13340_vm1, %v7585_v62 }
 0x281   : > { %2402 = vmatprep.mubr.f32.mxu1 %v13599_v23 }
 0x283   : > { %7602 = vmatmul.mubr.msk.f32.gmra.mrb[54].mxu0 %vm13340_vm1, %v7586_v57 }
 0x284   : > { %3973 = vmatprep.mubr.f32.mxu0 %v13599_v23  ;;  %7618 = vmatmul.mubr.msk.f32.gmra.mrb[54].mxu1 %vm13340_vm1, %v7586_v57  ;;  %vm13680_vm1 = vcmp.lt.s32.totalorder %v8246_v6, 8 }
 0x285   : > { %4122 = vmatprep.mubr.f32.mxu1 %v13599_v23  ;;  %v9779_v23 = vld [vmem:[%s13230_s3 + $0x6] ss:$8 sm:$0xf] }
 0x322   : > { %v2177_v18 = vpop.f32.mrb[28].mxu0 }
 0x323   : > { %2409 = vst [vmem:[#allocation2] sm:$0xff] %v2177_v18  ;;  %v2179_v55 = vpop.f32.mrb[29].mxu0  ;;  %v2326_v60 = vpop.f32.mrb[28].mxu1 }
 0x324   : > { %2410 = vst [vmem:[#allocation2 + $0x8] sm:$0xff] %v2179_v55  ;;  %2411 = vst [vmem:[#allocation2 + $0x10] sm:$0xff] %v2326_v60  ;;  %v2328_v59 = vpop.f32.mrb[29].mxu1 }
 0x325   : > { %2412 = vst [vmem:[#allocation2 + $0x18] sm:$0xff] %v2328_v59 }
 0x326   : > { %v2183_v48 = vpop.f32.mrb[30].mxu0 }
 0x327   : > { %2413 = vst [vmem:[#allocation2 + $0x20] sm:$0xff] %v2183_v48  ;;  %v2185_v47 = vpop.f32.mrb[31].mxu0  ;;  %v2332_v1 = vpop.f32.mrb[30].mxu1 }
 0x328   : > { %2414 = vst [vmem:[#allocation2 + $0x28] sm:$0xff] %v2185_v47  ;;  %2415 = vst [vmem:[#allocation2 + $0x30] sm:$0xff] %v2332_v1  ;;  %v2334_v32 = vpop.f32.mrb[31].mxu1 }
 0x329   : > { %2416 = vst [vmem:[#allocation2 + $0x38] sm:$0xff] %v2334_v32 }
 0x32a   : > { %v2465_v13 = vld [vmem:[#allocation2] sm:$0xf]  ;;  %v2189_v39 = vpop.f32.mrb[32].mxu0  ;;  %v2511_v5 = vld [vmem:[#allocation2] sm:$0xf0] }
 0x32b   : > { %2469 = vrot.lane.b32.xlu0 %v2465_v13, %s7836_s29  ;;  %v2466_v16 = vld [vmem:[#allocation2 + $0x8] sm:$0xf]  ;;  %2417 = vst [vmem:[#allocation2 + $0x40] sm:$0xff] %v2189_v39  ;;  %v2191_v63 = vpop.f32.mrb[33].mxu0  ;;  %v2467_v20 = vld [vmem:[#allocation2 + $0x10] sm:$0xf] }
 0x32c   : > { %2471 = vrot.lane.b32.xlu1 %v2466_v16, %s7836_s29  ;;  %2418 = vst [vmem:[#allocation2 + $0x48] sm:$0xff] %v2191_v63  ;;  %v2468_v43 = vld [vmem:[#allocation2 + $0x18] sm:$0xf]  ;;  %v2512_v33 = vld [vmem:[#allocation2 + $0x8] sm:$0xf0]  ;;  %v2338_v56 = vpop.f32.mrb[32].mxu1 }
 0x32d   : > { %2419 = vst [vmem:[#allocation2 + $0x50] sm:$0xff] %v2338_v56  ;;  %v2340_v3 = vpop.f32.mrb[33].mxu1  ;;  %v2519_v53 = vrot.slane %v2511_v5, 4  ;;  %v2520_v35 = vrot.slane %v2512_v33, 4  ;;  %v2513_v31 = vld [vmem:[#allocation2 + $0x10] sm:$0xf0] }
 0x32e   : > { %2420 = vst [vmem:[#allocation2 + $0x58] sm:$0xff] %v2340_v3  ;;  %v2195_v52 = vpop.f32.mrb[34].mxu0  ;;  %v2514_v30 = vld [vmem:[#allocation2 + $0x18] sm:$0xf0]  ;;  %v2521_v49 = vrot.slane %v2513_v31, 4 }
 0x32f   : > { %2473 = vrot.lane.b32.xlu0 %v2467_v20, %s7836_s29  ;;  %2421 = vst [vmem:[#allocation2 + $0x60] sm:$0xff] %v2195_v52  ;;  %v2197_v4 = vpop.f32.mrb[35].mxu0  ;;  %v2344_v26 = vpop.f32.mrb[34].mxu1  ;;  %v2522_v50 = vrot.slane %v2514_v30, 4  ;;  %v2569_v25 = vld [vmem:[#allocation2 + $0x20] sm:$0xf] }
 0x330   : > { %2475 = vrot.lane.b32.xlu1 %v2468_v43, %s7836_s29  ;;  %2422 = vst [vmem:[#allocation2 + $0x68] sm:$0xff] %v2197_v4  ;;  %2423 = vst [vmem:[#allocation2 + $0x70] sm:$0xff] %v2344_v26  ;;  %v2346_v36 = vpop.f32.mrb[35].mxu1  ;;  %v2570_v29 = vld [vmem:[#allocation2 + $0x28] sm:$0xf] }
 0x331   : > { %2424 = vst [vmem:[#allocation2 + $0x78] sm:$0xff] %v2346_v36  ;;  %v2571_v40 = vld [vmem:[#allocation2 + $0x30] sm:$0xf]  ;;  %v2572_v51 = vld [vmem:[#allocation2 + $0x38] sm:$0xf] }
 0x332   : > { %v2201_v44 = vpop.f32.mrb[36].mxu0  ;;  %v2615_v27 = vld [vmem:[#allocation2 + $0x20] sm:$0xf0]  ;;  %v2616_v10 = vld [vmem:[#allocation2 + $0x28] sm:$0xf0] }
 0x333   : > { %2527 = vrot.lane.b32.xlu0 %v2519_v53, %s7837_s30  ;;  %2425 = vst [vmem:[#allocation2 + $0x80] sm:$0xff] %v2201_v44  ;;  %v2203_v42 = vpop.f32.mrb[37].mxu0  ;;  %v2350_v41 = vpop.f32.mrb[36].mxu1  ;;  %v2623_v38 = vrot.slane %v2615_v27, 4  ;;  %v2624_v21 = vrot.slane %v2616_v10, 4 }
 0x334   : > { %2529 = vrot.lane.b32.xlu1 %v2520_v35, %s7837_s30  ;;  %2426 = vst [vmem:[#allocation2 + $0x88] sm:$0xff] %v2203_v42  ;;  %2427 = vst [vmem:[#allocation2 + $0x90] sm:$0xff] %v2350_v41  ;;  %v2352_v7 = vpop.f32.mrb[37].mxu1  ;;  %v2617_v28 = vld [vmem:[#allocation2 + $0x30] sm:$0xf0] }
 0x335   : > { %2428 = vst [vmem:[#allocation2 + $0x98] sm:$0xff] %v2352_v7  ;;  %v2618_v45 = vld [vmem:[#allocation2 + $0x38] sm:$0xf0]  ;;  %v2625_v11 = vrot.slane %v2617_v28, 4  ;;  %v2673_v48 = vld [vmem:[#allocation2 + $0x40] sm:$0xf] }
 0x336   : > { %v2207_v61 = vpop.f32.mrb[38].mxu0  ;;  %v2626_v62 = vrot.slane %v2618_v45, 4  ;;  %v2674_v47 = vld [vmem:[#allocation2 + $0x48] sm:$0xf]  ;;  %v2675_v16 = vld [vmem:[#allocation2 + $0x50] sm:$0xf] }
 0x337   : > { %2531 = vrot.lane.b32.xlu0 %v2521_v49, %s7837_s30  ;;  %2429 = vst [vmem:[#allocation2 + $0xa0] sm:$0xff] %v2207_v61  ;;  %v2209_v54 = vpop.f32.mrb[39].mxu0  ;;  %v2356_v0 = vpop.f32.mrb[38].mxu1  ;;  %v2676_v63 = vld [vmem:[#allocation2 + $0x58] sm:$0xf] }
 0x338   : > { %2533 = vrot.lane.b32.xlu1 %v2522_v50, %s7837_s30  ;;  %2430 = vst [vmem:[#allocation2 + $0xa8] sm:$0xff] %v2209_v54  ;;  %2431 = vst [vmem:[#allocation2 + $0xb0] sm:$0xff] %v2356_v0  ;;  %v2358_v24 = vpop.f32.mrb[39].mxu1  ;;  %v2719_v20 = vld [vmem:[#allocation2 + $0x40] sm:$0xf0] }
 0x339   : > { %2432 = vst [vmem:[#allocation2 + $0xb8] sm:$0xff] %v2358_v24  ;;  %v2720_v43 = vld [vmem:[#allocation2 + $0x48] sm:$0xf0]  ;;  %v2727_v56 = vrot.slane %v2719_v20, 4  ;;  %v2721_v53 = vld [vmem:[#allocation2 + $0x50] sm:$0xf0] }
 0x33a   : > { %v2213_v22 = vpop.f32.mrb[40].mxu0  ;;  %v2728_v3 = vrot.slane %v2720_v43, 4  ;;  %v2722_v35 = vld [vmem:[#allocation2 + $0x58] sm:$0xf0]  ;;  %v2729_v31 = vrot.slane %v2721_v53, 4 }
 0x33b   : > { %2573 = vrot.lane.b32.xlu0 %v2569_v25, %s7838_s5  ;;  %2433 = vst [vmem:[#allocation2 + $0xc0] sm:$0xff] %v2213_v22  ;;  %v2215_v37 = vpop.f32.mrb[41].mxu0  ;;  %v2362_v8 = vpop.f32.mrb[40].mxu1  ;;  %v2730_v4 = vrot.slane %v2722_v35, 4  ;;  %v2777_v36 = vld [vmem:[#allocation2 + $0x60] sm:$0xf] }
 0x33c   : > { %2575 = vrot.lane.b32.xlu1 %v2570_v29, %s7838_s5  ;;  %2434 = vst [vmem:[#allocation2 + $0xc8] sm:$0xff] %v2215_v37  ;;  %2435 = vst [vmem:[#allocation2 + $0xd0] sm:$0xff] %v2362_v8  ;;  %v2364_v34 = vpop.f32.mrb[41].mxu1  ;;  %v2778_v44 = vld [vmem:[#allocation2 + $0x68] sm:$0xf] }
 0x33d   : > { %2436 = vst [vmem:[#allocation2 + $0xd8] sm:$0xff] %v2364_v34  ;;  %v2779_v41 = vld [vmem:[#allocation2 + $0x70] sm:$0xf]  ;;  %v2780_v7 = vld [vmem:[#allocation2 + $0x78] sm:$0xf] }
 0x33e   : > { %v2219_v58 = vpop.f32.mrb[42].mxu0  ;;  %v2823_v61 = vld [vmem:[#allocation2 + $0x60] sm:$0xf0]  ;;  %v2824_v54 = vld [vmem:[#allocation2 + $0x68] sm:$0xf0] }
 0x33f   : > { %2577 = vrot.lane.b32.xlu0 %v2571_v40, %s7838_s5  ;;  %2437 = vst [vmem:[#allocation2 + $0xe0] sm:$0xff] %v2219_v58  ;;  %v2221_v17 = vpop.f32.mrb[43].mxu0  ;;  %v2368_v15 = vpop.f32.mrb[42].mxu1  ;;  %v2831_v0 = vrot.slane %v2823_v61, 4  ;;  %v2832_v24 = vrot.slane %v2824_v54, 4 }
 0x340   : > { %2579 = vrot.lane.b32.xlu1 %v2572_v51, %s7838_s5  ;;  %2438 = vst [vmem:[#allocation2 + $0xe8] sm:$0xff] %v2221_v17  ;;  %2439 = vst [vmem:[#allocation2 + $0xf0] sm:$0xff] %v2368_v15  ;;  %v2370_v12 = vpop.f32.mrb[43].mxu1  ;;  %v2825_v40 = vld [vmem:[#allocation2 + $0x70] sm:$0xf0] }
 0x341   : > { %2440 = vst [vmem:[#allocation2 + $0xf8] sm:$0xff] %v2370_v12  ;;  %v2826_v22 = vld [vmem:[#allocation2 + $0x78] sm:$0xf0]  ;;  %v2833_v51 = vrot.slane %v2825_v40, 4  ;;  %v2881_v27 = vld [vmem:[#allocation2 + $0x80] sm:$0xf] }
 0x342   : > { %v2225_v46 = vpop.f32.mrb[44].mxu0  ;;  %v2834_v37 = vrot.slane %v2826_v22, 4  ;;  %v2882_v8 = vld [vmem:[#allocation2 + $0x88] sm:$0xf]  ;;  %v2883_v34 = vld [vmem:[#allocation2 + $0x90] sm:$0xf] }
 0x343   : > { %2631 = vrot.lane.b32.xlu0 %v2623_v38, %s7839_s6  ;;  %2441 = vst [vmem:[#allocation2 + $0x100] sm:$0xff] %v2225_v46  ;;  %v2227_v57 = vpop.f32.mrb[45].mxu0  ;;  %v2374_v18 = vpop.f32.mrb[44].mxu1  ;;  %v2927_v28 = vld [vmem:[#allocation2 + $0x80] sm:$0xf0] }
 0x344   : > { %2633 = vrot.lane.b32.xlu1 %v2624_v21, %s7839_s6  ;;  %2442 = vst [vmem:[#allocation2 + $0x108] sm:$0xff] %v2227_v57  ;;  %2443 = vst [vmem:[#allocation2 + $0x110] sm:$0xff] %v2374_v18  ;;  %v2376_v55 = vpop.f32.mrb[45].mxu1  ;;  %v2884_v21 = vld [vmem:[#allocation2 + $0x98] sm:$0xf]  ;;  %v2935_v15 = vrot.slane %v2927_v28, 4 }
 0x345   : > { %2444 = vst [vmem:[#allocation2 + $0x118] sm:$0xff] %v2376_v55  ;;  %v2928_v45 = vld [vmem:[#allocation2 + $0x88] sm:$0xf0]  ;;  %v2929_v12 = vld [vmem:[#allocation2 + $0x90] sm:$0xf0] }
 0x346   : > { %v2231_v60 = vpop.f32.mrb[46].mxu0  ;;  %v2930_v46 = vld [vmem:[#allocation2 + $0x98] sm:$0xf0]  ;;  %v2985_v18 = vld [vmem:[#allocation2 + $0xa0] sm:$0xf] }
 0x347   : > { %2635 = vrot.lane.b32.xlu0 %v2625_v11, %s7839_s6  ;;  %2445 = vst [vmem:[#allocation2 + $0x120] sm:$0xff] %v2231_v60  ;;  %v2233_v59 = vpop.f32.mrb[47].mxu0  ;;  %v2380_v13 = vpop.f32.mrb[46].mxu1  ;;  %v2936_v11 = vrot.slane %v2928_v45, 4  ;;  %v2938_v57 = vrot.slane %v2930_v46, 4 }
 0x348   : > { %2637 = vrot.lane.b32.xlu1 %v2626_v62, %s7839_s6  ;;  %2446 = vst [vmem:[#allocation2 + $0x128] sm:$0xff] %v2233_v59  ;;  %2447 = vst [vmem:[#allocation2 + $0x130] sm:$0xff] %v2380_v13  ;;  %v2382_v39 = vpop.f32.mrb[47].mxu1  ;;  %v2937_v62 = vrot.slane %v2929_v12, 4  ;;  %v2986_v55 = vld [vmem:[#allocation2 + $0xa8] sm:$0xf] }
 0x349   : > { %2448 = vst [vmem:[#allocation2 + $0x138] sm:$0xff] %v2382_v39  ;;  %v2987_v60 = vld [vmem:[#allocation2 + $0xb0] sm:$0xf]  ;;  %v3031_v59 = vld [vmem:[#allocation2 + $0xa0] sm:$0xf0] }
 0x34a   : > { %v2237_v1 = vpop.f32.mrb[48].mxu0  ;;  %v3039_v13 = vrot.slane %v3031_v59, 4  ;;  %v3033_v39 = vld [vmem:[#allocation2 + $0xb0] sm:$0xf0]  ;;  %v3089_v20 = vld [vmem:[#allocation2 + $0xc0] sm:$0xf] }
 0x34b   : > { %2677 = vrot.lane.b32.xlu0 %v2673_v48, %s7840_s7  ;;  %2449 = vst [vmem:[#allocation2 + $0x140] sm:$0xff] %v2237_v1  ;;  %v2239_v32 = vpop.f32.mrb[49].mxu0  ;;  %v2386_v5 = vpop.f32.mrb[48].mxu1  ;;  %v2988_v48 = vld [vmem:[#allocation2 + $0xb8] sm:$0xf] }
 0x34c   : > { %2679 = vrot.lane.b32.xlu1 %v2674_v47, %s7840_s7  ;;  %2450 = vst [vmem:[#allocation2 + $0x148] sm:$0xff] %v2239_v32  ;;  %2451 = vst [vmem:[#allocation2 + $0x150] sm:$0xff] %v2386_v5  ;;  %v2388_v33 = vpop.f32.mrb[49].mxu1  ;;  %v3032_v47 = vld [vmem:[#allocation2 + $0xa8] sm:$0xf0]  ;;  %v3041_v32 = vrot.slane %v3033_v39, 4 }
 0x34d   : > { %2452 = vst [vmem:[#allocation2 + $0x158] sm:$0xff] %v2388_v33  ;;  %v3040_v1 = vrot.slane %v3032_v47, 4  ;;  %v3090_v5 = vld [vmem:[#allocation2 + $0xc8] sm:$0xf]  ;;  %v3091_v43 = vld [vmem:[#allocation2 + $0xd0] sm:$0xf] }
 0x34e   : > { %v2243_v52 = vpop.f32.mrb[50].mxu0  ;;  %v3092_v33 = vld [vmem:[#allocation2 + $0xd8] sm:$0xf]  ;;  %v3157_v53 = vld [vmem:[#allocation2 + $0xf0] sm:$0xf] }
 0x34f   : > { %2681 = vrot.lane.b32.xlu0 %v2675_v16, %s7840_s7  ;;  %2453 = vst [vmem:[#allocation2 + $0x160] sm:$0xff] %v2243_v52  ;;  %v2245_v30 = vpop.f32.mrb[51].mxu0  ;;  %v2392_v26 = vpop.f32.mrb[50].mxu1  ;;  %v3034_v16 = vld [vmem:[#allocation2 + $0xb8] sm:$0xf0] }
 0x350   : > { %2683 = vrot.lane.b32.xlu1 %v2676_v63, %s7840_s7  ;;  %2454 = vst [vmem:[#allocation2 + $0x168] sm:$0xff] %v2245_v30  ;;  %2455 = vst [vmem:[#allocation2 + $0x170] sm:$0xff] %v2392_v26  ;;  %v2394_v49 = vpop.f32.mrb[51].mxu1  ;;  %v3042_v63 = vrot.slane %v3034_v16, 4  ;;  %v3158_v52 = vld [vmem:[#allocation2 + $0xf8] sm:$0xf] }
 0x351   : > { %2456 = vst [vmem:[#allocation2 + $0x178] sm:$0xff] %v2394_v49  ;;  %v3201_v35 = vld [vmem:[#allocation2 + $0xe0] sm:$0xf0]  ;;  %v3204_v49 = vld [vmem:[#allocation2 + $0xf8] sm:$0xf0] }
 0x352   : > { %v2249_v50 = vpop.f32.mrb[52].mxu0  ;;  %v3209_v30 = vrot.slane %v3201_v35, 4  ;;  %v3305_v22 = vld [vmem:[#allocation2 + $0x100] sm:$0xf0]  ;;  %v3365_v46 = vld [vmem:[#allocation2 + $0x130] sm:$0xf] }
 0x353   : > { %2735 = vrot.lane.b32.xlu0 %v2727_v56, %s7841_s8  ;;  %2457 = vst [vmem:[#allocation2 + $0x180] sm:$0xff] %v2249_v50  ;;  %v2251_v42 = vpop.f32.mrb[53].mxu0  ;;  %v2398_v25 = vpop.f32.mrb[52].mxu1  ;;  %v3155_v56 = vld [vmem:[#allocation2 + $0xe0] sm:$0xf] }
 0x354   : > { %2737 = vrot.lane.b32.xlu1 %v2728_v3, %s7841_s8  ;;  %2458 = vst [vmem:[#allocation2 + $0x188] sm:$0xff] %v2251_v42  ;;  %2459 = vst [vmem:[#allocation2 + $0x190] sm:$0xff] %v2398_v25  ;;  %v2400_v29 = vpop.f32.mrb[53].mxu1  ;;  %v3156_v3 = vld [vmem:[#allocation2 + $0xe8] sm:$0xf] }
 0x355   : > { %2460 = vst [vmem:[#allocation2 + $0x198] sm:$0xff] %v2400_v29  ;;  %v3260_v25 = vld [vmem:[#allocation2 + $0x108] sm:$0xf]  ;;  %v3261_v29 = vld [vmem:[#allocation2 + $0x110] sm:$0xf] }
 0x356   : > { %v2255_v10 = vpop.f32.mrb[54].mxu0  ;;  %v3412_v39 = vld [vmem:[#allocation2 + $0x138] sm:$0xf0] }
 0x357   : > { %2739 = vrot.lane.b32.xlu0 %v2729_v31, %s7841_s8  ;;  %2461 = vst [vmem:[#allocation2 + $0x1a0] sm:$0xff] %v2255_v10  ;;  %v2257_v38 = vpop.f32.mrb[55].mxu0  ;;  %v2404_v58 = vpop.f32.mrb[54].mxu1  ;;  %v3202_v31 = vld [vmem:[#allocation2 + $0xe8] sm:$0xf0] }
 0x358   : > { %2741 = vrot.lane.b32.xlu1 %v2730_v4, %s7841_s8  ;;  %2462 = vst [vmem:[#allocation2 + $0x1a8] sm:$0xff] %v2257_v38  ;;  %2463 = vst [vmem:[#allocation2 + $0x1b0] sm:$0xff] %v2404_v58  ;;  %v2406_v17 = vpop.f32.mrb[55].mxu1  ;;  %v9553_v4 = vpop.permute.xlu0 %3829  ;;  %v3210_v26 = vrot.slane %v3202_v31, 4  ;;  %v3307_v38 = vld [vmem:[#allocation2 + $0x110] sm:$0xf0] }
 0x359   : > { %2464 = vst [vmem:[#allocation2 + $0x1b8] sm:$0xff] %v2406_v17  ;;  %13600 = vst [vmem:[#allocation6_spill] sm:$0xff] %v9553_v4  ;;  %v3315_v28 = vrot.slane %v3307_v38, 4  ;;  %v3363_v17 = vld [vmem:[#allocation2 + $0x120] sm:$0xf] }
 0x35a   : > { %v3513_v31 = vld [vmem:[#allocation2 + $0x140] sm:$0xf0] }
 0x35b   : > { %2781 = vrot.lane.b32.xlu0 %v2777_v36, %s7842_s9  ;;  %v3203_v36 = vld [vmem:[#allocation2 + $0xf0] sm:$0xf0] }
 0x35c   : > { %2783 = vrot.lane.b32.xlu1 %v2778_v44, %s7842_s9  ;;  %v3211_v50 = vrot.slane %v3203_v36, 4  ;;  %v3521_v36 = vrot.slane %v3513_v31, 4  ;;  %v9761_v4 = vld [vmem:[%s13230_s3 + $0x5] ss:$8 sm:$0xf] }
 0x35f   : > { %2785 = vrot.lane.b32.xlu0 %v2779_v41, %s7842_s9  ;;  %v3212_v41 = vrot.slane %v3204_v49, 4 }
 0x360   : > { %2787 = vrot.lane.b32.xlu1 %v2780_v7, %s7842_s9  ;;  %v3259_v7 = vld [vmem:[#allocation2 + $0x100] sm:$0xf] }
 0x363   : > { %2839 = vrot.lane.b32.xlu0 %v2831_v0, %s7843_s10 }
 0x364   : > { %2841 = vrot.lane.b32.xlu1 %v2832_v24, %s7843_s10  ;;  %v3262_v24 = vld [vmem:[#allocation2 + $0x118] sm:$0xf] }
 0x367   : > { %2843 = vrot.lane.b32.xlu0 %v2833_v51, %s7843_s10  ;;  %v3306_v51 = vld [vmem:[#allocation2 + $0x108] sm:$0xf0] }
 0x368   : > { %2845 = vrot.lane.b32.xlu1 %v2834_v37, %s7843_s10  ;;  %v3314_v10 = vrot.slane %v3306_v51, 4  ;;  %v3571_v51 = vld [vmem:[#allocation2 + $0x160] sm:$0xf] }
 0x36b   : > { %2885 = vrot.lane.b32.xlu0 %v2881_v27, %s7844_s11  ;;  %v3313_v27 = vrot.slane %v3305_v22, 4 }
 0x36c   : > { %2887 = vrot.lane.b32.xlu1 %v2882_v8, %s7844_s11 }
 0x36f   : > { %2889 = vrot.lane.b32.xlu0 %v2883_v34, %s7844_s11  ;;  %v3308_v34 = vld [vmem:[#allocation2 + $0x118] sm:$0xf0] }
 0x370   : > { %2891 = vrot.lane.b32.xlu1 %v2884_v21, %s7844_s11  ;;  %v3316_v45 = vrot.slane %v3308_v34, 4  ;;  %v3573_v34 = vld [vmem:[#allocation2 + $0x170] sm:$0xf] }
 0x373   : > { %2943 = vrot.lane.b32.xlu0 %v2935_v15, %s7845_s12 }
 0x374   : > { %2945 = vrot.lane.b32.xlu1 %v2936_v11, %s7845_s12  ;;  %v3364_v11 = vld [vmem:[#allocation2 + $0x128] sm:$0xf] }
 0x377   : > { %2947 = vrot.lane.b32.xlu0 %v2937_v62, %s7845_s12 }
 0x378   : > { %2949 = vrot.lane.b32.xlu1 %v2938_v57, %s7845_s12  ;;  %v3366_v57 = vld [vmem:[#allocation2 + $0x138] sm:$0xf] }
 0x37b   : > { %2989 = vrot.lane.b32.xlu0 %v2985_v18, %s7846_s13 }
 0x37c   : > { %2991 = vrot.lane.b32.xlu1 %v2986_v55, %s7846_s13  ;;  %v3409_v55 = vld [vmem:[#allocation2 + $0x120] sm:$0xf0] }
 0x37d   : > { %v3417_v59 = vrot.slane %v3409_v55, 4 }
 0x37f   : > { %2993 = vrot.lane.b32.xlu0 %v2987_v60, %s7846_s13  ;;  %v3410_v60 = vld [vmem:[#allocation2 + $0x128] sm:$0xf0] }
 0x380   : > { %2995 = vrot.lane.b32.xlu1 %v2988_v48, %s7846_s13 }
 0x383   : > { %3047 = vrot.lane.b32.xlu0 %v3039_v13, %s7847_s14  ;;  %v3418_v13 = vrot.slane %v3410_v60, 4 }
 0x384   : > { %3049 = vrot.lane.b32.xlu1 %v3040_v1, %s7847_s14  ;;  %v3411_v1 = vld [vmem:[#allocation2 + $0x130] sm:$0xf0] }
 0x387   : > { %3051 = vrot.lane.b32.xlu0 %v3041_v32, %s7847_s14  ;;  %v3419_v32 = vrot.slane %v3411_v1, 4  ;;  %v3620_v1 = vld [vmem:[#allocation2 + $0x178] sm:$0xf0] }
 0x388   : > { %3053 = vrot.lane.b32.xlu1 %v3042_v63, %s7847_s14 }
 0x38b   : > { %3093 = vrot.lane.b32.xlu0 %v3089_v20, %s7848_s18  ;;  %v3420_v20 = vrot.slane %v3412_v39, 4 }
 0x38c   : > { %3095 = vrot.lane.b32.xlu1 %v3090_v5, %s7848_s18  ;;  %v3467_v5 = vld [vmem:[#allocation2 + $0x140] sm:$0xf] }
 0x38f   : > { %3097 = vrot.lane.b32.xlu0 %v3091_v43, %s7848_s18 }
 0x390   : > { %3099 = vrot.lane.b32.xlu1 %v3092_v33, %s7848_s18  ;;  %v3468_v33 = vld [vmem:[#allocation2 + $0x148] sm:$0xf] }
 0x393   : > { %3159 = vrot.lane.b32.xlu0 %v3155_v56, %s7849_s19 }
 0x394   : > { %3161 = vrot.lane.b32.xlu1 %v3156_v3, %s7849_s19  ;;  %v3469_v3 = vld [vmem:[#allocation2 + $0x150] sm:$0xf] }
 0x397   : > { %3163 = vrot.lane.b32.xlu0 %v3157_v53, %s7849_s19 }
 0x398   : > { %3165 = vrot.lane.b32.xlu1 %v3158_v52, %s7849_s19  ;;  %v3470_v52 = vld [vmem:[#allocation2 + $0x158] sm:$0xf] }
 0x39b   : > { %3217 = vrot.lane.b32.xlu0 %v3209_v30, %s7850_s21  ;;  %v3514_v30 = vld [vmem:[#allocation2 + $0x148] sm:$0xf0] }
 0x39c   : > { %3219 = vrot.lane.b32.xlu1 %v3210_v26, %s7850_s21 }
 0x39d   : > { %v9557_v44 = vpop.permute.xlu0 %2469 }
 0x39e   : > { %v9559_v42 = vpop.permute.xlu1 %2471 }
 0x39f   : > { %3221 = vrot.lane.b32.xlu0 %v3211_v50, %s7850_s21  ;;  %v3522_v50 = vrot.slane %v3514_v30, 4  ;;  %v3677_v30 = vld [vmem:[#allocation2 + $0x190] sm:$0xf] }
 0x3a0   : > { %3223 = vrot.lane.b32.xlu1 %v3212_v41, %s7850_s21  ;;  %v3515_v41 = vld [vmem:[#allocation2 + $0x150] sm:$0xf0] }
 0x3a1   : > { %v9563_v61 = vpop.permute.xlu0 %2473 }
 0x3a2   : > { %v9565_v54 = vpop.permute.xlu1 %2475 }
 0x3a3   : > { %3263 = vrot.lane.b32.xlu0 %v3259_v7, %s7851_s22  ;;  %v3516_v7 = vld [vmem:[#allocation2 + $0x158] sm:$0xf0] }
 0x3a4   : > { %3265 = vrot.lane.b32.xlu1 %v3260_v25, %s7851_s22  ;;  %v3524_v22 = vrot.slane %v3516_v7, 4  ;;  %v3721_v7 = vld [vmem:[#allocation2 + $0x180] sm:$0xf0] }
 0x3a5   : > { %v9569_v0 = vpop.permute.xlu0 %2527 }
 0x3a6   : > { %v9571_v40 = vpop.permute.xlu1 %2529 }
 0x3a7   : > { %3267 = vrot.lane.b32.xlu0 %v3261_v29, %s7851_s22  ;;  %v3523_v29 = vrot.slane %v3515_v41, 4 }
 0x3a8   : > { %3269 = vrot.lane.b32.xlu1 %v3262_v24, %s7851_s22 }
 0x3a9   : > { %v9575_v37 = vpop.permute.xlu0 %2531 }
 0x3aa   : > { %v9577_v8 = vpop.permute.xlu1 %2533 }
 0x3ab   : > { %3321 = vrot.lane.b32.xlu0 %v3313_v27, %s7852_s23 }
 0x3ac   : > { %3323 = vrot.lane.b32.xlu1 %v3314_v10, %s7852_s23  ;;  %v3572_v10 = vld [vmem:[#allocation2 + $0x168] sm:$0xf] }
 0x3ad   : > { %v9581_v21 = vpop.permute.xlu0 %2573 }
 0x3ae   : > { %v9583_v58 = vpop.permute.xlu1 %2575 }
 0x3af   : > { %3325 = vrot.lane.b32.xlu0 %v3315_v28, %s7852_s23 }
 0x3b0   : > { %3327 = vrot.lane.b32.xlu1 %v3316_v45, %s7852_s23  ;;  %v3574_v45 = vld [vmem:[#allocation2 + $0x178] sm:$0xf] }
 0x3b1   : > { %v9587_v15 = vpop.permute.xlu0 %2577 }
 0x3b2   : > { %v9589_v12 = vpop.permute.xlu1 %2579 }
 0x3b3   : > { %3367 = vrot.lane.b32.xlu0 %v3363_v17, %s7836_s29 }
 0x3b4   : > { %3369 = vrot.lane.b32.xlu1 %v3364_v11, %s7836_s29  ;;  %v3617_v11 = vld [vmem:[#allocation2 + $0x160] sm:$0xf0] }
 0x3b5   : > { %v9593_v62 = vpop.permute.xlu0 %2631  ;;  %v3625_v55 = vrot.slane %v3617_v11, 4  ;;  %v3724_v11 = vld [vmem:[#allocation2 + $0x198] sm:$0xf0] }
 0x3b6   : > { %v9595_v18 = vpop.permute.xlu1 %2633 }
 0x3b7   : > { %3371 = vrot.lane.b32.xlu0 %v3365_v46, %s7836_s29  ;;  %v3618_v46 = vld [vmem:[#allocation2 + $0x168] sm:$0xf0] }
 0x3b8   : > { %3373 = vrot.lane.b32.xlu1 %v3366_v57, %s7836_s29 }
 0x3b9   : > { %v9599_v48 = vpop.permute.xlu0 %2635 }
 0x3ba   : > { %v9601_v47 = vpop.permute.xlu1 %2637 }
 0x3bb   : > { %3425 = vrot.lane.b32.xlu0 %v3417_v59, %s7837_s30  ;;  %v3626_v59 = vrot.slane %v3618_v46, 4 }
 0x3bc   : > { %3427 = vrot.lane.b32.xlu1 %v3418_v13, %s7837_s30  ;;  %v3619_v13 = vld [vmem:[#allocation2 + $0x170] sm:$0xf0] }
 0x3bd   : > { %v9605_v16 = vpop.permute.xlu0 %2677 }
 0x3be   : > { %v9607_v63 = vpop.permute.xlu1 %2679 }
 0x3bf   : > { %3429 = vrot.lane.b32.xlu0 %v3419_v32, %s7837_s30  ;;  %v3627_v32 = vrot.slane %v3619_v13, 4  ;;  %v3732_v13 = vrot.slane %v3724_v11, 4  ;;  %v9706_v11 = vld [vmem:[%s13230_s3] ss:$8 sm:$0xf] }
 0x3c0   : > { %3431 = vrot.lane.b32.xlu1 %v3420_v20, %s7837_s30 }
 0x3c1   : > { %v9611_v43 = vpop.permute.xlu0 %2681 }
 0x3c2   : > { %v9613_v56 = vpop.permute.xlu1 %2683 }
 0x3c3   : > { %3471 = vrot.lane.b32.xlu0 %v3467_v5, %s7838_s5  ;;  %v3628_v5 = vrot.slane %v3620_v1, 4  ;;  %v3780_v1 = vld [vmem:[#allocation2 + $0x1a8] sm:$0xf] }
 0x3c4   : > { %3473 = vrot.lane.b32.xlu1 %v3468_v33, %s7838_s5  ;;  %v3675_v33 = vld [vmem:[#allocation2 + $0x180] sm:$0xf] }
 0x3c5   : > { %v9617_v53 = vpop.permute.xlu0 %2735 }
 0x3c6   : > { %v9619_v35 = vpop.permute.xlu1 %2737 }
 0x3c7   : > { %3475 = vrot.lane.b32.xlu0 %v3469_v3, %s7838_s5 }
 0x3c8   : > { %3477 = vrot.lane.b32.xlu1 %v3470_v52, %s7838_s5  ;;  %v3676_v52 = vld [vmem:[#allocation2 + $0x188] sm:$0xf] }
 0x3c9   : > { %v9623_v26 = vpop.permute.xlu0 %2739 }
 0x3ca   : > { %v9625_v49 = vpop.permute.xlu1 %2741 }
 0x3cb   : > { %3529 = vrot.lane.b32.xlu0 %v3521_v36, %s7839_s6 }
 0x3cc   : > { %3531 = vrot.lane.b32.xlu1 %v3522_v50, %s7839_s6  ;;  %v3678_v50 = vld [vmem:[#allocation2 + $0x198] sm:$0xf] }
 0x3cd   : > { %v9629_v25 = vpop.permute.xlu0 %2781 }
 0x3ce   : > { %v9631_v24 = vpop.permute.xlu1 %2783 }
 0x3cf   : > { %3533 = vrot.lane.b32.xlu0 %v3523_v29, %s7839_s6  ;;  %v3722_v29 = vld [vmem:[#allocation2 + $0x188] sm:$0xf0] }
 0x3d0   : > { %3535 = vrot.lane.b32.xlu1 %v3524_v22, %s7839_s6 }
 0x3d1   : > { %v9635_v27 = vpop.permute.xlu0 %2785 }
 0x3d2   : > { %v9637_v38 = vpop.permute.xlu1 %2787 }
 0x3d3   : > { %3575 = vrot.lane.b32.xlu0 %v3571_v51, %s7840_s7  ;;  %v3729_v51 = vrot.slane %v3721_v7, 4 }
 0x3d4   : > { %3577 = vrot.lane.b32.xlu1 %v3572_v10, %s7840_s7 }
 0x3d5   : > { %v9641_v28 = vpop.permute.xlu0 %2839 }
 0x3d6   : > { %v9643_v17 = vpop.permute.xlu1 %2841 }
 0x3d7   : > { %3579 = vrot.lane.b32.xlu0 %v3573_v34, %s7840_s7  ;;  %v3730_v34 = vrot.slane %v3722_v29, 4 }
 0x3d8   : > { %3581 = vrot.lane.b32.xlu1 %v3574_v45, %s7840_s7  ;;  %v3723_v45 = vld [vmem:[#allocation2 + $0x190] sm:$0xf0] }
 0x3d9   : > { %v9647_v57 = vpop.permute.xlu0 %2843 }
 0x3da   : > { %v9649_v60 = vpop.permute.xlu1 %2845 }
 0x3db   : > { %3633 = vrot.lane.b32.xlu0 %v3625_v55, %s7841_s8  ;;  %v3731_v55 = vrot.slane %v3723_v45, 4 }
 0x3dc   : > { %3635 = vrot.lane.b32.xlu1 %v3626_v59, %s7841_s8 }
 0x3dd   : > { %v9653_v39 = vpop.permute.xlu0 %2885 }
 0x3de   : > { %v9655_v20 = vpop.permute.xlu1 %2887 }
 0x3df   : > { %3637 = vrot.lane.b32.xlu0 %v3627_v32, %s7841_s8 }
 0x3e0   : > { %3639 = vrot.lane.b32.xlu1 %v3628_v5, %s7841_s8  ;;  %v3779_v5 = vld [vmem:[#allocation2 + $0x1a0] sm:$0xf] }
 0x3e1   : > { %v9659_v3 = vpop.permute.xlu0 %2889 }
 0x3e2   : > { %v9661_v31 = vpop.permute.xlu1 %2891 }
 0x3e3   : > { %3679 = vrot.lane.b32.xlu0 %v3675_v33, %s7842_s9 }
 0x3e4   : > { %3681 = vrot.lane.b32.xlu1 %v3676_v52, %s7842_s9  ;;  %v3782_v52 = vld [vmem:[#allocation2 + $0x1b8] sm:$0xf] }
 0x3e5   : > { %v9665_v36 = vpop.permute.xlu0 %2943 }
 0x3e6   : > { %v9667_v41 = vpop.permute.xlu1 %2945 }
 0x3e7   : > { %3683 = vrot.lane.b32.xlu0 %v3677_v30, %s7842_s9 }
 0x3e8   : > { %3685 = vrot.lane.b32.xlu1 %v3678_v50, %s7842_s9  ;;  %v3781_v50 = vld [vmem:[#allocation2 + $0x1b0] sm:$0xf] }
 0x3e9   : > { %v9671_v22 = vpop.permute.xlu0 %2947 }
 0x3ea   : > { %13601 = vst [vmem:[#allocation9_spill] sm:$0xff] %v9671_v22  ;;  %v9673_v10 = vpop.permute.xlu1 %2949  ;;  %v9915_v22 = vld [vmem:[%s13230_s3 + $0x40] ss:$8 sm:$0xf] }
 0x3eb   : > { %13602 = vst [vmem:[#allocation12_spill] sm:$0xff] %v9673_v10  ;;  %3737 = vrot.lane.b32.xlu0 %v3729_v51, %s7843_s10  ;;  %13633 = vst [vmem:[#allocation43_spill] sm:$0xff] %v9915_v22  ;;  %v13644_v10 = vrot.slane %v9706_v11, %v8226_v9 }
 0x3ec   : > { %3739 = vrot.lane.b32.xlu1 %v3730_v34, %s7843_s10 }
 0x3ed   : > { %v9677_v46 = vpop.permute.xlu0 %2989 }
 0x3ee   : > { %13603 = vst [vmem:[#allocation15_spill] sm:$0xff] %v9677_v46  ;;  %v9679_v59 = vpop.permute.xlu1 %2991  ;;  %v9857_v46 = vld [vmem:[%s13230_s3 + $0x23] ss:$8 sm:$0xf] }
 0x3ef   : > { %13604 = vst [vmem:[#allocation10_spill] sm:$0xff] %v9679_v59  ;;  %3741 = vrot.lane.b32.xlu0 %v3731_v55, %s7843_s10  ;;  %v9842_v59 = vld [vmem:[%s13230_s3 + $0x22] ss:$8 sm:$0xf]  ;;  %13626 = vst [vmem:[#allocation39_spill] sm:$0xff] %v9857_v46 }
 0x3f0   : > { %3743 = vrot.lane.b32.xlu1 %v3732_v13, %s7843_s10  ;;  %v9713_v13 = vld [vmem:[%s13230_s3 + $0x1] ss:$8 sm:$0xf]  ;;  %13625 = vst [vmem:[#allocation36_spill] sm:$0xff] %v9842_v59 }
 0x3f1   : > { %v9683_v32 = vpop.permute.xlu0 %2993 }
 0x3f2   : > { %13605 = vst [vmem:[#allocation30_spill] sm:$0xff] %v9683_v32  ;;  %v9685_v33 = vpop.permute.xlu1 %2995  ;;  %v9766_v32 = vld [vmem:[#allocation2 + $0xc8] sm:$0xf0] }
 0x3f3   : > { %13606 = vst [vmem:[#allocation13_spill] sm:$0xff] %v9685_v33  ;;  %3785 = vrot.lane.b32.xlu0 %v3780_v1, %s7844_s11  ;;  %13618 = vst [vmem:[#allocation24_spill] sm:$0xff] %v9766_v32  ;;  %v9900_v33 = vld [vmem:[%s13230_s3 + $0x27] ss:$8 sm:$0xf] }
 0x3f4   : > { %3783 = vrot.lane.b32.xlu1 %v3779_v5, %s7844_s11  ;;  %v9720_v5 = vld [vmem:[%s13230_s3 + $0x2] ss:$8 sm:$0xf]  ;;  %13631 = vst [vmem:[#allocation42_spill] sm:$0xff] %v9900_v33  ;;  %v2480_v33 = vsel %vm638_vm2, %v9565_v54, %v9557_v44 }
 0x3f5   : > { %v9689_v30 = vpop.permute.xlu0 %3047 }
 0x3f6   : > { %13607 = vst [vmem:[#allocation16_spill] sm:$0xff] %v9689_v30  ;;  %v9691_v7 = vpop.permute.xlu1 %3049  ;;  %v9803_v30 = vld [vmem:[#allocation2 + $0xd0] sm:$0xf0] }
 0x3f7   : > { %13608 = vst [vmem:[#allocation19_spill] sm:$0xff] %v9691_v7  ;;  %3789 = vrot.lane.b32.xlu0 %v3782_v52, %s7844_s11  ;;  %v9722_v52 = vld [vmem:[#allocation2 + $0xc0] sm:$0xf0]  ;;  %13620 = vst [vmem:[#allocation29_spill] sm:$0xff] %v9803_v30  ;;  %v2479_v30 = vsel %vm638_vm2, %v9557_v44, %v9559_v42  ;;  %v2538_v44 = vsel %vm697_vm3, %v9577_v8, %v9569_v0 }
 0x3f8   : > { %3787 = vrot.lane.b32.xlu1 %v3781_v50, %s7844_s11  ;;  %13615 = vst [vmem:[#allocation20_spill] sm:$0xff] %v9722_v52  ;;  %v9805_v50 = vld [vmem:[#allocation2 + $0xd8] sm:$0xf0] }
 0x3f9   : > { %v9695_v29 = vpop.permute.xlu0 %3051  ;;  %13621 = vst [vmem:[#allocation28_spill] sm:$0xff] %v9805_v50 }
 0x3fa   : > { %13609 = vst [vmem:[#allocation14_spill] sm:$0xff] %v9695_v29  ;;  %v9697_v51 = vpop.permute.xlu1 %3053 }
 0x3fb   : > { %13610 = vst [vmem:[#allocation31_spill] sm:$0xff] %v9697_v51  ;;  %v9818_v51 = vld [vmem:[%s13230_s3 + $0x20] ss:$8 sm:$0xf] }
 0x3fc   : > { %13622 = vst [vmem:[#allocation33_spill] sm:$0xff] %v9818_v51 }
 0x3fd   : > { %v9699_v34 = vpop.permute.xlu0 %3093 }
 0x3fe   : > { %13611 = vst [vmem:[#allocation17_spill] sm:$0xff] %v9699_v34  ;;  %v9701_v45 = vpop.permute.xlu1 %3095  ;;  %v9833_v34 = vld [vmem:[%s13230_s3 + $0x21] ss:$8 sm:$0xf] }
 0x3ff   : > { %13612 = vst [vmem:[#allocation18_spill] sm:$0xff] %v9701_v45  ;;  %v9735_v45 = vld [vmem:[%s13230_s3 + $0x3] ss:$8 sm:$0xf]  ;;  %13624 = vst [vmem:[#allocation34_spill] sm:$0xff] %v9833_v34 }
 0x401   : > { %v9708_v55 = vpop.permute.xlu0 %3097 }
 0x402   : > { %13613 = vst [vmem:[#allocation32_spill] sm:$0xff] %v9708_v55  ;;  %v9715_v1 = vpop.permute.xlu1 %3099  ;;  %v9748_v55 = vld [vmem:[%s13230_s3 + $0x4] ss:$8 sm:$0xf] }
 0x403   : > { %13614 = vst [vmem:[#allocation21_spill] sm:$0xff] %v9715_v1 }
 0x405   : > { %v9750_v1 = vpop.permute.xlu0 %3159 }
 0x406   : > { %13616 = vst [vmem:[#allocation23_spill] sm:$0xff] %v9750_v1  ;;  %v9764_v7 = vpop.permute.xlu1 %3161  ;;  %v9792_v1 = vld [vmem:[%s13230_s3 + $0x7] ss:$8 sm:$0xf] }
 0x407   : > { %13617 = vst [vmem:[#allocation22_spill] sm:$0xff] %v9764_v7 }
 0x409   : > { %v9801_v29 = vpop.permute.xlu0 %3163 }
 0x40a   : > { %13619 = vst [vmem:[#allocation35_spill] sm:$0xff] %v9801_v29  ;;  %v9820_v32 = vpop.permute.xlu1 %3165  ;;  %v9872_v29 = vld [vmem:[%s13230_s3 + $0x24] ss:$8 sm:$0xf] }
 0x40b   : > { %13623 = vst [vmem:[#allocation25_spill] sm:$0xff] %v9820_v32  ;;  %13628 = vst [vmem:[#allocation41_spill] sm:$0xff] %v9872_v29  ;;  %v9887_v32 = vld [vmem:[%s13230_s3 + $0x26] ss:$8 sm:$0xf]  ;;  %v2537_v29 = vsel %vm697_vm3, %v9569_v0, %v9571_v40  ;;  %v2583_v0 = vsel %vm745_vm4, %v9581_v21, %v9583_v58 }
 0x40c   : > { %13630 = vst [vmem:[#allocation27_spill] sm:$0xff] %v9887_v32  ;;  %v13637_v32 = vrot.slane %v9706_v11, %v8228_v14 }
 0x40d   : > { %v9859_v7 = vpop.permute.xlu0 %3217 }
 0x40e   : > { %13627 = vst [vmem:[#allocation38_spill] sm:$0xff] %v9859_v7  ;;  %v9874_v50 = vpop.permute.xlu1 %3219  ;;  %v9938_v7 = vld [vmem:[%s13230_s3 + $0x41] ss:$8 sm:$0xf]  ;;  %v2504_v22 = vmul.f32 %v13637_v32, %v2479_v30  ;;  %v13640_v32 = vrot.slane %v9706_v11, %v8224_v2 }
 0x40f   : > { %13629 = vst [vmem:[#allocation26_spill] sm:$0xff] %v9874_v50  ;;  %v2536_v50 = vsel %vm697_vm3, %v9571_v40, %v9575_v37  ;;  %v2477_v40 = vsel %vm638_vm2, %v9563_v61, %v9565_v54  ;;  %v2582_v54 = vsel %vm745_vm4, %v9583_v58, %v9587_v15 }
 0x410   : > { %v2503_v30 = vmul.f32 %v13640_v32, %v2480_v33  ;;  %v13643_v33 = vrot.slane %v9713_v13, %v8226_v9  ;;  %v2506_v51 = vmul.f32 %v13644_v10, %v2477_v40  ;;  %v10049_v40 = vld [vmem:[%s13230_s3 + $0x43] ss:$8 sm:$0xf] }
 0x411   : > { %v9910_v59 = vpop.permute.xlu0 %3221 }
 0x412   : > { %13632 = vst [vmem:[#allocation37_spill] sm:$0xff] %v9910_v59  ;;  %v9925_v52 = vpop.permute.xlu1 %3223  ;;  %v2478_v59 = vsel %vm638_vm2, %v9559_v42, %v9563_v61  ;;  %v2535_v42 = vsel %vm697_vm3, %v9575_v37, %v9577_v8  ;;  %v13638_v37 = vrot.slane %v9713_v13, %v8228_v14  ;;  %v13639_v8 = vrot.slane %v9706_v11, %v8230_v19 }
 0x413   : > { %13634 = vst [vmem:[#allocation40_spill] sm:$0xff] %v9925_v52  ;;  %v2564_v32 = vmul.f32 %v13643_v33, %v2535_v42 }
 0x414   : > { %v2562_v34 = vmul.f32 %v13638_v37, %v2537_v29  ;;  %v2505_v46 = vmul.f32 %v13639_v8, %v2478_v59  ;;  %v10009_v29 = vld [vmem:[%s13230_s3 + $0x42] ss:$8 sm:$0xf]  ;;  %v13641_v37 = vrot.slane %v9713_v13, %v8230_v19  ;;  %v13642_v59 = vrot.slane %v9713_v13, %v8224_v2 }
 0x415   : > { %v9960_v52 = vpop.permute.xlu0 %3263  ;;  %v2584_v13 = vsel %vm745_vm4, %v9589_v12, %v9581_v21  ;;  %v13646_v21 = vrot.slane %v9720_v5, %v8230_v19  ;;  %v2568_v10 = vadd.f32 %v2564_v32, %v2506_v51  ;;  %v13736_v51 = vld [vmem:[#allocation42_spill] sm:$0xff] }
 0x416   : > { %13635 = vst [vmem:[#allocation44_spill] sm:$0xff] %v9960_v52  ;;  %v9978_v52 = vpop.permute.xlu1 %3265  ;;  %v2561_v8 = vmul.f32 %v13642_v59, %v2538_v44  ;;  %v2566_v44 = vadd.f32 %v2562_v34, %v2504_v22  ;;  %v2581_v22 = vsel %vm745_vm4, %v9587_v15, %v9589_v12  ;;  %v2641_v34 = vsel %vm805_vm5, %v9593_v62, %v9595_v18 }
 0x417   : > { %13636 = vst [vmem:[#allocation7_spill] sm:$0xff] %v9978_v52  ;;  %v2563_v52 = vmul.f32 %v13641_v37, %v2536_v50  ;;  %v13645_v50 = vrot.slane %v9720_v5, %v8228_v14  ;;  %v13647_v59 = vrot.slane %v9720_v5, %v8224_v2  ;;  %v2640_v15 = vsel %vm805_vm5, %v9595_v18, %v9599_v48 }
 0x418   : > { %v2565_v11 = vadd.f32 %v2561_v8, %v2503_v30  ;;  %v2642_v12 = vsel %vm805_vm5, %v9601_v47, %v9593_v62  ;;  %v13649_v8 = vrot.slane %v9735_v45, %v8228_v14  ;;  %v2639_v18 = vsel %vm805_vm5, %v9599_v48, %v9601_v47 }
 0x419   : > { %v10024_v61 = vpop.permute.xlu0 %3267  ;;  %v2608_v37 = vmul.f32 %v13645_v50, %v2583_v0  ;;  %v2609_v0 = vmul.f32 %v13646_v21, %v2582_v54  ;;  %v2567_v50 = vadd.f32 %v2563_v52, %v2505_v46  ;;  %v2607_v54 = vmul.f32 %v13647_v59, %v2584_v13  ;;  %v10104_v59 = vld [vmem:[%s13230_s3 + $0x44] ss:$8 sm:$0xf] }
 0x41a   : > { %v10036_v42 = vpop.permute.xlu1 %3269  ;;  %v13648_v52 = vrot.slane %v9720_v5, %v8226_v9  ;;  %v2666_v32 = vmul.f32 %v13649_v8, %v2641_v34  ;;  %v2687_v62 = vsel %vm853_vm6, %v9605_v16, %v9607_v63  ;;  %v13650_v47 = vrot.slane %v9735_v45, %v8230_v19 }
 0x41b   : > { %v2612_v58 = vadd.f32 %v2608_v37, %v2566_v44  ;;  %v2613_v37 = vadd.f32 %v2609_v0, %v2567_v50  ;;  %v2611_v48 = vadd.f32 %v2607_v54, %v2565_v11  ;;  %v13651_v0 = vrot.slane %v9735_v45, %v8224_v2 }
 0x41c   : > { %v2610_v30 = vmul.f32 %v13648_v52, %v2581_v22  ;;  %v2667_v22 = vmul.f32 %v13650_v47, %v2640_v15  ;;  %v2686_v50 = vsel %vm853_vm6, %v9607_v63, %v9611_v43  ;;  %v13652_v8 = vrot.slane %v9735_v45, %v8226_v9 }
 0x41d   : > { %v10067_v21 = vpop.permute.xlu0 %3321  ;;  %v2665_v34 = vmul.f32 %v13651_v0, %v2642_v12  ;;  %v13653_v11 = vrot.slane %v9748_v55, %v8228_v14  ;;  %v2685_v15 = vsel %vm853_vm6, %v9611_v43, %v9613_v56  ;;  %v2688_v63 = vsel %vm853_vm6, %v9613_v56, %v9605_v16 }
 0x41e   : > { %v10077_v46 = vpop.permute.xlu1 %3323  ;;  %v2668_v44 = vmul.f32 %v13652_v8, %v2639_v18  ;;  %v2614_v47 = vadd.f32 %v2610_v30, %v2568_v10  ;;  %v2670_v0 = vadd.f32 %v2666_v32, %v2612_v58  ;;  %v13654_v43 = vrot.slane %v9748_v55, %v8230_v19 }
 0x41f   : > { %v2712_v54 = vmul.f32 %v13653_v11, %v2687_v62  ;;  %v10141_v62 = vld [vmem:[%s13230_s3 + $0x45] ss:$8 sm:$0xf]  ;;  %v2745_v16 = vsel %vm913_vm7, %v9617_v53, %v9619_v35  ;;  %v2671_v10 = vadd.f32 %v2667_v22, %v2613_v37  ;;  %v13655_v30 = vrot.slane %v9748_v55, %v8224_v2 }
 0x420   : > { %v2713_v8 = vmul.f32 %v13654_v43, %v2686_v50  ;;  %v13656_v11 = vrot.slane %v9748_v55, %v8226_v9  ;;  %v2744_v43 = vsel %vm913_vm7, %v9619_v35, %v9623_v26  ;;  %v2669_v56 = vadd.f32 %v2665_v34, %v2611_v48  ;;  %v10173_v55 = vld [vmem:[%s13230_s3 + $0x46] ss:$8 sm:$0xf] }
 0x421   : > { %v10116_v52 = vpop.permute.xlu0 %3325  ;;  %v2711_v32 = vmul.f32 %v13655_v30, %v2688_v63  ;;  %v2672_v45 = vadd.f32 %v2668_v44, %v2614_v47  ;;  %v2716_v5 = vadd.f32 %v2712_v54, %v2670_v0  ;;  %v13657_v22 = vrot.slane %v9761_v4, %v8228_v14  ;;  %v13705_v47 = vld [vmem:[#allocation18_spill] sm:$0xff] }
 0x422   : > { %v10132_v12 = vpop.permute.xlu1 %3327  ;;  %v2714_v50 = vmul.f32 %v13656_v11, %v2685_v15  ;;  %v2743_v35 = vsel %vm913_vm7, %v9623_v26, %v9625_v49  ;;  %v2746_v44 = vsel %vm913_vm7, %v9625_v49, %v9617_v53  ;;  %v2717_v34 = vadd.f32 %v2713_v8, %v2671_v10  ;;  %v13679_v8 = vld [vmem:[#allocation13_spill] sm:$0xff] }
 0x423   : > { %v2770_v15 = vmul.f32 %v13657_v22, %v2745_v16  ;;  %v13658_v54 = vrot.slane %v9761_v4, %v8230_v19  ;;  %v2715_v26 = vadd.f32 %v2711_v32, %v2669_v56  ;;  %v2791_v53 = vsel %vm961_vm8, %v9629_v25, %v9631_v24 }
 0x424   : > { %v2718_v16 = vadd.f32 %v2714_v50, %v2672_v45  ;;  %v13659_v10 = vrot.slane %v9761_v4, %v8224_v2  ;;  %v13660_v11 = vrot.slane %v9761_v4, %v8226_v9  ;;  %v2790_v45 = vsel %vm961_vm8, %v9631_v24, %v9635_v27  ;;  %v7716_v50 = vld [vmem:[%s13229_s2 + $0x8] sm:$0xf]  ;;  %v13678_v24 = vld [vmem:[#allocation15_spill] sm:$0xff] }
 0x425   : > { %v10164_v18 = vpop.permute.xlu0 %3367  ;;  %v2771_v63 = vmul.f32 %v13658_v54, %v2744_v43  ;;  %v2792_v56 = vsel %vm961_vm8, %v9637_v38, %v9629_v25  ;;  %v2774_v22 = vadd.f32 %v2770_v15, %v2716_v5  ;;  %v2789_v4 = vsel %vm961_vm8, %v9635_v27, %v9637_v38  ;;  %5627 = vperm.xlu1 %7821, %v7716_v50  }
 0x426   : > { %v10166_v58 = vpop.permute.xlu1 %3369  ;;  %v2769_v30 = vmul.f32 %v13659_v10, %v2746_v44  ;;  %v2772_v43 = vmul.f32 %v13660_v11, %v2743_v35  ;;  %v13661_v44 = vrot.slane %v9779_v23, %v8228_v14  ;;  %v2849_v5 = vsel %vm1021_vm9, %v9641_v28, %v9643_v17  ;;  %v13676_v35 = vld [vmem:[#allocation34_spill] sm:$0xff] }
 0x427   : > { %v2775_v25 = vadd.f32 %v2771_v63, %v2717_v34  ;;  %v13662_v38 = vrot.slane %v9779_v23, %v8230_v19  ;;  %v13663_v10 = vrot.slane %v9779_v23, %v8224_v2  ;;  %v2848_v63 = vsel %vm1021_vm9, %v9643_v17, %v9647_v57 }
 0x428   : > { %v2816_v54 = vmul.f32 %v13661_v44, %v2791_v53  ;;  %v2850_v53 = vsel %vm1021_vm9, %v9649_v60, %v9641_v28  ;;  %v2773_v50 = vadd.f32 %v2769_v30, %v2715_v26  ;;  %v2776_v44 = vadd.f32 %v2772_v43, %v2718_v16 }
 0x429   : > { %v10199_v49 = vpop.permute.xlu0 %3371  ;;  %v2817_v15 = vmul.f32 %v13662_v38, %v2790_v45  ;;  %v2815_v34 = vmul.f32 %v13663_v10, %v2792_v56  ;;  %v13664_v45 = vrot.slane %v9779_v23, %v8226_v9  ;;  %v2847_v56 = vsel %vm1021_vm9, %v9647_v57, %v9649_v60 }
 0x42a   : > { %v10217_v32 = vpop.permute.xlu1 %3373  ;;  %v13665_v17 = vrot.slane %v9792_v1, %v8228_v14  ;;  %v2895_v28 = vsel %vm13343_vm10, %v9653_v39, %v9655_v20  ;;  %v2894_v23 = vsel %vm13343_vm10, %v9655_v20, %v9659_v3  ;;  %v2896_v57 = vsel %vm13343_vm10, %v9661_v31, %v9653_v39  ;;  %v10292_v20 = vld [vmem:[%s13230_s3 + $0x47] ss:$8 sm:$0xf] }
 0x42b   : > { %v2818_v38 = vmul.f32 %v13664_v45, %v2789_v4  ;;  %v2820_v60 = vadd.f32 %v2816_v54, %v2774_v22  ;;  %v13666_v26 = vrot.slane %v9792_v1, %v8230_v19  ;;  %v13667_v30 = vrot.slane %v9792_v1, %v8224_v2  ;;  %13668 = vst [vmem:[#allocation8_spill] sm:$0xff] %v10292_v20  ;;  %v13670_v45 = vld [vmem:[#allocation33_spill] sm:$0xff]  ;;  %v13740_v20 = vld [vmem:[#allocation28_spill] sm:$0xff] }
 0x42c   : > { %v2874_v27 = vmul.f32 %v13665_v17, %v2849_v5  ;;  %v2893_v4 = vsel %vm13343_vm10, %v9659_v3, %v9661_v31  ;;  %v2821_v39 = vadd.f32 %v2817_v15, %v2775_v25  ;;  %v2819_v22 = vadd.f32 %v2815_v34, %v2773_v50  ;;  %v13674_v34 = vld [vmem:[#allocation12_spill] sm:$0xff] }
 0x42d   : > { %v10253_v11 = vpop.permute.xlu0 %3425  ;;  %v2875_v16 = vmul.f32 %v13666_v26, %v2848_v63  ;;  %v2873_v43 = vmul.f32 %v13667_v30, %v2850_v53  ;;  %v13669_v54 = vrot.slane %v9792_v1, %v8226_v9  ;;  %v2953_v63 = vsel %vm13342_vm11, %v9665_v36, %v9667_v41 }
 0x42e   : > { %v10262_v10 = vpop.permute.xlu1 %3427  ;;  %v13671_v3 = vrot.slane %v13670_v45, %v8228_v14  ;;  %v13672_v17 = vrot.slane %v13670_v45, %v8230_v19  ;;  %v13673_v15 = vrot.slane %v13670_v45, %v8224_v2  ;;  %v2954_v50 = vsel %vm13342_vm11, %v13674_v34, %v9665_v36 }
 0x42f   : > { %v2876_v5 = vmul.f32 %v13669_v54, %v2847_v56  ;;  %v2822_v26 = vadd.f32 %v2818_v38, %v2776_v44  ;;  %v2878_v30 = vadd.f32 %v2874_v27, %v2820_v60  ;;  %v3000_v36 = vsel %vm13680_vm1, %v13679_v8, %v13678_v24  ;;  %v13681_v27 = vld [vmem:[#allocation9_spill] sm:$0xff] }
 0x430   : > { %v2920_v31 = vmul.f32 %v13671_v3, %v2895_v28  ;;  %v2921_v25 = vmul.f32 %v13672_v17, %v2894_v23  ;;  %v2919_v1 = vmul.f32 %v13673_v15, %v2896_v57  ;;  %v13675_v28 = vrot.slane %v13670_v45, %v8226_v9 }
 0x431   : > { %v10301_v53 = vpop.permute.xlu0 %3429  ;;  %v2879_v3 = vadd.f32 %v2875_v16, %v2821_v39  ;;  %v2877_v17 = vadd.f32 %v2873_v43, %v2819_v22  ;;  %v13677_v57 = vrot.slane %v13676_v35, %v8228_v14  ;;  %v2880_v44 = vadd.f32 %v2876_v5, %v2822_v26  ;;  %v13683_v26 = vld [vmem:[#allocation10_spill] sm:$0xff] }
 0x432   : > { %v10316_v56 = vpop.permute.xlu1 %3431  ;;  %v2922_v54 = vmul.f32 %v13675_v28, %v2893_v4  ;;  %v2952_v38 = vsel %vm13342_vm11, %v9667_v41, %v13681_v27  ;;  %v13682_v60 = vrot.slane %v13676_v35, %v8224_v2  ;;  %v2924_v39 = vadd.f32 %v2920_v31, %v2878_v30  ;;  %v13684_v28 = vld [vmem:[#allocation36_spill] sm:$0xff]  ;;  %v13698_v4 = vld [vmem:[#allocation14_spill] sm:$0xff] }
 0x433   : > { %v2978_v15 = vmul.f32 %v13677_v57, %v2953_v63  ;;  %v2925_v22 = vadd.f32 %v2921_v25, %v2879_v3  ;;  %v2923_v63 = vadd.f32 %v2919_v1, %v2877_v17  ;;  %v2951_v5 = vsel %vm13342_vm11, %v13681_v27, %v13674_v34  ;;  %v13686_v31 = vld [vmem:[#allocation16_spill] sm:$0xff]  ;;  %v13687_v25 = vld [vmem:[#allocation31_spill] sm:$0xff]  ;;  %vm13691_vm11 = vmmov %vm13680_vm1 }
 0x434   : > { %v2977_v16 = vmul.f32 %v13682_v60, %v2954_v50  ;;  %v2926_v41 = vadd.f32 %v2922_v54, %v2880_v44  ;;  %v2999_v50 = vsel %vm13680_vm1, %v13678_v24, %v13683_v26  ;;  %v13685_v57 = vrot.slane %v13684_v28, %v8224_v2  ;;  %v13690_v54 = vld [vmem:[#allocation30_spill] sm:$0xff] }
 0x435   : > { %v10337_v43 = vpop.permute.xlu0 %3471  ;;  %v3058_v1 = vsel %vm13688_vm0, %v13687_v25, %v13686_v31  ;;  %v2982_v30 = vadd.f32 %v2978_v15, %v2924_v39  ;;  %v13689_v34 = vrot.slane %v13676_v35, %v8230_v19  ;;  %v2998_v17 = vsel %vm13691_vm11, %v13683_v26, %v13690_v54  ;;  %v13693_v15 = vld [vmem:[#allocation19_spill] sm:$0xff]  ;;  %v13694_v39 = vld [vmem:[#allocation17_spill] sm:$0xff]  ;;  %vm13699_vm11 = vmmov %vm13688_vm0 }
 0x436   : > { %v10345_v45 = vpop.permute.xlu1 %3473  ;;  %v3023_v60 = vmul.f32 %v13685_v57, %v3000_v36  ;;  %v2997_v24 = vsel %vm13680_vm1, %v13690_v54, %v13679_v8  ;;  %v13692_v36 = vrot.slane %v13676_v35, %v8226_v9  ;;  %v2981_v27 = vadd.f32 %v2977_v16, %v2923_v63  ;;  %v13695_v57 = vld [vmem:[#allocation21_spill] sm:$0xff]  ;;  %vm13700_vm1 = vmmov %vm13688_vm0  ;;  %v13701_v63 = vld [vmem:[#allocation39_spill] sm:$0xff] }
 0x437   : > { %v2979_v3 = vmul.f32 %v13689_v34, %v2952_v38  ;;  %v3057_v38 = vsel %vm13688_vm0, %v13686_v31, %v13693_v15  ;;  %vm13696_vm10 = vcmp.lt.s32.totalorder %v8246_v6, 1  ;;  %v13697_v8 = vrot.slane %v13684_v28, %v8228_v14 }
 0x438   : > { %v2980_v44 = vmul.f32 %v13692_v36, %v2951_v5  ;;  %v3104_v26 = vsel %vm13696_vm10, %v13695_v57, %v13694_v39  ;;  %v3056_v35 = vsel %vm13699_vm11, %v13693_v15, %v13698_v4  ;;  %v3055_v16 = vsel %vm13700_vm1, %v13698_v4, %v13687_v25  ;;  %vm13708_vm0 = vmmov %vm13696_vm10 }
 0x439   : > { %v10380_v34 = vpop.permute.xlu0 %3475  ;;  %v3024_v54 = vmul.f32 %v13697_v8, %v2999_v50  ;;  %v13702_v5 = vrot.slane %v13701_v63, %v8224_v2  ;;  %v13703_v23 = vrot.slane %v13684_v28, %v8230_v19  ;;  %v13704_v8 = vrot.slane %v13684_v28, %v8226_v9  ;;  %vm13709_vm11 = vmmov %vm13708_vm0  ;;  %v13710_v28 = vld [vmem:[#allocation41_spill] sm:$0xff] }
 0x43a   : > { %v10396_v36 = vpop.permute.xlu1 %3477  ;;  %v3027_v15 = vadd.f32 %v3023_v60, %v2981_v27  ;;  %v3103_v4 = vsel %vm13696_vm10, %v13694_v39, %v13705_v47  ;;  %v13706_v25 = vrot.slane %v13701_v63, %v8228_v14  ;;  %v13711_v60 = vrot.slane %v13710_v28, %v8224_v2 }
 0x43b   : > { %v3081_v31 = vmul.f32 %v13702_v5, %v3058_v1  ;;  %v3025_v50 = vmul.f32 %v13703_v23, %v2998_v17  ;;  %v3026_v0 = vmul.f32 %v13704_v8, %v2997_v24  ;;  %v13707_v5 = vld [vmem:[#allocation32_spill] sm:$0xff]  ;;  %v2983_v24 = vadd.f32 %v2979_v3, %v2925_v22 }
 0x43c   : > { %v3082_v1 = vmul.f32 %v13706_v25, %v3057_v38  ;;  %v3102_v48 = vsel %vm13708_vm0, %v13705_v47, %v13707_v5  ;;  %v3101_v23 = vsel %vm13709_vm11, %v13707_v5, %v13695_v57  ;;  %v3127_v17 = vmul.f32 %v13711_v60, %v3104_v26  ;;  %v10433_v57 = vld [vmem:[%s13230_s3 + $0x60] ss:$8 sm:$0xf] }
 0x43d   : > { %v2984_v27 = vadd.f32 %v2980_v44, %v2926_v41  ;;  %v13712_v39 = vrot.slane %v13701_v63, %v8230_v19  ;;  %v13713_v8 = vrot.slane %v13701_v63, %v8226_v9  ;;  %v10428_v47 = vpop.permute.xlu0 %3529  ;;  %13714 = vst [vmem:[#allocation11_spill] sm:$0xff] %v10433_v57  ;;  %v3028_v5 = vadd.f32 %v3024_v54, %v2982_v30  ;;  %v10451_v54 = vld [vmem:[%s13230_s3 + $0x61] ss:$8 sm:$0xf] }
 0x43e   : > { %v3085_v37 = vadd.f32 %v3081_v31, %v3027_v15  ;;  %v13715_v22 = vrot.slane %v13710_v28, %v8228_v14  ;;  %v10438_v3 = vpop.permute.xlu1 %3531  ;;  %v3029_v26 = vadd.f32 %v3025_v50, %v2983_v24  ;;  %v13717_v60 = vrot.slane %v13710_v28, %v8226_v9  ;;  %13718 = vst [vmem:[#allocation5_spill] sm:$0xff] %v10451_v54  ;;  %v13733_v44 = vld [vmem:[#allocation24_spill] sm:$0xff]  ;;  %v13738_v54 = vld [vmem:[#allocation29_spill] sm:$0xff] }
 0x43f   : > { %v3083_v38 = vmul.f32 %v13712_v39, %v3056_v35  ;;  %v3084_v25 = vmul.f32 %v13713_v8, %v3055_v16  ;;  %v3030_v35 = vadd.f32 %v3026_v0, %v2984_v27  ;;  %v13716_v16 = vrot.slane %v13710_v28, %v8230_v19  ;;  %v13720_v27 = vld [vmem:[#allocation23_spill] sm:$0xff]  ;;  %v13728_v39 = vld [vmem:[#allocation38_spill] sm:$0xff]  ;;  %v13729_v8 = vld [vmem:[#allocation37_spill] sm:$0xff] }
 0x440   : > { %v3128_v41 = vmul.f32 %v13715_v22, %v3103_v4  ;;  %v3130_v30 = vmul.f32 %v13717_v60, %v3101_v23  ;;  %v3086_v31 = vadd.f32 %v3082_v1, %v3028_v5  ;;  %v3131_v15 = vadd.f32 %v3127_v17, %v3085_v37  ;;  %v13721_v22 = vld [vmem:[#allocation35_spill] sm:$0xff]  ;;  %v13723_v60 = vld [vmem:[#allocation20_spill] sm:$0xff] }
 0x441   : > { %v3129_v63 = vmul.f32 %v13716_v16, %v3102_v48  ;;  %v3087_v50 = vadd.f32 %v3083_v38, %v3029_v26  ;;  %v3088_v24 = vadd.f32 %v3084_v25, %v3030_v35  ;;  %v13719_v48 = vld [vmem:[#allocation22_spill] sm:$0xff]  ;;  %v10461_v28 = vpop.permute.xlu0 %3533  ;;  %v13722_v35 = vld [vmem:[#allocation25_spill] sm:$0xff]  ;;  %v13739_v57 = vrot.slane %v13738_v54, 4 }
 0x442   : > { %v3169_v23 = vsel %vm1353_vm15, %v13720_v27, %v13719_v48  ;;  %v3132_v1 = vadd.f32 %v3128_v41, %v3086_v31  ;;  %v10465_v37 = vpop.permute.xlu1 %3535  ;;  %v3168_v26 = vsel %vm1353_vm15, %v13719_v48, %v13721_v22  ;;  %v3167_v41 = vsel %vm1353_vm15, %v13721_v22, %v13722_v35  ;;  %v10484_v16 = vld [vmem:[%s13230_s3 + $0x62] ss:$8 sm:$0xf] }
 0x443   : > { %v3133_v25 = vadd.f32 %v3129_v63, %v3087_v50  ;;  %v3134_v5 = vadd.f32 %v3130_v30, %v3088_v24  ;;  %v13724_v31 = vrot.slane %v13723_v60, 4  ;;  %v13725_v63 = vld [vmem:[#allocation27_spill] sm:$0xff]  ;;  %v3170_v24 = vsel %vm1353_vm15, %v13722_v35, %v13720_v27  ;;  %v13727_v48 = vld [vmem:[#allocation26_spill] sm:$0xff] }
 0x444   : > { %v13726_v30 = vrot.slane %v13725_v63, %v8224_v2  ;;  %v3227_v22 = vsel %vm13352_vm12, %v13728_v39, %v13727_v48  ;;  %v3226_v60 = vsel %vm13352_vm12, %v13727_v48, %v13729_v8  ;;  %v13730_v35 = vrot.slane %v13725_v63, %v8228_v14  ;;  %v13732_v48 = vld [vmem:[#allocation40_spill] sm:$0xff] }
 0x445   : > { %v3151_v17 = vadd.f32 %v13724_v31, %v3131_v15  ;;  %v10503_v15 = vpop.permute.xlu0 %3575  ;;  %v13731_v38 = vrot.slane %v13725_v63, %v8230_v19  ;;  %v3225_v4 = vsel %vm13352_vm12, %v13729_v8, %v13732_v48  ;;  %v13734_v27 = vrot.slane %v13733_v44, 4 }
 0x446   : > { %v3193_v50 = vmul.f32 %v13726_v30, %v3169_v23  ;;  %v3194_v30 = vmul.f32 %v13730_v35, %v3168_v26  ;;  %v10521_v23 = vpop.permute.xlu1 %3577  ;;  %v13735_v26 = vrot.slane %v13725_v63, %v8226_v9  ;;  %v3228_v8 = vsel %vm13352_vm12, %v13732_v48, %v13728_v39 }
 0x447   : > { %v3195_v0 = vmul.f32 %v13731_v38, %v3167_v41  ;;  %v3152_v13 = vadd.f32 %v13734_v27, %v3132_v1  ;;  %v13737_v38 = vrot.slane %v13736_v51, %v8224_v2  ;;  %v3153_v31 = vadd.f32 %v13739_v57, %v3133_v25 }
 0x448   : > { %v3196_v35 = vmul.f32 %v13735_v26, %v3170_v24  ;;  %v3197_v33 = vadd.f32 %v3193_v50, %v3151_v17  ;;  %v13741_v44 = vrot.slane %v13740_v20, 4  ;;  %v13742_v63 = vrot.slane %v13736_v51, %v8228_v14  ;;  %v13744_v26 = vld [vmem:[#allocation7_spill] sm:$0xff] }
 0x449   : > { %v3251_v41 = vmul.f32 %v13737_v38, %v3227_v22  ;;  %v13743_v27 = vrot.slane %v13736_v51, %v8230_v19  ;;  %v13745_v38 = vld [vmem:[#allocation44_spill] sm:$0xff]  ;;  %v3272_v57 = vsel %vm13351_vm13, %v13744_v26, %v10024_v61  ;;  %v3271_v20 = vsel %vm13351_vm13, %v10024_v61, %v10036_v42  ;;  %v10559_v54 = vpop.permute.xlu0 %3579 }
 0x44a   : > { %v3154_v1 = vadd.f32 %v13741_v44, %v3134_v5  ;;  %v3252_v24 = vmul.f32 %v13742_v63, %v3226_v60  ;;  %v3273_v39 = vsel %vm13351_vm13, %v13745_v38, %v13744_v26  ;;  %v3198_v17 = vadd.f32 %v3194_v30, %v3152_v13  ;;  %v10568_v60 = vpop.permute.xlu1 %3581  ;;  %v13747_v13 = vld [vmem:[#allocation43_spill] sm:$0xff] }
 0x44b   : > { %v3253_v22 = vmul.f32 %v13743_v27, %v3225_v4  ;;  %v3199_v25 = vadd.f32 %v3195_v0, %v3153_v31  ;;  %v13746_v4 = vrot.slane %v13736_v51, %v8226_v9  ;;  %v3274_v50 = vsel %vm13351_vm13, %v10036_v42, %v13745_v38 }
 0x44c   : > { %v3200_v48 = vadd.f32 %v3196_v35, %v3154_v1  ;;  %v3255_v44 = vadd.f32 %v3251_v41, %v3197_v33  ;;  %v3331_v61 = vsel %vm13350_vm14, %v10067_v21, %v10077_v46  ;;  %v3330_v51 = vsel %vm13350_vm14, %v10077_v46, %v10116_v52 }
 0x44d   : > { %v3254_v5 = vmul.f32 %v13746_v4, %v3228_v8  ;;  %v13748_v0 = vrot.slane %v13747_v13, %v8224_v2  ;;  %v13749_v42 = vrot.slane %v13747_v13, %v8228_v14  ;;  %v13750_v33 = vrot.slane %v13747_v13, %v8230_v19  ;;  %v10598_v26 = vpop.permute.xlu0 %3633 }
 0x44e   : > { %v3329_v41 = vsel %vm13350_vm14, %v10116_v52, %v10132_v12  ;;  %v3256_v8 = vadd.f32 %v3252_v24, %v3198_v17  ;;  %v3257_v1 = vadd.f32 %v3253_v22, %v3199_v25  ;;  %v13751_v46 = vrot.slane %v13747_v13, %v8226_v9 }
 0x44f   : > { %v3297_v31 = vmul.f32 %v13748_v0, %v3273_v39  ;;  %v3298_v30 = vmul.f32 %v13749_v42, %v3272_v57  ;;  %v3299_v35 = vmul.f32 %v13750_v33, %v3271_v20  ;;  %v3332_v27 = vsel %vm13350_vm14, %v10132_v12, %v10067_v21  ;;  %v10610_v20 = vpop.permute.xlu1 %3635 }
 0x450   : > { %v3300_v63 = vmul.f32 %v13751_v46, %v3274_v50  ;;  %v3258_v38 = vadd.f32 %v3254_v5, %v3200_v48  ;;  %v13752_v39 = vrot.slane %v9938_v7, %v8224_v2  ;;  %v13753_v52 = vrot.slane %v9938_v7, %v8228_v14 }
 0x451   : > { %v3377_v22 = vsel %vm638_vm2, %v10164_v18, %v10166_v58  ;;  %v13754_v21 = vrot.slane %v9938_v7, %v8230_v19  ;;  %v3376_v17 = vsel %vm638_vm2, %v10166_v58, %v10199_v49  ;;  %v3375_v25 = vsel %vm638_vm2, %v10199_v49, %v10217_v32 }
 0x452   : > { %v3355_v57 = vmul.f32 %v13752_v39, %v3331_v61  ;;  %v3356_v24 = vmul.f32 %v13753_v52, %v3330_v51  ;;  %v3378_v4 = vsel %vm638_vm2, %v10217_v32, %v10164_v18  ;;  %v3301_v5 = vadd.f32 %v3297_v31, %v3255_v44  ;;  %v10641_v32 = vpop.permute.xlu0 %3637 }
 0x453   : > { %v3357_v12 = vmul.f32 %v13754_v21, %v3329_v41  ;;  %v3302_v50 = vadd.f32 %v3298_v30, %v3256_v8  ;;  %v3303_v48 = vadd.f32 %v3299_v35, %v3257_v1  ;;  %v13755_v61 = vrot.slane %v9938_v7, %v8226_v9 }
 0x454   : > { %v3304_v13 = vadd.f32 %v3300_v63, %v3258_v38  ;;  %v13756_v58 = vrot.slane %v10009_v29, %v8224_v2  ;;  %v3435_v49 = vsel %vm697_vm3, %v10253_v11, %v10262_v10  ;;  %v3434_v18 = vsel %vm697_vm3, %v10262_v10, %v10301_v53  ;;  %v3640_v10 = vpop.permute.xlu1 %3639 }
 0x455   : > { %v3358_v51 = vmul.f32 %v13755_v61, %v3332_v27  ;;  %v13757_v7 = vrot.slane %v10009_v29, %v8228_v14  ;;  %v13758_v31 = vrot.slane %v10009_v29, %v8230_v19  ;;  %v13759_v30 = vrot.slane %v10009_v29, %v8226_v9 }
 0x456   : > { %v3401_v0 = vmul.f32 %v13756_v58, %v3377_v22  ;;  %v3433_v35 = vsel %vm697_vm3, %v10301_v53, %v10316_v56  ;;  %v3359_v41 = vadd.f32 %v3355_v57, %v3301_v5  ;;  %v3360_v8 = vadd.f32 %v3356_v24, %v3302_v50 }
 0x457   : > { %v3402_v44 = vmul.f32 %v13757_v7, %v3376_v17  ;;  %v3403_v42 = vmul.f32 %v13758_v31, %v3375_v25  ;;  %v3404_v33 = vmul.f32 %v13759_v30, %v3378_v4  ;;  %v3361_v1 = vadd.f32 %v3357_v12, %v3303_v48 }
 0x458   : > { %v3812_v46 = vrot.slane %v10484_v16, %v8226_v9  ;;  %v3362_v63 = vadd.f32 %v3358_v51, %v3304_v13  ;;  %v13760_v27 = vrot.slane %v10049_v40, %v8224_v2  ;;  %v13761_v29 = vrot.slane %v10049_v40, %v8228_v14  ;;  %v3682_v4 = vpop.permute.xlu1 %3681 }
 0x459   : > { %v3436_v53 = vsel %vm697_vm3, %v10316_v56, %v10253_v11  ;;  %v13762_v57 = vrot.slane %v10049_v40, %v8230_v19  ;;  %v3481_v24 = vsel %vm745_vm4, %v10337_v43, %v10345_v45  ;;  %v3480_v22 = vsel %vm745_vm4, %v10345_v45, %v10380_v34  ;;  %v3680_v11 = vpop.permute.xlu0 %3679 }
 0x45a   : > { %v3459_v38 = vmul.f32 %v13760_v27, %v3435_v49  ;;  %v3460_v39 = vmul.f32 %v13761_v29, %v3434_v18  ;;  %v3479_v21 = vsel %vm745_vm4, %v10380_v34, %v10396_v36  ;;  %v3405_v56 = vadd.f32 %v3401_v0, %v3359_v41 }
 0x45b   : > { %v3461_v52 = vmul.f32 %v13762_v57, %v3433_v35  ;;  %v3406_v12 = vadd.f32 %v3402_v44, %v3360_v8  ;;  %v3407_v17 = vadd.f32 %v3403_v42, %v3361_v1  ;;  %v3408_v25 = vadd.f32 %v3404_v33, %v3362_v63 }
 0x45c   : > { %v13763_v5 = vrot.slane %v10049_v40, %v8226_v9  ;;  %v3482_v45 = vsel %vm745_vm4, %v10396_v36, %v10337_v43  ;;  %v3539_v34 = vsel %vm805_vm5, %v10428_v47, %v10438_v3  ;;  %v3538_v48 = vsel %vm805_vm5, %v10438_v3, %v10461_v28  ;;  %v3686_v41 = vpop.permute.xlu1 %3685 }
 0x45d   : > { %v13764_v61 = vrot.slane %v10104_v59, %v8224_v2  ;;  %v13765_v51 = vrot.slane %v10104_v59, %v8228_v14  ;;  %v13766_v43 = vrot.slane %v10104_v59, %v8230_v19  ;;  %v3537_v58 = vsel %vm805_vm5, %v10461_v28, %v10465_v37  ;;  %v3684_v7 = vpop.permute.xlu0 %3683 }
 0x45e   : > { %v3462_v50 = vmul.f32 %v13763_v5, %v3436_v53  ;;  %v3463_v0 = vadd.f32 %v3459_v38, %v3405_v56  ;;  %v3464_v49 = vadd.f32 %v3460_v39, %v3406_v12  ;;  %v3465_v3 = vadd.f32 %v3461_v52, %v3407_v17 }
 0x45f   : > { %v3505_v40 = vmul.f32 %v13764_v61, %v3481_v24  ;;  %v3506_v13 = vmul.f32 %v13765_v51, %v3480_v22  ;;  %v3507_v36 = vmul.f32 %v13766_v43, %v3479_v21  ;;  %v3540_v18 = vsel %vm805_vm5, %v10465_v37, %v10428_v47  ;;  %v13776_v51 = vld [vmem:[#allocation8_spill] sm:$0xff] }
 0x460   : > { %v13767_v44 = vrot.slane %v10104_v59, %v8226_v9  ;;  %v13768_v42 = vrot.slane %v10141_v62, %v8224_v2  ;;  %v13769_v28 = vrot.slane %v10141_v62, %v8228_v14  ;;  %v3585_v35 = vsel %vm853_vm6, %v10503_v15, %v10521_v23 }
 0x461   : > { %v3466_v47 = vadd.f32 %v3462_v50, %v3408_v25  ;;  %v13770_v37 = vrot.slane %v10141_v62, %v8230_v19  ;;  %v3804_v8 = vrot.slane %v10484_v16, %v8228_v14  ;;  %v3808_v1 = vrot.slane %v10484_v16, %v8230_v19  ;;  %v3738_v22 = vpop.permute.xlu0 %3737 }
 0x462   : > { %v3508_v31 = vmul.f32 %v13767_v44, %v3482_v45  ;;  %v3563_v30 = vmul.f32 %v13768_v42, %v3539_v34  ;;  %v3564_v33 = vmul.f32 %v13769_v28, %v3538_v48  ;;  %v3509_v63 = vadd.f32 %v3505_v40, %v3463_v0 }
 0x463   : > { %v3565_v59 = vmul.f32 %v13770_v37, %v3537_v58  ;;  %v3510_v27 = vadd.f32 %v3506_v13, %v3464_v49  ;;  %v3511_v38 = vadd.f32 %v3507_v36, %v3465_v3  ;;  %v13771_v29 = vrot.slane %v10141_v62, %v8226_v9 }
 0x464   : > { %v13772_v53 = vrot.slane %v10173_v55, %v8224_v2  ;;  %v3584_v52 = vsel %vm853_vm6, %v10521_v23, %v10559_v54  ;;  %v3583_v24 = vsel %vm853_vm6, %v10559_v54, %v10568_v60  ;;  %v3586_v62 = vsel %vm853_vm6, %v10568_v60, %v10503_v15  ;;  %v3740_v23 = vpop.permute.xlu1 %3739 }
 0x465   : > { %v3566_v39 = vmul.f32 %v13771_v29, %v3540_v18  ;;  %v3512_v21 = vadd.f32 %v3508_v31, %v3466_v47  ;;  %v3567_v56 = vadd.f32 %v3563_v30, %v3509_v63  ;;  %v3568_v12 = vadd.f32 %v3564_v33, %v3510_v27  ;;  %v3742_v43 = vpop.permute.xlu0 %3741  ;;  %v13781_v31 = vld [vmem:[#allocation11_spill] sm:$0xff] }
 0x466   : > { %v3609_v57 = vmul.f32 %v13772_v53, %v3585_v35  ;;  %v3643_v17 = vsel %vm913_vm7, %v10598_v26, %v10610_v20  ;;  %v3569_v25 = vadd.f32 %v3565_v59, %v3511_v38  ;;  %v3642_v54 = vsel %vm913_vm7, %v10610_v20, %v10641_v32  ;;  %v13784_v38 = vld [vmem:[#allocation5_spill] sm:$0xff] }
 0x467   : > { %v3641_v15 = vsel %vm913_vm7, %v10641_v32, %v3640_v10  ;;  %v3644_v60 = vsel %vm913_vm7, %v3640_v10, %v10598_v26  ;;  %v13773_v5 = vrot.slane %v10173_v55, %v8228_v14  ;;  %v13774_v45 = vrot.slane %v10173_v55, %v8230_v19 }
 0x468   : > { %v13775_v48 = vrot.slane %v10173_v55, %v8226_v9  ;;  %v3689_v61 = vsel %vm961_vm8, %v3680_v11, %v3682_v4  ;;  %v3570_v32 = vadd.f32 %v3566_v39, %v3512_v21  ;;  %v3613_v40 = vadd.f32 %v3609_v57, %v3567_v56  ;;  %v3744_v44 = vpop.permute.xlu1 %3743 }
 0x469   : > { %v3610_v50 = vmul.f32 %v13773_v5, %v3584_v52  ;;  %v3611_v34 = vmul.f32 %v13774_v45, %v3583_v24  ;;  %v13777_v26 = vrot.slane %v13776_v51, %v8224_v2  ;;  %v3690_v13 = vsel %vm961_vm8, %v3686_v41, %v3680_v11 }
 0x46a   : > { %v3612_v20 = vmul.f32 %v13775_v48, %v3586_v62  ;;  %v13778_v36 = vrot.slane %v13776_v51, %v8228_v14  ;;  %v13779_v55 = vrot.slane %v13776_v51, %v8230_v19  ;;  %v13780_v49 = vrot.slane %v13776_v51, %v8226_v9 }
 0x46b   : > { %v3667_v10 = vmul.f32 %v13777_v26, %v3643_v17  ;;  %v3747_v18 = vsel %vm1021_vm9, %v3738_v22, %v3740_v23  ;;  %v13782_v11 = vrot.slane %v13781_v31, %v8224_v2  ;;  %v3688_v30 = vsel %vm961_vm8, %v3682_v4, %v3684_v7 }
 0x46c   : > { %v3668_v58 = vmul.f32 %v13778_v36, %v3642_v54  ;;  %v3669_v0 = vmul.f32 %v13779_v55, %v3641_v15  ;;  %v3670_v3 = vmul.f32 %v13780_v49, %v3644_v60  ;;  %v3687_v28 = vsel %vm961_vm8, %v3684_v7, %v3686_v41  ;;  %v3786_v41 = vpop.permute.xlu0 %3785  ;;  %v3784_v56 = vpop.permute.xlu1 %3783 }
 0x46d   : > { %v3713_v42 = vmul.f32 %v13782_v11, %v3689_v61  ;;  %v3748_v33 = vsel %vm1021_vm9, %v3744_v44, %v3738_v22  ;;  %v3614_v35 = vadd.f32 %v3610_v50, %v3568_v12  ;;  %v3615_v47 = vadd.f32 %v3611_v34, %v3569_v25 }
 0x46e   : > { %v3616_v37 = vadd.f32 %v3612_v20, %v3570_v32  ;;  %v13783_v59 = vrot.slane %v13781_v31, %v8226_v9  ;;  %v3671_v27 = vadd.f32 %v3667_v10, %v3613_v40  ;;  %v13785_v29 = vrot.slane %v13784_v38, %v8224_v2 }
 0x46f   : > { %v3746_v4 = vsel %vm1021_vm9, %v3740_v23, %v3742_v43  ;;  %v3745_v7 = vsel %vm1021_vm9, %v3742_v43, %v3744_v44  ;;  %v13786_v57 = vrot.slane %v13781_v31, %v8228_v14  ;;  %v13787_v24 = vrot.slane %v13781_v31, %v8230_v19 }
 0x470   : > { %v3716_v63 = vmul.f32 %v13783_v59, %v3690_v13  ;;  %v3771_v39 = vmul.f32 %v13785_v29, %v3747_v18  ;;  %v3674_v53 = vadd.f32 %v3670_v3, %v3616_v37  ;;  %v13788_v22 = vrot.slane %v13784_v38, %v8226_v9  ;;  %v3790_v20 = vpop.permute.xlu0 %3789  ;;  %v3788_v26 = vpop.permute.xlu1 %3787  ;;  %v7647_v37 = vld [vmem:[%s13228_s1 + $0xf0] sm:$0xff]  ;;  %v7648_v59 = vld [vmem:[%s13228_s1 + $0xf8] sm:$0xff] }
 0x471   : > { %v3714_v52 = vmul.f32 %v13786_v57, %v3688_v30  ;;  %v3715_v62 = vmul.f32 %v13787_v24, %v3687_v28  ;;  %v3672_v12 = vadd.f32 %v3668_v58, %v3614_v35  ;;  %v3673_v17 = vadd.f32 %v3669_v0, %v3615_v47  ;;  %v7652_v29 = vld [vmem:[%s13228_s1 + $0x118] sm:$0xff]  ;;  %v7658_v57 = vld [vmem:[%s13228_s1 + $0x148] sm:$0xff] }
 0x472   : > { %v3774_v21 = vmul.f32 %v13788_v22, %v3748_v33  ;;  %v3717_v23 = vadd.f32 %v3713_v42, %v3671_v27  ;;  %vm13789_vm1 = vcmp.lt.s32.totalorder %v8246_v6, 55  ;;  %v3720_v54 = vadd.f32 %v3716_v63, %v3674_v53  ;;  %v7649_v63 = vld [vmem:[%s13228_s1 + $0x100] sm:$0xff]  ;;  %v7650_v27 = vld [vmem:[%s13228_s1 + $0x108] sm:$0xff] }
 0x473   : > { %v3793_v25 = vsel %vm13789_vm1, %v3784_v56, %v3786_v41  ;;  %v13790_v15 = vrot.slane %v13784_v38, %v8228_v14  ;;  %v13791_v5 = vrot.slane %v13784_v38, %v8230_v19  ;;  %v13792_v45 = vrot.slane %v10484_v16, %v8224_v2  ;;  %vm13793_vm10 = vmmov %vm13789_vm1  ;;  %v7645_v16 = vld [vmem:[%s13228_s1 + $0xe0] sm:$0xff]  ;;  %v7651_v38 = vld [vmem:[%s13228_s1 + $0x110] sm:$0xff] }
 0x474   : > { %v3775_v48 = vadd.f32 %v3771_v39, %v3717_v23  ;;  %v3718_v61 = vadd.f32 %v3714_v52, %v3672_v12  ;;  %v3719_v32 = vadd.f32 %v3715_v62, %v3673_v17  ;;  %v3778_v40 = vadd.f32 %v3774_v21, %v3720_v54  ;;  %vm13794_vm0 = vmmov %vm13789_vm1  ;;  %v7653_v39 = vld [vmem:[%s13228_s1 + $0x120] sm:$0xff] }
 0x475   : > { %v3772_v60 = vmul.f32 %v13790_v15, %v3746_v4  ;;  %v3773_v50 = vmul.f32 %v13791_v5, %v3745_v7  ;;  %v3817_v34 = vmul.f32 %v13792_v45, %v3793_v25  ;;  %v3794_v51 = vsel %vm13793_vm10, %v3790_v20, %v3784_v56  ;;  %vm13795_vm11 = vmmov %vm13794_vm0  ;;  %v7654_v4 = vld [vmem:[%s13228_s1 + $0x128] sm:$0xff]  ;;  %v7655_v7 = vld [vmem:[%s13228_s1 + $0x130] sm:$0xff] }
 0x476   : > { %v3820_v13 = vmul.f32 %v3812_v46, %v3794_v51  ;;  %v3791_v43 = vsel %vm13794_vm0, %v3788_v26, %v3790_v20  ;;  %v3792_v36 = vsel %vm13795_vm11, %v3786_v41, %v3788_v26  ;;  %v13796_v46 = vld [vmem:[#allocation6_spill] sm:$0xff]  ;;  %vm13797_vm1 = vcmask 1043456   ;;  %v7657_v53 = vld [vmem:[%s13228_s1 + $0x140] sm:$0xff] }
 0x477   : > { %v3821_v10 = vadd.f32 %v3817_v34, %v3775_v48  ;;  %v3776_v58 = vadd.f32 %v3772_v60, %v3718_v61  ;;  %v3777_v55 = vadd.f32 %v3773_v50, %v3719_v32  ;;  %v3818_v0 = vmul.f32 %v3804_v8, %v3792_v36  ;;  %vm13798_vm10 = vmmov %vm13797_vm1  ;;  %v7656_v41 = vld [vmem:[%s13228_s1 + $0x138] sm:$0xff] }
 0x478   : > { %v3819_v49 = vmul.f32 %v3808_v1, %v3791_v43  ;;  %v3824_v3 = vadd.f32 %v3820_v13, %v3778_v40  ;;  %vm13799_vm0 = vmmov %vm13797_vm1  ;;  %vm13801_vm14 = vcmask 31744   ;;  %v13803_v8 = vmov 0.0   ;;  %v7646_v1 = vld [vmem:[%s13228_s1 + $0xe8] sm:$0xff] }
 0x479   : > { %v3822_v18 = vadd.f32 %v3818_v0, %v3776_v58  ;;  %v3832_v31 = vadd.f32 %v13796_v46, %v3821_v10  ;;  %vm13800_vm11 = vmmov %vm13799_vm0 }
 0x47a   : > { %v3823_v44 = vadd.f32 %v3819_v49, %v3777_v55  ;;  %v3835_v11 = vadd.f32 %v13796_v46, %v3824_v3  ;;  %vm13802_vm13 = vmmov %vm13801_vm14 }
 0x47b   : > { %v3833_v30 = vadd.f32 %v13796_v46, %v3822_v18  ;;  %v3836_v47 = vmax.f32 %v3832_v31, 0.0 }
 0x47c   : > { %v3834_v42 = vadd.f32 %v13796_v46, %v3823_v44  ;;  %v3839_v28 = vmax.f32 %v3835_v11, 0.0 }
 0x47d   : > { %v3837_v35 = vmax.f32 %v3833_v30, 0.0 }
 0x47e   : > { %v3838_v33 = vmax.f32 %v3834_v42, 0.0  ;;  %7675 = vmatprep.subr.msk.mxu1 %vm13797_vm1, %v3839_v28  ;;  %vm13804_vm1 = vmmov %vm13802_vm13 }
 0x47f   : > { %7659 = vmatprep.subr.msk.mxu0 %vm13798_vm10, %v3837_v35  ;;  %vm13805_vm12 = vmmov %vm13804_vm1 }
 0x480   : > { %7676 = vmatpush1.msk.msra.mxu1 %vm13799_vm0, %v3838_v33  ;;  %7660 = vmatpush1.msk.msra.mxu0 %vm13800_vm11, %v3836_v47  ;;  %vm13809_vm10 = vmmov %vm13804_vm1 }
 0x481   : > { %7677 = vmatmul.mubr.msk.f32.vlgmr.msra.gmra.mrb[56].mxu1 %vm13801_vm14, %v7645_v16  ;;  %7661 = vmatmul.mubr.msk.f32.vlgmr.msra.gmra.mrb[56].mxu0 %vm13802_vm13, %v7645_v16  ;;  %vm13806_vm13 = vmmov %vm13804_vm1 }
 0x482   : > { %4128 = vmatprep.mubr.f32.mxu1 %v13803_v8  ;;  %3979 = vmatprep.mubr.f32.mxu0 %v13803_v8  ;;  %vm13807_vm14 = vmmov %vm13804_vm1 }
 0x483   : > { %vm13810_vm0 = vmmov %vm13804_vm1 }
 0x484   : > { %vm13811_vm11 = vmmov %vm13810_vm0 }
 0x485   : > { %7678 = vmatmul.mubr.msk.f32.gmra.mrb[58].mxu1 %vm13804_vm1, %v7646_v1  ;;  %7662 = vmatmul.mubr.msk.f32.gmra.mrb[58].mxu0 %vm13805_vm12, %v7646_v1  ;;  %vm13808_vm12 = vmmov %vm13804_vm1 }
 0x486   : > { %4134 = vmatprep.mubr.f32.mxu1 %v13803_v8  ;;  %3985 = vmatprep.mubr.f32.mxu0 %v13803_v8  ;;  %vm13812_vm1 = vmmov %vm13810_vm0 }
 0x489   : > { %7679 = vmatmul.mubr.msk.f32.gmra.mrb[60].mxu1 %vm13806_vm13, %v7647_v37  ;;  %7663 = vmatmul.mubr.msk.f32.gmra.mrb[60].mxu0 %vm13807_vm14, %v7647_v37  ;;  %vm13813_vm13 = vmmov %vm13810_vm0 }
 0x48a   : > { %4140 = vmatprep.mubr.f32.mxu1 %v13803_v8  ;;  %3991 = vmatprep.mubr.f32.mxu0 %v13803_v8  ;;  %vm13814_vm14 = vmmov %vm13810_vm0 }
 0x48d   : > { %7680 = vmatmul.mubr.msk.f32.gmra.mrb[62].mxu1 %vm13808_vm12, %v7648_v59  ;;  %7664 = vmatmul.mubr.msk.f32.gmra.mrb[62].mxu0 %vm13809_vm10, %v7648_v59  ;;  %vm13815_vm12 = vmmov %vm13810_vm0 }
 0x48e   : > { %4146 = vmatprep.mubr.f32.mxu1 %v13803_v8  ;;  %3997 = vmatprep.mubr.f32.mxu0 %v13803_v8  ;;  %vm13816_vm10 = vmmov %vm13810_vm0 }
 0x491   : > { %7681 = vmatmul.mubr.msk.f32.gmra.mrb[64].mxu1 %vm13810_vm0, %v7649_v63  ;;  %7665 = vmatmul.mubr.msk.f32.gmra.mrb[64].mxu0 %vm13811_vm11, %v7649_v63  ;;  %vm13817_vm11 = vmmov %vm13810_vm0 }
 0x492   : > { %4152 = vmatprep.mubr.f32.mxu1 %v13803_v8  ;;  %4003 = vmatprep.mubr.f32.mxu0 %v13803_v8 }
 0x495   : > { %7682 = vmatmul.mubr.msk.f32.gmra.mrb[66].mxu1 %vm13812_vm1, %v7650_v27  ;;  %7666 = vmatmul.mubr.msk.f32.gmra.mrb[66].mxu0 %vm13813_vm13, %v7650_v27  ;;  %vm13818_vm1 = vmmov %vm13810_vm0 }
 0x496   : > { %4158 = vmatprep.mubr.f32.mxu1 %v13803_v8  ;;  %4009 = vmatprep.mubr.f32.mxu0 %v13803_v8  ;;  %vm13819_vm13 = vmmov %vm13810_vm0 }
 0x499   : > { %7683 = vmatmul.mubr.msk.f32.gmra.mrb[68].mxu1 %vm13814_vm14, %v7651_v38  ;;  %7667 = vmatmul.mubr.msk.f32.gmra.mrb[68].mxu0 %vm13815_vm12, %v7651_v38  ;;  %vm13820_vm14 = vmmov %vm13810_vm0 }
 0x49a   : > { %4164 = vmatprep.mubr.f32.mxu1 %v13803_v8  ;;  %4015 = vmatprep.mubr.f32.mxu0 %v13803_v8  ;;  %vm13821_vm12 = vmmov %vm13810_vm0 }
 0x49d   : > { %7684 = vmatmul.mubr.msk.f32.gmra.mrb[70].mxu1 %vm13816_vm10, %v7652_v29  ;;  %7668 = vmatmul.mubr.msk.f32.gmra.mrb[70].mxu0 %vm13810_vm0, %v7652_v29  ;;  %vm13822_vm10 = vmmov %vm13810_vm0 }
 0x49e   : > { %4170 = vmatprep.mubr.f32.mxu1 %v13803_v8  ;;  %4021 = vmatprep.mubr.f32.mxu0 %v13803_v8 }
 0x4a1   : > { %7685 = vmatmul.mubr.msk.f32.gmra.mrb[72].mxu1 %vm13817_vm11, %v7653_v39  ;;  %7669 = vmatmul.mubr.msk.f32.gmra.mrb[72].mxu0 %vm13818_vm1, %v7653_v39  ;;  %vm13823_vm11 = vmmov %vm13810_vm0 }
 0x4a2   : > { %4176 = vmatprep.mubr.f32.mxu1 %v13803_v8  ;;  %4027 = vmatprep.mubr.f32.mxu0 %v13803_v8  ;;  %vm13824_vm1 = vmmov %vm13810_vm0 }
 0x4a5   : > { %7686 = vmatmul.mubr.msk.f32.gmra.mrb[74].mxu1 %vm13819_vm13, %v7654_v4  ;;  %7670 = vmatmul.mubr.msk.f32.gmra.mrb[74].mxu0 %vm13820_vm14, %v7654_v4  ;;  %vm13825_vm13 = vmmov %vm13810_vm0 }
 0x4a6   : > { %4182 = vmatprep.mubr.f32.mxu1 %v13803_v8  ;;  %4033 = vmatprep.mubr.f32.mxu0 %v13803_v8  ;;  %vm13826_vm14 = vmmov %vm13810_vm0 }
 0x4a9   : > { %7687 = vmatmul.mubr.msk.f32.gmra.mrb[76].mxu1 %vm13821_vm12, %v7655_v7  ;;  %7671 = vmatmul.mubr.msk.f32.gmra.mrb[76].mxu0 %vm13822_vm10, %v7655_v7  ;;  %vm13827_vm12 = vmmov %vm13810_vm0  ;;  %vm13894_vm10 = vcmp.lt.s32.totalorder %v8246_v6, 55 }
 0x4aa   : > { %4188 = vmatprep.mubr.f32.mxu1 %v13803_v8  ;;  %4039 = vmatprep.mubr.f32.mxu0 %v13803_v8 }
 0x4ad   : > { %7688 = vmatmul.mubr.msk.f32.gmra.mrb[78].mxu1 %vm13810_vm0, %v7656_v41  ;;  %7672 = vmatmul.mubr.msk.f32.gmra.mrb[78].mxu0 %vm13823_vm11, %v7656_v41  ;;  %vm13895_vm0 = vmmov %vm13894_vm10 }
 0x4ae   : > { %4194 = vmatprep.mubr.f32.mxu1 %v13803_v8  ;;  %4045 = vmatprep.mubr.f32.mxu0 %v13803_v8  ;;  %vm13896_vm11 = vmmov %vm13895_vm0 }
 0x4b1   : > { %7689 = vmatmul.mubr.msk.f32.gmra.mrb[80].mxu1 %vm13824_vm1, %v7657_v53  ;;  %7673 = vmatmul.mubr.msk.f32.gmra.mrb[80].mxu0 %vm13825_vm13, %v7657_v53  ;;  %vm13899_vm1 = vmmov %vm13895_vm0  ;;  %vm13902_vm13 = vcmp.lt.s32.totalorder %v8246_v6, 9 }
 0x4b2   : > { %4200 = vmatprep.mubr.f32.mxu1 %v13803_v8  ;;  %4051 = vmatprep.mubr.f32.mxu0 %v13803_v8 }
 0x4b5   : > { %7690 = vmatmul.mubr.msk.f32.gmra.mrb[82].mxu1 %vm13826_vm14, %v7658_v57  ;;  %7674 = vmatmul.mubr.msk.f32.gmra.mrb[82].mxu0 %vm13827_vm12, %v7658_v57  ;;  %vm13908_vm14 = vmmov %vm13902_vm13  ;;  %vm13914_vm12 = vcmp.lt.s32.totalorder %v8246_v6, 8 }
 0x4b6   : > { %5920 = vmatprep.mubr.f32.mxu1 %v13803_v8  ;;  %5771 = vmatprep.mubr.f32.mxu0 %v13803_v8  ;;  %v11304_v8 = vld [vmem:[%s13230_s3 + $0x22] ss:$8 sm:$0xf] }
 0x4b7   : > { %13853 = vst [vmem:[#allocation26_spill] sm:$0xff] %v11304_v8 }
 0x554   : > { %v4124_v52 = vpop.f32.mrb[56].mxu1  ;;  %v3975_v24 = vpop.f32.mrb[56].mxu0 }
 0x555   : > { %4209 = vst [vmem:[#allocation2 + $0x10] sm:$0xff] %v4124_v52  ;;  %v4126_v62 = vpop.f32.mrb[57].mxu1  ;;  %4207 = vst [vmem:[#allocation2] sm:$0xff] %v3975_v24  ;;  %v3977_v22 = vpop.f32.mrb[57].mxu0 }
 0x556   : > { %4210 = vst [vmem:[#allocation2 + $0x18] sm:$0xff] %v4126_v62  ;;  %4208 = vst [vmem:[#allocation2 + $0x8] sm:$0xff] %v3977_v22 }
 0x558   : > { %v4130_v21 = vpop.f32.mrb[58].mxu1  ;;  %v3981_v56 = vpop.f32.mrb[58].mxu0 }
 0x559   : > { %4213 = vst [vmem:[#allocation2 + $0x30] sm:$0xff] %v4130_v21  ;;  %v4132_v12 = vpop.f32.mrb[59].mxu1  ;;  %4211 = vst [vmem:[#allocation2 + $0x20] sm:$0xff] %v3981_v56  ;;  %v3983_v17 = vpop.f32.mrb[59].mxu0 }
 0x55a   : > { %4214 = vst [vmem:[#allocation2 + $0x38] sm:$0xff] %v4132_v12  ;;  %4212 = vst [vmem:[#allocation2 + $0x28] sm:$0xff] %v3983_v17 }
 0x55c   : > { %v4136_v23 = vpop.f32.mrb[60].mxu1  ;;  %v4263_v25 = vld [vmem:[#allocation2] sm:$0xf]  ;;  %v4265_v15 = vld [vmem:[#allocation2 + $0x10] sm:$0xf]  ;;  %v3987_v60 = vpop.f32.mrb[60].mxu0 }
 0x55d   : > { %4217 = vst [vmem:[#allocation2 + $0x50] sm:$0xff] %v4136_v23  ;;  %4267 = vrot.lane.b32.xlu1 %v4263_v25, %s7836_s29  ;;  %v4264_v54 = vld [vmem:[#allocation2 + $0x8] sm:$0xf]  ;;  %v4138_v5 = vpop.f32.mrb[61].mxu1  ;;  %v4266_v50 = vld [vmem:[#allocation2 + $0x18] sm:$0xf] }
 0x55e   : > { %4269 = vrot.lane.b32.xlu0 %v4264_v54, %s7836_s29  ;;  %4215 = vst [vmem:[#allocation2 + $0x40] sm:$0xff] %v3987_v60  ;;  %v3989_v45 = vpop.f32.mrb[61].mxu0  ;;  %4218 = vst [vmem:[#allocation2 + $0x58] sm:$0xff] %v4138_v5  ;;  %v4309_v34 = vld [vmem:[#allocation2] sm:$0xf0] }
 0x55f   : > { %4216 = vst [vmem:[#allocation2 + $0x48] sm:$0xff] %v3989_v45  ;;  %v4310_v48 = vld [vmem:[#allocation2 + $0x8] sm:$0xf0]  ;;  %v4317_v32 = vrot.slane %v4309_v34, 4  ;;  %v4311_v10 = vld [vmem:[#allocation2 + $0x10] sm:$0xf0] }
 0x560   : > { %v3993_v20 = vpop.f32.mrb[62].mxu0  ;;  %v4142_v61 = vpop.f32.mrb[62].mxu1  ;;  %v4318_v26 = vrot.slane %v4310_v48, 4  ;;  %v4312_v36 = vld [vmem:[#allocation2 + $0x18] sm:$0xf0]  ;;  %v4319_v0 = vrot.slane %v4311_v10, 4 }
 0x561   : > { %4271 = vrot.lane.b32.xlu1 %v4265_v15, %s7836_s29  ;;  %4219 = vst [vmem:[#allocation2 + $0x60] sm:$0xff] %v3993_v20  ;;  %v3995_v40 = vpop.f32.mrb[63].mxu0  ;;  %4221 = vst [vmem:[#allocation2 + $0x70] sm:$0xff] %v4142_v61  ;;  %v4144_v51 = vpop.f32.mrb[63].mxu1  ;;  %v4320_v3 = vrot.slane %v4312_v36, 4 }
 0x562   : > { %4273 = vrot.lane.b32.xlu0 %v4266_v50, %s7836_s29  ;;  %4220 = vst [vmem:[#allocation2 + $0x68] sm:$0xff] %v3995_v40  ;;  %4222 = vst [vmem:[#allocation2 + $0x78] sm:$0xff] %v4144_v51  ;;  %v4367_v31 = vld [vmem:[#allocation2 + $0x20] sm:$0xf]  ;;  %v4368_v11 = vld [vmem:[#allocation2 + $0x28] sm:$0xf] }
 0x563   : > { %v4369_v28 = vld [vmem:[#allocation2 + $0x30] sm:$0xf]  ;;  %v4370_v33 = vld [vmem:[#allocation2 + $0x38] sm:$0xf]  ;;  %v4413_v35 = vld [vmem:[#allocation2 + $0x20] sm:$0xf0] }
 0x564   : > { %v3999_v13 = vpop.f32.mrb[64].mxu0  ;;  %v4148_v43 = vpop.f32.mrb[64].mxu1  ;;  %v4414_v16 = vld [vmem:[#allocation2 + $0x28] sm:$0xf0]  ;;  %v4421_v37 = vrot.slane %v4413_v35, 4 }
 0x565   : > { %4325 = vrot.lane.b32.xlu1 %v4317_v32, %s7837_s30  ;;  %4223 = vst [vmem:[#allocation2 + $0x80] sm:$0xff] %v3999_v13  ;;  %v4001_v58 = vpop.f32.mrb[65].mxu0  ;;  %4225 = vst [vmem:[#allocation2 + $0x90] sm:$0xff] %v4148_v43  ;;  %v4150_v55 = vpop.f32.mrb[65].mxu1  ;;  %v4422_v63 = vrot.slane %v4414_v16, 4 }
 0x566   : > { %4327 = vrot.lane.b32.xlu0 %v4318_v26, %s7837_s30  ;;  %4224 = vst [vmem:[#allocation2 + $0x88] sm:$0xff] %v4001_v58  ;;  %4226 = vst [vmem:[#allocation2 + $0x98] sm:$0xff] %v4150_v55  ;;  %v4415_v27 = vld [vmem:[#allocation2 + $0x30] sm:$0xf0]  ;;  %v4416_v39 = vld [vmem:[#allocation2 + $0x38] sm:$0xf0] }
 0x567   : > { %v4423_v53 = vrot.slane %v4415_v27, 4  ;;  %v4424_v24 = vrot.slane %v4416_v39, 4  ;;  %v4471_v12 = vld [vmem:[#allocation2 + $0x40] sm:$0xf]  ;;  %v4472_v17 = vld [vmem:[#allocation2 + $0x48] sm:$0xf] }
 0x568   : > { %v4154_v49 = vpop.f32.mrb[66].mxu1  ;;  %v4005_v18 = vpop.f32.mrb[66].mxu0  ;;  %v4473_v54 = vld [vmem:[#allocation2 + $0x50] sm:$0xf]  ;;  %v4474_v15 = vld [vmem:[#allocation2 + $0x58] sm:$0xf] }
 0x569   : > { %4229 = vst [vmem:[#allocation2 + $0xb0] sm:$0xff] %v4154_v49  ;;  %v4156_v44 = vpop.f32.mrb[67].mxu1  ;;  %4329 = vrot.lane.b32.xlu1 %v4319_v0, %s7837_s30  ;;  %4227 = vst [vmem:[#allocation2 + $0xa0] sm:$0xff] %v4005_v18  ;;  %v4007_v46 = vpop.f32.mrb[67].mxu0  ;;  %v4517_v5 = vld [vmem:[#allocation2 + $0x40] sm:$0xf0] }
 0x56a   : > { %4230 = vst [vmem:[#allocation2 + $0xb8] sm:$0xff] %v4156_v44  ;;  %4331 = vrot.lane.b32.xlu0 %v4320_v3, %s7837_s30  ;;  %4228 = vst [vmem:[#allocation2 + $0xa8] sm:$0xff] %v4007_v46  ;;  %v4518_v50 = vld [vmem:[#allocation2 + $0x48] sm:$0xf0]  ;;  %v4525_v45 = vrot.slane %v4517_v5, 4 }
 0x56b   : > { %v4526_v34 = vrot.slane %v4518_v50, 4  ;;  %v4519_v48 = vld [vmem:[#allocation2 + $0x50] sm:$0xf0]  ;;  %v4520_v61 = vld [vmem:[#allocation2 + $0x58] sm:$0xf0] }
 0x56c   : > { %v4160_v42 = vpop.f32.mrb[68].mxu1  ;;  %v4011_v30 = vpop.f32.mrb[68].mxu0  ;;  %v4527_v40 = vrot.slane %v4519_v48, 4  ;;  %v4528_v26 = vrot.slane %v4520_v61, 4  ;;  %v4575_v43 = vld [vmem:[#allocation2 + $0x60] sm:$0xf] }
 0x56d   : > { %4233 = vst [vmem:[#allocation2 + $0xd0] sm:$0xff] %v4160_v42  ;;  %4371 = vrot.lane.b32.xlu1 %v4367_v31, %s7838_s5  ;;  %4231 = vst [vmem:[#allocation2 + $0xc0] sm:$0xff] %v4011_v30  ;;  %v4013_v47 = vpop.f32.mrb[69].mxu0  ;;  %v4162_v1 = vpop.f32.mrb[69].mxu1  ;;  %v4576_v36 = vld [vmem:[#allocation2 + $0x68] sm:$0xf] }
 0x56e   : > { %4373 = vrot.lane.b32.xlu0 %v4368_v11, %s7838_s5  ;;  %4232 = vst [vmem:[#allocation2 + $0xc8] sm:$0xff] %v4013_v47  ;;  %4234 = vst [vmem:[#allocation2 + $0xd8] sm:$0xff] %v4162_v1  ;;  %v4577_v0 = vld [vmem:[#allocation2 + $0x70] sm:$0xf]  ;;  %v4578_v49 = vld [vmem:[#allocation2 + $0x78] sm:$0xf] }
 0x56f   : > { %v4621_v3 = vld [vmem:[#allocation2 + $0x60] sm:$0xf0]  ;;  %v4622_v44 = vld [vmem:[#allocation2 + $0x68] sm:$0xf0]  ;;  %v4623_v42 = vld [vmem:[#allocation2 + $0x70] sm:$0xf0] }
 0x570   : > { %v4017_v59 = vpop.f32.mrb[70].mxu0  ;;  %v4166_v29 = vpop.f32.mrb[70].mxu1  ;;  %v4629_v31 = vrot.slane %v4621_v3, 4  ;;  %v4630_v11 = vrot.slane %v4622_v44, 4  ;;  %v4624_v30 = vld [vmem:[#allocation2 + $0x78] sm:$0xf0] }
 0x571   : > { %4375 = vrot.lane.b32.xlu1 %v4369_v28, %s7838_s5  ;;  %4235 = vst [vmem:[#allocation2 + $0xe0] sm:$0xff] %v4017_v59  ;;  %v4019_v38 = vpop.f32.mrb[71].mxu0  ;;  %4237 = vst [vmem:[#allocation2 + $0xf0] sm:$0xff] %v4166_v29  ;;  %v4168_v4 = vpop.f32.mrb[71].mxu1  ;;  %v4631_v28 = vrot.slane %v4623_v42, 4 }
 0x572   : > { %4377 = vrot.lane.b32.xlu0 %v4370_v33, %s7838_s5  ;;  %4236 = vst [vmem:[#allocation2 + $0xe8] sm:$0xff] %v4019_v38  ;;  %4238 = vst [vmem:[#allocation2 + $0xf8] sm:$0xff] %v4168_v4  ;;  %v4632_v33 = vrot.slane %v4624_v30, 4  ;;  %v4679_v35 = vld [vmem:[#allocation2 + $0x80] sm:$0xf] }
 0x573   : > { %v4680_v47 = vld [vmem:[#allocation2 + $0x88] sm:$0xf]  ;;  %v4682_v59 = vld [vmem:[#allocation2 + $0x98] sm:$0xf]  ;;  %v4726_v38 = vld [vmem:[#allocation2 + $0x88] sm:$0xf0] }
 0x574   : > { %v4023_v7 = vpop.f32.mrb[72].mxu0  ;;  %v4172_v41 = vpop.f32.mrb[72].mxu1  ;;  %v4734_v4 = vrot.slane %v4726_v38, 4  ;;  %v4889_v50 = vld [vmem:[#allocation2 + $0xd0] sm:$0xf] }
 0x575   : > { %4429 = vrot.lane.b32.xlu1 %v4421_v37, %s7839_s6  ;;  %4239 = vst [vmem:[#allocation2 + $0x100] sm:$0xff] %v4023_v7  ;;  %v4025_v57 = vpop.f32.mrb[73].mxu0  ;;  %4241 = vst [vmem:[#allocation2 + $0x110] sm:$0xff] %v4172_v41  ;;  %v4174_v52 = vpop.f32.mrb[73].mxu1  ;;  %v4681_v37 = vld [vmem:[#allocation2 + $0x90] sm:$0xf] }
 0x576   : > { %4431 = vrot.lane.b32.xlu0 %v4422_v63, %s7839_s6  ;;  %4240 = vst [vmem:[#allocation2 + $0x108] sm:$0xff] %v4025_v57  ;;  %4242 = vst [vmem:[#allocation2 + $0x118] sm:$0xff] %v4174_v52  ;;  %v4725_v63 = vld [vmem:[#allocation2 + $0x80] sm:$0xf0]  ;;  %v4727_v7 = vld [vmem:[#allocation2 + $0x90] sm:$0xf0] }
 0x577   : > { %v4733_v39 = vrot.slane %v4725_v63, 4  ;;  %v4728_v41 = vld [vmem:[#allocation2 + $0x98] sm:$0xf0]  ;;  %v4783_v52 = vld [vmem:[#allocation2 + $0xa0] sm:$0xf] }
 0x578   : > { %v4029_v62 = vpop.f32.mrb[74].mxu0  ;;  %v4178_v22 = vpop.f32.mrb[74].mxu1  ;;  %v4736_v57 = vrot.slane %v4728_v41, 4  ;;  %v4888_v5 = vld [vmem:[#allocation2 + $0xc8] sm:$0xf] }
 0x579   : > { %4433 = vrot.lane.b32.xlu1 %v4423_v53, %s7839_s6  ;;  %4243 = vst [vmem:[#allocation2 + $0x120] sm:$0xff] %v4029_v62  ;;  %v4031_v21 = vpop.f32.mrb[75].mxu0  ;;  %4245 = vst [vmem:[#allocation2 + $0x130] sm:$0xff] %v4178_v22  ;;  %v4180_v56 = vpop.f32.mrb[75].mxu1  ;;  %v4735_v53 = vrot.slane %v4727_v7, 4 }
 0x57a   : > { %4435 = vrot.lane.b32.xlu0 %v4424_v24, %s7839_s6  ;;  %4244 = vst [vmem:[#allocation2 + $0x128] sm:$0xff] %v4031_v21  ;;  %4246 = vst [vmem:[#allocation2 + $0x138] sm:$0xff] %v4180_v56  ;;  %v4784_v24 = vld [vmem:[#allocation2 + $0xa8] sm:$0xf]  ;;  %v4785_v62 = vld [vmem:[#allocation2 + $0xb0] sm:$0xf] }
 0x57b   : > { %v4786_v22 = vld [vmem:[#allocation2 + $0xb8] sm:$0xf]  ;;  %v4829_v21 = vld [vmem:[#allocation2 + $0xa0] sm:$0xf0]  ;;  %v4830_v56 = vld [vmem:[#allocation2 + $0xa8] sm:$0xf0] }
 0x57c   : > { %v4184_v23 = vpop.f32.mrb[76].mxu1  ;;  %v4035_v25 = vpop.f32.mrb[76].mxu0  ;;  %v4954_v48 = vld [vmem:[#allocation2 + $0xe8] sm:$0xf]  ;;  %v4956_v61 = vld [vmem:[#allocation2 + $0xf8] sm:$0xf] }
 0x57d   : > { %4249 = vst [vmem:[#allocation2 + $0x150] sm:$0xff] %v4184_v23  ;;  %4475 = vrot.lane.b32.xlu1 %v4471_v12, %s7840_s7  ;;  %4247 = vst [vmem:[#allocation2 + $0x140] sm:$0xff] %v4035_v25  ;;  %v4037_v60 = vpop.f32.mrb[77].mxu0  ;;  %v4186_v20 = vpop.f32.mrb[77].mxu1  ;;  %v4837_v12 = vrot.slane %v4829_v21, 4 }
 0x57e   : > { %4477 = vrot.lane.b32.xlu0 %v4472_v17, %s7840_s7  ;;  %4248 = vst [vmem:[#allocation2 + $0x148] sm:$0xff] %v4037_v60  ;;  %4250 = vst [vmem:[#allocation2 + $0x158] sm:$0xff] %v4186_v20  ;;  %v4838_v17 = vrot.slane %v4830_v56, 4  ;;  %v4831_v23 = vld [vmem:[#allocation2 + $0xb0] sm:$0xf0] }
 0x57f   : > { %v4832_v25 = vld [vmem:[#allocation2 + $0xb8] sm:$0xf0]  ;;  %v4887_v60 = vld [vmem:[#allocation2 + $0xc0] sm:$0xf]  ;;  %v4955_v20 = vld [vmem:[#allocation2 + $0xf0] sm:$0xf] }
 0x580   : > { %v4041_v32 = vpop.f32.mrb[78].mxu0  ;;  %v4190_v10 = vpop.f32.mrb[78].mxu1  ;;  %v5103_v30 = vld [vmem:[#allocation2 + $0x100] sm:$0xf0]  ;;  %v5163_v41 = vld [vmem:[#allocation2 + $0x130] sm:$0xf] }
 0x581   : > { %4479 = vrot.lane.b32.xlu1 %v4473_v54, %s7840_s7  ;;  %4251 = vst [vmem:[#allocation2 + $0x160] sm:$0xff] %v4041_v32  ;;  %v4043_v51 = vpop.f32.mrb[79].mxu0  ;;  %4253 = vst [vmem:[#allocation2 + $0x170] sm:$0xff] %v4190_v10  ;;  %v4192_v13 = vpop.f32.mrb[79].mxu1  ;;  %v4839_v54 = vrot.slane %v4831_v23, 4 }
 0x582   : > { %4481 = vrot.lane.b32.xlu0 %v4474_v15, %s7840_s7  ;;  %4252 = vst [vmem:[#allocation2 + $0x168] sm:$0xff] %v4043_v51  ;;  %4254 = vst [vmem:[#allocation2 + $0x178] sm:$0xff] %v4192_v13  ;;  %v4840_v15 = vrot.slane %v4832_v25, 4  ;;  %v4999_v32 = vld [vmem:[#allocation2 + $0xe0] sm:$0xf0] }
 0x583   : > { %v5000_v51 = vld [vmem:[#allocation2 + $0xe8] sm:$0xf0]  ;;  %v5001_v13 = vld [vmem:[#allocation2 + $0xf0] sm:$0xf0]  ;;  %v5210_v23 = vld [vmem:[#allocation2 + $0x138] sm:$0xf0] }
 0x584   : > { %v4047_v58 = vpop.f32.mrb[80].mxu0  ;;  %v4196_v18 = vpop.f32.mrb[80].mxu1  ;;  %v5008_v10 = vrot.slane %v5000_v51, 4  ;;  %v5311_v51 = vld [vmem:[#allocation2 + $0x140] sm:$0xf0] }
 0x585   : > { %4533 = vrot.lane.b32.xlu1 %v4525_v45, %s7841_s8  ;;  %4255 = vst [vmem:[#allocation2 + $0x180] sm:$0xff] %v4047_v58  ;;  %v4049_v55 = vpop.f32.mrb[81].mxu0  ;;  %4257 = vst [vmem:[#allocation2 + $0x190] sm:$0xff] %v4196_v18  ;;  %v4198_v46 = vpop.f32.mrb[81].mxu1  ;;  %v4890_v45 = vld [vmem:[#allocation2 + $0xd8] sm:$0xf] }
 0x586   : > { %4535 = vrot.lane.b32.xlu0 %v4526_v34, %s7841_s8  ;;  %4256 = vst [vmem:[#allocation2 + $0x188] sm:$0xff] %v4049_v55  ;;  %4258 = vst [vmem:[#allocation2 + $0x198] sm:$0xff] %v4198_v46  ;;  %v4953_v34 = vld [vmem:[#allocation2 + $0xe0] sm:$0xf]  ;;  %v5009_v58 = vrot.slane %v5001_v13, 4  ;;  %v5319_v13 = vrot.slane %v5311_v51, 4 }
 0x587   : > { %v5058_v18 = vld [vmem:[#allocation2 + $0x108] sm:$0xf]  ;;  %v5059_v46 = vld [vmem:[#allocation2 + $0x110] sm:$0xf] }
 0x588   : > { %v4053_v16 = vpop.f32.mrb[82].mxu0  ;;  %v4202_v27 = vpop.f32.mrb[82].mxu1 }
 0x589   : > { %4537 = vrot.lane.b32.xlu1 %v4527_v40, %s7841_s8  ;;  %4259 = vst [vmem:[#allocation2 + $0x1a0] sm:$0xff] %v4053_v16  ;;  %v4055_v1 = vpop.f32.mrb[83].mxu0  ;;  %4261 = vst [vmem:[#allocation2 + $0x1b0] sm:$0xff] %v4202_v27  ;;  %v4204_v29 = vpop.f32.mrb[83].mxu1 }
 0x58a   : > { %4539 = vrot.lane.b32.xlu0 %v4528_v26, %s7841_s8  ;;  %4260 = vst [vmem:[#allocation2 + $0x1a8] sm:$0xff] %v4055_v1  ;;  %4262 = vst [vmem:[#allocation2 + $0x1b8] sm:$0xff] %v4204_v29  ;;  %v11009_v40 = vpop.permute.xlu1 %5627  ;;  %v5007_v26 = vrot.slane %v4999_v32, 4  ;;  %v5105_v1 = vld [vmem:[#allocation2 + $0x110] sm:$0xf0] }
 0x58b   : > { %13828 = vst [vmem:[#allocation33_spill] sm:$0xff] %v11009_v40  ;;  %v5113_v63 = vrot.slane %v5105_v1, 4  ;;  %v5161_v29 = vld [vmem:[#allocation2 + $0x120] sm:$0xf] }
 0x58c   : > { %v11225_v40 = vld [vmem:[%s13230_s3 + $0x5] ss:$8 sm:$0xf] }
 0x58d   : > { %4579 = vrot.lane.b32.xlu1 %v4575_v43, %s7842_s9  ;;  %v5002_v43 = vld [vmem:[#allocation2 + $0xf8] sm:$0xf0] }
 0x58e   : > { %4581 = vrot.lane.b32.xlu0 %v4576_v36, %s7842_s9 }
 0x591   : > { %4583 = vrot.lane.b32.xlu1 %v4577_v0, %s7842_s9  ;;  %v5010_v0 = vrot.slane %v5002_v43, 4 }
 0x592   : > { %4585 = vrot.lane.b32.xlu0 %v4578_v49, %s7842_s9  ;;  %v5057_v49 = vld [vmem:[#allocation2 + $0x100] sm:$0xf] }
 0x595   : > { %4637 = vrot.lane.b32.xlu1 %v4629_v31, %s7843_s10 }
 0x596   : > { %4639 = vrot.lane.b32.xlu0 %v4630_v11, %s7843_s10  ;;  %v5060_v11 = vld [vmem:[#allocation2 + $0x118] sm:$0xf] }
 0x599   : > { %4641 = vrot.lane.b32.xlu1 %v4631_v28, %s7843_s10  ;;  %v5104_v28 = vld [vmem:[#allocation2 + $0x108] sm:$0xf0] }
 0x59a   : > { %4643 = vrot.lane.b32.xlu0 %v4632_v33, %s7843_s10  ;;  %v5112_v16 = vrot.slane %v5104_v28, 4  ;;  %v5369_v28 = vld [vmem:[#allocation2 + $0x160] sm:$0xf] }
 0x59d   : > { %4683 = vrot.lane.b32.xlu1 %v4679_v35, %s7844_s11  ;;  %v5111_v35 = vrot.slane %v5103_v30, 4 }
 0x59e   : > { %4685 = vrot.lane.b32.xlu0 %v4680_v47, %s7844_s11 }
 0x5a1   : > { %4687 = vrot.lane.b32.xlu1 %v4681_v37, %s7844_s11  ;;  %v5106_v37 = vld [vmem:[#allocation2 + $0x118] sm:$0xf0] }
 0x5a2   : > { %4689 = vrot.lane.b32.xlu0 %v4682_v59, %s7844_s11  ;;  %v5114_v38 = vrot.slane %v5106_v37, 4  ;;  %v5371_v37 = vld [vmem:[#allocation2 + $0x170] sm:$0xf] }
 0x5a5   : > { %4741 = vrot.lane.b32.xlu1 %v4733_v39, %s7845_s12 }
 0x5a6   : > { %4743 = vrot.lane.b32.xlu0 %v4734_v4, %s7845_s12  ;;  %v5162_v4 = vld [vmem:[#allocation2 + $0x128] sm:$0xf] }
 0x5a9   : > { %4745 = vrot.lane.b32.xlu1 %v4735_v53, %s7845_s12 }
 0x5aa   : > { %4747 = vrot.lane.b32.xlu0 %v4736_v57, %s7845_s12  ;;  %v5164_v57 = vld [vmem:[#allocation2 + $0x138] sm:$0xf] }
 0x5ad   : > { %4787 = vrot.lane.b32.xlu1 %v4783_v52, %s7846_s13 }
 0x5ae   : > { %4789 = vrot.lane.b32.xlu0 %v4784_v24, %s7846_s13  ;;  %v5207_v24 = vld [vmem:[#allocation2 + $0x120] sm:$0xf0] }
 0x5af   : > { %v5215_v21 = vrot.slane %v5207_v24, 4 }
 0x5b1   : > { %4791 = vrot.lane.b32.xlu1 %v4785_v62, %s7846_s13  ;;  %v5208_v62 = vld [vmem:[#allocation2 + $0x128] sm:$0xf0] }
 0x5b2   : > { %4793 = vrot.lane.b32.xlu0 %v4786_v22, %s7846_s13 }
 0x5b5   : > { %4845 = vrot.lane.b32.xlu1 %v4837_v12, %s7847_s14  ;;  %v5216_v12 = vrot.slane %v5208_v62, 4 }
 0x5b6   : > { %4847 = vrot.lane.b32.xlu0 %v4838_v17, %s7847_s14  ;;  %v5209_v17 = vld [vmem:[#allocation2 + $0x130] sm:$0xf0] }
 0x5b9   : > { %4849 = vrot.lane.b32.xlu1 %v4839_v54, %s7847_s14  ;;  %v5217_v54 = vrot.slane %v5209_v17, 4  ;;  %v5418_v17 = vld [vmem:[#allocation2 + $0x178] sm:$0xf0] }
 0x5ba   : > { %4851 = vrot.lane.b32.xlu0 %v4840_v15, %s7847_s14 }
 0x5bd   : > { %4891 = vrot.lane.b32.xlu1 %v4887_v60, %s7848_s18  ;;  %v5218_v60 = vrot.slane %v5210_v23, 4 }
 0x5be   : > { %4893 = vrot.lane.b32.xlu0 %v4888_v5, %s7848_s18  ;;  %v5265_v5 = vld [vmem:[#allocation2 + $0x140] sm:$0xf] }
 0x5c1   : > { %4895 = vrot.lane.b32.xlu1 %v4889_v50, %s7848_s18 }
 0x5c2   : > { %4897 = vrot.lane.b32.xlu0 %v4890_v45, %s7848_s18  ;;  %v5266_v45 = vld [vmem:[#allocation2 + $0x148] sm:$0xf] }
 0x5c5   : > { %4957 = vrot.lane.b32.xlu1 %v4953_v34, %s7849_s19 }
 0x5c6   : > { %4959 = vrot.lane.b32.xlu0 %v4954_v48, %s7849_s19  ;;  %v5267_v48 = vld [vmem:[#allocation2 + $0x150] sm:$0xf] }
 0x5c9   : > { %4961 = vrot.lane.b32.xlu1 %v4955_v20, %s7849_s19 }
 0x5ca   : > { %4963 = vrot.lane.b32.xlu0 %v4956_v61, %s7849_s19  ;;  %v5268_v61 = vld [vmem:[#allocation2 + $0x158] sm:$0xf] }
 0x5cd   : > { %5015 = vrot.lane.b32.xlu1 %v5007_v26, %s7850_s21  ;;  %v5312_v26 = vld [vmem:[#allocation2 + $0x148] sm:$0xf0] }
 0x5ce   : > { %5017 = vrot.lane.b32.xlu0 %v5008_v10, %s7850_s21 }
 0x5cf   : > { %v11014_v36 = vpop.permute.xlu1 %4267 }
 0x5d0   : > { %v11016_v55 = vpop.permute.xlu0 %4269 }
 0x5d1   : > { %5019 = vrot.lane.b32.xlu1 %v5009_v58, %s7850_s21  ;;  %v5320_v58 = vrot.slane %v5312_v26, 4  ;;  %v5475_v26 = vld [vmem:[#allocation2 + $0x190] sm:$0xf] }
 0x5d2   : > { %5021 = vrot.lane.b32.xlu0 %v5010_v0, %s7850_s21  ;;  %v5313_v0 = vld [vmem:[#allocation2 + $0x150] sm:$0xf0] }
 0x5d3   : > { %v11020_v3 = vpop.permute.xlu1 %4271 }
 0x5d4   : > { %v11022_v44 = vpop.permute.xlu0 %4273 }
 0x5d5   : > { %5061 = vrot.lane.b32.xlu1 %v5057_v49, %s7851_s22  ;;  %v5314_v49 = vld [vmem:[#allocation2 + $0x158] sm:$0xf0] }
 0x5d6   : > { %5063 = vrot.lane.b32.xlu0 %v5058_v18, %s7851_s22  ;;  %v5322_v30 = vrot.slane %v5314_v49, 4  ;;  %v5519_v49 = vld [vmem:[#allocation2 + $0x180] sm:$0xf0] }
 0x5d7   : > { %v11026_v31 = vpop.permute.xlu1 %4325 }
 0x5d8   : > { %v11028_v42 = vpop.permute.xlu0 %4327 }
 0x5d9   : > { %5065 = vrot.lane.b32.xlu1 %v5059_v46, %s7851_s22  ;;  %v5321_v46 = vrot.slane %v5313_v0, 4 }
 0x5da   : > { %5067 = vrot.lane.b32.xlu0 %v5060_v11, %s7851_s22 }
 0x5db   : > { %v11032_v33 = vpop.permute.xlu1 %4329 }
 0x5dc   : > { %v11034_v47 = vpop.permute.xlu0 %4331 }
 0x5dd   : > { %5119 = vrot.lane.b32.xlu1 %v5111_v35, %s7852_s23 }
 0x5de   : > { %5121 = vrot.lane.b32.xlu0 %v5112_v16, %s7852_s23  ;;  %v5370_v16 = vld [vmem:[#allocation2 + $0x168] sm:$0xf] }
 0x5df   : > { %v11038_v59 = vpop.permute.xlu1 %4371 }
 0x5e0   : > { %v11040_v27 = vpop.permute.xlu0 %4373 }
 0x5e1   : > { %5123 = vrot.lane.b32.xlu1 %v5113_v63, %s7852_s23 }
 0x5e2   : > { %5125 = vrot.lane.b32.xlu0 %v5114_v38, %s7852_s23  ;;  %v5372_v38 = vld [vmem:[#allocation2 + $0x178] sm:$0xf] }
 0x5e3   : > { %v11044_v39 = vpop.permute.xlu1 %4375 }
 0x5e4   : > { %v11046_v7 = vpop.permute.xlu0 %4377 }
 0x5e5   : > { %5165 = vrot.lane.b32.xlu1 %v5161_v29, %s7836_s29 }
 0x5e6   : > { %5167 = vrot.lane.b32.xlu0 %v5162_v4, %s7836_s29  ;;  %v5415_v4 = vld [vmem:[#allocation2 + $0x160] sm:$0xf0] }
 0x5e7   : > { %v11050_v53 = vpop.permute.xlu1 %4429  ;;  %v5423_v24 = vrot.slane %v5415_v4, 4  ;;  %v5522_v4 = vld [vmem:[#allocation2 + $0x198] sm:$0xf0] }
 0x5e8   : > { %v11052_v52 = vpop.permute.xlu0 %4431 }
 0x5e9   : > { %5169 = vrot.lane.b32.xlu1 %v5163_v41, %s7836_s29  ;;  %v5416_v41 = vld [vmem:[#allocation2 + $0x168] sm:$0xf0] }
 0x5ea   : > { %5171 = vrot.lane.b32.xlu0 %v5164_v57, %s7836_s29 }
 0x5eb   : > { %v11056_v22 = vpop.permute.xlu1 %4433 }
 0x5ec   : > { %v11058_v56 = vpop.permute.xlu0 %4435 }
 0x5ed   : > { %5223 = vrot.lane.b32.xlu1 %v5215_v21, %s7837_s30  ;;  %v5424_v21 = vrot.slane %v5416_v41, 4 }
 0x5ee   : > { %5225 = vrot.lane.b32.xlu0 %v5216_v12, %s7837_s30  ;;  %v5417_v12 = vld [vmem:[#allocation2 + $0x170] sm:$0xf0] }
 0x5ef   : > { %v11062_v25 = vpop.permute.xlu1 %4475 }
 0x5f0   : > { %v11064_v15 = vpop.permute.xlu0 %4477 }
 0x5f1   : > { %5227 = vrot.lane.b32.xlu1 %v5217_v54, %s7837_s30  ;;  %v5425_v54 = vrot.slane %v5417_v12, 4  ;;  %v5530_v12 = vrot.slane %v5522_v4, 4 }
 0x5f2   : > { %5229 = vrot.lane.b32.xlu0 %v5218_v60, %s7837_s30 }
 0x5f3   : > { %v11068_v50 = vpop.permute.xlu1 %4479 }
 0x5f4   : > { %v11070_v34 = vpop.permute.xlu0 %4481 }
 0x5f5   : > { %5269 = vrot.lane.b32.xlu1 %v5265_v5, %s7838_s5  ;;  %v5426_v5 = vrot.slane %v5418_v17, 4  ;;  %v5578_v17 = vld [vmem:[#allocation2 + $0x1a8] sm:$0xf] }
 0x5f6   : > { %5271 = vrot.lane.b32.xlu0 %v5266_v45, %s7838_s5  ;;  %v5473_v45 = vld [vmem:[#allocation2 + $0x180] sm:$0xf] }
 0x5f7   : > { %v11074_v20 = vpop.permute.xlu1 %4533 }
 0x5f8   : > { %v11076_v32 = vpop.permute.xlu0 %4535 }
 0x5f9   : > { %5273 = vrot.lane.b32.xlu1 %v5267_v48, %s7838_s5 }
 0x5fa   : > { %5275 = vrot.lane.b32.xlu0 %v5268_v61, %s7838_s5  ;;  %v5474_v61 = vld [vmem:[#allocation2 + $0x188] sm:$0xf] }
 0x5fb   : > { %v11080_v10 = vpop.permute.xlu1 %4537 }
 0x5fc   : > { %v11082_v43 = vpop.permute.xlu0 %4539 }
 0x5fd   : > { %5327 = vrot.lane.b32.xlu1 %v5319_v13, %s7839_s6 }
 0x5fe   : > { %5329 = vrot.lane.b32.xlu0 %v5320_v58, %s7839_s6  ;;  %v5476_v58 = vld [vmem:[#allocation2 + $0x198] sm:$0xf] }
 0x5ff   : > { %v11086_v18 = vpop.permute.xlu1 %4579 }
 0x600   : > { %v11088_v11 = vpop.permute.xlu0 %4581 }
 0x601   : > { %5331 = vrot.lane.b32.xlu1 %v5321_v46, %s7839_s6  ;;  %v5520_v46 = vld [vmem:[#allocation2 + $0x188] sm:$0xf0] }
 0x602   : > { %5333 = vrot.lane.b32.xlu0 %v5322_v30, %s7839_s6 }
 0x603   : > { %v11092_v35 = vpop.permute.xlu1 %4583 }
 0x604   : > { %v11094_v1 = vpop.permute.xlu0 %4585 }
 0x605   : > { %5373 = vrot.lane.b32.xlu1 %v5369_v28, %s7840_s7  ;;  %v5527_v28 = vrot.slane %v5519_v49, 4 }
 0x606   : > { %5375 = vrot.lane.b32.xlu0 %v5370_v16, %s7840_s7 }
 0x607   : > { %v11098_v63 = vpop.permute.xlu1 %4637 }
 0x608   : > { %v11100_v29 = vpop.permute.xlu0 %4639 }
 0x609   : > { %5377 = vrot.lane.b32.xlu1 %v5371_v37, %s7840_s7  ;;  %v5528_v37 = vrot.slane %v5520_v46, 4 }
 0x60a   : > { %5379 = vrot.lane.b32.xlu0 %v5372_v38, %s7840_s7  ;;  %v5521_v38 = vld [vmem:[#allocation2 + $0x190] sm:$0xf0] }
 0x60b   : > { %v11104_v57 = vpop.permute.xlu1 %4641 }
 0x60c   : > { %v11106_v62 = vpop.permute.xlu0 %4643 }
 0x60d   : > { %5431 = vrot.lane.b32.xlu1 %v5423_v24, %s7841_s8  ;;  %v5529_v24 = vrot.slane %v5521_v38, 4 }
 0x60e   : > { %5433 = vrot.lane.b32.xlu0 %v5424_v21, %s7841_s8 }
 0x60f   : > { %v11110_v23 = vpop.permute.xlu1 %4683 }
 0x610   : > { %v11112_v60 = vpop.permute.xlu0 %4685 }
 0x611   : > { %5435 = vrot.lane.b32.xlu1 %v5425_v54, %s7841_s8 }
 0x612   : > { %5437 = vrot.lane.b32.xlu0 %v5426_v5, %s7841_s8  ;;  %v5577_v5 = vld [vmem:[#allocation2 + $0x1a0] sm:$0xf] }
 0x613   : > { %v11116_v48 = vpop.permute.xlu1 %4687 }
 0x614   : > { %v11118_v51 = vpop.permute.xlu0 %4689 }
 0x615   : > { %5477 = vrot.lane.b32.xlu1 %v5473_v45, %s7842_s9 }
 0x616   : > { %5479 = vrot.lane.b32.xlu0 %v5474_v61, %s7842_s9  ;;  %v5580_v61 = vld [vmem:[#allocation2 + $0x1b8] sm:$0xf] }
 0x617   : > { %v11122_v13 = vpop.permute.xlu1 %4741 }
 0x618   : > { %v11124_v0 = vpop.permute.xlu0 %4743 }
 0x619   : > { %5481 = vrot.lane.b32.xlu1 %v5475_v26, %s7842_s9 }
 0x61a   : > { %5483 = vrot.lane.b32.xlu0 %v5476_v58, %s7842_s9  ;;  %v5579_v58 = vld [vmem:[#allocation2 + $0x1b0] sm:$0xf] }
 0x61b   : > { %v11128_v30 = vpop.permute.xlu1 %4745 }
 0x61c   : > { %13829 = vst [vmem:[#allocation12_spill] sm:$0xff] %v11128_v30  ;;  %v11130_v16 = vpop.permute.xlu0 %4747  ;;  %v11332_v30 = vld [vmem:[%s13230_s3 + $0x24] ss:$8 sm:$0xf] }
 0x61d   : > { %13830 = vst [vmem:[#allocation34_spill] sm:$0xff] %v11130_v16  ;;  %5535 = vrot.lane.b32.xlu1 %v5527_v28, %s7843_s10  ;;  %v7788_v28 = vld [vmem:[%s13229_s2 + $0xc] sm:$0xf]  ;;  %13856 = vst [vmem:[#allocation40_spill] sm:$0xff] %v11332_v30  ;;  %v4335_v30 = vsel %vm697_vm3, %v11026_v31, %v11028_v42 }
 0x61e   : > { %5537 = vrot.lane.b32.xlu0 %v5528_v37, %s7843_s10 }
 0x61f   : > { %v11134_v41 = vpop.permute.xlu1 %4787 }
 0x620   : > { %13831 = vst [vmem:[#allocation15_spill] sm:$0xff] %v11134_v41  ;;  %v11136_v21 = vpop.permute.xlu0 %4789  ;;  %v11275_v41 = vld [vmem:[%s13230_s3 + $0x20] ss:$8 sm:$0xf] }
 0x621   : > { %13832 = vst [vmem:[#allocation13_spill] sm:$0xff] %v11136_v21  ;;  %5539 = vrot.lane.b32.xlu1 %v5529_v24, %s7843_s10  ;;  %v11166_v24 = vld [vmem:[%s13230_s3] ss:$8 sm:$0xf]  ;;  %13850 = vst [vmem:[#allocation25_spill] sm:$0xff] %v11275_v41 }
 0x622   : > { %5541 = vrot.lane.b32.xlu0 %v5530_v12, %s7843_s10  ;;  %v13872_v16 = vrot.slane %v11166_v24, %v8226_v9 }
 0x623   : > { %v11140_v54 = vpop.permute.xlu1 %4791 }
 0x624   : > { %13833 = vst [vmem:[#allocation9_spill] sm:$0xff] %v11140_v54  ;;  %v11142_v45 = vpop.permute.xlu0 %4793  ;;  %v11229_v54 = vld [vmem:[#allocation2 + $0xc8] sm:$0xf0] }
 0x625   : > { %13834 = vst [vmem:[#allocation10_spill] sm:$0xff] %v11142_v45  ;;  %5583 = vrot.lane.b32.xlu1 %v5578_v17, %s7844_s11  ;;  %v11173_v17 = vld [vmem:[%s13230_s3 + $0x1] ss:$8 sm:$0xf]  ;;  %13847 = vst [vmem:[#allocation22_spill] sm:$0xff] %v11229_v54 }
 0x626   : > { %5581 = vrot.lane.b32.xlu0 %v5577_v5, %s7844_s11  ;;  %v11317_v45 = vld [vmem:[%s13230_s3 + $0x23] ss:$8 sm:$0xf] }
 0x627   : > { %v11146_v26 = vpop.permute.xlu1 %4845  ;;  %13854 = vst [vmem:[#allocation38_spill] sm:$0xff] %v11317_v45 }
 0x628   : > { %13835 = vst [vmem:[#allocation36_spill] sm:$0xff] %v11146_v26  ;;  %v11148_v49 = vpop.permute.xlu0 %4847  ;;  %v11259_v26 = vld [vmem:[%s13230_s3 + $0x7] ss:$8 sm:$0xf] }
 0x629   : > { %13836 = vst [vmem:[#allocation16_spill] sm:$0xff] %v11148_v49  ;;  %5587 = vrot.lane.b32.xlu1 %v5580_v61, %s7844_s11  ;;  %v11180_v61 = vld [vmem:[%s13230_s3 + $0x2] ss:$8 sm:$0xf] }
 0x62a   : > { %5585 = vrot.lane.b32.xlu0 %v5579_v58, %s7844_s11  ;;  %v11347_v58 = vld [vmem:[%s13230_s3 + $0x26] ss:$8 sm:$0xf]  ;;  %v11360_v49 = vld [vmem:[%s13230_s3 + $0x27] ss:$8 sm:$0xf] }
 0x62b   : > { %v11152_v46 = vpop.permute.xlu1 %4849  ;;  %13858 = vst [vmem:[#allocation42_spill] sm:$0xff] %v11347_v58  ;;  %13859 = vst [vmem:[#allocation29_spill] sm:$0xff] %v11360_v49  ;;  %v4278_v49 = vsel %vm638_vm2, %v11022_v44, %v11014_v36  ;;  %v13865_v58 = vrot.slane %v11166_v24, %v8228_v14 }
 0x62c   : > { %13837 = vst [vmem:[#allocation31_spill] sm:$0xff] %v11152_v46  ;;  %v11157_v37 = vpop.permute.xlu0 %4851 }
 0x62d   : > { %13838 = vst [vmem:[#allocation30_spill] sm:$0xff] %v11157_v37  ;;  %v11239_v37 = vld [vmem:[#allocation2 + $0xd8] sm:$0xf0] }
 0x62e   : > { %7425 = vperm.xlu0 %7820, %v7788_v28   ;;  %13848 = vst [vmem:[#allocation23_spill] sm:$0xff] %v11239_v37  ;;  %v11252_v28 = vld [vmem:[%s13230_s3 + $0x6] ss:$8 sm:$0xf] }
 0x62f   : > { %v11159_v38 = vpop.permute.xlu1 %4891  ;;  %v11375_v37 = vld [vmem:[%s13230_s3 + $0x40] ss:$8 sm:$0xf] }
 0x630   : > { %13839 = vst [vmem:[#allocation19_spill] sm:$0xff] %v11159_v38  ;;  %v11161_v4 = vpop.permute.xlu0 %4893  ;;  %v11212_v38 = vld [vmem:[#allocation2 + $0xd0] sm:$0xf0]  ;;  %13861 = vst [vmem:[#allocation7_spill] sm:$0xff] %v11375_v37 }
 0x631   : > { %13840 = vst [vmem:[#allocation17_spill] sm:$0xff] %v11161_v4  ;;  %v11198_v4 = vld [vmem:[%s13230_s3 + $0x4] ss:$8 sm:$0xf]  ;;  %13845 = vst [vmem:[#allocation32_spill] sm:$0xff] %v11212_v38 }
 0x632   : > { %v11291_v38 = vld [vmem:[%s13230_s3 + $0x21] ss:$8 sm:$0xf] }
 0x633   : > { %v11168_v12 = vpop.permute.xlu1 %4895  ;;  %13852 = vst [vmem:[#allocation27_spill] sm:$0xff] %v11291_v38 }
 0x634   : > { %13841 = vst [vmem:[#allocation21_spill] sm:$0xff] %v11168_v12  ;;  %v11175_v5 = vpop.permute.xlu0 %4897  ;;  %v11193_v12 = vld [vmem:[%s13230_s3 + $0x3] ss:$8 sm:$0xf] }
 0x635   : > { %13842 = vst [vmem:[#allocation14_spill] sm:$0xff] %v11175_v5  ;;  %v11210_v5 = vld [vmem:[#allocation2 + $0xc0] sm:$0xf0] }
 0x636   : > { %13844 = vst [vmem:[#allocation18_spill] sm:$0xff] %v11210_v5 }
 0x637   : > { %v11208_v46 = vpop.permute.xlu1 %4957 }
 0x638   : > { %13843 = vst [vmem:[#allocation39_spill] sm:$0xff] %v11208_v46  ;;  %v11227_v46 = vpop.permute.xlu0 %4959 }
 0x639   : > { %13846 = vst [vmem:[#allocation41_spill] sm:$0xff] %v11227_v46 }
 0x63b   : > { %v11263_v21 = vpop.permute.xlu1 %4961 }
 0x63c   : > { %13849 = vst [vmem:[#allocation35_spill] sm:$0xff] %v11263_v21  ;;  %v11278_v46 = vpop.permute.xlu0 %4963  ;;  %v4334_v21 = vsel %vm697_vm3, %v11028_v42, %v11032_v33  ;;  %v4275_v42 = vsel %vm638_vm2, %v11020_v3, %v11022_v44  ;;  %v4380_v44 = vsel %vm745_vm4, %v11040_v27, %v11044_v39 }
 0x63d   : > { %13851 = vst [vmem:[#allocation20_spill] sm:$0xff] %v11278_v46  ;;  %v4304_v41 = vmul.f32 %v13872_v16, %v4275_v42  ;;  %v11509_v42 = vld [vmem:[%s13230_s3 + $0x43] ss:$8 sm:$0xf] }
 0x63f   : > { %v11319_v54 = vpop.permute.xlu1 %5015 }
 0x640   : > { %13855 = vst [vmem:[#allocation37_spill] sm:$0xff] %v11319_v54  ;;  %v11334_v46 = vpop.permute.xlu0 %5017  ;;  %v4277_v54 = vsel %vm638_vm2, %v11014_v36, %v11016_v55  ;;  %v4336_v36 = vsel %vm697_vm3, %v11034_v47, %v11026_v31  ;;  %v4381_v31 = vsel %vm745_vm4, %v11038_v59, %v11040_v27 }
 0x641   : > { %13857 = vst [vmem:[#allocation24_spill] sm:$0xff] %v11334_v46  ;;  %v11398_v46 = vld [vmem:[%s13230_s3 + $0x41] ss:$8 sm:$0xf]  ;;  %v4302_v37 = vmul.f32 %v13865_v58, %v4277_v54  ;;  %v13868_v54 = vrot.slane %v11166_v24, %v8224_v2 }
 0x643   : > { %v11370_v8 = vpop.permute.xlu1 %5019  ;;  %v4301_v58 = vmul.f32 %v13868_v54, %v4278_v49  ;;  %v13871_v49 = vrot.slane %v11173_v17, %v8226_v9 }
 0x644   : > { %13860 = vst [vmem:[#allocation28_spill] sm:$0xff] %v11370_v8  ;;  %v11385_v5 = vpop.permute.xlu0 %5021  ;;  %v4276_v8 = vsel %vm638_vm2, %v11016_v55, %v11020_v3  ;;  %v4333_v55 = vsel %vm697_vm3, %v11032_v33, %v11034_v47  ;;  %v13866_v33 = vrot.slane %v11173_v17, %v8228_v14  ;;  %v13867_v47 = vrot.slane %v11166_v24, %v8230_v19 }
 0x645   : > { %13862 = vst [vmem:[#allocation44_spill] sm:$0xff] %v11385_v5  ;;  %v4362_v54 = vmul.f32 %v13871_v49, %v4333_v55 }
 0x646   : > { %v4360_v38 = vmul.f32 %v13866_v33, %v4335_v30  ;;  %v4303_v45 = vmul.f32 %v13867_v47, %v4276_v8  ;;  %v11469_v30 = vld [vmem:[%s13230_s3 + $0x42] ss:$8 sm:$0xf]  ;;  %v13869_v33 = vrot.slane %v11173_v17, %v8230_v19  ;;  %v13870_v8 = vrot.slane %v11173_v17, %v8224_v2 }
 0x647   : > { %v11420_v5 = vpop.permute.xlu1 %5061  ;;  %v4382_v17 = vsel %vm745_vm4, %v11046_v7, %v11038_v59  ;;  %v13874_v59 = vrot.slane %v11180_v61, %v8230_v19  ;;  %v4366_v16 = vadd.f32 %v4362_v54, %v4304_v41  ;;  %v13979_v41 = vld [vmem:[#allocation29_spill] sm:$0xff] }
 0x648   : > { %13863 = vst [vmem:[#allocation43_spill] sm:$0xff] %v11420_v5  ;;  %v11438_v5 = vpop.permute.xlu0 %5063  ;;  %v4359_v47 = vmul.f32 %v13870_v8, %v4336_v36  ;;  %v4364_v36 = vadd.f32 %v4360_v38, %v4302_v37  ;;  %v4379_v37 = vsel %vm745_vm4, %v11044_v39, %v11046_v7  ;;  %v4439_v38 = vsel %vm805_vm5, %v11050_v53, %v11052_v52 }
 0x649   : > { %13864 = vst [vmem:[#allocation8_spill] sm:$0xff] %v11438_v5  ;;  %v4361_v5 = vmul.f32 %v13869_v33, %v4334_v21  ;;  %v13873_v21 = vrot.slane %v11180_v61, %v8228_v14  ;;  %v13875_v8 = vrot.slane %v11180_v61, %v8224_v2  ;;  %v4438_v39 = vsel %vm805_vm5, %v11052_v52, %v11056_v22 }
 0x64a   : > { %v4363_v24 = vadd.f32 %v4359_v47, %v4301_v58  ;;  %v4440_v7 = vsel %vm805_vm5, %v11058_v56, %v11050_v53  ;;  %v13877_v47 = vrot.slane %v11193_v12, %v8228_v14  ;;  %v4437_v52 = vsel %vm805_vm5, %v11056_v22, %v11058_v56 }
 0x64b   : > { %v11484_v3 = vpop.permute.xlu1 %5065  ;;  %v4406_v33 = vmul.f32 %v13873_v21, %v4381_v31  ;;  %v4407_v31 = vmul.f32 %v13874_v59, %v4380_v44  ;;  %v4365_v21 = vadd.f32 %v4361_v5, %v4303_v45  ;;  %v4405_v44 = vmul.f32 %v13875_v8, %v4382_v17  ;;  %v11564_v8 = vld [vmem:[%s13230_s3 + $0x44] ss:$8 sm:$0xf] }
 0x64c   : > { %v11496_v55 = vpop.permute.xlu0 %5067  ;;  %v13876_v5 = vrot.slane %v11180_v61, %v8226_v9  ;;  %v4464_v54 = vmul.f32 %v13877_v47, %v4439_v38  ;;  %v4485_v53 = vsel %vm853_vm6, %v11062_v25, %v11064_v15  ;;  %v13878_v56 = vrot.slane %v11193_v12, %v8230_v19 }
 0x64d   : > { %v4410_v27 = vadd.f32 %v4406_v33, %v4364_v36  ;;  %v4411_v33 = vadd.f32 %v4407_v31, %v4365_v21  ;;  %v4409_v22 = vadd.f32 %v4405_v44, %v4363_v24  ;;  %v13879_v31 = vrot.slane %v11193_v12, %v8224_v2 }
 0x64e   : > { %v4408_v58 = vmul.f32 %v13876_v5, %v4379_v37  ;;  %v4465_v37 = vmul.f32 %v13878_v56, %v4438_v39  ;;  %v4484_v21 = vsel %vm853_vm6, %v11064_v15, %v11068_v50  ;;  %v13880_v47 = vrot.slane %v11193_v12, %v8226_v9 }
 0x64f   : > { %v11527_v59 = vpop.permute.xlu1 %5119  ;;  %v4463_v38 = vmul.f32 %v13879_v31, %v4440_v7  ;;  %v13881_v24 = vrot.slane %v11198_v4, %v8228_v14  ;;  %v4483_v39 = vsel %vm853_vm6, %v11068_v50, %v11070_v34  ;;  %v4486_v15 = vsel %vm853_vm6, %v11070_v34, %v11062_v25 }
 0x650   : > { %v11537_v45 = vpop.permute.xlu0 %5121  ;;  %v4466_v36 = vmul.f32 %v13880_v47, %v4437_v52  ;;  %v4412_v56 = vadd.f32 %v4408_v58, %v4366_v16  ;;  %v4468_v31 = vadd.f32 %v4464_v54, %v4410_v27  ;;  %v13882_v50 = vrot.slane %v11198_v4, %v8230_v19 }
 0x651   : > { %v4510_v44 = vmul.f32 %v13881_v24, %v4485_v53  ;;  %v11601_v53 = vld [vmem:[%s13230_s3 + $0x45] ss:$8 sm:$0xf]  ;;  %v4543_v25 = vsel %vm913_vm7, %v11074_v20, %v11076_v32  ;;  %v4469_v16 = vadd.f32 %v4465_v37, %v4411_v33  ;;  %v13883_v58 = vrot.slane %v11198_v4, %v8224_v2 }
 0x652   : > { %v4511_v47 = vmul.f32 %v13882_v50, %v4484_v21  ;;  %v13884_v24 = vrot.slane %v11198_v4, %v8226_v9  ;;  %v4542_v50 = vsel %vm913_vm7, %v11076_v32, %v11080_v10  ;;  %v4467_v34 = vadd.f32 %v4463_v38, %v4409_v22  ;;  %v11633_v4 = vld [vmem:[%s13230_s3 + $0x46] ss:$8 sm:$0xf] }
 0x653   : > { %v11576_v5 = vpop.permute.xlu1 %5123  ;;  %v4509_v54 = vmul.f32 %v13883_v58, %v4486_v15  ;;  %v4470_v12 = vadd.f32 %v4466_v36, %v4412_v56  ;;  %v4514_v61 = vadd.f32 %v4510_v44, %v4468_v31  ;;  %v13885_v37 = vrot.slane %v11225_v40, %v8228_v14  ;;  %v13944_v56 = vld [vmem:[#allocation17_spill] sm:$0xff] }
 0x654   : > { %v11592_v7 = vpop.permute.xlu0 %5125  ;;  %v4512_v21 = vmul.f32 %v13884_v24, %v4483_v39  ;;  %v4541_v32 = vsel %vm913_vm7, %v11080_v10, %v11082_v43  ;;  %v4544_v36 = vsel %vm913_vm7, %v11082_v43, %v11074_v20  ;;  %v4515_v38 = vadd.f32 %v4511_v47, %v4469_v16  ;;  %v13913_v47 = vld [vmem:[#allocation10_spill] sm:$0xff] }
 0x655   : > { %v4568_v39 = vmul.f32 %v13885_v37, %v4543_v25  ;;  %v13886_v44 = vrot.slane %v11225_v40, %v8230_v19  ;;  %v4513_v10 = vadd.f32 %v4509_v54, %v4467_v34  ;;  %v4589_v20 = vsel %vm961_vm8, %v11086_v18, %v11088_v11 }
 0x656   : > { %v4516_v25 = vadd.f32 %v4512_v21, %v4470_v12  ;;  %v13887_v16 = vrot.slane %v11225_v40, %v8224_v2  ;;  %v13888_v24 = vrot.slane %v11225_v40, %v8226_v9  ;;  %v4588_v12 = vsel %vm961_vm8, %v11088_v11, %v11092_v35  ;;  %v13912_v40 = vld [vmem:[#allocation15_spill] sm:$0xff] }
 0x657   : > { %v11624_v52 = vpop.permute.xlu1 %5165  ;;  %v4569_v15 = vmul.f32 %v13886_v44, %v4542_v50  ;;  %v4590_v34 = vsel %vm961_vm8, %v11094_v1, %v11086_v18  ;;  %v4572_v21 = vadd.f32 %v4568_v39, %v4514_v61  ;;  %v4587_v37 = vsel %vm961_vm8, %v11092_v35, %v11094_v1 }
 0x658   : > { %v11626_v27 = vpop.permute.xlu0 %5167  ;;  %v4567_v58 = vmul.f32 %v13887_v16, %v4544_v36  ;;  %v4570_v50 = vmul.f32 %v13888_v24, %v4541_v32  ;;  %v13889_v36 = vrot.slane %v11252_v28, %v8228_v14  ;;  %v4647_v18 = vsel %vm1021_vm9, %v11098_v63, %v11100_v29  ;;  %v13910_v32 = vld [vmem:[#allocation27_spill] sm:$0xff] }
 0x659   : > { %v4573_v11 = vadd.f32 %v4569_v15, %v4515_v38  ;;  %v13890_v35 = vrot.slane %v11252_v28, %v8230_v19  ;;  %v13891_v39 = vrot.slane %v11252_v28, %v8224_v2  ;;  %v4646_v15 = vsel %vm1021_vm9, %v11100_v29, %v11104_v57 }
 0x65a   : > { %v4614_v44 = vmul.f32 %v13889_v36, %v4589_v20  ;;  %v4648_v20 = vsel %vm1021_vm9, %v11106_v62, %v11098_v63  ;;  %v4571_v24 = vadd.f32 %v4567_v58, %v4513_v10  ;;  %v4574_v36 = vadd.f32 %v4570_v50, %v4516_v25 }
 0x65b   : > { %v11659_v43 = vpop.permute.xlu1 %5169  ;;  %v4615_v1 = vmul.f32 %v13890_v35, %v4588_v12  ;;  %v4613_v38 = vmul.f32 %v13891_v39, %v4590_v34  ;;  %v13892_v12 = vrot.slane %v11252_v28, %v8226_v9  ;;  %v4645_v34 = vsel %vm1021_vm9, %v11104_v57, %v11106_v62 }
 0x65c   : > { %v11677_v54 = vpop.permute.xlu0 %5171  ;;  %v13893_v29 = vrot.slane %v11259_v26, %v8228_v14  ;;  %v4693_v63 = vsel %vm13894_vm10, %v11110_v23, %v11112_v60  ;;  %v4692_v28 = vsel %vm13895_vm0, %v11112_v60, %v11116_v48  ;;  %v4694_v57 = vsel %vm13896_vm11, %v11118_v51, %v11110_v23  ;;  %v11749_v60 = vld [vmem:[%s13230_s3 + $0x47] ss:$8 sm:$0xf]  ;;  %vm13916_vm10 = vmmov %vm13902_vm13 }
 0x65d   : > { %v4616_v35 = vmul.f32 %v13892_v12, %v4587_v37  ;;  %v4618_v62 = vadd.f32 %v4614_v44, %v4572_v21  ;;  %v13897_v10 = vrot.slane %v11259_v26, %v8230_v19  ;;  %v13898_v58 = vrot.slane %v11259_v26, %v8224_v2  ;;  %13900 = vst [vmem:[#allocation11_spill] sm:$0xff] %v11749_v60  ;;  %v13903_v12 = vld [vmem:[#allocation25_spill] sm:$0xff]  ;;  %vm13918_vm0 = vmmov %vm13916_vm10  ;;  %v13984_v60 = vld [vmem:[#allocation23_spill] sm:$0xff] }
 0x65e   : > { %v4672_v61 = vmul.f32 %v13893_v29, %v4647_v18  ;;  %v4691_v37 = vsel %vm13899_vm1, %v11116_v48, %v11118_v51  ;;  %v4619_v23 = vadd.f32 %v4615_v1, %v4573_v11  ;;  %v4617_v21 = vadd.f32 %v4613_v38, %v4571_v24  ;;  %v13907_v38 = vld [vmem:[#allocation34_spill] sm:$0xff]  ;;  %vm13920_vm11 = vmmov %vm13914_vm12 }
 0x65f   : > { %v11710_v16 = vpop.permute.xlu1 %5223  ;;  %v4673_v25 = vmul.f32 %v13897_v10, %v4646_v15  ;;  %v4671_v50 = vmul.f32 %v13898_v58, %v4648_v20  ;;  %v13901_v44 = vrot.slane %v11259_v26, %v8226_v9  ;;  %v4751_v15 = vsel %vm13902_vm13, %v11122_v13, %v11124_v0  ;;  %vm13928_vm13 = vmmov %vm13920_vm11 }
 0x660   : > { %v11719_v39 = vpop.permute.xlu0 %5225  ;;  %v13904_v48 = vrot.slane %v13903_v12, %v8228_v14  ;;  %v13905_v29 = vrot.slane %v13903_v12, %v8230_v19  ;;  %v13906_v1 = vrot.slane %v13903_v12, %v8224_v2  ;;  %v4752_v24 = vsel %vm13908_vm14, %v13907_v38, %v11122_v13  ;;  %vm13929_vm14 = vmmov %vm13920_vm11 }
 0x661   : > { %v4674_v18 = vmul.f32 %v13901_v44, %v4645_v34  ;;  %v4620_v10 = vadd.f32 %v4616_v35, %v4574_v36  ;;  %v4676_v58 = vadd.f32 %v4672_v61, %v4618_v62  ;;  %v4798_v13 = vsel %vm13914_vm12, %v13913_v47, %v13912_v40  ;;  %v13915_v61 = vld [vmem:[#allocation12_spill] sm:$0xff] }
 0x662   : > { %v4718_v51 = vmul.f32 %v13904_v48, %v4693_v63  ;;  %v4719_v11 = vmul.f32 %v13905_v29, %v4692_v28  ;;  %v4717_v26 = vmul.f32 %v13906_v1, %v4694_v57  ;;  %v13909_v63 = vrot.slane %v13903_v12, %v8226_v9 }
 0x663   : > { %v11758_v20 = vpop.permute.xlu1 %5227  ;;  %v4677_v48 = vadd.f32 %v4673_v25, %v4619_v23  ;;  %v4675_v29 = vadd.f32 %v4671_v50, %v4617_v21  ;;  %v13911_v57 = vrot.slane %v13910_v32, %v8228_v14  ;;  %v4678_v36 = vadd.f32 %v4674_v18, %v4620_v10  ;;  %v13919_v10 = vld [vmem:[#allocation13_spill] sm:$0xff] }
 0x664   : > { %v11773_v34 = vpop.permute.xlu0 %5229  ;;  %v4720_v44 = vmul.f32 %v13909_v63, %v4691_v37  ;;  %v4750_v35 = vsel %vm13916_vm10, %v11124_v0, %v13915_v61  ;;  %v13917_v62 = vrot.slane %v13910_v32, %v8224_v2  ;;  %v4722_v23 = vadd.f32 %v4718_v51, %v4676_v58  ;;  %v13921_v63 = vld [vmem:[#allocation26_spill] sm:$0xff]  ;;  %v13923_v51 = vld [vmem:[#allocation36_spill] sm:$0xff]  ;;  %v13937_v37 = vld [vmem:[#allocation31_spill] sm:$0xff] }
 0x665   : > { %v4776_v1 = vmul.f32 %v13911_v57, %v4751_v15  ;;  %v4723_v21 = vadd.f32 %v4719_v11, %v4677_v48  ;;  %v4721_v15 = vadd.f32 %v4717_v26, %v4675_v29  ;;  %v4749_v18 = vsel %vm13918_vm0, %v13915_v61, %v13907_v38  ;;  %v13924_v11 = vld [vmem:[#allocation30_spill] sm:$0xff] }
 0x666   : > { %v4775_v25 = vmul.f32 %v13917_v62, %v4752_v24  ;;  %v4724_v0 = vadd.f32 %v4720_v44, %v4678_v36  ;;  %v4797_v24 = vsel %vm13920_vm11, %v13912_v40, %v13919_v10  ;;  %v13922_v57 = vrot.slane %v13921_v63, %v8224_v2  ;;  %v13927_v44 = vld [vmem:[#allocation9_spill] sm:$0xff] }
 0x667   : > { %v11794_v50 = vpop.permute.xlu1 %5269  ;;  %vm13925_vm1 = vcmp.lt.s32.totalorder %v8246_v6, 7  ;;  %v4780_v58 = vadd.f32 %v4776_v1, %v4722_v23  ;;  %v13926_v38 = vrot.slane %v13910_v32, %v8230_v19  ;;  %v4796_v29 = vsel %vm13928_vm13, %v13919_v10, %v13927_v44  ;;  %v13931_v1 = vld [vmem:[#allocation16_spill] sm:$0xff]  ;;  %v13933_v23 = vld [vmem:[#allocation19_spill] sm:$0xff] }
 0x668   : > { %v11802_v12 = vpop.permute.xlu0 %5271  ;;  %v4821_v62 = vmul.f32 %v13922_v57, %v4798_v13  ;;  %v4856_v26 = vsel %vm13925_vm1, %v13924_v11, %v13923_v51  ;;  %v4795_v40 = vsel %vm13929_vm14, %v13927_v44, %v13913_v47  ;;  %v13930_v13 = vrot.slane %v13910_v32, %v8226_v9  ;;  %vm13932_vm12 = vmmov %vm13925_vm1  ;;  %v13934_v57 = vld [vmem:[#allocation14_spill] sm:$0xff] }
 0x669   : > { %v4777_v48 = vmul.f32 %v13926_v38, %v4750_v35  ;;  %v4779_v61 = vadd.f32 %v4775_v25, %v4721_v15  ;;  %v4855_v35 = vsel %vm13932_vm12, %v13923_v51, %v13931_v1  ;;  %vm13935_vm10 = vcmp.lt.s32.totalorder %v8246_v6, 1  ;;  %vm13938_vm0 = vmmov %vm13925_vm1  ;;  %v13940_v15 = vld [vmem:[#allocation38_spill] sm:$0xff] }
 0x66a   : > { %v4778_v36 = vmul.f32 %v13930_v13, %v4749_v18  ;;  %v4902_v10 = vsel %vm13935_vm10, %v13934_v57, %v13933_v23  ;;  %v13936_v47 = vrot.slane %v13921_v63, %v8228_v14  ;;  %v4854_v32 = vsel %vm13938_vm0, %v13931_v1, %v13937_v37  ;;  %vm13939_vm11 = vmmov %vm13938_vm0 }
 0x66b   : > { %v11837_v38 = vpop.permute.xlu1 %5273  ;;  %v4853_v25 = vsel %vm13939_vm11, %v13937_v37, %v13924_v11  ;;  %v13941_v18 = vrot.slane %v13940_v15, %v8224_v2  ;;  %v13942_v28 = vrot.slane %v13921_v63, %v8230_v19  ;;  %v4825_v1 = vadd.f32 %v4821_v62, %v4779_v61  ;;  %vm13945_vm1 = vmmov %vm13935_vm10 }
 0x66c   : > { %v4822_v44 = vmul.f32 %v13936_v47, %v4797_v24  ;;  %v11853_v13 = vpop.permute.xlu0 %5275  ;;  %v13943_v47 = vrot.slane %v13921_v63, %v8226_v9  ;;  %v4901_v37 = vsel %vm13945_vm1, %v13933_v23, %v13944_v56  ;;  %v13946_v11 = vrot.slane %v13940_v15, %v8228_v14  ;;  %vm13948_vm13 = vmmov %vm13945_vm1  ;;  %v13950_v63 = vld [vmem:[#allocation40_spill] sm:$0xff] }
 0x66d   : > { %v4879_v51 = vmul.f32 %v13941_v18, %v4856_v26  ;;  %v4823_v24 = vmul.f32 %v13942_v28, %v4796_v29  ;;  %v13947_v18 = vld [vmem:[#allocation21_spill] sm:$0xff]  ;;  %vm13949_vm14 = vmmov %vm13945_vm1  ;;  %v13951_v62 = vrot.slane %v13950_v63, %v8224_v2  ;;  %v4782_v61 = vadd.f32 %v4778_v36, %v4724_v0  ;;  %v13976_v36 = vld [vmem:[#allocation22_spill] sm:$0xff] }
 0x66e   : > { %v4824_v31 = vmul.f32 %v13943_v47, %v4795_v40  ;;  %v4880_v26 = vmul.f32 %v13946_v11, %v4855_v35  ;;  %v4900_v22 = vsel %vm13948_vm13, %v13944_v56, %v13947_v18  ;;  %v4899_v28 = vsel %vm13949_vm14, %v13947_v18, %v13934_v57  ;;  %v11890_v57 = vld [vmem:[%s13230_s3 + $0x60] ss:$8 sm:$0xf] }
 0x66f   : > { %v4925_v29 = vmul.f32 %v13951_v62, %v4902_v10  ;;  %v4781_v40 = vadd.f32 %v4777_v48, %v4723_v21  ;;  %v13952_v23 = vrot.slane %v13940_v15, %v8230_v19  ;;  %v13953_v47 = vrot.slane %v13940_v15, %v8226_v9  ;;  %v11885_v56 = vpop.permute.xlu1 %5327  ;;  %13954 = vst [vmem:[#allocation5_spill] sm:$0xff] %v11890_v57 }
 0x670   : > { %v4826_v18 = vadd.f32 %v4822_v44, %v4780_v58  ;;  %v4883_v33 = vadd.f32 %v4879_v51, %v4825_v1  ;;  %v13955_v21 = vrot.slane %v13950_v63, %v8228_v14  ;;  %v11895_v48 = vpop.permute.xlu0 %5329  ;;  %v13957_v62 = vrot.slane %v13950_v63, %v8226_v9  ;;  %v11908_v44 = vld [vmem:[%s13230_s3 + $0x61] ss:$8 sm:$0xf] }
 0x671   : > { %v4881_v35 = vmul.f32 %v13952_v23, %v4854_v32  ;;  %v4882_v11 = vmul.f32 %v13953_v47, %v4853_v25  ;;  %v4827_v10 = vadd.f32 %v4823_v24, %v4781_v40  ;;  %v4828_v32 = vadd.f32 %v4824_v31, %v4782_v61  ;;  %13958 = vst [vmem:[#allocation6_spill] sm:$0xff] %v11908_v44  ;;  %v13960_v61 = vld [vmem:[#allocation39_spill] sm:$0xff]  ;;  %v13968_v23 = vld [vmem:[#allocation37_spill] sm:$0xff]  ;;  %v13970_v47 = vld [vmem:[#allocation28_spill] sm:$0xff] }
 0x672   : > { %v4926_v0 = vmul.f32 %v13955_v21, %v4901_v37  ;;  %v13956_v25 = vrot.slane %v13950_v63, %v8230_v19  ;;  %v4928_v58 = vmul.f32 %v13957_v62, %v4899_v28  ;;  %v4884_v51 = vadd.f32 %v4880_v26, %v4826_v18  ;;  %v13961_v21 = vld [vmem:[#allocation35_spill] sm:$0xff]  ;;  %v13963_v62 = vld [vmem:[#allocation18_spill] sm:$0xff]  ;;  %v13982_v44 = vld [vmem:[#allocation32_spill] sm:$0xff] }
 0x673   : > { %v4929_v1 = vadd.f32 %v4925_v29, %v4883_v33  ;;  %v4885_v24 = vadd.f32 %v4881_v35, %v4827_v10  ;;  %v4886_v40 = vadd.f32 %v4882_v11, %v4828_v32  ;;  %v11918_v63 = vpop.permute.xlu1 %5331  ;;  %v13962_v32 = vld [vmem:[#allocation20_spill] sm:$0xff]  ;;  %vm13969_vm12 = vcmp.lt.s32.totalorder %v8246_v6, 121 }
 0x674   : > { %v4927_v15 = vmul.f32 %v13956_v25, %v4900_v22  ;;  %v13959_v22 = vld [vmem:[#allocation41_spill] sm:$0xff]  ;;  %v4930_v26 = vadd.f32 %v4926_v0, %v4884_v51  ;;  %v11922_v33 = vpop.permute.xlu0 %5333  ;;  %v4965_v0 = vsel %vm1353_vm15, %v13961_v21, %v13962_v32  ;;  %v13964_v51 = vrot.slane %v13963_v62, 4  ;;  %vm13971_vm10 = vmmov %vm13969_vm12 }
 0x675   : > { %v4967_v28 = vsel %vm1353_vm15, %v13960_v61, %v13959_v22  ;;  %v4932_v18 = vadd.f32 %v4928_v58, %v4886_v40  ;;  %v4966_v10 = vsel %vm1353_vm15, %v13959_v22, %v13961_v21  ;;  %v11941_v25 = vld [vmem:[%s13230_s3 + $0x62] ss:$8 sm:$0xf]  ;;  %v4968_v40 = vsel %vm1353_vm15, %v13962_v32, %v13960_v61  ;;  %vm13975_vm0 = vmmov %vm13971_vm10 }
 0x676   : > { %v4931_v11 = vadd.f32 %v4927_v15, %v4885_v24  ;;  %v4949_v29 = vadd.f32 %v13964_v51, %v4929_v1  ;;  %v13965_v15 = vld [vmem:[#allocation42_spill] sm:$0xff]  ;;  %v13967_v22 = vld [vmem:[#allocation24_spill] sm:$0xff]  ;;  %v13977_v61 = vrot.slane %v13976_v36, 4  ;;  %vm13981_vm11 = vmmov %vm13975_vm0  ;;  %v13983_v57 = vrot.slane %v13982_v44, 4 }
 0x677   : > { %v13966_v58 = vrot.slane %v13965_v15, %v8224_v2  ;;  %v5025_v21 = vsel %vm13969_vm12, %v13968_v23, %v13967_v22  ;;  %v5024_v62 = vsel %vm13971_vm10, %v13967_v22, %v13970_v47  ;;  %v11960_v1 = vpop.permute.xlu1 %5373  ;;  %v13972_v32 = vrot.slane %v13965_v15, %v8228_v14  ;;  %v13974_v22 = vld [vmem:[#allocation44_spill] sm:$0xff] }
 0x678   : > { %v13973_v35 = vrot.slane %v13965_v15, %v8230_v19  ;;  %v5023_v37 = vsel %vm13975_vm0, %v13970_v47, %v13974_v22  ;;  %v4950_v17 = vadd.f32 %v13977_v61, %v4930_v26  ;;  %v5026_v47 = vsel %vm13981_vm11, %v13974_v22, %v13968_v23 }
 0x679   : > { %v4991_v24 = vmul.f32 %v13966_v58, %v4967_v28  ;;  %v4992_v58 = vmul.f32 %v13972_v32, %v4966_v10  ;;  %v11978_v28 = vpop.permute.xlu0 %5375  ;;  %v13978_v10 = vrot.slane %v13965_v15, %v8226_v9  ;;  %v4951_v51 = vadd.f32 %v13983_v57, %v4931_v11 }
 0x67a   : > { %v4993_v31 = vmul.f32 %v13973_v35, %v4965_v0  ;;  %v13980_v35 = vrot.slane %v13979_v41, %v8224_v2  ;;  %v13985_v36 = vrot.slane %v13984_v60, 4  ;;  %v13986_v15 = vrot.slane %v13979_v41, %v8228_v14 }
 0x67b   : > { %v4994_v32 = vmul.f32 %v13978_v10, %v4968_v40  ;;  %v4995_v49 = vadd.f32 %v4991_v24, %v4949_v29  ;;  %v13987_v61 = vrot.slane %v13979_v41, %v8230_v19  ;;  %v13988_v10 = vld [vmem:[#allocation8_spill] sm:$0xff]  ;;  %vm13990_vm1 = vcmp.lt.s32.totalorder %v8246_v6, 120  ;;  %v12016_v44 = vpop.permute.xlu1 %5377 }
 0x67c   : > { %v5049_v0 = vmul.f32 %v13980_v35, %v5025_v21  ;;  %v4952_v26 = vadd.f32 %v13985_v36, %v4932_v18  ;;  %v5050_v40 = vmul.f32 %v13986_v15, %v5024_v62  ;;  %v13989_v35 = vld [vmem:[#allocation43_spill] sm:$0xff]  ;;  %vm13991_vm13 = vmmov %vm13990_vm1  ;;  %v4996_v29 = vadd.f32 %v4992_v58, %v4950_v17 }
 0x67d   : > { %v5051_v21 = vmul.f32 %v13987_v61, %v5023_v37  ;;  %v5071_v23 = vsel %vm13990_vm1, %v13989_v35, %v13988_v10  ;;  %v5070_v57 = vsel %vm13991_vm13, %v13988_v10, %v11484_v3  ;;  %vm13992_vm14 = vmmov %vm13990_vm1  ;;  %v4997_v11 = vadd.f32 %v4993_v31, %v4951_v51  ;;  %v12025_v62 = vpop.permute.xlu0 %5379  ;;  %v13997_v17 = vld [vmem:[#allocation7_spill] sm:$0xff] }
 0x67e   : > { %v5069_v60 = vsel %vm13992_vm14, %v11484_v3, %v11496_v55  ;;  %v13993_v37 = vrot.slane %v13979_v41, %v8226_v9  ;;  %vm13994_vm12 = vmmov %vm13990_vm1  ;;  %v4998_v22 = vadd.f32 %v4994_v32, %v4952_v26  ;;  %v5053_v36 = vadd.f32 %v5049_v0, %v4995_v49 }
 0x67f   : > { %v5072_v24 = vsel %vm13994_vm12, %v11496_v55, %v13989_v35  ;;  %vm13995_vm10 = vcmp.lt.s32.totalorder %v8246_v6, 119  ;;  %v13998_v31 = vrot.slane %v13997_v17, %v8224_v2  ;;  %v13999_v55 = vrot.slane %v13997_v17, %v8228_v14  ;;  %v12055_v10 = vpop.permute.xlu1 %5431 }
 0x680   : > { %v5052_v18 = vmul.f32 %v13993_v37, %v5026_v47  ;;  %v5129_v3 = vsel %vm13995_vm10, %v11527_v59, %v11537_v45  ;;  %vm13996_vm0 = vmmov %vm13995_vm10  ;;  %v14000_v49 = vrot.slane %v13997_v17, %v8230_v19  ;;  %v5054_v47 = vadd.f32 %v5050_v40, %v4996_v29 }
 0x681   : > { %v5128_v41 = vsel %vm13996_vm0, %v11537_v45, %v11576_v5  ;;  %v5095_v51 = vmul.f32 %v13998_v31, %v5071_v23  ;;  %v5096_v58 = vmul.f32 %v13999_v55, %v5070_v57  ;;  %vm14001_vm11 = vmmov %vm13996_vm0  ;;  %v5055_v26 = vadd.f32 %v5051_v21, %v4997_v11 }
 0x682   : > { %v5097_v32 = vmul.f32 %v14000_v49, %v5069_v60  ;;  %v5127_v0 = vsel %vm14001_vm11, %v11576_v5, %v11592_v7  ;;  %v14002_v45 = vrot.slane %v13997_v17, %v8226_v9  ;;  %vm14003_vm1 = vmmov %vm13996_vm0  ;;  %v5056_v35 = vadd.f32 %v5052_v18, %v4998_v22  ;;  %v12067_v60 = vpop.permute.xlu0 %5433 }
 0x683   : > { %v5130_v61 = vsel %vm14003_vm1, %v11592_v7, %v11527_v59  ;;  %v14004_v23 = vrot.slane %v11398_v46, %v8224_v2  ;;  %v14005_v5 = vrot.slane %v11398_v46, %v8228_v14  ;;  %v5175_v21 = vsel %vm638_vm2, %v11624_v52, %v11626_v27 }
 0x684   : > { %v5098_v15 = vmul.f32 %v14002_v45, %v5072_v24  ;;  %v14006_v59 = vrot.slane %v11398_v46, %v8230_v19  ;;  %v5174_v29 = vsel %vm638_vm2, %v11626_v27, %v11659_v43  ;;  %v5173_v11 = vsel %vm638_vm2, %v11659_v43, %v11677_v54 }
 0x685   : > { %v5153_v57 = vmul.f32 %v14004_v23, %v5129_v3  ;;  %v5154_v40 = vmul.f32 %v14005_v5, %v5128_v41  ;;  %v5176_v37 = vsel %vm638_vm2, %v11677_v54, %v11624_v52  ;;  %v5099_v18 = vadd.f32 %v5095_v51, %v5053_v36  ;;  %v12098_v54 = vpop.permute.xlu1 %5435 }
 0x686   : > { %v5155_v7 = vmul.f32 %v14006_v59, %v5127_v0  ;;  %v5100_v24 = vadd.f32 %v5096_v58, %v5054_v47  ;;  %v5101_v22 = vadd.f32 %v5097_v32, %v5055_v26  ;;  %v14007_v3 = vrot.slane %v11398_v46, %v8226_v9 }
 0x687   : > { %v5102_v17 = vadd.f32 %v5098_v15, %v5056_v35  ;;  %v14008_v27 = vrot.slane %v11469_v30, %v8224_v2  ;;  %v5233_v43 = vsel %vm697_vm3, %v11710_v16, %v11719_v39  ;;  %v5232_v52 = vsel %vm697_vm3, %v11719_v39, %v11758_v20  ;;  %v5438_v39 = vpop.permute.xlu0 %5437 }
 0x688   : > { %v5156_v41 = vmul.f32 %v14007_v3, %v5130_v61  ;;  %v14009_v46 = vrot.slane %v11469_v30, %v8228_v14  ;;  %v14010_v51 = vrot.slane %v11469_v30, %v8230_v19  ;;  %v14011_v58 = vrot.slane %v11469_v30, %v8226_v9 }
 0x689   : > { %v5199_v31 = vmul.f32 %v14008_v27, %v5175_v21  ;;  %v5231_v32 = vsel %vm697_vm3, %v11758_v20, %v11773_v34  ;;  %v5157_v0 = vadd.f32 %v5153_v57, %v5099_v18  ;;  %v5158_v47 = vadd.f32 %v5154_v40, %v5100_v24 }
 0x68a   : > { %v5200_v36 = vmul.f32 %v14009_v46, %v5174_v29  ;;  %v5201_v55 = vmul.f32 %v14010_v51, %v5173_v11  ;;  %v5202_v49 = vmul.f32 %v14011_v58, %v5176_v37  ;;  %v5159_v26 = vadd.f32 %v5155_v7, %v5101_v22 }
 0x68b   : > { %v5610_v45 = vrot.slane %v11941_v25, %v8226_v9  ;;  %v5160_v15 = vadd.f32 %v5156_v41, %v5102_v17  ;;  %v14012_v61 = vrot.slane %v11509_v42, %v8224_v2  ;;  %v14013_v30 = vrot.slane %v11509_v42, %v8228_v14  ;;  %v5480_v37 = vpop.permute.xlu0 %5479 }
 0x68c   : > { %v5234_v20 = vsel %vm697_vm3, %v11773_v34, %v11710_v16  ;;  %v14014_v57 = vrot.slane %v11509_v42, %v8230_v19  ;;  %v5279_v40 = vsel %vm745_vm4, %v11794_v50, %v11802_v12  ;;  %v5278_v21 = vsel %vm745_vm4, %v11802_v12, %v11837_v38  ;;  %v5478_v16 = vpop.permute.xlu1 %5477 }
 0x68d   : > { %v5257_v35 = vmul.f32 %v14012_v61, %v5233_v43  ;;  %v5258_v23 = vmul.f32 %v14013_v30, %v5232_v52  ;;  %v5277_v59 = vsel %vm745_vm4, %v11837_v38, %v11853_v13  ;;  %v5203_v34 = vadd.f32 %v5199_v31, %v5157_v0 }
 0x68e   : > { %v5259_v5 = vmul.f32 %v14014_v57, %v5231_v32  ;;  %v5204_v7 = vadd.f32 %v5200_v36, %v5158_v47  ;;  %v5205_v29 = vadd.f32 %v5201_v55, %v5159_v26  ;;  %v5206_v11 = vadd.f32 %v5202_v49, %v5160_v15 }
 0x68f   : > { %v14015_v18 = vrot.slane %v11509_v42, %v8226_v9  ;;  %v5280_v12 = vsel %vm745_vm4, %v11853_v13, %v11794_v50  ;;  %v5337_v38 = vsel %vm805_vm5, %v11885_v56, %v11895_v48  ;;  %v5336_v22 = vsel %vm805_vm5, %v11895_v48, %v11918_v63  ;;  %v5484_v0 = vpop.permute.xlu0 %5483 }
 0x690   : > { %v14016_v3 = vrot.slane %v11564_v8, %v8224_v2  ;;  %v14017_v41 = vrot.slane %v11564_v8, %v8228_v14  ;;  %v14018_v50 = vrot.slane %v11564_v8, %v8230_v19  ;;  %v5335_v27 = vsel %vm805_vm5, %v11918_v63, %v11922_v33  ;;  %v5482_v46 = vpop.permute.xlu1 %5481 }
 0x691   : > { %v5260_v24 = vmul.f32 %v14015_v18, %v5234_v20  ;;  %v5261_v31 = vadd.f32 %v5257_v35, %v5203_v34  ;;  %v5262_v43 = vadd.f32 %v5258_v23, %v5204_v7  ;;  %v5263_v48 = vadd.f32 %v5259_v5, %v5205_v29 }
 0x692   : > { %v5303_v42 = vmul.f32 %v14016_v3, %v5279_v40  ;;  %v5304_v17 = vmul.f32 %v14017_v41, %v5278_v21  ;;  %v5305_v13 = vmul.f32 %v14018_v50, %v5277_v59  ;;  %v5338_v52 = vsel %vm805_vm5, %v11922_v33, %v11885_v56  ;;  %v14028_v41 = vld [vmem:[#allocation11_spill] sm:$0xff] }
 0x693   : > { %v14019_v36 = vrot.slane %v11564_v8, %v8226_v9  ;;  %v14020_v55 = vrot.slane %v11601_v53, %v8224_v2  ;;  %v14021_v63 = vrot.slane %v11601_v53, %v8228_v14  ;;  %v5383_v32 = vsel %vm853_vm6, %v11960_v1, %v11978_v28 }
 0x694   : > { %v5264_v56 = vadd.f32 %v5260_v24, %v5206_v11  ;;  %v14022_v33 = vrot.slane %v11601_v53, %v8230_v19  ;;  %v5602_v47 = vrot.slane %v11941_v25, %v8228_v14  ;;  %v5606_v26 = vrot.slane %v11941_v25, %v8230_v19  ;;  %v5536_v21 = vpop.permute.xlu1 %5535 }
 0x695   : > { %v5306_v51 = vmul.f32 %v14019_v36, %v5280_v12  ;;  %v5361_v58 = vmul.f32 %v14020_v55, %v5337_v38  ;;  %v5362_v49 = vmul.f32 %v14021_v63, %v5336_v22  ;;  %v5307_v15 = vadd.f32 %v5303_v42, %v5261_v31 }
 0x696   : > { %v5363_v8 = vmul.f32 %v14022_v33, %v5335_v27  ;;  %v5308_v61 = vadd.f32 %v5304_v17, %v5262_v43  ;;  %v5309_v35 = vadd.f32 %v5305_v13, %v5263_v48  ;;  %v14023_v30 = vrot.slane %v11601_v53, %v8226_v9 }
 0x697   : > { %v14024_v20 = vrot.slane %v11633_v4, %v8224_v2  ;;  %v5382_v5 = vsel %vm853_vm6, %v11978_v28, %v12016_v44  ;;  %v5381_v40 = vsel %vm853_vm6, %v12016_v44, %v12025_v62  ;;  %v5384_v53 = vsel %vm853_vm6, %v12025_v62, %v11960_v1  ;;  %v5538_v28 = vpop.permute.xlu0 %5537 }
 0x698   : > { %v5364_v23 = vmul.f32 %v14023_v30, %v5338_v52  ;;  %v5310_v59 = vadd.f32 %v5306_v51, %v5264_v56  ;;  %v5365_v34 = vadd.f32 %v5361_v58, %v5307_v15  ;;  %v5366_v7 = vadd.f32 %v5362_v49, %v5308_v61  ;;  %v5540_v50 = vpop.permute.xlu1 %5539  ;;  %v14033_v51 = vld [vmem:[#allocation5_spill] sm:$0xff] }
 0x699   : > { %v5407_v57 = vmul.f32 %v14024_v20, %v5383_v32  ;;  %v5441_v29 = vsel %vm913_vm7, %v12055_v10, %v12067_v60  ;;  %v5367_v11 = vadd.f32 %v5363_v8, %v5309_v35  ;;  %v5440_v44 = vsel %vm913_vm7, %v12067_v60, %v12098_v54  ;;  %v14036_v35 = vld [vmem:[#allocation6_spill] sm:$0xff] }
 0x69a   : > { %v5439_v1 = vsel %vm913_vm7, %v12098_v54, %v5438_v39  ;;  %v5442_v62 = vsel %vm913_vm7, %v5438_v39, %v12055_v10  ;;  %v14025_v18 = vrot.slane %v11633_v4, %v8228_v14  ;;  %v14026_v12 = vrot.slane %v11633_v4, %v8230_v19 }
 0x69b   : > { %v14027_v22 = vrot.slane %v11633_v4, %v8226_v9  ;;  %v5487_v3 = vsel %vm961_vm8, %v5478_v16, %v5480_v37  ;;  %v5368_v54 = vadd.f32 %v5364_v23, %v5310_v59  ;;  %v5411_v42 = vadd.f32 %v5407_v57, %v5365_v34  ;;  %v5542_v36 = vpop.permute.xlu0 %5541 }
 0x69c   : > { %v5408_v24 = vmul.f32 %v14025_v18, %v5382_v5  ;;  %v5409_v38 = vmul.f32 %v14026_v12, %v5381_v40  ;;  %v14029_v10 = vrot.slane %v14028_v41, %v8224_v2  ;;  %v5488_v17 = vsel %vm961_vm8, %v5484_v0, %v5478_v16 }
 0x69d   : > { %v5410_v60 = vmul.f32 %v14027_v22, %v5384_v53  ;;  %v14030_v13 = vrot.slane %v14028_v41, %v8228_v14  ;;  %v14031_v4 = vrot.slane %v14028_v41, %v8230_v19  ;;  %v14032_v43 = vrot.slane %v14028_v41, %v8226_v9 }
 0x69e   : > { %v5465_v39 = vmul.f32 %v14029_v10, %v5441_v29  ;;  %v5545_v52 = vsel %vm1021_vm9, %v5536_v21, %v5538_v28  ;;  %v14034_v16 = vrot.slane %v14033_v51, %v8224_v2  ;;  %v5486_v58 = vsel %vm961_vm8, %v5480_v37, %v5482_v46 }
 0x69f   : > { %v5466_v27 = vmul.f32 %v14030_v13, %v5440_v44  ;;  %v5467_v31 = vmul.f32 %v14031_v4, %v5439_v1  ;;  %v5468_v48 = vmul.f32 %v14032_v43, %v5442_v62  ;;  %v5485_v63 = vsel %vm961_vm8, %v5482_v46, %v5484_v0  ;;  %v5584_v0 = vpop.permute.xlu1 %5583  ;;  %v5582_v34 = vpop.permute.xlu0 %5581 }
 0x6a0   : > { %v5511_v55 = vmul.f32 %v14034_v16, %v5487_v3  ;;  %v5546_v49 = vsel %vm1021_vm9, %v5542_v36, %v5536_v21  ;;  %v5412_v32 = vadd.f32 %v5408_v24, %v5366_v7  ;;  %v5413_v56 = vadd.f32 %v5409_v38, %v5367_v11 }
 0x6a1   : > { %v5414_v33 = vadd.f32 %v5410_v60, %v5368_v54  ;;  %v14035_v8 = vrot.slane %v14033_v51, %v8226_v9  ;;  %v5469_v61 = vadd.f32 %v5465_v39, %v5411_v42  ;;  %v14037_v30 = vrot.slane %v14036_v35, %v8224_v2 }
 0x6a2   : > { %v5544_v37 = vsel %vm1021_vm9, %v5538_v28, %v5540_v50  ;;  %v5543_v46 = vsel %vm1021_vm9, %v5540_v50, %v5542_v36  ;;  %v14038_v57 = vrot.slane %v14033_v51, %v8228_v14  ;;  %v14039_v40 = vrot.slane %v14033_v51, %v8230_v19 }
 0x6a3   : > { %v5514_v15 = vmul.f32 %v14035_v8, %v5488_v17  ;;  %v5569_v23 = vmul.f32 %v14037_v30, %v5545_v52  ;;  %v5472_v20 = vadd.f32 %v5468_v48, %v5414_v33  ;;  %v14040_v21 = vrot.slane %v14036_v35, %v8226_v9  ;;  %v5588_v60 = vpop.permute.xlu1 %5587  ;;  %v5586_v10 = vpop.permute.xlu0 %5585  ;;  %v7719_v33 = vld [vmem:[%s13228_s1 + $0x160] sm:$0xff]  ;;  %v7720_v8 = vld [vmem:[%s13228_s1 + $0x168] sm:$0xff] }
 0x6a4   : > { %v5512_v5 = vmul.f32 %v14038_v57, %v5486_v58  ;;  %v5513_v53 = vmul.f32 %v14039_v40, %v5485_v63  ;;  %v5470_v7 = vadd.f32 %v5466_v27, %v5412_v32  ;;  %v5471_v29 = vadd.f32 %v5467_v31, %v5413_v56  ;;  %v7724_v30 = vld [vmem:[%s13228_s1 + $0x188] sm:$0xff]  ;;  %v7730_v57 = vld [vmem:[%s13228_s1 + $0x1b8] sm:$0xff] }
 0x6a5   : > { %v5572_v59 = vmul.f32 %v14040_v21, %v5546_v49  ;;  %v5515_v28 = vadd.f32 %v5511_v55, %v5469_v61  ;;  %vm14041_vm13 = vcmp.lt.s32.totalorder %v8246_v6, 55  ;;  %v5518_v44 = vadd.f32 %v5514_v15, %v5472_v20  ;;  %v7721_v15 = vld [vmem:[%s13228_s1 + $0x170] sm:$0xff]  ;;  %v7722_v61 = vld [vmem:[%s13228_s1 + $0x178] sm:$0xff] }
 0x6a6   : > { %v5591_v11 = vsel %vm14041_vm13, %v5582_v34, %v5584_v0  ;;  %v14042_v1 = vrot.slane %v14036_v35, %v8228_v14  ;;  %v14043_v18 = vrot.slane %v14036_v35, %v8230_v19  ;;  %v14044_v12 = vrot.slane %v11941_v25, %v8224_v2  ;;  %vm14045_vm14 = vmmov %vm14041_vm13  ;;  %v7717_v25 = vld [vmem:[%s13228_s1 + $0x150] sm:$0xff]  ;;  %v7723_v35 = vld [vmem:[%s13228_s1 + $0x180] sm:$0xff] }
 0x6a7   : > { %v5573_v22 = vadd.f32 %v5569_v23, %v5515_v28  ;;  %v5516_v3 = vadd.f32 %v5512_v5, %v5470_v7  ;;  %v5517_v54 = vadd.f32 %v5513_v53, %v5471_v29  ;;  %v5576_v42 = vadd.f32 %v5572_v59, %v5518_v44  ;;  %vm14046_vm12 = vmmov %vm14041_vm13  ;;  %v7725_v23 = vld [vmem:[%s13228_s1 + $0x190] sm:$0xff] }
 0x6a8   : > { %v5570_v62 = vmul.f32 %v14042_v1, %v5544_v37  ;;  %v5571_v24 = vmul.f32 %v14043_v18, %v5543_v46  ;;  %v5615_v38 = vmul.f32 %v14044_v12, %v5591_v11  ;;  %v5592_v41 = vsel %vm14045_vm14, %v5588_v60, %v5582_v34  ;;  %vm14047_vm10 = vmmov %vm14046_vm12  ;;  %v7726_v37 = vld [vmem:[%s13228_s1 + $0x198] sm:$0xff]  ;;  %v7727_v46 = vld [vmem:[%s13228_s1 + $0x1a0] sm:$0xff] }
 0x6a9   : > { %v5618_v17 = vmul.f32 %v5610_v45, %v5592_v41  ;;  %v5589_v50 = vsel %vm14046_vm12, %v5586_v10, %v5588_v60  ;;  %v5590_v13 = vsel %vm14047_vm10, %v5584_v0, %v5586_v10  ;;  %v14048_v45 = vld [vmem:[#allocation33_spill] sm:$0xff]  ;;  %vm14049_vm0 = vcmask 1043456   ;;  %v7728_v0 = vld [vmem:[%s13228_s1 + $0x1a8] sm:$0xff] }
 0x6aa   : > { %v5619_v39 = vadd.f32 %v5615_v38, %v5573_v22  ;;  %v5574_v27 = vadd.f32 %v5570_v62, %v5516_v3  ;;  %v5575_v4 = vadd.f32 %v5571_v24, %v5517_v54  ;;  %v5616_v31 = vmul.f32 %v5602_v47, %v5590_v13  ;;  %vm14050_vm11 = vmmov %vm14049_vm0  ;;  %v7729_v20 = vld [vmem:[%s13228_s1 + $0x1b0] sm:$0xff] }
 0x6ab   : > { %v5617_v43 = vmul.f32 %v5606_v26, %v5589_v50  ;;  %v5622_v48 = vadd.f32 %v5618_v17, %v5576_v42  ;;  %vm14051_vm1 = vmmov %vm14049_vm0  ;;  %vm14053_vm14 = vcmask 31744   ;;  %v14055_v47 = vmov 0.0   ;;  %v7718_v26 = vld [vmem:[%s13228_s1 + $0x158] sm:$0xff] }
 0x6ac   : > { %v5620_v52 = vadd.f32 %v5616_v31, %v5574_v27  ;;  %v5630_v51 = vadd.f32 %v14048_v45, %v5619_v39  ;;  %vm14052_vm13 = vmmov %vm14049_vm0 }
 0x6ad   : > { %v5621_v36 = vadd.f32 %v5617_v43, %v5575_v4  ;;  %v5633_v16 = vadd.f32 %v14048_v45, %v5622_v48  ;;  %vm14054_vm12 = vmmov %vm14053_vm14 }
 0x6ae   : > { %v5631_v58 = vadd.f32 %v14048_v45, %v5620_v52  ;;  %v5634_v56 = vmax.f32 %v5630_v51, 0.0  ;;  %vm14056_vm10 = vmmov %vm14054_vm12 }
 0x6af   : > { %v5632_v55 = vadd.f32 %v14048_v45, %v5621_v36  ;;  %v5637_v63 = vmax.f32 %v5633_v16, 0.0 }
 0x6b0   : > { %v5635_v32 = vmax.f32 %v5631_v58, 0.0 }
 0x6b1   : > { %v5636_v49 = vmax.f32 %v5632_v55, 0.0  ;;  %7747 = vmatprep.subr.msk.mxu1 %vm14049_vm0, %v5637_v63  ;;  %vm14057_vm0 = vmmov %vm14056_vm10 }
 0x6b2   : > { %7731 = vmatprep.subr.msk.mxu0 %vm14050_vm11, %v5635_v32  ;;  %vm14058_vm11 = vmmov %vm14057_vm0 }
 0x6b3   : > { %7748 = vmatpush1.msk.msra.mxu1 %vm14051_vm1, %v5636_v49  ;;  %7732 = vmatpush1.msk.msra.mxu0 %vm14052_vm13, %v5634_v56  ;;  %vm14059_vm1 = vmmov %vm14057_vm0 }
 0x6b4   : > { %7749 = vmatmul.mubr.msk.f32.vlgmr.msra.gmra.mrb[84].mxu1 %vm14053_vm14, %v7717_v25  ;;  %7733 = vmatmul.mubr.msk.f32.vlgmr.msra.gmra.mrb[84].mxu0 %vm14054_vm12, %v7717_v25  ;;  %vm14060_vm13 = vmmov %vm14057_vm0 }
 0x6b5   : > { %5926 = vmatprep.mubr.f32.mxu1 %v14055_v47  ;;  %5777 = vmatprep.mubr.f32.mxu0 %v14055_v47  ;;  %vm14061_vm14 = vmmov %vm14057_vm0 }
 0x6b6   : > { %vm14062_vm12 = vmmov %vm14057_vm0 }
 0x6b8   : > { %7750 = vmatmul.mubr.msk.f32.gmra.mrb[86].mxu1 %vm14056_vm10, %v7718_v26  ;;  %7734 = vmatmul.mubr.msk.f32.gmra.mrb[86].mxu0 %vm14057_vm0, %v7718_v26  ;;  %vm14063_vm10 = vmmov %vm14057_vm0 }
 0x6b9   : > { %5932 = vmatprep.mubr.f32.mxu1 %v14055_v47  ;;  %5783 = vmatprep.mubr.f32.mxu0 %v14055_v47 }
 0x6bc   : > { %7751 = vmatmul.mubr.msk.f32.gmra.mrb[88].mxu1 %vm14058_vm11, %v7719_v33  ;;  %7735 = vmatmul.mubr.msk.f32.gmra.mrb[88].mxu0 %vm14059_vm1, %v7719_v33  ;;  %vm14064_vm11 = vmmov %vm14057_vm0 }
 0x6bd   : > { %5938 = vmatprep.mubr.f32.mxu1 %v14055_v47  ;;  %5789 = vmatprep.mubr.f32.mxu0 %v14055_v47  ;;  %vm14065_vm1 = vmmov %vm14057_vm0 }
 0x6c0   : > { %7752 = vmatmul.mubr.msk.f32.gmra.mrb[90].mxu1 %vm14060_vm13, %v7720_v8  ;;  %7736 = vmatmul.mubr.msk.f32.gmra.mrb[90].mxu0 %vm14061_vm14, %v7720_v8  ;;  %vm14066_vm13 = vmmov %vm14057_vm0 }
 0x6c1   : > { %5944 = vmatprep.mubr.f32.mxu1 %v14055_v47  ;;  %5795 = vmatprep.mubr.f32.mxu0 %v14055_v47  ;;  %vm14067_vm14 = vmmov %vm14057_vm0 }
 0x6c4   : > { %7753 = vmatmul.mubr.msk.f32.gmra.mrb[92].mxu1 %vm14062_vm12, %v7721_v15  ;;  %7737 = vmatmul.mubr.msk.f32.gmra.mrb[92].mxu0 %vm14063_vm10, %v7721_v15  ;;  %vm14068_vm12 = vmmov %vm14057_vm0 }
 0x6c5   : > { %5950 = vmatprep.mubr.f32.mxu1 %v14055_v47  ;;  %5801 = vmatprep.mubr.f32.mxu0 %v14055_v47  ;;  %vm14069_vm10 = vmmov %vm14057_vm0 }
 0x6c8   : > { %7754 = vmatmul.mubr.msk.f32.gmra.mrb[94].mxu1 %vm14057_vm0, %v7722_v61  ;;  %7738 = vmatmul.mubr.msk.f32.gmra.mrb[94].mxu0 %vm14064_vm11, %v7722_v61  ;;  %vm14070_vm11 = vmmov %vm14057_vm0 }
 0x6c9   : > { %5956 = vmatprep.mubr.f32.mxu1 %v14055_v47  ;;  %5807 = vmatprep.mubr.f32.mxu0 %v14055_v47 }
 0x6cc   : > { %7755 = vmatmul.mubr.msk.f32.gmra.mrb[96].mxu1 %vm14065_vm1, %v7723_v35  ;;  %7739 = vmatmul.mubr.msk.f32.gmra.mrb[96].mxu0 %vm14066_vm13, %v7723_v35  ;;  %vm14071_vm1 = vmmov %vm14057_vm0 }
 0x6cd   : > { %5962 = vmatprep.mubr.f32.mxu1 %v14055_v47  ;;  %5813 = vmatprep.mubr.f32.mxu0 %v14055_v47  ;;  %vm14072_vm13 = vmmov %vm14057_vm0 }
 0x6d0   : > { %7756 = vmatmul.mubr.msk.f32.gmra.mrb[98].mxu1 %vm14067_vm14, %v7724_v30  ;;  %7740 = vmatmul.mubr.msk.f32.gmra.mrb[98].mxu0 %vm14068_vm12, %v7724_v30  ;;  %vm14073_vm14 = vmmov %vm14057_vm0 }
 0x6d1   : > { %5968 = vmatprep.mubr.f32.mxu1 %v14055_v47  ;;  %5819 = vmatprep.mubr.f32.mxu0 %v14055_v47  ;;  %vm14074_vm12 = vmmov %vm14057_vm0 }
 0x6d4   : > { %7757 = vmatmul.mubr.msk.f32.gmra.mrb[100].mxu1 %vm14069_vm10, %v7725_v23  ;;  %7741 = vmatmul.mubr.msk.f32.gmra.mrb[100].mxu0 %vm14057_vm0, %v7725_v23  ;;  %vm14075_vm10 = vmmov %vm14057_vm0 }
 0x6d5   : > { %5974 = vmatprep.mubr.f32.mxu1 %v14055_v47  ;;  %5825 = vmatprep.mubr.f32.mxu0 %v14055_v47 }
 0x6d8   : > { %7758 = vmatmul.mubr.msk.f32.gmra.mrb[102].mxu1 %vm14070_vm11, %v7726_v37  ;;  %7742 = vmatmul.mubr.msk.f32.gmra.mrb[102].mxu0 %vm14071_vm1, %v7726_v37  ;;  %vm14076_vm11 = vmmov %vm14057_vm0 }
 0x6d9   : > { %5980 = vmatprep.mubr.f32.mxu1 %v14055_v47  ;;  %5831 = vmatprep.mubr.f32.mxu0 %v14055_v47  ;;  %vm14077_vm1 = vmmov %vm14057_vm0 }
 0x6dc   : > { %7759 = vmatmul.mubr.msk.f32.gmra.mrb[104].mxu1 %vm14072_vm13, %v7727_v46  ;;  %7743 = vmatmul.mubr.msk.f32.gmra.mrb[104].mxu0 %vm14073_vm14, %v7727_v46  ;;  %vm14078_vm13 = vmmov %vm14057_vm0  ;;  %vm14079_vm14 = vcmp.lt.s32.totalorder %v8246_v6, 55 }
 0x6dd   : > { %5986 = vmatprep.mubr.f32.mxu1 %v14055_v47  ;;  %5837 = vmatprep.mubr.f32.mxu0 %v14055_v47 }
 0x6e0   : > { %7760 = vmatmul.mubr.msk.f32.gmra.mrb[106].mxu1 %vm14074_vm12, %v7728_v0  ;;  %7744 = vmatmul.mubr.msk.f32.gmra.mrb[106].mxu0 %vm14075_vm10, %v7728_v0  ;;  %vm14080_vm12 = vmmov %vm14079_vm14 }
 0x6e1   : > { %5992 = vmatprep.mubr.f32.mxu1 %v14055_v47  ;;  %5843 = vmatprep.mubr.f32.mxu0 %v14055_v47  ;;  %vm14081_vm10 = vmmov %vm14080_vm12 }
 0x6e4   : > { %7761 = vmatmul.mubr.msk.f32.gmra.mrb[108].mxu1 %vm14057_vm0, %v7729_v20  ;;  %7745 = vmatmul.mubr.msk.f32.gmra.mrb[108].mxu0 %vm14076_vm11, %v7729_v20  ;;  %vm14082_vm0 = vmmov %vm14081_vm10  ;;  %vm14083_vm11 = vcmp.lt.s32.totalorder %v8246_v6, 9 }
 0x6e5   : > { %5998 = vmatprep.mubr.f32.mxu1 %v14055_v47  ;;  %5849 = vmatprep.mubr.f32.mxu0 %v14055_v47 }
 0x6e8   : > { %7762 = vmatmul.mubr.msk.f32.gmra.mrb[110].mxu1 %vm14077_vm1, %v7730_v57  ;;  %7746 = vmatmul.mubr.msk.f32.gmra.mrb[110].mxu0 %vm14078_vm13, %v7730_v57  ;;  %vm14084_vm1 = vmmov %vm14083_vm11 }
 0x6e9   : > { %vm14085_vm13 = vmmov %vm14084_vm1 }
 0x787   : > { %v5922_v5 = vpop.f32.mrb[84].mxu1  ;;  %v5773_v40 = vpop.f32.mrb[84].mxu0 }
 0x788   : > { %6007 = vst [vmem:[#allocation2 + $0x10] sm:$0xff] %v5922_v5  ;;  %v5924_v53 = vpop.f32.mrb[85].mxu1  ;;  %6005 = vst [vmem:[#allocation2] sm:$0xff] %v5773_v40  ;;  %v5775_v21 = vpop.f32.mrb[85].mxu0 }
 0x789   : > { %6008 = vst [vmem:[#allocation2 + $0x18] sm:$0xff] %v5924_v53  ;;  %6006 = vst [vmem:[#allocation2 + $0x8] sm:$0xff] %v5775_v21 }
 0x78b   : > { %v5928_v59 = vpop.f32.mrb[86].mxu1  ;;  %v5779_v34 = vpop.f32.mrb[86].mxu0 }
 0x78c   : > { %6011 = vst [vmem:[#allocation2 + $0x30] sm:$0xff] %v5928_v59  ;;  %v5930_v7 = vpop.f32.mrb[87].mxu1  ;;  %6009 = vst [vmem:[#allocation2 + $0x20] sm:$0xff] %v5779_v34  ;;  %v5781_v29 = vpop.f32.mrb[87].mxu0 }
 0x78d   : > { %6012 = vst [vmem:[#allocation2 + $0x38] sm:$0xff] %v5930_v7  ;;  %6010 = vst [vmem:[#allocation2 + $0x28] sm:$0xff] %v5781_v29 }
 0x78f   : > { %v5934_v28 = vpop.f32.mrb[88].mxu1  ;;  %v6061_v11 = vld [vmem:[#allocation2] sm:$0xf]  ;;  %v6063_v1 = vld [vmem:[#allocation2 + $0x10] sm:$0xf]  ;;  %v5785_v62 = vpop.f32.mrb[88].mxu0 }
 0x790   : > { %6015 = vst [vmem:[#allocation2 + $0x50] sm:$0xff] %v5934_v28  ;;  %6065 = vrot.lane.b32.xlu0 %v6061_v11, %s7836_s29  ;;  %v6062_v44 = vld [vmem:[#allocation2 + $0x8] sm:$0xf]  ;;  %v5936_v18 = vpop.f32.mrb[89].mxu1  ;;  %v6064_v24 = vld [vmem:[#allocation2 + $0x18] sm:$0xf] }
 0x791   : > { %6067 = vrot.lane.b32.xlu1 %v6062_v44, %s7836_s29  ;;  %6013 = vst [vmem:[#allocation2 + $0x40] sm:$0xff] %v5785_v62  ;;  %v5787_v12 = vpop.f32.mrb[89].mxu0  ;;  %6016 = vst [vmem:[#allocation2 + $0x58] sm:$0xff] %v5936_v18  ;;  %v6107_v38 = vld [vmem:[#allocation2] sm:$0xf0] }
 0x792   : > { %6014 = vst [vmem:[#allocation2 + $0x48] sm:$0xff] %v5787_v12  ;;  %v6108_v22 = vld [vmem:[#allocation2 + $0x8] sm:$0xf0]  ;;  %v6115_v54 = vrot.slane %v6107_v38, 4  ;;  %v6109_v10 = vld [vmem:[#allocation2 + $0x10] sm:$0xf0] }
 0x793   : > { %v5791_v60 = vpop.f32.mrb[90].mxu0  ;;  %v5940_v3 = vpop.f32.mrb[90].mxu1  ;;  %v6116_v41 = vrot.slane %v6108_v22, 4  ;;  %v6110_v50 = vld [vmem:[#allocation2 + $0x18] sm:$0xf0]  ;;  %v6117_v4 = vrot.slane %v6109_v10, 4 }
 0x794   : > { %6069 = vrot.lane.b32.xlu0 %v6063_v1, %s7836_s29  ;;  %6017 = vst [vmem:[#allocation2 + $0x60] sm:$0xff] %v5791_v60  ;;  %v5793_v42 = vpop.f32.mrb[91].mxu0  ;;  %6019 = vst [vmem:[#allocation2 + $0x70] sm:$0xff] %v5940_v3  ;;  %v5942_v39 = vpop.f32.mrb[91].mxu1  ;;  %v6118_v43 = vrot.slane %v6110_v50, 4 }
 0x795   : > { %6071 = vrot.lane.b32.xlu1 %v6064_v24, %s7836_s29  ;;  %6018 = vst [vmem:[#allocation2 + $0x68] sm:$0xff] %v5793_v42  ;;  %6020 = vst [vmem:[#allocation2 + $0x78] sm:$0xff] %v5942_v39  ;;  %v6165_v51 = vld [vmem:[#allocation2 + $0x20] sm:$0xf]  ;;  %v6166_v16 = vld [vmem:[#allocation2 + $0x28] sm:$0xf] }
 0x796   : > { %v6167_v49 = vld [vmem:[#allocation2 + $0x30] sm:$0xf]  ;;  %v6168_v56 = vld [vmem:[#allocation2 + $0x38] sm:$0xf]  ;;  %v6211_v25 = vld [vmem:[#allocation2 + $0x20] sm:$0xf0] }
 0x797   : > { %v5797_v17 = vpop.f32.mrb[92].mxu0  ;;  %v5946_v27 = vpop.f32.mrb[92].mxu1  ;;  %v6212_v47 = vld [vmem:[#allocation2 + $0x28] sm:$0xf0]  ;;  %v6219_v26 = vrot.slane %v6211_v25, 4 }
 0x798   : > { %6123 = vrot.lane.b32.xlu0 %v6115_v54, %s7837_s30  ;;  %6021 = vst [vmem:[#allocation2 + $0x80] sm:$0xff] %v5797_v17  ;;  %v5799_v13 = vpop.f32.mrb[93].mxu0  ;;  %6023 = vst [vmem:[#allocation2 + $0x90] sm:$0xff] %v5946_v27  ;;  %v5948_v31 = vpop.f32.mrb[93].mxu1  ;;  %v6220_v8 = vrot.slane %v6212_v47, 4 }
 0x799   : > { %6125 = vrot.lane.b32.xlu1 %v6116_v41, %s7837_s30  ;;  %6022 = vst [vmem:[#allocation2 + $0x88] sm:$0xff] %v5799_v13  ;;  %6024 = vst [vmem:[#allocation2 + $0x98] sm:$0xff] %v5948_v31  ;;  %v6213_v15 = vld [vmem:[#allocation2 + $0x30] sm:$0xf0]  ;;  %v6214_v30 = vld [vmem:[#allocation2 + $0x38] sm:$0xf0] }
 0x79a   : > { %v6221_v0 = vrot.slane %v6213_v15, 4  ;;  %v6222_v5 = vrot.slane %v6214_v30, 4  ;;  %v6269_v34 = vld [vmem:[#allocation2 + $0x40] sm:$0xf]  ;;  %v6270_v7 = vld [vmem:[#allocation2 + $0x48] sm:$0xf] }
 0x79b   : > { %v5803_v48 = vpop.f32.mrb[94].mxu0  ;;  %v5952_v52 = vpop.f32.mrb[94].mxu1  ;;  %v6271_v11 = vld [vmem:[#allocation2 + $0x50] sm:$0xf]  ;;  %v6272_v44 = vld [vmem:[#allocation2 + $0x58] sm:$0xf] }
 0x79c   : > { %6127 = vrot.lane.b32.xlu0 %v6117_v4, %s7837_s30  ;;  %6025 = vst [vmem:[#allocation2 + $0xa0] sm:$0xff] %v5803_v48  ;;  %v5805_v36 = vpop.f32.mrb[95].mxu0  ;;  %6027 = vst [vmem:[#allocation2 + $0xb0] sm:$0xff] %v5952_v52  ;;  %v5954_v45 = vpop.f32.mrb[95].mxu1  ;;  %v6315_v62 = vld [vmem:[#allocation2 + $0x40] sm:$0xf0] }
 0x79d   : > { %6129 = vrot.lane.b32.xlu1 %v6118_v43, %s7837_s30  ;;  %6026 = vst [vmem:[#allocation2 + $0xa8] sm:$0xff] %v5805_v36  ;;  %6028 = vst [vmem:[#allocation2 + $0xb8] sm:$0xff] %v5954_v45  ;;  %v6316_v18 = vld [vmem:[#allocation2 + $0x48] sm:$0xf0]  ;;  %v6323_v24 = vrot.slane %v6315_v62, 4 }
 0x79e   : > { %v6324_v12 = vrot.slane %v6316_v18, 4  ;;  %v6317_v38 = vld [vmem:[#allocation2 + $0x50] sm:$0xf0]  ;;  %v6318_v60 = vld [vmem:[#allocation2 + $0x58] sm:$0xf0] }
 0x79f   : > { %v5958_v55 = vpop.f32.mrb[96].mxu1  ;;  %v5809_v58 = vpop.f32.mrb[96].mxu0  ;;  %v6325_v54 = vrot.slane %v6317_v38, 4  ;;  %v6326_v41 = vrot.slane %v6318_v60, 4  ;;  %v6373_v17 = vld [vmem:[#allocation2 + $0x60] sm:$0xf] }
 0x7a0   : > { %6031 = vst [vmem:[#allocation2 + $0xd0] sm:$0xff] %v5958_v55  ;;  %6169 = vrot.lane.b32.xlu0 %v6165_v51, %s7838_s5  ;;  %6029 = vst [vmem:[#allocation2 + $0xc0] sm:$0xff] %v5809_v58  ;;  %v5811_v63 = vpop.f32.mrb[97].mxu0  ;;  %v5960_v32 = vpop.f32.mrb[97].mxu1  ;;  %v6374_v50 = vld [vmem:[#allocation2 + $0x68] sm:$0xf] }
 0x7a1   : > { %6171 = vrot.lane.b32.xlu1 %v6166_v16, %s7838_s5  ;;  %6030 = vst [vmem:[#allocation2 + $0xc8] sm:$0xff] %v5811_v63  ;;  %6032 = vst [vmem:[#allocation2 + $0xd8] sm:$0xff] %v5960_v32  ;;  %v6375_v4 = vld [vmem:[#allocation2 + $0x70] sm:$0xf]  ;;  %v6376_v31 = vld [vmem:[#allocation2 + $0x78] sm:$0xf] }
 0x7a2   : > { %v6419_v43 = vld [vmem:[#allocation2 + $0x60] sm:$0xf0]  ;;  %v6420_v52 = vld [vmem:[#allocation2 + $0x68] sm:$0xf0]  ;;  %v6421_v16 = vld [vmem:[#allocation2 + $0x70] sm:$0xf0] }
 0x7a3   : > { %v5815_v33 = vpop.f32.mrb[98].mxu0  ;;  %v5964_v35 = vpop.f32.mrb[98].mxu1  ;;  %v6427_v45 = vrot.slane %v6419_v43, 4  ;;  %v6428_v51 = vrot.slane %v6420_v52, 4  ;;  %v6422_v55 = vld [vmem:[#allocation2 + $0x78] sm:$0xf0] }
 0x7a4   : > { %6173 = vrot.lane.b32.xlu0 %v6167_v49, %s7838_s5  ;;  %6033 = vst [vmem:[#allocation2 + $0xe0] sm:$0xff] %v5815_v33  ;;  %v5817_v61 = vpop.f32.mrb[99].mxu0  ;;  %6035 = vst [vmem:[#allocation2 + $0xf0] sm:$0xff] %v5964_v35  ;;  %v5966_v23 = vpop.f32.mrb[99].mxu1  ;;  %v6429_v58 = vrot.slane %v6421_v16, 4  ;;  %v6430_v63 = vrot.slane %v6422_v55, 4 }
 0x7a5   : > { %6175 = vrot.lane.b32.xlu1 %v6168_v56, %s7838_s5  ;;  %6034 = vst [vmem:[#allocation2 + $0xe8] sm:$0xff] %v5817_v61  ;;  %6036 = vst [vmem:[#allocation2 + $0xf8] sm:$0xff] %v5966_v23  ;;  %v6477_v49 = vld [vmem:[#allocation2 + $0x80] sm:$0xf]  ;;  %v6478_v32 = vld [vmem:[#allocation2 + $0x88] sm:$0xf] }
 0x7a6   : > { %v6479_v47 = vld [vmem:[#allocation2 + $0x90] sm:$0xf]  ;;  %v6523_v33 = vld [vmem:[#allocation2 + $0x80] sm:$0xf0]  ;;  %v6524_v15 = vld [vmem:[#allocation2 + $0x88] sm:$0xf0] }
 0x7a7   : > { %v5821_v37 = vpop.f32.mrb[100].mxu0  ;;  %v5970_v46 = vpop.f32.mrb[100].mxu1  ;;  %v6531_v35 = vrot.slane %v6523_v33, 4  ;;  %v6532_v30 = vrot.slane %v6524_v15, 4  ;;  %v6525_v23 = vld [vmem:[#allocation2 + $0x90] sm:$0xf0] }
 0x7a8   : > { %6227 = vrot.lane.b32.xlu0 %v6219_v26, %s7839_s6  ;;  %6037 = vst [vmem:[#allocation2 + $0x100] sm:$0xff] %v5821_v37  ;;  %v5823_v20 = vpop.f32.mrb[101].mxu0  ;;  %6039 = vst [vmem:[#allocation2 + $0x110] sm:$0xff] %v5970_v46  ;;  %v5972_v57 = vpop.f32.mrb[101].mxu1  ;;  %v6480_v26 = vld [vmem:[#allocation2 + $0x98] sm:$0xf] }
 0x7a9   : > { %6229 = vrot.lane.b32.xlu1 %v6220_v8, %s7839_s6  ;;  %6038 = vst [vmem:[#allocation2 + $0x108] sm:$0xff] %v5823_v20  ;;  %6040 = vst [vmem:[#allocation2 + $0x118] sm:$0xff] %v5972_v57  ;;  %v6526_v37 = vld [vmem:[#allocation2 + $0x98] sm:$0xf0]  ;;  %v6533_v46 = vrot.slane %v6525_v23, 4 }
 0x7aa   : > { %v6581_v20 = vld [vmem:[#allocation2 + $0xa0] sm:$0xf]  ;;  %v6582_v57 = vld [vmem:[#allocation2 + $0xa8] sm:$0xf]  ;;  %v6687_v62 = vld [vmem:[#allocation2 + $0xd0] sm:$0xf] }
 0x7ab   : > { %v5827_v40 = vpop.f32.mrb[102].mxu0  ;;  %v5976_v53 = vpop.f32.mrb[102].mxu1  ;;  %v6688_v18 = vld [vmem:[#allocation2 + $0xd8] sm:$0xf]  ;;  %v6753_v38 = vld [vmem:[#allocation2 + $0xf0] sm:$0xf] }
 0x7ac   : > { %6231 = vrot.lane.b32.xlu0 %v6221_v0, %s7839_s6  ;;  %6041 = vst [vmem:[#allocation2 + $0x120] sm:$0xff] %v5827_v40  ;;  %v5829_v21 = vpop.f32.mrb[103].mxu0  ;;  %6043 = vst [vmem:[#allocation2 + $0x130] sm:$0xff] %v5976_v53  ;;  %v5978_v59 = vpop.f32.mrb[103].mxu1  ;;  %v6534_v0 = vrot.slane %v6526_v37, 4 }
 0x7ad   : > { %6233 = vrot.lane.b32.xlu1 %v6222_v5, %s7839_s6  ;;  %6042 = vst [vmem:[#allocation2 + $0x128] sm:$0xff] %v5829_v21  ;;  %6044 = vst [vmem:[#allocation2 + $0x138] sm:$0xff] %v5978_v59  ;;  %v6583_v5 = vld [vmem:[#allocation2 + $0xb0] sm:$0xf]  ;;  %v6584_v40 = vld [vmem:[#allocation2 + $0xb8] sm:$0xf] }
 0x7ae   : > { %v6627_v53 = vld [vmem:[#allocation2 + $0xa0] sm:$0xf0]  ;;  %v6628_v21 = vld [vmem:[#allocation2 + $0xa8] sm:$0xf0] }
 0x7af   : > { %v5982_v29 = vpop.f32.mrb[104].mxu1  ;;  %v5833_v28 = vpop.f32.mrb[104].mxu0  ;;  %v6635_v59 = vrot.slane %v6627_v53, 4  ;;  %v6797_v60 = vld [vmem:[#allocation2 + $0xe0] sm:$0xf0] }
 0x7b0   : > { %6047 = vst [vmem:[#allocation2 + $0x150] sm:$0xff] %v5982_v29  ;;  %6273 = vrot.lane.b32.xlu0 %v6269_v34, %s7840_s7  ;;  %6045 = vst [vmem:[#allocation2 + $0x140] sm:$0xff] %v5833_v28  ;;  %v5835_v1 = vpop.f32.mrb[105].mxu0  ;;  %v5984_v22 = vpop.f32.mrb[105].mxu1  ;;  %v6636_v34 = vrot.slane %v6628_v21, 4 }
 0x7b1   : > { %6275 = vrot.lane.b32.xlu1 %v6270_v7, %s7840_s7  ;;  %6046 = vst [vmem:[#allocation2 + $0x148] sm:$0xff] %v5835_v1  ;;  %6048 = vst [vmem:[#allocation2 + $0x158] sm:$0xff] %v5984_v22  ;;  %v6629_v7 = vld [vmem:[#allocation2 + $0xb0] sm:$0xf0]  ;;  %v6630_v29 = vld [vmem:[#allocation2 + $0xb8] sm:$0xf0] }
 0x7b2   : > { %v6637_v28 = vrot.slane %v6629_v7, 4  ;;  %v6686_v1 = vld [vmem:[#allocation2 + $0xc8] sm:$0xf]  ;;  %v6754_v22 = vld [vmem:[#allocation2 + $0xf8] sm:$0xf] }
 0x7b3   : > { %v5839_v3 = vpop.f32.mrb[106].mxu0  ;;  %v5988_v10 = vpop.f32.mrb[106].mxu1  ;;  %v6856_v43 = vld [vmem:[#allocation2 + $0x108] sm:$0xf]  ;;  %v6857_v52 = vld [vmem:[#allocation2 + $0x110] sm:$0xf] }
 0x7b4   : > { %6277 = vrot.lane.b32.xlu0 %v6271_v11, %s7840_s7  ;;  %6049 = vst [vmem:[#allocation2 + $0x160] sm:$0xff] %v5839_v3  ;;  %v5841_v42 = vpop.f32.mrb[107].mxu0  ;;  %6051 = vst [vmem:[#allocation2 + $0x170] sm:$0xff] %v5988_v10  ;;  %v5990_v39 = vpop.f32.mrb[107].mxu1  ;;  %v6638_v11 = vrot.slane %v6630_v29, 4 }
 0x7b5   : > { %6279 = vrot.lane.b32.xlu1 %v6272_v44, %s7840_s7  ;;  %6050 = vst [vmem:[#allocation2 + $0x168] sm:$0xff] %v5841_v42  ;;  %6052 = vst [vmem:[#allocation2 + $0x178] sm:$0xff] %v5990_v39  ;;  %v6685_v44 = vld [vmem:[#allocation2 + $0xc0] sm:$0xf]  ;;  %v6798_v3 = vld [vmem:[#allocation2 + $0xe8] sm:$0xf0] }
 0x7b6   : > { %v6805_v42 = vrot.slane %v6797_v60, 4  ;;  %v6799_v10 = vld [vmem:[#allocation2 + $0xf0] sm:$0xf0]  ;;  %v6800_v39 = vld [vmem:[#allocation2 + $0xf8] sm:$0xf0] }
 0x7b7   : > { %v5845_v13 = vpop.f32.mrb[108].mxu0  ;;  %v5994_v48 = vpop.f32.mrb[108].mxu1  ;;  %v6901_v16 = vld [vmem:[#allocation2 + $0x100] sm:$0xf0]  ;;  %v6903_v15 = vld [vmem:[#allocation2 + $0x110] sm:$0xf0] }
 0x7b8   : > { %6331 = vrot.lane.b32.xlu0 %v6323_v24, %s7841_s8  ;;  %6053 = vst [vmem:[#allocation2 + $0x180] sm:$0xff] %v5845_v13  ;;  %v5847_v27 = vpop.f32.mrb[109].mxu0  ;;  %6055 = vst [vmem:[#allocation2 + $0x190] sm:$0xff] %v5994_v48  ;;  %v5996_v36 = vpop.f32.mrb[109].mxu1  ;;  %v6751_v24 = vld [vmem:[#allocation2 + $0xe0] sm:$0xf] }
 0x7b9   : > { %6333 = vrot.lane.b32.xlu1 %v6324_v12, %s7841_s8  ;;  %6054 = vst [vmem:[#allocation2 + $0x188] sm:$0xff] %v5847_v27  ;;  %6056 = vst [vmem:[#allocation2 + $0x198] sm:$0xff] %v5996_v36  ;;  %v6752_v12 = vld [vmem:[#allocation2 + $0xe8] sm:$0xf]  ;;  %v6808_v27 = vrot.slane %v6800_v39, 4  ;;  %v6911_v21 = vrot.slane %v6903_v15, 4 }
 0x7ba   : > { %v6077_v55 = vld [vmem:[%s13230_s3] ss:$8 sm:$0xf]  ;;  %v6904_v37 = vld [vmem:[#allocation2 + $0x118] sm:$0xf0] }
 0x7bb   : > { %v5851_v56 = vpop.f32.mrb[110].mxu0  ;;  %v6000_v8 = vpop.f32.mrb[110].mxu1  ;;  %v6960_v39 = vld [vmem:[#allocation2 + $0x128] sm:$0xf] }
 0x7bc   : > { %6335 = vrot.lane.b32.xlu0 %v6325_v54, %s7841_s8  ;;  %6057 = vst [vmem:[#allocation2 + $0x1a0] sm:$0xff] %v5851_v56  ;;  %v5853_v25 = vpop.f32.mrb[111].mxu0  ;;  %6059 = vst [vmem:[#allocation2 + $0x1b0] sm:$0xff] %v6000_v8  ;;  %v6002_v61 = vpop.f32.mrb[111].mxu1  ;;  %v6086_v56 = vrot.slane %v6077_v55, %v8228_v14 }
 0x7bd   : > { %6337 = vrot.lane.b32.xlu1 %v6326_v41, %s7841_s8  ;;  %6058 = vst [vmem:[#allocation2 + $0x1a8] sm:$0xff] %v5853_v25  ;;  %6060 = vst [vmem:[#allocation2 + $0x1b8] sm:$0xff] %v6002_v61  ;;  %v12465_v54 = vpop.permute.xlu0 %7425  ;;  %v6806_v41 = vrot.slane %v6798_v3, 4  ;;  %v6090_v25 = vrot.slane %v6077_v55, %v8230_v19  ;;  %v7764_v8 = vld [vmem:[%s13230_s3 + $0x2] ss:$8 sm:$0xf]  ;;  %v6082_v61 = vrot.slane %v6077_v55, %v8224_v2 }
 0x7be   : > { %v6190_v53 = vrot.slane %v7764_v8, %v8228_v14  ;;  %v6198_v60 = vrot.slane %v7764_v8, %v8226_v9  ;;  %v6959_v3 = vld [vmem:[#allocation2 + $0x120] sm:$0xf] }
 0x7c0   : > { %6377 = vrot.lane.b32.xlu0 %v6373_v17, %s7842_s9 }
 0x7c1   : > { %6379 = vrot.lane.b32.xlu1 %v6374_v50, %s7842_s9  ;;  %v6807_v50 = vrot.slane %v6799_v10, 4 }
 0x7c4   : > { %6381 = vrot.lane.b32.xlu0 %v6375_v4, %s7842_s9  ;;  %v6855_v4 = vld [vmem:[#allocation2 + $0x100] sm:$0xf] }
 0x7c5   : > { %6383 = vrot.lane.b32.xlu1 %v6376_v31, %s7842_s9 }
 0x7c8   : > { %6435 = vrot.lane.b32.xlu0 %v6427_v45, %s7843_s10  ;;  %v6858_v45 = vld [vmem:[#allocation2 + $0x118] sm:$0xf] }
 0x7c9   : > { %6437 = vrot.lane.b32.xlu1 %v6428_v51, %s7843_s10 }
 0x7cc   : > { %6439 = vrot.lane.b32.xlu0 %v6429_v58, %s7843_s10  ;;  %v6902_v58 = vld [vmem:[#allocation2 + $0x108] sm:$0xf0] }
 0x7cd   : > { %6441 = vrot.lane.b32.xlu1 %v6430_v63, %s7843_s10  ;;  %v7763_v63 = vld [vmem:[%s13230_s3 + $0x1] ss:$8 sm:$0xf]  ;;  %v6910_v33 = vrot.slane %v6902_v58, 4 }
 0x7ce   : > { %v6961_v58 = vld [vmem:[#allocation2 + $0x130] sm:$0xf] }
 0x7d0   : > { %6481 = vrot.lane.b32.xlu0 %v6477_v49, %s7844_s11 }
 0x7d1   : > { %6483 = vrot.lane.b32.xlu1 %v6478_v32, %s7844_s11  ;;  %v6909_v32 = vrot.slane %v6901_v16, 4 }
 0x7d4   : > { %6485 = vrot.lane.b32.xlu0 %v6479_v47, %s7844_s11  ;;  %v6148_v47 = vrot.slane %v7763_v63, %v8230_v19 }
 0x7d5   : > { %6487 = vrot.lane.b32.xlu1 %v6480_v26, %s7844_s11 }
 0x7d8   : > { %6539 = vrot.lane.b32.xlu0 %v6531_v35, %s7845_s12 }
 0x7d9   : > { %6541 = vrot.lane.b32.xlu1 %v6532_v30, %s7845_s12  ;;  %v6140_v30 = vrot.slane %v7763_v63, %v8224_v2 }
 0x7dc   : > { %6543 = vrot.lane.b32.xlu0 %v6533_v46, %s7845_s12  ;;  %v6094_v46 = vrot.slane %v6077_v55, %v8226_v9 }
 0x7dd   : > { %6545 = vrot.lane.b32.xlu1 %v6534_v0, %s7845_s12  ;;  %v6144_v0 = vrot.slane %v7763_v63, %v8228_v14 }
 0x7e0   : > { %6585 = vrot.lane.b32.xlu0 %v6581_v20, %s7846_s13  ;;  %v6152_v20 = vrot.slane %v7763_v63, %v8226_v9 }
 0x7e1   : > { %6587 = vrot.lane.b32.xlu1 %v6582_v57, %s7846_s13 }
 0x7e4   : > { %6589 = vrot.lane.b32.xlu0 %v6583_v5, %s7846_s13 }
 0x7e5   : > { %6591 = vrot.lane.b32.xlu1 %v6584_v40, %s7846_s13 }
 0x7e8   : > { %6643 = vrot.lane.b32.xlu0 %v6635_v59, %s7847_s14  ;;  %v6194_v59 = vrot.slane %v7764_v8, %v8230_v19 }
 0x7e9   : > { %6645 = vrot.lane.b32.xlu1 %v6636_v34, %s7847_s14 }
 0x7ec   : > { %6647 = vrot.lane.b32.xlu0 %v6637_v28, %s7847_s14 }
 0x7ed   : > { %6649 = vrot.lane.b32.xlu1 %v6638_v11, %s7847_s14  ;;  %v6912_v11 = vrot.slane %v6904_v37, 4 }
 0x7f0   : > { %6689 = vrot.lane.b32.xlu0 %v6685_v44, %s7848_s18  ;;  %v12511_v44 = vld [vmem:[%s13230_s3 + $0x3] ss:$8 sm:$0xf] }
 0x7f1   : > { %6691 = vrot.lane.b32.xlu1 %v6686_v1, %s7848_s18  ;;  %v6252_v15 = vrot.slane %v12511_v44, %v8230_v19  ;;  %v6256_v37 = vrot.slane %v12511_v44, %v8226_v9 }
 0x7f4   : > { %6693 = vrot.lane.b32.xlu0 %v6687_v62, %s7848_s18 }
 0x7f5   : > { %6695 = vrot.lane.b32.xlu1 %v6688_v18, %s7848_s18 }
 0x7f8   : > { %6755 = vrot.lane.b32.xlu0 %v6751_v24, %s7849_s19 }
 0x7f9   : > { %6757 = vrot.lane.b32.xlu1 %v6752_v12, %s7849_s19 }
 0x7fc   : > { %6759 = vrot.lane.b32.xlu0 %v6753_v38, %s7849_s19 }
 0x7fd   : > { %6761 = vrot.lane.b32.xlu1 %v6754_v22, %s7849_s19  ;;  %v6186_v22 = vrot.slane %v7764_v8, %v8224_v2 }
 0x800   : > { %6813 = vrot.lane.b32.xlu0 %v6805_v42, %s7850_s21 }
 0x801   : > { %6815 = vrot.lane.b32.xlu1 %v6806_v41, %s7850_s21 }
 0x802   : > { %v6066_v17 = vpop.permute.xlu0 %6065 }
 0x803   : > { %v6068_v13 = vpop.permute.xlu1 %6067 }
 0x804   : > { %6817 = vrot.lane.b32.xlu0 %v6807_v50, %s7850_s21  ;;  %v6075_v34 = vsel %vm638_vm2, %v6066_v17, %v6068_v13 }
 0x805   : > { %6819 = vrot.lane.b32.xlu1 %v6808_v27, %s7850_s21  ;;  %v6100_v42 = vmul.f32 %v6086_v56, %v6075_v34 }
 0x806   : > { %v6070_v31 = vpop.permute.xlu0 %6069 }
 0x807   : > { %v6072_v48 = vpop.permute.xlu1 %6071  ;;  %v6074_v5 = vsel %vm638_vm2, %v6068_v13, %v6070_v31 }
 0x808   : > { %6859 = vrot.lane.b32.xlu0 %v6855_v4, %s7851_s22  ;;  %v6076_v7 = vsel %vm638_vm2, %v6072_v48, %v6066_v17  ;;  %v6073_v1 = vsel %vm638_vm2, %v6070_v31, %v6072_v48  ;;  %v6101_v12 = vmul.f32 %v6090_v25, %v6074_v5  ;;  %v6248_v17 = vrot.slane %v12511_v44, %v8228_v14 }
 0x809   : > { %6861 = vrot.lane.b32.xlu1 %v6856_v43, %s7851_s22  ;;  %v6099_v41 = vmul.f32 %v6082_v61, %v6076_v7  ;;  %v6102_v50 = vmul.f32 %v6094_v46, %v6073_v1  ;;  %v7006_v61 = vld [vmem:[#allocation2 + $0x128] sm:$0xf0] }
 0x80a   : > { %v6124_v36 = vpop.permute.xlu0 %6123 }
 0x80b   : > { %v6126_v51 = vpop.permute.xlu1 %6125 }
 0x80c   : > { %6863 = vrot.lane.b32.xlu0 %v6857_v52, %s7851_s22  ;;  %v6133_v62 = vsel %vm697_vm3, %v6124_v36, %v6126_v51 }
 0x80d   : > { %6865 = vrot.lane.b32.xlu1 %v6858_v45, %s7851_s22  ;;  %v6158_v13 = vmul.f32 %v6144_v0, %v6133_v62  ;;  %s14141_s22 = sshll.u32 %s14143_s16, 4 }
 0x80e   : > { %v6128_v49 = vpop.permute.xlu0 %6127  ;;  %s197_s25 = scalar_lea.vmem %s13231_s4, %s14141_s22 }
 0x80f   : > { %v6130_v26 = vpop.permute.xlu1 %6129  ;;  %v6132_v35 = vsel %vm697_vm3, %v6126_v51, %v6128_v49  ;;  %v6162_v56 = vadd.f32 %v6158_v13, %v6100_v42  ;;  %v7767_v13 = vld [vmem:[%s13230_s3 + $0x5] ss:$8 sm:$0xf] }
 0x810   : > { %v6131_v23 = vsel %vm697_vm3, %v6128_v49, %v6130_v26  ;;  %6917 = vrot.lane.b32.xlu0 %v6909_v32, %s7852_s23  ;;  %v6134_v57 = vsel %vm697_vm3, %v6130_v26, %v6124_v36  ;;  %v6159_v29 = vmul.f32 %v6148_v47, %v6132_v35  ;;  %v6962_v32 = vld [vmem:[#allocation2 + $0x138] sm:$0xf] }
 0x811   : > { %6919 = vrot.lane.b32.xlu1 %v6910_v33, %s7852_s23  ;;  %v6157_v18 = vmul.f32 %v6140_v30, %v6134_v57  ;;  %v6160_v38 = vmul.f32 %v6152_v20, %v6131_v23  ;;  %v7005_v33 = vld [vmem:[#allocation2 + $0x120] sm:$0xf0]  ;;  %v6244_v23 = vrot.slane %v12511_v44, %v8224_v2 }
 0x812   : > { %v6170_v40 = vpop.permute.xlu0 %6169  ;;  %v6163_v27 = vadd.f32 %v6159_v29, %v6101_v12  ;;  %v7013_v0 = vrot.slane %v7005_v33, 4  ;;  %v7766_v20 = vld [vmem:[%s13230_s3 + $0x4] ss:$8 sm:$0xf] }
 0x813   : > { %v6172_v28 = vpop.permute.xlu1 %6171  ;;  %v6161_v43 = vadd.f32 %v6157_v18, %v6099_v41  ;;  %v6164_v45 = vadd.f32 %v6160_v38, %v6102_v50  ;;  %v7008_v29 = vld [vmem:[#allocation2 + $0x138] sm:$0xf0]  ;;  %v6294_v44 = vrot.slane %v7766_v20, %v8228_v14  ;;  %v6290_v41 = vrot.slane %v7766_v20, %v8224_v2  ;;  %v7064_v50 = vld [vmem:[#allocation2 + $0x148] sm:$0xf]  ;;  %v7110_v33 = vld [vmem:[#allocation2 + $0x148] sm:$0xf0] }
 0x814   : > { %v6179_v24 = vsel %vm745_vm4, %v6170_v40, %v6172_v28  ;;  %6921 = vrot.lane.b32.xlu0 %v6911_v21, %s7852_s23  ;;  %v7007_v21 = vld [vmem:[#allocation2 + $0x130] sm:$0xf0] }
 0x815   : > { %6923 = vrot.lane.b32.xlu1 %v6912_v11, %s7852_s23  ;;  %v6204_v51 = vmul.f32 %v6190_v53, %v6179_v24  ;;  %v7014_v53 = vrot.slane %v7006_v61, 4  ;;  %v7015_v18 = vrot.slane %v7007_v21, 4  ;;  %v6360_v61 = vrot.slane %v7767_v13, %v8226_v9  ;;  %v7112_v21 = vld [vmem:[#allocation2 + $0x158] sm:$0xf0] }
 0x816   : > { %v6174_v10 = vpop.permute.xlu0 %6173 }
 0x817   : > { %v6178_v4 = vsel %vm745_vm4, %v6172_v28, %v6174_v10  ;;  %v6176_v31 = vpop.permute.xlu1 %6175  ;;  %v6208_v35 = vadd.f32 %v6204_v51, %v6162_v56  ;;  %v6352_v51 = vrot.slane %v7767_v13, %v8228_v14 }
 0x818   : > { %v6205_v48 = vmul.f32 %v6194_v59, %v6178_v4  ;;  %v6177_v52 = vsel %vm745_vm4, %v6174_v10, %v6176_v31  ;;  %v6180_v36 = vsel %vm745_vm4, %v6176_v31, %v6170_v40  ;;  %6963 = vrot.lane.b32.xlu0 %v6959_v3, %s7836_s29  ;;  %v6298_v3 = vrot.slane %v7766_v20, %v8230_v19 }
 0x819   : > { %v6203_v16 = vmul.f32 %v6186_v22, %v6180_v36  ;;  %v6206_v55 = vmul.f32 %v6198_v60, %v6177_v52  ;;  %6965 = vrot.lane.b32.xlu1 %v6960_v39, %s7836_s29  ;;  %v7016_v22 = vrot.slane %v7008_v29, 4  ;;  %v6302_v10 = vrot.slane %v7766_v20, %v8226_v9  ;;  %v7063_v39 = vld [vmem:[#allocation2 + $0x140] sm:$0xf] }
 0x81a   : > { %v6209_v63 = vadd.f32 %v6205_v48, %v6163_v27  ;;  %v6228_v49 = vpop.permute.xlu0 %6227  ;;  %v7118_v20 = vrot.slane %v7110_v33, 4 }
 0x81b   : > { %v6207_v25 = vadd.f32 %v6203_v16, %v6161_v43  ;;  %v6210_v47 = vadd.f32 %v6206_v55, %v6164_v45  ;;  %v6230_v26 = vpop.permute.xlu1 %6229  ;;  %v7065_v16 = vld [vmem:[#allocation2 + $0x150] sm:$0xf] }
 0x81c   : > { %v6237_v8 = vsel %vm805_vm5, %v6228_v49, %v6230_v26  ;;  %6967 = vrot.lane.b32.xlu0 %v6961_v58, %s7836_s29 }
 0x81d   : > { %v6262_v30 = vmul.f32 %v6248_v17, %v6237_v8  ;;  %6969 = vrot.lane.b32.xlu1 %v6962_v32, %s7836_s29 }
 0x81e   : > { %v6232_v46 = vpop.permute.xlu0 %6231 }
 0x81f   : > { %v6266_v57 = vadd.f32 %v6262_v30, %v6208_v35  ;;  %v6236_v5 = vsel %vm805_vm5, %v6230_v26, %v6232_v46  ;;  %v6234_v40 = vpop.permute.xlu1 %6233  ;;  %v6356_v26 = vrot.slane %v7767_v13, %v8230_v19 }
 0x820   : > { %v6263_v59 = vmul.f32 %v6252_v15, %v6236_v5  ;;  %v6235_v34 = vsel %vm805_vm5, %v6232_v46, %v6234_v40  ;;  %v6238_v7 = vsel %vm805_vm5, %v6234_v40, %v6228_v49  ;;  %7021 = vrot.lane.b32.xlu0 %v7013_v0, %s7837_s30  ;;  %v6348_v15 = vrot.slane %v7767_v13, %v8224_v2 }
 0x821   : > { %v6261_v28 = vmul.f32 %v6244_v23, %v6238_v7  ;;  %v6264_v11 = vmul.f32 %v6256_v37, %v6235_v34  ;;  %7023 = vrot.lane.b32.xlu1 %v7014_v53, %s7837_s30  ;;  %v7768_v23 = vld [vmem:[%s13230_s3 + $0x6] ss:$8 sm:$0xf] }
 0x822   : > { %v6267_v1 = vadd.f32 %v6263_v59, %v6209_v63  ;;  %v6274_v62 = vpop.permute.xlu0 %6273  ;;  %v7066_v63 = vld [vmem:[#allocation2 + $0x158] sm:$0xf]  ;;  %v6398_v7 = vrot.slane %v7768_v23, %v8228_v14 }
 0x823   : > { %v6265_v24 = vadd.f32 %v6261_v28, %v6207_v25  ;;  %v6268_v12 = vadd.f32 %v6264_v11, %v6210_v47  ;;  %v6276_v38 = vpop.permute.xlu1 %6275  ;;  %v7109_v25 = vld [vmem:[#allocation2 + $0x140] sm:$0xf0] }
 0x824   : > { %v6283_v60 = vsel %vm853_vm6, %v6274_v62, %v6276_v38  ;;  %7025 = vrot.lane.b32.xlu0 %v7015_v18, %s7837_s30  ;;  %v7117_v30 = vrot.slane %v7109_v25, 4  ;;  %v7120_v18 = vrot.slane %v7112_v21, 4 }
 0x825   : > { %v6308_v42 = vmul.f32 %v6294_v44, %v6283_v60  ;;  %7027 = vrot.lane.b32.xlu1 %v7016_v22, %s7837_s30  ;;  %v6394_v22 = vrot.slane %v7768_v23, %v8224_v2  ;;  %v6406_v60 = vrot.slane %v7768_v23, %v8226_v9 }
 0x826   : > { %v6278_v17 = vpop.permute.xlu0 %6277 }
 0x827   : > { %v6312_v27 = vadd.f32 %v6308_v42, %v6266_v57  ;;  %v6282_v4 = vsel %vm853_vm6, %v6276_v38, %v6278_v17  ;;  %v6280_v31 = vpop.permute.xlu1 %6279  ;;  %v7111_v57 = vld [vmem:[#allocation2 + $0x150] sm:$0xf0] }
 0x828   : > { %v6309_v43 = vmul.f32 %v6298_v3, %v6282_v4  ;;  %v6281_v48 = vsel %vm853_vm6, %v6278_v17, %v6280_v31  ;;  %v6284_v52 = vsel %vm853_vm6, %v6280_v31, %v6274_v62  ;;  %7067 = vrot.lane.b32.xlu0 %v7063_v39, %s7838_s5  ;;  %v7119_v11 = vrot.slane %v7111_v57, 4  ;;  %v7167_v3 = vld [vmem:[#allocation2 + $0x160] sm:$0xf]  ;;  %v7216_v57 = vld [vmem:[#allocation2 + $0x178] sm:$0xf0] }
 0x829   : > { %v6307_v36 = vmul.f32 %v6290_v41, %v6284_v52  ;;  %v6310_v45 = vmul.f32 %v6302_v10, %v6281_v48  ;;  %7069 = vrot.lane.b32.xlu1 %v7064_v50, %s7838_s5  ;;  %v7168_v41 = vld [vmem:[#allocation2 + $0x168] sm:$0xf]  ;;  %v7769_v10 = vld [vmem:[%s13230_s3 + $0x7] ss:$8 sm:$0xf] }
 0x82a   : > { %v6313_v55 = vadd.f32 %v6309_v43, %v6267_v1  ;;  %v6332_v58 = vpop.permute.xlu0 %6331  ;;  %v6456_v48 = vrot.slane %v7769_v10, %v8228_v14  ;;  %v7169_v52 = vld [vmem:[#allocation2 + $0x170] sm:$0xf] }
 0x82b   : > { %v6311_v49 = vadd.f32 %v6307_v36, %v6265_v24  ;;  %v6314_v32 = vadd.f32 %v6310_v45, %v6268_v12  ;;  %v6334_v56 = vpop.permute.xlu1 %6333  ;;  %v6402_v12 = vrot.slane %v7768_v23, %v8230_v19 }
 0x82c   : > { %v6341_v47 = vsel %vm913_vm7, %v6332_v58, %v6334_v56  ;;  %7071 = vrot.lane.b32.xlu0 %v7065_v16, %s7838_s5 }
 0x82d   : > { %v6366_v8 = vmul.f32 %v6352_v51, %v6341_v47  ;;  %7073 = vrot.lane.b32.xlu1 %v7066_v63, %s7838_s5  ;;  %v7170_v51 = vld [vmem:[#allocation2 + $0x178] sm:$0xf]  ;;  %v7213_v63 = vld [vmem:[#allocation2 + $0x160] sm:$0xf0]  ;;  %v6452_v47 = vrot.slane %v7769_v10, %v8224_v2 }
 0x82e   : > { %v6336_v35 = vpop.permute.xlu0 %6335 }
 0x82f   : > { %v6370_v37 = vadd.f32 %v6366_v8, %v6312_v27  ;;  %v6340_v46 = vsel %vm913_vm7, %v6334_v56, %v6336_v35  ;;  %v6338_v0 = vpop.permute.xlu1 %6337  ;;  %v7214_v56 = vld [vmem:[#allocation2 + $0x168] sm:$0xf0]  ;;  %v7221_v8 = vrot.slane %v7213_v63, 4 }
 0x830   : > { %v6367_v5 = vmul.f32 %v6356_v26, %v6340_v46  ;;  %v6339_v40 = vsel %vm913_vm7, %v6336_v35, %v6338_v0  ;;  %v6342_v53 = vsel %vm913_vm7, %v6338_v0, %v6332_v58  ;;  %7125 = vrot.lane.b32.xlu0 %v7117_v30, %s7839_s6  ;;  %v6464_v26 = vrot.slane %v7769_v10, %v8226_v9 }
 0x831   : > { %v6365_v59 = vmul.f32 %v6348_v15, %v6342_v53  ;;  %v6368_v34 = vmul.f32 %v6360_v61, %v6339_v40  ;;  %7127 = vrot.lane.b32.xlu1 %v7118_v20, %s7839_s6  ;;  %v7770_v15 = vld [vmem:[%s13230_s3 + $0x20] ss:$8 sm:$0xf]  ;;  %v7222_v23 = vrot.slane %v7214_v56, 4 }
 0x832   : > { %v6371_v29 = vadd.f32 %v6367_v5, %v6313_v55  ;;  %v6378_v28 = vpop.permute.xlu0 %6377  ;;  %v6502_v53 = vrot.slane %v7770_v15, %v8228_v14 }
 0x833   : > { %v6369_v44 = vadd.f32 %v6365_v59, %v6311_v49  ;;  %v6372_v1 = vadd.f32 %v6368_v34, %v6314_v32  ;;  %v6380_v62 = vpop.permute.xlu1 %6379  ;;  %v6460_v32 = vrot.slane %v7769_v10, %v8230_v19 }
 0x834   : > { %v6387_v24 = vsel %vm961_vm8, %v6378_v28, %v6380_v62  ;;  %7129 = vrot.lane.b32.xlu0 %v7119_v11, %s7839_s6  ;;  %v7224_v11 = vrot.slane %v7216_v57, 4 }
 0x835   : > { %v6412_v38 = vmul.f32 %v6398_v7, %v6387_v24  ;;  %7131 = vrot.lane.b32.xlu1 %v7120_v18, %s7839_s6  ;;  %v6498_v18 = vrot.slane %v7770_v15, %v8224_v2  ;;  %v6510_v24 = vrot.slane %v7770_v15, %v8226_v9 }
 0x836   : > { %v6382_v42 = vpop.permute.xlu0 %6381 }
 0x837   : > { %v6416_v39 = vadd.f32 %v6412_v38, %v6370_v37  ;;  %v6386_v17 = vsel %vm961_vm8, %v6380_v62, %v6382_v42  ;;  %v6384_v50 = vpop.permute.xlu1 %6383  ;;  %v7215_v37 = vld [vmem:[#allocation2 + $0x170] sm:$0xf0] }
 0x838   : > { %v6413_v13 = vmul.f32 %v6402_v12, %v6386_v17  ;;  %v6385_v27 = vsel %vm961_vm8, %v6382_v42, %v6384_v50  ;;  %v6388_v4 = vsel %vm961_vm8, %v6384_v50, %v6378_v28  ;;  %7171 = vrot.lane.b32.xlu0 %v7167_v3, %s7840_s7  ;;  %v7223_v34 = vrot.slane %v7215_v37, 4  ;;  %v7271_v12 = vld [vmem:[#allocation2 + $0x180] sm:$0xf]  ;;  %v7320_v37 = vld [vmem:[#allocation2 + $0x198] sm:$0xf0] }
 0x839   : > { %v6411_v31 = vmul.f32 %v6394_v22, %v6388_v4  ;;  %v6414_v43 = vmul.f32 %v6406_v60, %v6385_v27  ;;  %7173 = vrot.lane.b32.xlu1 %v7168_v41, %s7840_s7  ;;  %v7272_v22 = vld [vmem:[#allocation2 + $0x188] sm:$0xf]  ;;  %v7273_v4 = vld [vmem:[#allocation2 + $0x190] sm:$0xf] }
 0x83a   : > { %v6417_v36 = vadd.f32 %v6413_v13, %v6371_v29  ;;  %v6436_v45 = vpop.permute.xlu0 %6435  ;;  %v7771_v60 = vld [vmem:[%s13230_s3 + $0x21] ss:$8 sm:$0xf] }
 0x83b   : > { %v6415_v16 = vadd.f32 %v6411_v31, %v6369_v44  ;;  %v6418_v55 = vadd.f32 %v6414_v43, %v6372_v1  ;;  %v6438_v58 = vpop.permute.xlu1 %6437  ;;  %v6506_v1 = vrot.slane %v7770_v15, %v8230_v19  ;;  %v6560_v27 = vrot.slane %v7771_v60, %v8228_v14 }
 0x83c   : > { %v6445_v49 = vsel %vm1021_vm9, %v6436_v45, %v6438_v58  ;;  %7175 = vrot.lane.b32.xlu0 %v7169_v52, %s7840_s7 }
 0x83d   : > { %v6470_v25 = vmul.f32 %v6456_v48, %v6445_v49  ;;  %7177 = vrot.lane.b32.xlu1 %v7170_v51, %s7840_s7  ;;  %v7274_v48 = vld [vmem:[#allocation2 + $0x198] sm:$0xf]  ;;  %v7317_v51 = vld [vmem:[#allocation2 + $0x180] sm:$0xf0]  ;;  %v6556_v49 = vrot.slane %v7771_v60, %v8224_v2 }
 0x83e   : > { %v6440_v33 = vpop.permute.xlu0 %6439 }
 0x83f   : > { %v6474_v61 = vadd.f32 %v6470_v25, %v6416_v39  ;;  %v6444_v35 = vsel %vm1021_vm9, %v6438_v58, %v6440_v33  ;;  %v6442_v30 = vpop.permute.xlu1 %6441  ;;  %v7318_v58 = vld [vmem:[#allocation2 + $0x188] sm:$0xf0]  ;;  %v7325_v25 = vrot.slane %v7317_v51, 4 }
 0x840   : > { %v6471_v46 = vmul.f32 %v6460_v32, %v6444_v35  ;;  %v6443_v0 = vsel %vm1021_vm9, %v6440_v33, %v6442_v30  ;;  %v6446_v20 = vsel %vm1021_vm9, %v6442_v30, %v6436_v45  ;;  %7229 = vrot.lane.b32.xlu0 %v7221_v8, %s7841_s8  ;;  %v6568_v32 = vrot.slane %v7771_v60, %v8226_v9 }
 0x841   : > { %v6469_v5 = vmul.f32 %v6452_v47, %v6446_v20  ;;  %v6472_v40 = vmul.f32 %v6464_v26, %v6443_v0  ;;  %7231 = vrot.lane.b32.xlu1 %v7222_v23, %s7841_s8  ;;  %v7772_v47 = vld [vmem:[%s13230_s3 + $0x22] ss:$8 sm:$0xf]  ;;  %v7326_v15 = vrot.slane %v7318_v58, 4 }
 0x842   : > { %v6475_v21 = vadd.f32 %v6471_v46, %v6417_v36  ;;  %v6482_v59 = vpop.permute.xlu0 %6481  ;;  %v6606_v20 = vrot.slane %v7772_v47, %v8228_v14 }
 0x843   : > { %v6473_v7 = vadd.f32 %v6469_v5, %v6415_v16  ;;  %v6476_v29 = vadd.f32 %v6472_v40, %v6418_v55  ;;  %v6484_v28 = vpop.permute.xlu1 %6483  ;;  %v6564_v55 = vrot.slane %v7771_v60, %v8230_v19 }
 0x844   : > { %v6491_v44 = vsel %vm14079_vm14, %v6482_v59, %v6484_v28  ;;  %7233 = vrot.lane.b32.xlu0 %v7223_v34, %s7841_s8  ;;  %vm14086_vm14 = vmmov %vm14084_vm1  ;;  %v7328_v34 = vrot.slane %v7320_v37, 4 }
 0x845   : > { %v6516_v62 = vmul.f32 %v6502_v53, %v6491_v44  ;;  %7235 = vrot.lane.b32.xlu1 %v7224_v11, %s7841_s8  ;;  %v6602_v11 = vrot.slane %v7772_v47, %v8224_v2  ;;  %v6614_v44 = vrot.slane %v7772_v47, %v8226_v9 }
 0x846   : > { %v6486_v38 = vpop.permute.xlu0 %6485 }
 0x847   : > { %v6520_v3 = vadd.f32 %v6516_v62, %v6474_v61  ;;  %v6490_v42 = vsel %vm14080_vm12, %v6484_v28, %v6486_v38  ;;  %v6488_v41 = vpop.permute.xlu1 %6487  ;;  %v7319_v61 = vld [vmem:[#allocation2 + $0x190] sm:$0xf0]  ;;  %vm14087_vm12 = vcmp.lt.s32.totalorder %v8246_v6, 8 }
 0x848   : > { %v6517_v10 = vmul.f32 %v6506_v1, %v6490_v42  ;;  %v6489_v39 = vsel %vm14081_vm10, %v6486_v38, %v6488_v41  ;;  %v6492_v17 = vsel %vm14082_vm0, %v6488_v41, %v6482_v59  ;;  %7275 = vrot.lane.b32.xlu0 %v7271_v12, %s7842_s9  ;;  %v7327_v40 = vrot.slane %v7319_v61, 4  ;;  %v7376_v1 = vld [vmem:[#allocation2 + $0x1a8] sm:$0xf]  ;;  %vm14088_vm10 = vmmov %vm14087_vm12 }
 0x849   : > { %v6515_v50 = vmul.f32 %v6498_v18, %v6492_v17  ;;  %v6518_v13 = vmul.f32 %v6510_v24, %v6489_v39  ;;  %7277 = vrot.lane.b32.xlu1 %v7272_v22, %s7842_s9  ;;  %v7375_v18 = vld [vmem:[#allocation2 + $0x1a0] sm:$0xf]  ;;  %vm14089_vm0 = vmmov %vm14088_vm10  ;;  %v7378_v17 = vld [vmem:[#allocation2 + $0x1b8] sm:$0xf] }
 0x84a   : > { %v6521_v31 = vadd.f32 %v6517_v10, %v6475_v21  ;;  %v6540_v43 = vpop.permute.xlu0 %6539  ;;  %v7773_v24 = vld [vmem:[%s13230_s3 + $0x23] ss:$8 sm:$0xf] }
 0x84b   : > { %v6519_v52 = vadd.f32 %v6515_v50, %v6473_v7  ;;  %v6522_v36 = vadd.f32 %v6518_v13, %v6476_v29  ;;  %v6542_v45 = vpop.permute.xlu1 %6541  ;;  %v6610_v29 = vrot.slane %v7772_v47, %v8230_v19  ;;  %v6664_v39 = vrot.slane %v7773_v24, %v8228_v14 }
 0x84c   : > { %v6549_v16 = vsel %vm14083_vm11, %v6540_v43, %v6542_v45  ;;  %7279 = vrot.lane.b32.xlu0 %v7273_v4, %s7842_s9  ;;  %vm14090_vm11 = vmmov %vm14089_vm0  ;;  %v6672_v51 = vrot.slane %v7773_v24, %v8226_v9 }
 0x84d   : > { %v6574_v63 = vmul.f32 %v6560_v27, %v6549_v16  ;;  %7281 = vrot.lane.b32.xlu1 %v7274_v48, %s7842_s9  ;;  %v7377_v27 = vld [vmem:[#allocation2 + $0x1b0] sm:$0xf] }
 0x84e   : > { %v6544_v56 = vpop.permute.xlu0 %6543 }
 0x84f   : > { %v6578_v26 = vadd.f32 %v6574_v63, %v6520_v3  ;;  %v6548_v33 = vsel %vm14084_vm1, %v6542_v45, %v6544_v56  ;;  %v6546_v8 = vpop.permute.xlu1 %6545  ;;  %vm14091_vm1 = vcmp.lt.s32.totalorder %v8246_v6, 7  ;;  %v6660_v45 = vrot.slane %v7773_v24, %v8224_v2 }
 0x850   : > { %v6575_v35 = vmul.f32 %v6564_v55, %v6548_v33  ;;  %v6547_v30 = vsel %vm14085_vm13, %v6544_v56, %v6546_v8  ;;  %v6550_v23 = vsel %vm14086_vm14, %v6546_v8, %v6540_v43  ;;  %7333 = vrot.lane.b32.xlu0 %v7325_v25, %s7843_s10  ;;  %v7774_v55 = vld [vmem:[%s13230_s3 + $0x24] ss:$8 sm:$0xf]  ;;  %vm14092_vm13 = vmmov %vm14091_vm1 }
 0x851   : > { %v6573_v46 = vmul.f32 %v6556_v49, %v6550_v23  ;;  %v6576_v0 = vmul.f32 %v6568_v32, %v6547_v30  ;;  %7335 = vrot.lane.b32.xlu1 %v7326_v15, %s7843_s10  ;;  %vm14093_vm14 = vmmov %vm14091_vm1  ;;  %v6710_v33 = vrot.slane %v7774_v55, %v8228_v14  ;;  %v6714_v37 = vrot.slane %v7774_v55, %v8230_v19 }
 0x852   : > { %v6579_v57 = vadd.f32 %v6575_v35, %v6521_v31  ;;  %v6586_v5 = vpop.permute.xlu0 %6585 }
 0x853   : > { %v6577_v53 = vadd.f32 %v6573_v46, %v6519_v52  ;;  %v6580_v21 = vadd.f32 %v6576_v0, %v6522_v36  ;;  %v6588_v59 = vpop.permute.xlu1 %6587  ;;  %v6668_v52 = vrot.slane %v7773_v24, %v8230_v19  ;;  %v6706_v0 = vrot.slane %v7774_v55, %v8224_v2 }
 0x854   : > { %v6595_v7 = vsel %vm14087_vm12, %v6586_v5, %v6588_v59  ;;  %7337 = vrot.lane.b32.xlu0 %v7327_v40, %s7843_s10  ;;  %vm14094_vm12 = vmmov %vm14091_vm1 }
 0x855   : > { %v6620_v28 = vmul.f32 %v6606_v20, %v6595_v7  ;;  %7339 = vrot.lane.b32.xlu1 %v7328_v34, %s7843_s10  ;;  %v6718_v20 = vrot.slane %v7774_v55, %v8226_v9 }
 0x856   : > { %v6590_v62 = vpop.permute.xlu0 %6589 }
 0x857   : > { %v6624_v12 = vadd.f32 %v6620_v28, %v6578_v26  ;;  %v6594_v38 = vsel %vm14088_vm10, %v6588_v59, %v6590_v62  ;;  %v6592_v22 = vpop.permute.xlu1 %6591  ;;  %vm14095_vm10 = vcmp.lt.s32.totalorder %v8246_v6, 1 }
 0x858   : > { %v6621_v60 = vmul.f32 %v6610_v29, %v6594_v38  ;;  %v6593_v3 = vsel %vm14089_vm0, %v6590_v62, %v6592_v22  ;;  %v6596_v42 = vsel %vm14090_vm11, %v6592_v22, %v6586_v5  ;;  %7381 = vrot.lane.b32.xlu0 %v7376_v1, %s7844_s11  ;;  %v7775_v5 = vld [vmem:[%s13230_s3 + $0x26] ss:$8 sm:$0xf]  ;;  %vm14096_vm0 = vmmov %vm14095_vm10 }
 0x859   : > { %v6619_v41 = vmul.f32 %v6602_v11, %v6596_v42  ;;  %v6622_v10 = vmul.f32 %v6614_v44, %v6593_v3  ;;  %7379 = vrot.lane.b32.xlu1 %v7375_v18, %s7844_s11  ;;  %vm14097_vm11 = vmmov %vm14096_vm0  ;;  %v6731_v29 = vld [vmem:[#allocation2 + $0xc0] sm:$0xf0]  ;;  %v6772_v44 = vrot.slane %v7775_v5, %v8224_v2  ;;  %v6732_v22 = vld [vmem:[#allocation2 + $0xc8] sm:$0xf0]  ;;  %v6776_v42 = vrot.slane %v7775_v5, %v8228_v14 }
 0x85a   : > { %v6625_v50 = vadd.f32 %v6621_v60, %v6579_v57  ;;  %v6644_v13 = vpop.permute.xlu0 %6643  ;;  %v6733_v60 = vld [vmem:[#allocation2 + $0xd0] sm:$0xf0] }
 0x85b   : > { %v6623_v4 = vadd.f32 %v6619_v41, %v6577_v53  ;;  %v6626_v31 = vadd.f32 %v6622_v10, %v6580_v21  ;;  %v6646_v43 = vpop.permute.xlu1 %6645  ;;  %v6734_v41 = vld [vmem:[#allocation2 + $0xd8] sm:$0xf0] }
 0x85c   : > { %v6653_v48 = vsel %vm14091_vm1, %v6644_v13, %v6646_v43  ;;  %7385 = vrot.lane.b32.xlu0 %v7378_v17, %s7844_s11  ;;  %vm14098_vm1 = vmmov %vm14096_vm0  ;;  %v7776_v10 = vld [vmem:[%s13230_s3 + $0x27] ss:$8 sm:$0xf] }
 0x85d   : > { %v6678_v36 = vmul.f32 %v6664_v39, %v6653_v48  ;;  %7383 = vrot.lane.b32.xlu1 %v7377_v27, %s7844_s11  ;;  %v6740_v27 = vrot.slane %v6732_v22, 4 }
 0x85e   : > { %v6648_v16 = vpop.permute.xlu0 %6647 }
 0x85f   : > { %v6682_v58 = vadd.f32 %v6678_v36, %v6624_v12  ;;  %v6652_v63 = vsel %vm14092_vm13, %v6646_v43, %v6648_v16  ;;  %v6650_v49 = vpop.permute.xlu1 %6649  ;;  %v6739_v12 = vrot.slane %v6731_v29, 4  ;;  %vm14099_vm13 = vcmp.lt.s32.totalorder %v8246_v6, 121 }
 0x860   : > { %v6679_v32 = vmul.f32 %v6668_v52, %v6652_v63  ;;  %v6651_v56 = vsel %vm14093_vm14, %v6648_v16, %v6650_v49  ;;  %v6654_v25 = vsel %vm14094_vm12, %v6650_v49, %v6644_v13  ;;  %v6784_v13 = vrot.slane %v7775_v5, %v8226_v9  ;;  %vm14101_vm14 = vmmov %vm14099_vm13 }
 0x861   : > { %v6677_v47 = vmul.f32 %v6660_v45, %v6654_v25  ;;  %v6680_v26 = vmul.f32 %v6672_v51, %v6651_v56  ;;  %v6742_v52 = vrot.slane %v6734_v41, 4  ;;  %v6830_v45 = vrot.slane %v7776_v10, %v8224_v2  ;;  %vm14102_vm12 = vmmov %vm14099_vm13 }
 0x862   : > { %v6683_v8 = vadd.f32 %v6679_v32, %v6625_v50  ;;  %v6690_v15 = vpop.permute.xlu0 %6689  ;;  %v6780_v50 = vrot.slane %v7775_v5, %v8230_v19 }
 0x863   : > { %v6681_v61 = vadd.f32 %v6677_v47, %v6623_v4  ;;  %v6684_v35 = vadd.f32 %v6680_v26, %v6626_v31  ;;  %v6692_v30 = vpop.permute.xlu1 %6691  ;;  %v6741_v31 = vrot.slane %v6733_v60, 4 }
 0x864   : > { %v6699_v23 = vsel %vm14095_vm10, %v6690_v15, %v6692_v30  ;;  %vm14103_vm10 = vcmp.lt.s32.totalorder %v8246_v6, 120 }
 0x865   : > { %v6724_v46 = vmul.f32 %v6710_v33, %v6699_v23  ;;  %v6842_v23 = vrot.slane %v7776_v10, %v8226_v9 }
 0x866   : > { %v6694_v57 = vpop.permute.xlu0 %6693 }
 0x867   : > { %v6728_v40 = vadd.f32 %v6724_v46, %v6682_v58  ;;  %v6698_v53 = vsel %vm14096_vm0, %v6692_v30, %v6694_v57  ;;  %v6696_v21 = vpop.permute.xlu1 %6695  ;;  %v6838_v30 = vrot.slane %v7776_v10, %v8230_v19  ;;  %v12743_v46 = vld [vmem:[%s13230_s3 + $0x40] ss:$8 sm:$0xf]  ;;  %vm14104_vm0 = vmmov %vm14103_vm10 }
 0x868   : > { %v6725_v59 = vmul.f32 %v6714_v37, %v6698_v53  ;;  %v6697_v34 = vsel %vm14097_vm11, %v6694_v57, %v6696_v21  ;;  %v6700_v7 = vsel %vm14098_vm1, %v6696_v21, %v6690_v15  ;;  %vm14105_vm11 = vmmov %vm14104_vm0 }
 0x869   : > { %v6723_v28 = vmul.f32 %v6706_v0, %v6700_v7  ;;  %v6726_v11 = vmul.f32 %v6718_v20, %v6697_v34  ;;  %v6748_v51 = vadd.f32 %v6740_v27, %v6728_v40  ;;  %v6876_v34 = vrot.slane %v12743_v46, %v8224_v2  ;;  %vm14106_vm1 = vmmov %vm14104_vm0 }
 0x86a   : > { %v6729_v1 = vadd.f32 %v6725_v59, %v6683_v8  ;;  %v6756_v62 = vpop.permute.xlu0 %6755 }
 0x86b   : > { %v6727_v18 = vadd.f32 %v6723_v28, %v6681_v61  ;;  %v6730_v24 = vadd.f32 %v6726_v11, %v6684_v35  ;;  %v6758_v38 = vpop.permute.xlu1 %6757  ;;  %v6834_v61 = vrot.slane %v7776_v10, %v8228_v14 }
 0x86c   : > { %v6765_v3 = vsel %vm1353_vm15, %v6756_v62, %v6758_v38  ;;  %v6749_v63 = vadd.f32 %v6741_v31, %v6729_v1 }
 0x86d   : > { %v6747_v39 = vadd.f32 %v6739_v12, %v6727_v18  ;;  %v6789_v17 = vmul.f32 %v6772_v44, %v6765_v3  ;;  %v6750_v49 = vadd.f32 %v6742_v52, %v6730_v24  ;;  %v6888_v24 = vrot.slane %v12743_v46, %v8226_v9 }
 0x86e   : > { %v6760_v4 = vpop.permute.xlu0 %6759 }
 0x86f   : > { %v6793_v43 = vadd.f32 %v6789_v17, %v6747_v39  ;;  %v6764_v48 = vsel %vm1353_vm15, %v6758_v38, %v6760_v4  ;;  %v6762_v36 = vpop.permute.xlu1 %6761 }
 0x870   : > { %v6790_v16 = vmul.f32 %v6776_v42, %v6764_v48  ;;  %v6763_v55 = vsel %vm1353_vm15, %v6760_v4, %v6762_v36  ;;  %v6766_v58 = vsel %vm1353_vm15, %v6762_v36, %v6756_v62  ;;  %vm14100_vm15 = vmmov %vm14099_vm13  ;;  %v6880_v62 = vrot.slane %v12743_v46, %v8228_v14 }
 0x871   : > { %v6791_v32 = vmul.f32 %v6780_v50, %v6763_v55  ;;  %v6792_v56 = vmul.f32 %v6784_v13, %v6766_v58 }
 0x872   : > { %v6794_v25 = vadd.f32 %v6790_v16, %v6748_v51  ;;  %v6814_v47 = vpop.permute.xlu0 %6813 }
 0x873   : > { %v6795_v26 = vadd.f32 %v6791_v32, %v6749_v63  ;;  %v6796_v33 = vadd.f32 %v6792_v56, %v6750_v49  ;;  %v6816_v8 = vpop.permute.xlu1 %6815  ;;  %v12816_v56 = vld [vmem:[%s13230_s3 + $0x41] ss:$8 sm:$0xf] }
 0x874   : > { %v6823_v15 = vsel %vm14099_vm13, %v6814_v47, %v6816_v8  ;;  %vm14107_vm13 = vcmp.lt.s32.totalorder %v8246_v6, 119 }
 0x875   : > { %v6847_v35 = vmul.f32 %v6830_v45, %v6823_v15  ;;  %v6934_v15 = vrot.slane %v12816_v56, %v8224_v2 }
 0x876   : > { %v6818_v37 = vpop.permute.xlu0 %6817 }
 0x877   : > { %v6851_v0 = vadd.f32 %v6847_v35, %v6793_v43  ;;  %v6822_v20 = vsel %vm14100_vm15, %v6816_v8, %v6818_v37  ;;  %v6820_v57 = vpop.permute.xlu1 %6819  ;;  %v12832_v8 = vld [vmem:[%s13230_s3 + $0x43] ss:$8 sm:$0xf]  ;;  %v6942_v35 = vrot.slane %v12816_v56, %v8230_v19  ;;  %vm14108_vm15 = vmmov %vm14107_vm13 }
 0x878   : > { %v6848_v5 = vmul.f32 %v6834_v61, %v6822_v20  ;;  %v6821_v40 = vsel %vm14101_vm14, %v6818_v37, %v6820_v57  ;;  %v6824_v53 = vsel %vm14102_vm12, %v6820_v57, %v6814_v47  ;;  %v12823_v47 = vld [vmem:[%s13230_s3 + $0x42] ss:$8 sm:$0xf]  ;;  %v6938_v61 = vrot.slane %v12816_v56, %v8228_v14  ;;  %v12858_v57 = vld [vmem:[%s13230_s3 + $0x45] ss:$8 sm:$0xf]  ;;  %vm14109_vm14 = vmmov %vm14107_vm13 }
 0x879   : > { %v6849_v21 = vmul.f32 %v6838_v30, %v6821_v40  ;;  %v6850_v59 = vmul.f32 %v6842_v23, %v6824_v53  ;;  %v6946_v30 = vrot.slane %v12816_v56, %v8226_v9  ;;  %v12845_v23 = vld [vmem:[%s13230_s3 + $0x44] ss:$8 sm:$0xf]  ;;  %v6980_v37 = vrot.slane %v12823_v47, %v8224_v2  ;;  %v12955_v56 = vld [vmem:[%s13230_s3 + $0x62] ss:$8 sm:$0xf]  ;;  %vm14110_vm12 = vmmov %vm14107_vm13 }
 0x87a   : > { %v6852_v7 = vadd.f32 %v6848_v5, %v6794_v25  ;;  %v6860_v29 = vpop.permute.xlu0 %6859  ;;  %v6992_v20 = vrot.slane %v12823_v47, %v8226_v9  ;;  %v7038_v40 = vrot.slane %v12832_v8, %v8224_v2 }
 0x87b   : > { %v12753_v28 = vadd.f32 %v6849_v21, %v6795_v26  ;;  %v6854_v11 = vadd.f32 %v6850_v59, %v6796_v33  ;;  %v6862_v44 = vpop.permute.xlu1 %6861  ;;  %v6884_v33 = vrot.slane %v12743_v46, %v8230_v19  ;;  %v6984_v46 = vrot.slane %v12823_v47, %v8228_v14 }
 0x87c   : > { %v6869_v1 = vsel %vm14103_vm10, %v6860_v29, %v6862_v44 }
 0x87d   : > { %v6893_v18 = vmul.f32 %v6876_v34, %v6869_v1  ;;  %v12873_v34 = vld [vmem:[%s13230_s3 + $0x46] ss:$8 sm:$0xf] }
 0x87e   : > { %v12761_v12 = vpop.permute.xlu0 %6863 }
 0x87f   : > { %v12763_v38 = vadd.f32 %v6893_v18, %v6851_v0  ;;  %v6868_v22 = vsel %vm14104_vm0, %v6862_v44, %v12761_v12  ;;  %v12768_v60 = vpop.permute.xlu1 %6865  ;;  %v6988_v0 = vrot.slane %v12823_v47, %v8230_v19  ;;  %v14111_v47 = vrot.slane %v12832_v8, %v8228_v14 }
 0x880   : > { %v6894_v3 = vmul.f32 %v6880_v62, %v6868_v22  ;;  %v6870_v42 = vsel %vm14105_vm11, %v12768_v60, %v6860_v29  ;;  %v12888_v62 = vld [vmem:[%s13230_s3 + $0x47] ss:$8 sm:$0xf]  ;;  %v12928_v22 = vld [vmem:[%s13230_s3 + $0x61] ss:$8 sm:$0xf] }
 0x881   : > { %v6896_v41 = vmul.f32 %v6888_v24, %v6870_v42  ;;  %v12901_v42 = vld [vmem:[%s13230_s3 + $0x60] ss:$8 sm:$0xf]  ;;  %v7358_v21 = vrot.slane %v12928_v22, %v8230_v19  ;;  %v7362_v53 = vrot.slane %v12928_v22, %v8226_v9 }
 0x882   : > { %v12773_v10 = vadd.f32 %v6894_v3, %v6852_v7  ;;  %v12775_v39 = vpop.permute.xlu0 %6917  ;;  %v6867_v3 = vsel %vm14106_vm1, %v12761_v12, %v12768_v60 }
 0x883   : > { %v12777_v17 = vadd.f32 %v6896_v41, %v6854_v11  ;;  %v12779_v50 = vpop.permute.xlu1 %6919  ;;  %v6895_v44 = vmul.f32 %v6884_v33, %v6867_v3 }
 0x884   : > { %v6927_v12 = vsel %vm14107_vm13, %v12775_v39, %v12779_v50 }
 0x885   : > { %v6951_v29 = vmul.f32 %v6934_v15, %v6927_v12 }
 0x886   : > { %v12781_v13 = vpop.permute.xlu0 %6921 }
 0x887   : > { %v12783_v27 = vpop.permute.xlu1 %6923  ;;  %v6926_v60 = vsel %vm14108_vm15, %v12779_v50, %v12781_v13  ;;  %v7350_v50 = vrot.slane %v12928_v22, %v8224_v2 }
 0x888   : > { %v6925_v24 = vsel %vm14109_vm14, %v12781_v13, %v12783_v27  ;;  %v6928_v13 = vsel %vm14110_vm12, %v12783_v27, %v12775_v39  ;;  %v6952_v59 = vmul.f32 %v6938_v61, %v6926_v60  ;;  %v7354_v39 = vrot.slane %v12928_v22, %v8228_v14 }
 0x889   : > { %v6953_v27 = vmul.f32 %v6942_v35, %v6925_v24  ;;  %v6954_v61 = vmul.f32 %v6946_v30, %v6928_v13  ;;  %v6899_v24 = vadd.f32 %v6895_v44, %v12753_v28  ;;  %v14113_v13 = vrot.slane %v12832_v8, %v8226_v9 }
 0x88a   : > { %v12785_v4 = vpop.permute.xlu0 %6963 }
 0x88b   : > { %v12787_v31 = vpop.permute.xlu1 %6965 }
 0x88c   : > { %v6973_v41 = vsel %vm638_vm2, %v12785_v4, %v12787_v31 }
 0x88d   : > { %v6997_v12 = vmul.f32 %v6980_v37, %v6973_v41  ;;  %v7408_v37 = vrot.slane %v12955_v56, %v8226_v9  ;;  %v6956_v41 = vadd.f32 %v6952_v59, %v12773_v10 }
 0x88e   : > { %v12789_v43 = vpop.permute.xlu0 %6967 }
 0x88f   : > { %v12791_v48 = vpop.permute.xlu1 %6969  ;;  %v6972_v33 = vsel %vm638_vm2, %v12787_v31, %v12789_v43 }
 0x890   : > { %v6971_v31 = vsel %vm638_vm2, %v12789_v43, %v12791_v48  ;;  %v6974_v35 = vsel %vm638_vm2, %v12791_v48, %v12785_v4  ;;  %v6998_v60 = vmul.f32 %v6984_v46, %v6972_v33  ;;  %v6955_v43 = vadd.f32 %v6951_v29, %v12763_v38 }
 0x891   : > { %v6957_v46 = vadd.f32 %v6953_v27, %v6899_v24  ;;  %v6999_v44 = vmul.f32 %v6988_v0, %v6971_v31  ;;  %v7000_v38 = vmul.f32 %v6992_v20, %v6974_v35  ;;  %vm14134_vm2 = vcmp.lt.s32.totalorder %v8246_v6, 55 }
 0x892   : > { %v12793_v52 = vpop.permute.xlu0 %7021  ;;  %v7001_v59 = vadd.f32 %v6997_v12, %v6955_v43  ;;  %v7002_v29 = vadd.f32 %v6998_v60, %v6956_v41  ;;  %v14116_v41 = vrot.slane %v12845_v23, %v8230_v19 }
 0x893   : > { %v12795_v36 = vpop.permute.xlu1 %7023  ;;  %v7003_v12 = vadd.f32 %v6999_v44, %v6957_v46  ;;  %v14118_v46 = vrot.slane %v12858_v57, %v8224_v2 }
 0x894   : > { %v7031_v15 = vsel %vm697_vm3, %v12793_v52, %v12795_v36 }
 0x896   : > { %v12797_v45 = vpop.permute.xlu0 %7025 }
 0x897   : > { %v12799_v51 = vpop.permute.xlu1 %7027  ;;  %v7030_v28 = vsel %vm697_vm3, %v12795_v36, %v12797_v45  ;;  %v6958_v36 = vadd.f32 %v6954_v61, %v12777_v17 }
 0x898   : > { %v7029_v4 = vsel %vm697_vm3, %v12797_v45, %v12799_v51  ;;  %v7032_v10 = vsel %vm697_vm3, %v12799_v51, %v12793_v52  ;;  %v7055_v45 = vmul.f32 %v7038_v40, %v7031_v15  ;;  %v7056_v20 = vmul.f32 %v14111_v47, %v7030_v28  ;;  %vm14136_vm3 = vmmov %vm14134_vm2 }
 0x899   : > { %v14112_v52 = vrot.slane %v12832_v8, %v8230_v19  ;;  %v7058_v33 = vmul.f32 %v14113_v13, %v7032_v10  ;;  %v7004_v31 = vadd.f32 %v7000_v38, %v6958_v36  ;;  %v14114_v8 = vrot.slane %v12845_v23, %v8224_v2 }
 0x89a   : > { %v12801_v16 = vpop.permute.xlu0 %7067  ;;  %v7059_v24 = vadd.f32 %v7055_v45, %v7001_v59  ;;  %v7060_v10 = vadd.f32 %v7056_v20, %v7002_v29  ;;  %v14119_v36 = vrot.slane %v12858_v57, %v8228_v14 }
 0x89b   : > { %v12803_v55 = vpop.permute.xlu1 %7069  ;;  %v7057_v51 = vmul.f32 %v14112_v52, %v7029_v4  ;;  %v14121_v52 = vrot.slane %v12858_v57, %v8226_v9 }
 0x89c   : > { %v7077_v0 = vsel %vm745_vm4, %v12801_v16, %v12803_v55 }
 0x89d   : > { %v7101_v35 = vmul.f32 %v14114_v8, %v7077_v0  ;;  %v14120_v0 = vrot.slane %v12858_v57, %v8230_v19  ;;  %v14123_v8 = vrot.slane %v12873_v34, %v8228_v14 }
 0x89e   : > { %v12805_v58 = vpop.permute.xlu0 %7071 }
 0x89f   : > { %v12807_v63 = vpop.permute.xlu1 %7073  ;;  %v7076_v17 = vsel %vm745_vm4, %v12803_v55, %v12805_v58 }
 0x8a0   : > { %v7075_v27 = vsel %vm745_vm4, %v12805_v58, %v12807_v63  ;;  %v7078_v15 = vsel %vm745_vm4, %v12807_v63, %v12801_v16  ;;  %v14115_v16 = vrot.slane %v12845_v23, %v8228_v14  ;;  %vm14137_vm4 = vmmov %vm14134_vm2 }
 0x8a1   : > { %v7103_v28 = vmul.f32 %v14116_v41, %v7075_v27  ;;  %v7404_v27 = vrot.slane %v12955_v56, %v8230_v19 }
 0x8a2   : > { %v12809_v49 = vpop.permute.xlu0 %7125  ;;  %v7102_v63 = vmul.f32 %v14115_v16, %v7076_v17 }
 0x8a3   : > { %v12811_v32 = vpop.permute.xlu1 %7127 }
 0x8a4   : > { %v7135_v55 = vsel %vm805_vm5, %v12809_v49, %v12811_v32  ;;  %v7106_v20 = vadd.f32 %v7102_v63, %v7060_v10 }
 0x8a5   : > { %v7159_v44 = vmul.f32 %v14118_v46, %v7135_v55  ;;  %v14126_v46 = vrot.slane %v12873_v34, %v8226_v9 }
 0x8a6   : > { %v12818_v25 = vpop.permute.xlu0 %7129 }
 0x8a7   : > { %v12825_v26 = vpop.permute.xlu1 %7131  ;;  %v7134_v58 = vsel %vm805_vm5, %v12811_v32, %v12818_v25  ;;  %v14117_v32 = vrot.slane %v12845_v23, %v8226_v9  ;;  %v7105_v23 = vadd.f32 %v7101_v35, %v7059_v24 }
 0x8a8   : > { %v7133_v60 = vsel %vm805_vm5, %v12818_v25, %v12825_v26  ;;  %v7136_v43 = vsel %vm805_vm5, %v12825_v26, %v12809_v49  ;;  %v7061_v49 = vadd.f32 %v7057_v51, %v7003_v12  ;;  %v7062_v26 = vadd.f32 %v7058_v33, %v7004_v31  ;;  %vm14138_vm5 = vmmov %vm14134_vm2 }
 0x8a9   : > { %v7104_v4 = vmul.f32 %v14117_v32, %v7078_v15  ;;  %v7160_v59 = vmul.f32 %v14119_v36, %v7134_v58  ;;  %v7161_v47 = vmul.f32 %v14120_v0, %v7133_v60  ;;  %v7162_v17 = vmul.f32 %v14121_v52, %v7136_v43 }
 0x8aa   : > { %v12860_v5 = vpop.permute.xlu0 %7171  ;;  %v14122_v51 = vrot.slane %v12873_v34, %v8224_v2  ;;  %v7400_v33 = vrot.slane %v12955_v56, %v8228_v14  ;;  %v7107_v15 = vadd.f32 %v7103_v28, %v7061_v49  ;;  %v7163_v57 = vadd.f32 %v7159_v44, %v7105_v23 }
 0x8ab   : > { %v12875_v7 = vpop.permute.xlu1 %7173  ;;  %v7108_v55 = vadd.f32 %v7104_v4, %v7062_v26  ;;  %v7164_v31 = vadd.f32 %v7160_v59, %v7106_v20  ;;  %v14127_v26 = vrot.slane %v12888_v62, %v8228_v14  ;;  %v14130_v0 = vrot.slane %v12888_v62, %v8226_v9 }
 0x8ac   : > { %v7181_v25 = vsel %vm853_vm6, %v12860_v5, %v12875_v7  ;;  %v7165_v63 = vadd.f32 %v7161_v47, %v7107_v15  ;;  %v14131_v20 = vrot.slane %v12901_v42, %v8228_v14 }
 0x8ad   : > { %v7205_v13 = vmul.f32 %v14122_v51, %v7181_v25  ;;  %v7166_v60 = vadd.f32 %v7162_v17, %v7108_v55 }
 0x8ae   : > { %v12907_v18 = vpop.permute.xlu0 %7175 }
 0x8af   : > { %v12917_v1 = vpop.permute.xlu1 %7177  ;;  %v7180_v29 = vsel %vm853_vm6, %v12875_v7, %v12907_v18  ;;  %v7209_v28 = vadd.f32 %v7205_v13, %v7163_v57 }
 0x8b0   : > { %v7206_v35 = vmul.f32 %v14123_v8, %v7180_v29  ;;  %v7179_v58 = vsel %vm853_vm6, %v12907_v18, %v12917_v1  ;;  %v7182_v24 = vsel %vm853_vm6, %v12917_v1, %v12860_v5  ;;  %v14124_v18 = vrot.slane %v12888_v62, %v8224_v2 }
 0x8b1   : > { %v7208_v44 = vmul.f32 %v14126_v46, %v7182_v24  ;;  %v14133_v8 = vrot.slane %v12901_v42, %v8230_v19 }
 0x8b2   : > { %v12965_v11 = vpop.permute.xlu0 %7229  ;;  %v7210_v49 = vadd.f32 %v7206_v35, %v7164_v31 }
 0x8b3   : > { %v12973_v3 = vpop.permute.xlu1 %7231  ;;  %v7212_v15 = vadd.f32 %v7208_v44, %v7166_v60 }
 0x8b4   : > { %v7239_v12 = vsel %vm913_vm7, %v12965_v11, %v12973_v3 }
 0x8b5   : > { %v7263_v32 = vmul.f32 %v14124_v18, %v7239_v12 }
 0x8b6   : > { %v12996_v30 = vpop.permute.xlu0 %7233 }
 0x8b7   : > { %v13010_v48 = vpop.permute.xlu1 %7235  ;;  %v7238_v43 = vsel %vm913_vm7, %v12973_v3, %v12996_v30  ;;  %v14125_v3 = vrot.slane %v12873_v34, %v8230_v19  ;;  %v7267_v29 = vadd.f32 %v7263_v32, %v7209_v28 }
 0x8b8   : > { %v7237_v5 = vsel %vm913_vm7, %v12996_v30, %v13010_v48  ;;  %v7240_v1 = vsel %vm913_vm7, %v13010_v48, %v12965_v11  ;;  %v7264_v11 = vmul.f32 %v14127_v26, %v7238_v43  ;;  %v14128_v48 = vrot.slane %v12901_v42, %v8224_v2 }
 0x8b9   : > { %v7207_v4 = vmul.f32 %v14125_v3, %v7179_v58  ;;  %v7266_v47 = vmul.f32 %v14130_v0, %v7240_v1 }
 0x8ba   : > { %v7276_v40 = vpop.permute.xlu0 %7275  ;;  %v7268_v12 = vadd.f32 %v7264_v11, %v7210_v49 }
 0x8bb   : > { %v7278_v61 = vpop.permute.xlu1 %7277  ;;  %v7270_v24 = vadd.f32 %v7266_v47, %v7212_v15 }
 0x8bc   : > { %v7285_v41 = vsel %vm961_vm8, %v7276_v40, %v7278_v61 }
 0x8bd   : > { %v7309_v36 = vmul.f32 %v14128_v48, %v7285_v41  ;;  %v14135_v41 = vrot.slane %v12955_v56, %v8224_v2  ;;  %v14140_v56 = vld [vmem:[#allocation3_spill] sm:$0xff] }
 0x8be   : > { %v7280_v38 = vpop.permute.xlu0 %7279 }
 0x8bf   : > { %v7282_v45 = vpop.permute.xlu1 %7281  ;;  %v7284_v25 = vsel %vm961_vm8, %v7278_v61, %v7280_v38  ;;  %v14129_v61 = vrot.slane %v12888_v62, %v8230_v19  ;;  %v7211_v62 = vadd.f32 %v7207_v4, %v7165_v63  ;;  %v7313_v31 = vadd.f32 %v7309_v36, %v7267_v29 }
 0x8c0   : > { %v7286_v34 = vsel %vm961_vm8, %v7282_v45, %v7276_v40  ;;  %v7283_v52 = vsel %vm961_vm8, %v7280_v38, %v7282_v45  ;;  %v7310_v40 = vmul.f32 %v14131_v20, %v7284_v25  ;;  %v14132_v38 = vrot.slane %v12901_v42, %v8226_v9 }
 0x8c1   : > { %v7265_v23 = vmul.f32 %v14129_v61, %v7237_v5  ;;  %v7311_v35 = vmul.f32 %v14133_v8, %v7283_v52  ;;  %v7825_v61 = vld [vmem:[%s7896_s20 + $0x8] sm:$0xff] }
 0x8c2   : > { %v7334_v7 = vpop.permute.xlu0 %7333  ;;  %v7312_v45 = vmul.f32 %v14132_v38, %v7286_v34  ;;  %v7314_v60 = vadd.f32 %v7310_v40, %v7268_v12 }
 0x8c3   : > { %v7336_v16 = vpop.permute.xlu1 %7335  ;;  %v7269_v58 = vadd.f32 %v7265_v23, %v7211_v62 }
 0x8c4   : > { %v7343_v10 = vsel %vm1021_vm9, %v7334_v7, %v7336_v16  ;;  %v7316_v28 = vadd.f32 %v7312_v45, %v7270_v24 }
 0x8c5   : > { %v7367_v51 = vmul.f32 %v7350_v50, %v7343_v10  ;;  %v7315_v32 = vadd.f32 %v7311_v35, %v7269_v58 }
 0x8c6   : > { %v7338_v30 = vpop.permute.xlu0 %7337 }
 0x8c7   : > { %v7340_v59 = vpop.permute.xlu1 %7339  ;;  %v7342_v17 = vsel %vm1021_vm9, %v7336_v16, %v7338_v30  ;;  %v7371_v43 = vadd.f32 %v7367_v51, %v7313_v31 }
 0x8c8   : > { %v7344_v13 = vsel %vm1021_vm9, %v7340_v59, %v7334_v7  ;;  %v7341_v55 = vsel %vm1021_vm9, %v7338_v30, %v7340_v59  ;;  %v7368_v50 = vmul.f32 %v7354_v39, %v7342_v17  ;;  %v7824_v59 = vld [vmem:[%s7896_s20] sm:$0xff] }
 0x8c9   : > { %v7370_v16 = vmul.f32 %v7362_v53, %v7344_v13  ;;  %v7369_v42 = vmul.f32 %v7358_v21, %v7341_v55 }
 0x8ca   : > { %v7382_v57 = vpop.permute.xlu0 %7381  ;;  %v7372_v5 = vadd.f32 %v7368_v50, %v7314_v60 }
 0x8cb   : > { %v7380_v7 = vpop.permute.xlu1 %7379  ;;  %v7374_v4 = vadd.f32 %v7370_v16, %v7316_v28  ;;  %v7373_v22 = vadd.f32 %v7369_v42, %v7315_v32 }
 0x8cc   : > { %v7389_v63 = vsel %vm14134_vm2, %v7380_v7, %v7382_v57 }
 0x8cd   : > { %v7413_v39 = vmul.f32 %v14135_v41, %v7389_v63 }
 0x8ce   : > { %v7386_v18 = vpop.permute.xlu0 %7385 }
 0x8cf   : > { %v7417_v1 = vadd.f32 %v7413_v39, %v7371_v43  ;;  %v7390_v53 = vsel %vm14136_vm3, %v7386_v18, %v7380_v7  ;;  %v7384_v3 = vpop.permute.xlu1 %7383 }
 0x8d0   : > { %v7416_v46 = vmul.f32 %v7408_v37, %v7390_v53  ;;  %v7387_v21 = vsel %vm14137_vm4, %v7384_v3, %v7386_v18  ;;  %v7388_v2 = vsel %vm14138_vm5, %v7382_v57, %v7384_v3 }
 0x8d1   : > { %v7428_v44 = vadd.f32 %v12465_v54, %v7417_v1  ;;  %v7414_v25 = vmul.f32 %v7400_v33, %v7388_v2  ;;  %v7415_v9 = vmul.f32 %v7404_v27, %v7387_v21  ;;  %v14139_v33 = vld [vmem:[#allocation4_spill] sm:$0xff] }
 0x8d2   : > { %v7420_v37 = vadd.f32 %v7416_v46, %v7374_v4 }
 0x8d3   : > { %v7418_v10 = vadd.f32 %v7414_v25, %v7372_v5  ;;  %v7419_v30 = vadd.f32 %v7415_v9, %v7373_v22  ;;  %v7432_v49 = vmax.f32 %v7428_v44, 0.0 }
 0x8d4   : > { %v7431_v6 = vadd.f32 %v12465_v54, %v7420_v37 }
 0x8d5   : > { %v7429_v26 = vadd.f32 %v12465_v54, %v7418_v10  ;;  %v7430_v11 = vadd.f32 %v12465_v54, %v7419_v30  ;;  %v7438_v19 = vadd.f32 %v7824_v59, %v7432_v49 }
 0x8d6   : > { %v7435_v48 = vmax.f32 %v7431_v6, 0.0 }
 0x8d7   : > { %v7433_v36 = vmax.f32 %v7429_v26, 0.0  ;;  %v7434_v14 = vmax.f32 %v7430_v11, 0.0 }
 0x8d8   : > { %v7441_v34 = vadd.f32 %v7435_v48, %v14139_v33 }
 0x8d9   : > { %v7439_v27 = vadd.f32 %v7433_v36, %v14140_v56  ;;  %v7440_v23 = vadd.f32 %v7825_v61, %v7434_v14 }
 0x8db   : > { %v7446_v0 = vcombine.low %v7438_v19, %v7439_v27  ;;  %v7447_v47 = vcombine.low %v7440_v23, %v7441_v34 }
 0x8dd   : > { %7450 = vst [vmem:[%s197_s25] sm:$0xff] %v7446_v0  ;;  %7451 = vst [vmem:[%s197_s25 + $0x8] sm:$0xff] %v7447_v47 }
 0x8de PF: > { %s14_s15 = sadd.s32 1, %s7832_s15  }
 0x8df   : > { %p11_p4 = scmp.ge.s32.totalorder %s14_s15, 4  }
 0x8e1   :  { %13 = sbr.rel (!%p11_p4) target bundleno = 1 (0x1), region = 97 }

</bundles_post_ra>
